<compile_context>
chip_gen: v7x
topology: tpu7x:2x2x1
jax: 0.10.0
libtpu: 0.0.40
codegen_flags: <defaults>
</compile_context>

<pallas_src>
import functools

import jax
import jax.numpy as jnp
from jax import lax
from jax.experimental import pallas as pl
from jax.experimental.pallas import tpu as pltpu


# ----------------------------------------------------------------------------
# hardware-aware limits / tiling
# ----------------------------------------------------------------------------
def _vmem_limit_bytes():
    """Generation-aware scoped-VMEM limit (conservative fallback fits v7x)."""
    try:
        cap = int(pltpu.get_tpu_info().vmem_capacity_bytes)
    except Exception:
        cap = None
    if cap is None or cap <= 80 * 1024 * 1024:    # v7x-class (64 MiB) / unknown
        return 48 * 1024 * 1024
    return 100 * 1024 * 1024                      # v5e / v6e (128 MiB physical)


def _pick_tile_h(H, W, C, itemsize, vmem_limit):
    """Largest divisor-of-H row tile (multiple of 8, or H) whose fused-unit
    footprint fits the VMEM budget; prefers >=2 row tiles so both v7x
    TensorCores get work even at batch 1."""
    # per tile row: ~3 double-buffered (W, C) activation streams (x, res, out),
    # two 3C-wide im2col slabs (xs, hs) and one f32 accumulator.
    per_row = W * C * (6 * itemsize + 6 * itemsize + 4)
    budget_rows = max(8, int(0.55 * vmem_limit) // max(per_row, 1))
    divs = [d for d in range(1, H + 1)
            if H % d == 0 and (d % 8 == 0 or d == H)]
    fit = [d for d in divs if d <= budget_rows] or [min(divs)]
    multi = [d for d in fit if d < H]
    return max(multi) if multi else max(fit)


def _cparams(vmem_limit):
    return pltpu.CompilerParams(
        dimension_semantics=("parallel", "parallel"),
        vmem_limit_bytes=vmem_limit)


# ----------------------------------------------------------------------------
# in-kernel helpers
# ----------------------------------------------------------------------------
def _shift_bands(xs_ref, rows, W, C):
    """Fill the dx=0 / dx=2 bands of the (rows, W, 3C) im2col slab from its
    center band (dx=1): xs[:, w, dx*C:(dx+1)*C] = x[:, w + dx - 1, :], with
    zeros at the image W edges. Stores are full-sublane, lane-band only."""
    c = xs_ref[:, :, C:2 * C]
    z = jnp.zeros((rows, 1, C), xs_ref.dtype)
    xs_ref[:, :, 0:C] = jnp.concatenate([z, c[:, :W - 1, :]], axis=1)
    xs_ref[:, :, 2 * C:3 * C] = jnp.concatenate([c[:, 1:, :], z], axis=1)


def _conv3x3_folded(xs_ref, w3_ref, acc_ref, rows_out, W, C):
    """acc[0:rows_out] = sum_dy  xs[dy:dy+rows_out] @ w3[dy]   (K = 3C)."""
    C3 = 3 * C
    for dy in range(3):
        lhs = xs_ref[dy:dy + rows_out].reshape(rows_out * W, C3)
        p = jnp.dot(lhs, w3_ref[dy],
                    preferred_element_type=jnp.float32).reshape(rows_out, W, C)
        if dy == 0:
            acc_ref[0:rows_out] = p
        else:
            acc_ref[0:rows_out] += p


def _acc_tap(acc_ref, p, dx, W):
    """Column-tap accumulate with the conv column shift (VPU path, used only
    by the tiny Cin=1 / Cout=1 edge convs)."""
    if dx == 1:
        acc_ref[...] += p
    elif dx == 0:
        if p.ndim == 3:
            acc_ref[:, 1:, :] += p[:, :W - 1, :]
        else:
            acc_ref[:, 1:] += p[:, :W - 1]
    else:  # dx == 2
        if p.ndim == 3:
            acc_ref[:, :W - 1, :] += p[:, 1:, :]
        else:
            acc_ref[:, :W - 1] += p[:, 1:]


# ----------------------------------------------------------------------------
# fused residual unit:
#   conv3x3 + BN + ReLU + conv1x1 + conv3x3 + BN + ReLU + conv1x1 + skip add
# ----------------------------------------------------------------------------
def make_fused_resid_unit(C, H, W, TH, cdt, sdt, vmem_limit):
    NT = H // TH
    C3 = 3 * C

    def kernel(xm, xt2, xt1, xb0, xb1,
               w3a, ba, sa, ta, w1b, bb,
               w3c, bc, scc, tcc, w1d, bd,
               res, o_ref, xs, hs, acc):
        i = pl.program_id(1)

        # ---- x with a 2-row H halo into the center band of xs -------------
        xs[0:1, :, C:2 * C] = xt2[...].astype(cdt)
        xs[1:2, :, C:2 * C] = xt1[...].astype(cdt)
        xs[2:TH + 2, :, C:2 * C] = xm[...].astype(cdt)
        xs[TH + 2:TH + 3, :, C:2 * C] = xb0[...].astype(cdt)
        xs[TH + 3:TH + 4, :, C:2 * C] = xb1[...].astype(cdt)

        @pl.when(i == 0)
        def _():
            xs[0:2, :, C:2 * C] = jnp.zeros((2, W, C), cdt)

        @pl.when(i == NT - 1)
        def _():
            xs[TH + 2:TH + 4, :, C:2 * C] = jnp.zeros((2, W, C), cdt)

        _shift_bands(xs, TH + 4, W, C)

        # ---- conv_a (3x3) + BN + ReLU over TH+2 rows (1-row halo of h) ----
        _conv3x3_folded(xs, w3a, acc, TH + 2, W, C)
        h = jnp.maximum((acc[...] + ba[...]) * sa[...] + ta[...], 0.0)

        # ---- conv_b (1x1); kept explicit: folding its bias into the next
        # zero-padded 3x3 would be inexact at image borders ------------------
        yb = jnp.dot(h.astype(cdt).reshape((TH + 2) * W, C), w1b[...],
                     preferred_element_type=jnp.float32)
        yb = yb.reshape(TH + 2, W, C) + bb[...]
        hs[:, :, C:2 * C] = yb.astype(cdt)

        # conv_c's zero padding rows at the image top / bottom
        @pl.when(i == 0)
        def _():
            hs[0:1, :, C:2 * C] = jnp.zeros((1, W, C), cdt)

        @pl.when(i == NT - 1)
        def _():
            hs[TH + 1:TH + 2, :, C:2 * C] = jnp.zeros((1, W, C), cdt)

        _shift_bands(hs, TH + 2, W, C)

        # ---- conv_c (3x3) + BN + ReLU --------------------------------------
        _conv3x3_folded(hs, w3c, acc, TH, W, C)
        y = jnp.maximum((acc[0:TH] + bc[...]) * scc[...] + tcc[...], 0.0)

        # ---- conv_d (1x1) + bias + residual-unit skip add -------------------
        z = jnp.dot(y.astype(cdt).reshape(TH * W, C), w1d[...],
                    preferred_element_type=jnp.float32).reshape(TH, W, C)
        o_ref[...] = (z + bd[...] + res[...]).astype(o_ref.dtype)

    def vec_spec():
        return pl.BlockSpec((1, C), lambda n, i: (0, 0))

    in_specs = [
        pl.BlockSpec((None, TH, W, C), lambda n, i: (n, i, 0, 0)),          # xm
        pl.BlockSpec((None, 1, W, C),
                     lambda n, i: (n, jnp.maximum(i * TH - 2, 0), 0, 0)),   # xt2
        pl.BlockSpec((None, 1, W, C),
                     lambda n, i: (n, jnp.maximum(i * TH - 1, 0), 0, 0)),   # xt1
        pl.BlockSpec((None, 1, W, C),
                     lambda n, i: (n, jnp.minimum(i * TH + TH, H - 1), 0, 0)),     # xb0
        pl.BlockSpec((None, 1, W, C),
                     lambda n, i: (n, jnp.minimum(i * TH + TH + 1, H - 1), 0, 0)),  # xb1
        pl.BlockSpec((3, C3, C), lambda n, i: (0, 0, 0)),                   # w3a
        vec_spec(), vec_spec(), vec_spec(),                                 # ba, sa, ta
        pl.BlockSpec((C, C), lambda n, i: (0, 0)),                          # w1b
        vec_spec(),                                                         # bb
        pl.BlockSpec((3, C3, C), lambda n, i: (0, 0, 0)),                   # w3c
        vec_spec(), vec_spec(), vec_spec(),                                 # bc, scc, tcc
        pl.BlockSpec((C, C), lambda n, i: (0, 0)),                          # w1d
        vec_spec(),                                                         # bd
        pl.BlockSpec((None, TH, W, C), lambda n, i: (n, i, 0, 0)),          # res
    ]

    def call(x, w3a, ba, sa, ta, w1b, bb, w3c, bc, scc, tcc, w1d, bd, res):
        N = x.shape[0]
        return pl.pallas_call(
            kernel,
            out_shape=jax.ShapeDtypeStruct((N, H, W, C), sdt),
            grid_spec=pltpu.PrefetchScalarGridSpec(
                num_scalar_prefetch=0,
                grid=(N, NT),
                in_specs=in_specs,
                out_specs=pl.BlockSpec((None, TH, W, C),
                                       lambda n, i: (n, i, 0, 0)),
                scratch_shapes=[pltpu.VMEM((TH + 4, W, C3), cdt),
                                pltpu.VMEM((TH + 2, W, C3), cdt),
                                pltpu.VMEM((TH + 2, W, C), jnp.float32)]),
            compiler_params=_cparams(vmem_limit),
        )(x, x, x, x, x, w3a, ba, sa, ta, w1b, bb,
          w3c, bc, scc, tcc, w1d, bd, res)

    return call


# ----------------------------------------------------------------------------
# plain 3x3 conv + bias (block input conv for recursive blocks > 0)
# ----------------------------------------------------------------------------
def make_conv3x3_bias(C, H, W, TH, cdt, sdt, vmem_limit):
    NT = H // TH
    C3 = 3 * C

    def kernel(xm, xt, xb, w3, b3, o_ref, xs, acc):
        i = pl.program_id(1)
        xs[0:1, :, C:2 * C] = xt[...].astype(cdt)
        xs[1:TH + 1, :, C:2 * C] = xm[...].astype(cdt)
        xs[TH + 1:TH + 2, :, C:2 * C] = xb[...].astype(cdt)

        @pl.when(i == 0)
        def _():
            xs[0:1, :, C:2 * C] = jnp.zeros((1, W, C), cdt)

        @pl.when(i == NT - 1)
        def _():
            xs[TH + 1:TH + 2, :, C:2 * C] = jnp.zeros((1, W, C), cdt)

        _shift_bands(xs, TH + 2, W, C)
        _conv3x3_folded(xs, w3, acc, TH, W, C)
        o_ref[...] = (acc[...] + b3[...]).astype(o_ref.dtype)

    in_specs = [
        pl.BlockSpec((None, TH, W, C), lambda n, i: (n, i, 0, 0)),
        pl.BlockSpec((None, 1, W, C),
                     lambda n, i: (n, jnp.maximum(i * TH - 1, 0), 0, 0)),
        pl.BlockSpec((None, 1, W, C),
                     lambda n, i: (n, jnp.minimum(i * TH + TH, H - 1), 0, 0)),
        pl.BlockSpec((3, C3, C), lambda n, i: (0, 0, 0)),
        pl.BlockSpec((1, C), lambda n, i: (0, 0)),
    ]

    def call(x, w3, b3):
        N = x.shape[0]
        return pl.pallas_call(
            kernel,
            out_shape=jax.ShapeDtypeStruct((N, H, W, C), sdt),
            grid_spec=pltpu.PrefetchScalarGridSpec(
                num_scalar_prefetch=0,
                grid=(N, NT),
                in_specs=in_specs,
                out_specs=pl.BlockSpec((None, TH, W, C),
                                       lambda n, i: (n, i, 0, 0)),
                scratch_shapes=[pltpu.VMEM((TH + 2, W, C3), cdt),
                                pltpu.VMEM((TH, W, C), jnp.float32)]),
            compiler_params=_cparams(vmem_limit),
        )(x, x, x, w3, b3)

    return call


# ----------------------------------------------------------------------------
# first conv: Cin = 1 -> C  (no matmul; 9 lane-broadcast VPU multiply-adds)
# ----------------------------------------------------------------------------
def make_first_conv(C, H, W, TH, sdt, vmem_limit):
    NT = H // TH

    def kernel(xm, xt, xb, w, b, o_ref, xp, acc):
        i = pl.program_id(1)
        xp[1:TH + 1] = xm[...]
        xp[0:1] = xt[...]
        xp[TH + 1:TH + 2] = xb[...]

        @pl.when(i == 0)
        def _():
            xp[0:1] = jnp.zeros((1, W, 1), xp.dtype)

        @pl.when(i == NT - 1)
        def _():
            xp[TH + 1:TH + 2] = jnp.zeros((1, W, 1), xp.dtype)

        acc[...] = jnp.zeros((TH, W, C), jnp.float32)
        for dy in range(3):
            slab = xp[dy:dy + TH]                       # (TH, W, 1)
            for dx in range(3):
                p = slab * w[dy:dy + 1, dx:dx + 1, :]   # (TH, W, C)
                _acc_tap(acc, p, dx, W)
        o_ref[...] = (acc[...] + b[...]).astype(o_ref.dtype)

    in_specs = [
        pl.BlockSpec((None, TH, W, 1), lambda n, i: (n, i, 0, 0)),
        pl.BlockSpec((None, 1, W, 1),
                     lambda n, i: (n, jnp.maximum(i * TH - 1, 0), 0, 0)),
        pl.BlockSpec((None, 1, W, 1),
                     lambda n, i: (n, jnp.minimum(i * TH + TH, H - 1), 0, 0)),
        pl.BlockSpec((3, 3, C), lambda n, i: (0, 0, 0)),
        pl.BlockSpec((1, C), lambda n, i: (0, 0)),
    ]

    def call(x, w, b):
        N = x.shape[0]
        return pl.pallas_call(
            kernel,
            out_shape=jax.ShapeDtypeStruct((N, H, W, C), sdt),
            grid_spec=pltpu.PrefetchScalarGridSpec(
                num_scalar_prefetch=0,
                grid=(N, NT),
                in_specs=in_specs,
                out_specs=pl.BlockSpec((None, TH, W, C),
                                       lambda n, i: (n, i, 0, 0)),
                scratch_shapes=[pltpu.VMEM((TH + 2, W, 1), jnp.float32),
                                pltpu.VMEM((TH, W, C), jnp.float32)]),
            compiler_params=_cparams(vmem_limit),
        )(x, x, x, w, b)

    return call


# ----------------------------------------------------------------------------
# last conv: C -> 1, lane-dense (N, H, W) output, fused global residual add
# ----------------------------------------------------------------------------
def make_last_conv(C, H, W, TH, sdt, vmem_limit):
    NT = H // TH

    def kernel(xm, xt, xb, w, b, skip, o_ref, xp, acc):
        i = pl.program_id(1)
        xp[1:TH + 1] = xm[...]
        xp[0:1] = xt[...]
        xp[TH + 1:TH + 2] = xb[...]

        @pl.when(i == 0)
        def _():
            xp[0:1] = jnp.zeros((1, W, C), xp.dtype)

        @pl.when(i == NT - 1)
        def _():
            xp[TH + 1:TH + 2] = jnp.zeros((1, W, C), xp.dtype)

        acc[...] = jnp.zeros((TH, W), jnp.float32)
        for dy in range(3):
            slab = xp[dy:dy + TH]                                        # (TH, W, C)
            for dx in range(3):
                p = jnp.sum(slab * w[dy:dy + 1, dx:dx + 1, :], axis=-1)  # (TH, W) f32
                _acc_tap(acc, p, dx, W)
        o_ref[...] = (acc[...] + b[...] + skip[...]).astype(o_ref.dtype)

    in_specs = [
        pl.BlockSpec((None, TH, W, C), lambda n, i: (n, i, 0, 0)),
        pl.BlockSpec((None, 1, W, C),
                     lambda n, i: (n, jnp.maximum(i * TH - 1, 0), 0, 0)),
        pl.BlockSpec((None, 1, W, C),
                     lambda n, i: (n, jnp.minimum(i * TH + TH, H - 1), 0, 0)),
        pl.BlockSpec((3, 3, C), lambda n, i: (0, 0, 0)),
        pl.BlockSpec((1, 1), lambda n, i: (0, 0)),
        pl.BlockSpec((None, TH, W), lambda n, i: (n, i, 0)),
    ]

    def call(x, w, b, skip):
        N = x.shape[0]
        return pl.pallas_call(
            kernel,
            out_shape=jax.ShapeDtypeStruct((N, H, W), jnp.float32),
            grid_spec=pltpu.PrefetchScalarGridSpec(
                num_scalar_prefetch=0,
                grid=(N, NT),
                in_specs=in_specs,
                out_specs=pl.BlockSpec((None, TH, W), lambda n, i: (n, i, 0)),
                scratch_shapes=[pltpu.VMEM((TH + 2, W, C), sdt),
                                pltpu.VMEM((TH, W), jnp.float32)]),
            compiler_params=_cparams(vmem_limit),
        )(x, x, x, w, b, skip)

    return call


# ----------------------------------------------------------------------------
# parameter initialization (deterministic, synthetic) + weight preparation
# ----------------------------------------------------------------------------
def _conv_init(key, cout, cin, k):
    kw, kb = jax.random.split(key)
    w = 0.05 * jax.random.normal(kw, (cout, cin, k, k), jnp.float32)
    b = 0.05 * jax.random.normal(kb, (cout,), jnp.float32)
    return w, b


def _bn_init(key, c):
    k1, k2, k3 = jax.random.split(key, 3)
    gamma = 1.0 + 0.1 * jax.random.normal(k1, (c,), jnp.float32)
    beta = 0.1 * jax.random.normal(k2, (c,), jnp.float32)
    mean = 0.1 * jax.random.normal(k3, (c,), jnp.float32)
    var = jnp.ones((c,), jnp.float32)
    return gamma, beta, mean, var


def init_drrn_params(key, num_recur_blocks, num_filter, filter_size):
    params = {"blocks": []}
    for bi in range(num_recur_blocks):
        cin = 1 if bi == 0 else num_filter
        keys = jax.random.split(jax.random.fold_in(key, bi), 7)
        blk = {
            "input_conv": _conv_init(keys[0], num_filter, cin, filter_size),
            "conv_a": _conv_init(keys[1], num_filter, num_filter, filter_size),
            "bn_a": _bn_init(keys[2], num_filter),
            "conv_b": _conv_init(keys[3], num_filter, num_filter, 1),
            "conv_c": _conv_init(keys[4], num_filter, num_filter, filter_size),
            "bn_c": _bn_init(keys[5], num_filter),
            "conv_d": _conv_init(keys[6], num_filter, num_filter, 1),
        }
        params["blocks"].append(blk)
    params["last_conv"] = _conv_init(jax.random.fold_in(key, 999),
                                     1, num_filter, filter_size)
    return params


def _prep_w3(w, cdt):
    # torch (Cout, Cin, 3, 3) -> (3, 3*Cin, Cout); row dy of the result holds
    # the K=3C weight where K index = dx*Cin + ci (matches the im2col bands).
    co, ci, kh, kw = w.shape
    return jnp.transpose(w, (2, 3, 1, 0)).reshape(kh, kw * ci, co).astype(cdt)


def _prep_w1(w, cdt):
    # torch (Cout, Cin, 1, 1) -> (Cin, Cout)
    return jnp.transpose(w[:, :, 0, 0], (1, 0)).astype(cdt)


def _prep_w_first(w):
    # torch (C, 1, 3, 3) -> (3, 3, C)
    return jnp.transpose(w[:, 0], (1, 2, 0))


def _prep_w_last(w):
    # torch (1, C, 3, 3) -> (3, 3, C)
    return jnp.transpose(w[0], (1, 2, 0))


def _bn_affine(gamma, beta, mean, var, eps=1e-5):
    scale = gamma / jnp.sqrt(var + eps)
    shift = beta - mean * scale
    return scale[None, :], shift[None, :]


# ----------------------------------------------------------------------------
# DRRN forward (Pallas)
# ----------------------------------------------------------------------------
def drrn_forward_pallas(img_nchw, params, *, num_resid_units, filter_size=3,
                        compute_dtype=jnp.bfloat16, tile_h=None):
    if filter_size != 3:
        # TODO(synk): general odd filter_size (DRRN default is 3).
        raise NotImplementedError("Pallas DRRN kernels are specialized to 3x3")
    N, cin_img, H, W = img_nchw.shape
    assert cin_img == 1
    C = params["last_conv"][0].shape[1]

    cdt = compute_dtype
    sdt = jnp.bfloat16 if compute_dtype == jnp.bfloat16 else jnp.float32
    itemsize = 2 if sdt == jnp.bfloat16 else 4
    vmem_limit = _vmem_limit_bytes()

    TH = tile_h if tile_h is not None else _pick_tile_h(H, W, C, itemsize,
                                                        vmem_limit)
    assert H % TH == 0 and (TH % 8 == 0 or TH == H)

    x_img = jnp.transpose(img_nchw, (0, 2, 3, 1))     # (N, H, W, 1) NHWC
    skip0 = img_nchw[:, 0]                            # (N, H, W) lane-dense

    conv_first = make_first_conv(C, H, W, TH, sdt, vmem_limit)
    conv_in = (make_conv3x3_bias(C, H, W, TH, cdt, sdt, vmem_limit)
               if len(params["blocks"]) > 1 else None)
    unit = make_fused_resid_unit(C, H, W, TH, cdt, sdt, vmem_limit)
    conv_last = make_last_conv(C, H, W, TH, sdt, vmem_limit)

    x = None
    for blk_i, bp in enumerate(params["blocks"]):
        wi, bi_ = bp["input_conv"]
        if blk_i == 0:
            x = conv_first(x_img, _prep_w_first(wi), bi_[None, :])
        else:
            x = conv_in(x, _prep_w3(wi, cdt), bi_[None, :])
        skip_b = x

        sa, ta = _bn_affine(*bp["bn_a"])
        scc, tcc = _bn_affine(*bp["bn_c"])
        wa, ba = bp["conv_a"]
        wb, bb = bp["conv_b"]
        wc, bc = bp["conv_c"]
        wd, bd = bp["conv_d"]
        w3a = _prep_w3(wa, cdt)
        w1b = _prep_w1(wb, cdt)
        w3c = _prep_w3(wc, cdt)
        w1d = _prep_w1(wd, cdt)

        for _ in range(num_resid_units):      # weights shared across iterations
            x = unit(x, w3a, ba[None, :], sa, ta, w1b, bb[None, :],
                     w3c, bc[None, :], scc, tcc, w1d, bd[None, :], skip_b)

    wl, bl = params["last_conv"]
    out = conv_last(x, _prep_w_last(wl), bl.reshape(1, 1), skip0)
    return out[:, None, :, :]                 # (N, 1, H, W) like PyTorch


# ----------------------------------------------------------------------------
# pure-JAX f32 reference (same semantics as the PyTorch module, eval-mode BN)
# ----------------------------------------------------------------------------
def _conv_ref(x, w, b, pad):
    w_hwio = jnp.transpose(w, (2, 3, 1, 0))
    y = lax.conv_general_dilated(x, w_hwio, (1, 1),
                                 [(pad, pad), (pad, pad)],
                                 dimension_numbers=("NHWC", "HWIO", "NHWC"),
                                 preferred_element_type=jnp.float32)
    return y + b[None, None, None, :]


def _bn_ref(x, gamma, beta, mean, var, eps=1e-5):
    return (x - mean) / jnp.sqrt(var + eps) * gamma + beta


def drrn_forward_ref(img_nchw, params, *, num_resid_units, filter_size=3):
    pad = filter_size // 2
    x = jnp.transpose(img_nchw, (0, 2, 3, 1))
    skip0 = x
    for bp in params["blocks"]:
        x = _conv_ref(x, *bp["input_conv"], pad)
        skip_b = x
        for _ in range(num_resid_units):
            y = _conv_ref(x, *bp["conv_a"], pad)
            y = jax.nn.relu(_bn_ref(y, *bp["bn_a"]))
            y = _conv_ref(y, *bp["conv_b"], 0)
            y = _conv_ref(y, *bp["conv_c"], pad)
            y = jax.nn.relu(_bn_ref(y, *bp["bn_c"]))
            y = _conv_ref(y, *bp["conv_d"], 0)
            x = skip_b + y
    out = _conv_ref(x, *params["last_conv"], pad) + skip0
    return jnp.transpose(out, (0, 3, 1, 2))


# ----------------------------------------------------------------------------
if __name__ == "__main__":
    key = jax.random.PRNGKey(0)
    kp, kx = jax.random.split(key)

    # Small config consistent with the module (defaults: 1 block / 10 units /
    # 128 filters; scaled down for a quick synthetic run).
    num_recur_blocks = 1
    num_resid_units = 2
    num_filter = 32
    filter_size = 3

    params = init_drrn_params(kp, num_recur_blocks, num_filter, filter_size)
    img = jax.random.normal(kx, (2, 1, 16, 16), jnp.float32)  # NCHW like PyTorch

    ref = drrn_forward_ref(img, params, num_resid_units=num_resid_units,
                           filter_size=filter_size)

    # f32 compute path, tile_h=8 -> 2 row tiles per image (exercises the
    # cross-tile halo exchange and the 2-D parallel grid); tight tolerance.
    fwd_f32 = jax.jit(functools.partial(
        drrn_forward_pallas, num_resid_units=num_resid_units,
        filter_size=filter_size, compute_dtype=jnp.float32, tile_h=8))
    out_f32 = jax.block_until_ready(fwd_f32(img, params))
    assert out_f32.shape == img.shape and out_f32.dtype == jnp.float32
    err_f32 = float(jnp.max(jnp.abs(out_f32 - ref)))
    assert err_f32 < 2e-3, f"f32 max abs err {err_f32}"

    # bf16 MXU path with bf16 activation storage (f32 accumulation), auto
    # tile_h; compared against the f32 reference at a bf16-appropriate
    # tolerance.
    fwd_bf16 = jax.jit(functools.partial(
        drrn_forward_pallas, num_resid_units=num_resid_units,
        filter_size=filter_size, compute_dtype=jnp.bfloat16, tile_h=None))
    out_bf16 = jax.block_until_ready(fwd_bf16(img, params))
    assert out_bf16.shape == img.shape and out_bf16.dtype == jnp.float32
    err_bf16 = float(jnp.max(jnp.abs(out_bf16 - ref)))
    assert err_bf16 < 5e-2, f"bf16 max abs err {err_bf16}"

    print("KERNEL_OK")
</pallas_src>

<mosaic_0001>
module attributes {stable_mosaic.version = 11 : i64} {
  func.func @kernel(%arg0: i32, %arg1: i32, %arg2: memref<1x8x16x1xf32, #tpu.memory_space<vmem>>, %arg3: memref<1x1x16x1xf32, #tpu.memory_space<vmem>>, %arg4: memref<1x1x16x1xf32, #tpu.memory_space<vmem>>, %arg5: memref<3x3x32xf32, #tpu.memory_space<vmem>>, %arg6: memref<1x32xf32, #tpu.memory_space<vmem>>, %arg7: memref<1x8x16x32xf32, #tpu.memory_space<vmem>>, %arg8: memref<10x16x1xf32, #tpu.memory_space<vmem>>, %arg9: memref<8x16x32xf32, #tpu.memory_space<vmem>>) attributes {dimension_semantics = [#tpu.dimension_semantics<parallel>, #tpu.dimension_semantics<parallel>], iteration_bounds = array<i64: 2, 2>, scalar_prefetch = 0 : i64, scratch_operands = 2 : i64, tpu.core_type = #tpu.core_type<tc>, window_params = [{transform_indices = @transform_0, window_bounds = array<i64: 1, 8, 16, 1>}, {transform_indices = @transform_1, window_bounds = array<i64: 1, 1, 16, 1>}, {transform_indices = @transform_2, window_bounds = array<i64: 1, 1, 16, 1>}, {pipeline_mode = #tpu.pipeline_mode<synchronous>, transform_indices = @transform_3, window_bounds = array<i64: 3, 3, 32>}, {pipeline_mode = #tpu.pipeline_mode<synchronous>, transform_indices = @transform_4, window_bounds = array<i64: 1, 32>}, {transform_indices = @transform_5, window_bounds = array<i64: 1, 8, 16, 32>}]} {
    %c0 = arith.constant 0 : index
    %c0_0 = arith.constant 0 : index
    %c0_1 = arith.constant 0 : index
    %c0_2 = arith.constant 0 : index
    %0 = vector.load %arg2[%c0, %c0_0, %c0_1, %c0_2] : memref<1x8x16x1xf32, #tpu.memory_space<vmem>>, vector<1x8x16x1xf32>
    %1 = vector.shape_cast %0 : vector<1x8x16x1xf32> to vector<8x16x1xf32>
    %c1 = arith.constant 1 : index
    %c0_3 = arith.constant 0 : index
    %c0_4 = arith.constant 0 : index
    %2 = vector.load %arg8[%c1, %c0_3, %c0_4] : memref<10x16x1xf32, #tpu.memory_space<vmem>>, vector<8x16x1xf32>
    tpu.vector_store %arg8[%c1, %c0_3, %c0_4], %1 {strides = array<i32>} : memref<10x16x1xf32, #tpu.memory_space<vmem>>, vector<8x16x1xf32>,
    %c0_5 = arith.constant 0 : index
    %c0_6 = arith.constant 0 : index
    %c0_7 = arith.constant 0 : index
    %c0_8 = arith.constant 0 : index
    %3 = vector.load %arg3[%c0_5, %c0_6, %c0_7, %c0_8] : memref<1x1x16x1xf32, #tpu.memory_space<vmem>>, vector<1x1x16x1xf32>
    %4 = vector.shape_cast %3 : vector<1x1x16x1xf32> to vector<1x16x1xf32>
    %c0_9 = arith.constant 0 : index
    %c0_10 = arith.constant 0 : index
    %c0_11 = arith.constant 0 : index
    %5 = vector.load %arg8[%c0_9, %c0_10, %c0_11] : memref<10x16x1xf32, #tpu.memory_space<vmem>>, vector<1x16x1xf32>
    tpu.vector_store %arg8[%c0_9, %c0_10, %c0_11], %4 {strides = array<i32>} : memref<10x16x1xf32, #tpu.memory_space<vmem>>, vector<1x16x1xf32>,
    %c0_12 = arith.constant 0 : index
    %c0_13 = arith.constant 0 : index
    %c0_14 = arith.constant 0 : index
    %c0_15 = arith.constant 0 : index
    %6 = vector.load %arg4[%c0_12, %c0_13, %c0_14, %c0_15] : memref<1x1x16x1xf32, #tpu.memory_space<vmem>>, vector<1x1x16x1xf32>
    %7 = vector.shape_cast %6 : vector<1x1x16x1xf32> to vector<1x16x1xf32>
    %c9 = arith.constant 9 : index
    %c0_16 = arith.constant 0 : index
    %c0_17 = arith.constant 0 : index
    %8 = vector.load %arg8[%c9, %c0_16, %c0_17] : memref<10x16x1xf32, #tpu.memory_space<vmem>>, vector<1x16x1xf32>
    tpu.vector_store %arg8[%c9, %c0_16, %c0_17], %7 {strides = array<i32>} : memref<10x16x1xf32, #tpu.memory_space<vmem>>, vector<1x16x1xf32>,
    %c0_i32 = arith.constant 0 : i32
    %9 = arith.cmpi eq, %arg1, %c0_i32 : i32
    %10 = arith.extui %9 : i1 to i32
    %c0_i32_18 = arith.constant 0 : i32
    %11 = arith.cmpi ne, %10, %c0_i32_18 : i32
    scf.if %11 {
      %cst_121 = arith.constant 0.000000e+00 : f32
      %97 = vector.broadcast %cst_121 : f32 to vector<1x16x1xf32>
      %c0_122 = arith.constant 0 : index
      %c0_123 = arith.constant 0 : index
      %c0_124 = arith.constant 0 : index
      %98 = vector.load %arg8[%c0_122, %c0_123, %c0_124] : memref<10x16x1xf32, #tpu.memory_space<vmem>>, vector<1x16x1xf32>
      tpu.vector_store %arg8[%c0_122, %c0_123, %c0_124], %97 {strides = array<i32>} : memref<10x16x1xf32, #tpu.memory_space<vmem>>, vector<1x16x1xf32>,
    } else {
    }
    %c1_i32 = arith.constant 1 : i32
    %12 = arith.cmpi eq, %arg1, %c1_i32 : i32
    %13 = arith.extui %12 : i1 to i32
    %c0_i32_19 = arith.constant 0 : i32
    %14 = arith.cmpi ne, %13, %c0_i32_19 : i32
    scf.if %14 {
      %cst_121 = arith.constant 0.000000e+00 : f32
      %97 = vector.broadcast %cst_121 : f32 to vector<1x16x1xf32>
      %c9_122 = arith.constant 9 : index
      %c0_123 = arith.constant 0 : index
      %c0_124 = arith.constant 0 : index
      %98 = vector.load %arg8[%c9_122, %c0_123, %c0_124] : memref<10x16x1xf32, #tpu.memory_space<vmem>>, vector<1x16x1xf32>
      tpu.vector_store %arg8[%c9_122, %c0_123, %c0_124], %97 {strides = array<i32>} : memref<10x16x1xf32, #tpu.memory_space<vmem>>, vector<1x16x1xf32>,
    } else {
    }
    %cst = arith.constant 0.000000e+00 : f32
    %15 = vector.broadcast %cst : f32 to vector<8x16x32xf32>
    %c0_20 = arith.constant 0 : index
    %c0_21 = arith.constant 0 : index
    %c0_22 = arith.constant 0 : index
    %16 = vector.load %arg9[%c0_20, %c0_21, %c0_22] : memref<8x16x32xf32, #tpu.memory_space<vmem>>, vector<8x16x32xf32>
    tpu.vector_store %arg9[%c0_20, %c0_21, %c0_22], %15 {strides = array<i32>} : memref<8x16x32xf32, #tpu.memory_space<vmem>>, vector<8x16x32xf32>,
    %c0_23 = arith.constant 0 : index
    %c0_24 = arith.constant 0 : index
    %c0_25 = arith.constant 0 : index
    %17 = vector.load %arg8[%c0_23, %c0_24, %c0_25] : memref<10x16x1xf32, #tpu.memory_space<vmem>>, vector<8x16x1xf32>
    %c0_26 = arith.constant 0 : index
    %c0_27 = arith.constant 0 : index
    %c0_28 = arith.constant 0 : index
    %18 = vector.load %arg5[%c0_26, %c0_27, %c0_28] : memref<3x3x32xf32, #tpu.memory_space<vmem>>, vector<1x1x32xf32>
    %19 = vector.broadcast %17 : vector<8x16x1xf32> to vector<8x16x32xf32>
    %20 = vector.broadcast %18 : vector<1x1x32xf32> to vector<8x16x32xf32>
    %21 = arith.mulf %19, %20 : vector<8x16x32xf32>
    %c0_29 = arith.constant 0 : index
    %c1_30 = arith.constant 1 : index
    %c0_31 = arith.constant 0 : index
    %22 = vector.load %arg9[%c0_29, %c1_30, %c0_31] : memref<8x16x32xf32, #tpu.memory_space<vmem>>, vector<8x15x32xf32>
    %23 = vector.extract_strided_slice %21 {offsets = [0, 0, 0], sizes = [8, 15, 32], strides = [1, 1, 1]} : vector<8x16x32xf32> to vector<8x15x32xf32>
    %24 = arith.addf %22, %23 : vector<8x15x32xf32>
    %c0_32 = arith.constant 0 : index
    %c1_33 = arith.constant 1 : index
    %c0_34 = arith.constant 0 : index
    %25 = vector.load %arg9[%c0_32, %c1_33, %c0_34] : memref<8x16x32xf32, #tpu.memory_space<vmem>>, vector<8x15x32xf32>
    tpu.vector_store %arg9[%c0_32, %c1_33, %c0_34], %24 {strides = array<i32>} : memref<8x16x32xf32, #tpu.memory_space<vmem>>, vector<8x15x32xf32>,
    %c0_35 = arith.constant 0 : index
    %c1_36 = arith.constant 1 : index
    %c0_37 = arith.constant 0 : index
    %26 = vector.load %arg5[%c0_35, %c1_36, %c0_37] : memref<3x3x32xf32, #tpu.memory_space<vmem>>, vector<1x1x32xf32>
    %27 = vector.broadcast %17 : vector<8x16x1xf32> to vector<8x16x32xf32>
    %28 = vector.broadcast %26 : vector<1x1x32xf32> to vector<8x16x32xf32>
    %29 = arith.mulf %27, %28 : vector<8x16x32xf32>
    %c0_38 = arith.constant 0 : index
    %c0_39 = arith.constant 0 : index
    %c0_40 = arith.constant 0 : index
    %30 = vector.load %arg9[%c0_38, %c0_39, %c0_40] : memref<8x16x32xf32, #tpu.memory_space<vmem>>, vector<8x16x32xf32>
    %31 = arith.addf %30, %29 : vector<8x16x32xf32>
    %c0_41 = arith.constant 0 : index
    %c0_42 = arith.constant 0 : index
    %c0_43 = arith.constant 0 : index
    %32 = vector.load %arg9[%c0_41, %c0_42, %c0_43] : memref<8x16x32xf32, #tpu.memory_space<vmem>>, vector<8x16x32xf32>
    tpu.vector_store %arg9[%c0_41, %c0_42, %c0_43], %31 {strides = array<i32>} : memref<8x16x32xf32, #tpu.memory_space<vmem>>, vector<8x16x32xf32>,
    %c0_44 = arith.constant 0 : index
    %c2 = arith.constant 2 : index
    %c0_45 = arith.constant 0 : index
    %33 = vector.load %arg5[%c0_44, %c2, %c0_45] : memref<3x3x32xf32, #tpu.memory_space<vmem>>, vector<1x1x32xf32>
    %34 = vector.broadcast %17 : vector<8x16x1xf32> to vector<8x16x32xf32>
    %35 = vector.broadcast %33 : vector<1x1x32xf32> to vector<8x16x32xf32>
    %36 = arith.mulf %34, %35 : vector<8x16x32xf32>
    %c0_46 = arith.constant 0 : index
    %c0_47 = arith.constant 0 : index
    %c0_48 = arith.constant 0 : index
    %37 = vector.load %arg9[%c0_46, %c0_47, %c0_48] : memref<8x16x32xf32, #tpu.memory_space<vmem>>, vector<8x15x32xf32>
    %38 = vector.extract_strided_slice %36 {offsets = [0, 1, 0], sizes = [8, 15, 32], strides = [1, 1, 1]} : vector<8x16x32xf32> to vector<8x15x32xf32>
    %39 = arith.addf %37, %38 : vector<8x15x32xf32>
    %c0_49 = arith.constant 0 : index
    %c0_50 = arith.constant 0 : index
    %c0_51 = arith.constant 0 : index
    %40 = vector.load %arg9[%c0_49, %c0_50, %c0_51] : memref<8x16x32xf32, #tpu.memory_space<vmem>>, vector<8x15x32xf32>
    tpu.vector_store %arg9[%c0_49, %c0_50, %c0_51], %39 {strides = array<i32>} : memref<8x16x32xf32, #tpu.memory_space<vmem>>, vector<8x15x32xf32>,
    %c1_52 = arith.constant 1 : index
    %c0_53 = arith.constant 0 : index
    %c0_54 = arith.constant 0 : index
    %41 = vector.load %arg8[%c1_52, %c0_53, %c0_54] : memref<10x16x1xf32, #tpu.memory_space<vmem>>, vector<8x16x1xf32>
    %c1_55 = arith.constant 1 : index
    %c0_56 = arith.constant 0 : index
    %c0_57 = arith.constant 0 : index
    %42 = vector.load %arg5[%c1_55, %c0_56, %c0_57] : memref<3x3x32xf32, #tpu.memory_space<vmem>>, vector<1x1x32xf32>
    %43 = vector.broadcast %41 : vector<8x16x1xf32> to vector<8x16x32xf32>
    %44 = vector.broadcast %42 : vector<1x1x32xf32> to vector<8x16x32xf32>
    %45 = arith.mulf %43, %44 : vector<8x16x32xf32>
    %c0_58 = arith.constant 0 : index
    %c1_59 = arith.constant 1 : index
    %c0_60 = arith.constant 0 : index
    %46 = vector.load %arg9[%c0_58, %c1_59, %c0_60] : memref<8x16x32xf32, #tpu.memory_space<vmem>>, vector<8x15x32xf32>
    %47 = vector.extract_strided_slice %45 {offsets = [0, 0, 0], sizes = [8, 15, 32], strides = [1, 1, 1]} : vector<8x16x32xf32> to vector<8x15x32xf32>
    %48 = arith.addf %46, %47 : vector<8x15x32xf32>
    %c0_61 = arith.constant 0 : index
    %c1_62 = arith.constant 1 : index
    %c0_63 = arith.constant 0 : index
    %49 = vector.load %arg9[%c0_61, %c1_62, %c0_63] : memref<8x16x32xf32, #tpu.memory_space<vmem>>, vector<8x15x32xf32>
    tpu.vector_store %arg9[%c0_61, %c1_62, %c0_63], %48 {strides = array<i32>} : memref<8x16x32xf32, #tpu.memory_space<vmem>>, vector<8x15x32xf32>,
    %c1_64 = arith.constant 1 : index
    %c1_65 = arith.constant 1 : index
    %c0_66 = arith.constant 0 : index
    %50 = vector.load %arg5[%c1_64, %c1_65, %c0_66] : memref<3x3x32xf32, #tpu.memory_space<vmem>>, vector<1x1x32xf32>
    %51 = vector.broadcast %41 : vector<8x16x1xf32> to vector<8x16x32xf32>
    %52 = vector.broadcast %50 : vector<1x1x32xf32> to vector<8x16x32xf32>
    %53 = arith.mulf %51, %52 : vector<8x16x32xf32>
    %c0_67 = arith.constant 0 : index
    %c0_68 = arith.constant 0 : index
    %c0_69 = arith.constant 0 : index
    %54 = vector.load %arg9[%c0_67, %c0_68, %c0_69] : memref<8x16x32xf32, #tpu.memory_space<vmem>>, vector<8x16x32xf32>
    %55 = arith.addf %54, %53 : vector<8x16x32xf32>
    %c0_70 = arith.constant 0 : index
    %c0_71 = arith.constant 0 : index
    %c0_72 = arith.constant 0 : index
    %56 = vector.load %arg9[%c0_70, %c0_71, %c0_72] : memref<8x16x32xf32, #tpu.memory_space<vmem>>, vector<8x16x32xf32>
    tpu.vector_store %arg9[%c0_70, %c0_71, %c0_72], %55 {strides = array<i32>} : memref<8x16x32xf32, #tpu.memory_space<vmem>>, vector<8x16x32xf32>,
    %c1_73 = arith.constant 1 : index
    %c2_74 = arith.constant 2 : index
    %c0_75 = arith.constant 0 : index
    %57 = vector.load %arg5[%c1_73, %c2_74, %c0_75] : memref<3x3x32xf32, #tpu.memory_space<vmem>>, vector<1x1x32xf32>
    %58 = vector.broadcast %41 : vector<8x16x1xf32> to vector<8x16x32xf32>
    %59 = vector.broadcast %57 : vector<1x1x32xf32> to vector<8x16x32xf32>
    %60 = arith.mulf %58, %59 : vector<8x16x32xf32>
    %c0_76 = arith.constant 0 : index
    %c0_77 = arith.constant 0 : index
    %c0_78 = arith.constant 0 : index
    %61 = vector.load %arg9[%c0_76, %c0_77, %c0_78] : memref<8x16x32xf32, #tpu.memory_space<vmem>>, vector<8x15x32xf32>
    %62 = vector.extract_strided_slice %60 {offsets = [0, 1, 0], sizes = [8, 15, 32], strides = [1, 1, 1]} : vector<8x16x32xf32> to vector<8x15x32xf32>
    %63 = arith.addf %61, %62 : vector<8x15x32xf32>
    %c0_79 = arith.constant 0 : index
    %c0_80 = arith.constant 0 : index
    %c0_81 = arith.constant 0 : index
    %64 = vector.load %arg9[%c0_79, %c0_80, %c0_81] : memref<8x16x32xf32, #tpu.memory_space<vmem>>, vector<8x15x32xf32>
    tpu.vector_store %arg9[%c0_79, %c0_80, %c0_81], %63 {strides = array<i32>} : memref<8x16x32xf32, #tpu.memory_space<vmem>>, vector<8x15x32xf32>,
    %c2_82 = arith.constant 2 : index
    %c0_83 = arith.constant 0 : index
    %c0_84 = arith.constant 0 : index
    %65 = vector.load %arg8[%c2_82, %c0_83, %c0_84] : memref<10x16x1xf32, #tpu.memory_space<vmem>>, vector<8x16x1xf32>
    %c2_85 = arith.constant 2 : index
    %c0_86 = arith.constant 0 : index
    %c0_87 = arith.constant 0 : index
    %66 = vector.load %arg5[%c2_85, %c0_86, %c0_87] : memref<3x3x32xf32, #tpu.memory_space<vmem>>, vector<1x1x32xf32>
    %67 = vector.broadcast %65 : vector<8x16x1xf32> to vector<8x16x32xf32>
    %68 = vector.broadcast %66 : vector<1x1x32xf32> to vector<8x16x32xf32>
    %69 = arith.mulf %67, %68 : vector<8x16x32xf32>
    %c0_88 = arith.constant 0 : index
    %c1_89 = arith.constant 1 : index
    %c0_90 = arith.constant 0 : index
    %70 = vector.load %arg9[%c0_88, %c1_89, %c0_90] : memref<8x16x32xf32, #tpu.memory_space<vmem>>, vector<8x15x32xf32>
    %71 = vector.extract_strided_slice %69 {offsets = [0, 0, 0], sizes = [8, 15, 32], strides = [1, 1, 1]} : vector<8x16x32xf32> to vector<8x15x32xf32>
    %72 = arith.addf %70, %71 : vector<8x15x32xf32>
    %c0_91 = arith.constant 0 : index
    %c1_92 = arith.constant 1 : index
    %c0_93 = arith.constant 0 : index
    %73 = vector.load %arg9[%c0_91, %c1_92, %c0_93] : memref<8x16x32xf32, #tpu.memory_space<vmem>>, vector<8x15x32xf32>
    tpu.vector_store %arg9[%c0_91, %c1_92, %c0_93], %72 {strides = array<i32>} : memref<8x16x32xf32, #tpu.memory_space<vmem>>, vector<8x15x32xf32>,
    %c2_94 = arith.constant 2 : index
    %c1_95 = arith.constant 1 : index
    %c0_96 = arith.constant 0 : index
    %74 = vector.load %arg5[%c2_94, %c1_95, %c0_96] : memref<3x3x32xf32, #tpu.memory_space<vmem>>, vector<1x1x32xf32>
    %75 = vector.broadcast %65 : vector<8x16x1xf32> to vector<8x16x32xf32>
    %76 = vector.broadcast %74 : vector<1x1x32xf32> to vector<8x16x32xf32>
    %77 = arith.mulf %75, %76 : vector<8x16x32xf32>
    %c0_97 = arith.constant 0 : index
    %c0_98 = arith.constant 0 : index
    %c0_99 = arith.constant 0 : index
    %78 = vector.load %arg9[%c0_97, %c0_98, %c0_99] : memref<8x16x32xf32, #tpu.memory_space<vmem>>, vector<8x16x32xf32>
    %79 = arith.addf %78, %77 : vector<8x16x32xf32>
    %c0_100 = arith.constant 0 : index
    %c0_101 = arith.constant 0 : index
    %c0_102 = arith.constant 0 : index
    %80 = vector.load %arg9[%c0_100, %c0_101, %c0_102] : memref<8x16x32xf32, #tpu.memory_space<vmem>>, vector<8x16x32xf32>
    tpu.vector_store %arg9[%c0_100, %c0_101, %c0_102], %79 {strides = array<i32>} : memref<8x16x32xf32, #tpu.memory_space<vmem>>, vector<8x16x32xf32>,
    %c2_103 = arith.constant 2 : index
    %c2_104 = arith.constant 2 : index
    %c0_105 = arith.constant 0 : index
    %81 = vector.load %arg5[%c2_103, %c2_104, %c0_105] : memref<3x3x32xf32, #tpu.memory_space<vmem>>, vector<1x1x32xf32>
    %82 = vector.broadcast %65 : vector<8x16x1xf32> to vector<8x16x32xf32>
    %83 = vector.broadcast %81 : vector<1x1x32xf32> to vector<8x16x32xf32>
    %84 = arith.mulf %82, %83 : vector<8x16x32xf32>
    %c0_106 = arith.constant 0 : index
    %c0_107 = arith.constant 0 : index
    %c0_108 = arith.constant 0 : index
    %85 = vector.load %arg9[%c0_106, %c0_107, %c0_108] : memref<8x16x32xf32, #tpu.memory_space<vmem>>, vector<8x15x32xf32>
    %86 = vector.extract_strided_slice %84 {offsets = [0, 1, 0], sizes = [8, 15, 32], strides = [1, 1, 1]} : vector<8x16x32xf32> to vector<8x15x32xf32>
    %87 = arith.addf %85, %86 : vector<8x15x32xf32>
    %c0_109 = arith.constant 0 : index
    %c0_110 = arith.constant 0 : index
    %c0_111 = arith.constant 0 : index
    %88 = vector.load %arg9[%c0_109, %c0_110, %c0_111] : memref<8x16x32xf32, #tpu.memory_space<vmem>>, vector<8x15x32xf32>
    tpu.vector_store %arg9[%c0_109, %c0_110, %c0_111], %87 {strides = array<i32>} : memref<8x16x32xf32, #tpu.memory_space<vmem>>, vector<8x15x32xf32>,
    %c0_112 = arith.constant 0 : index
    %c0_113 = arith.constant 0 : index
    %c0_114 = arith.constant 0 : index
    %89 = vector.load %arg9[%c0_112, %c0_113, %c0_114] : memref<8x16x32xf32, #tpu.memory_space<vmem>>, vector<8x16x32xf32>
    %c0_115 = arith.constant 0 : index
    %c0_116 = arith.constant 0 : index
    %90 = vector.load %arg6[%c0_115, %c0_116] : memref<1x32xf32, #tpu.memory_space<vmem>>, vector<1x32xf32>
    %91 = vector.shape_cast %90 : vector<1x32xf32> to vector<1x1x32xf32>
    %92 = vector.broadcast %91 : vector<1x1x32xf32> to vector<8x16x32xf32>
    %93 = arith.addf %89, %92 : vector<8x16x32xf32>
    %c0_117 = arith.constant 0 : index
    %c0_118 = arith.constant 0 : index
    %c0_119 = arith.constant 0 : index
    %c0_120 = arith.constant 0 : index
    %94 = vector.load %arg7[%c0_117, %c0_118, %c0_119, %c0_120] : memref<1x8x16x32xf32, #tpu.memory_space<vmem>>, vector<1x8x16x32xf32>
    %95 = vector.shape_cast %94 : vector<1x8x16x32xf32> to vector<8x16x32xf32>
    %96 = vector.shape_cast %93 : vector<8x16x32xf32> to vector<1x8x16x32xf32>
    tpu.vector_store %arg7[%c0_117, %c0_118, %c0_119, %c0_120], %96 {strides = array<i32>} : memref<1x8x16x32xf32, #tpu.memory_space<vmem>>, vector<1x8x16x32xf32>,
    return
  }
  func.func @transform_0(%arg0: i32, %arg1: i32) -> (i32, i32, i32, i32) {
    %c0_i32 = arith.constant 0 : i32
    %c0_i32_0 = arith.constant 0 : i32
    %c0_i32_1 = arith.constant 0 : i32
    return %arg0, %arg1, %c0_i32, %c0_i32_0 : i32, i32, i32, i32
  }
  func.func @transform_1(%arg0: i32, %arg1: i32) -> (i32, i32, i32, i32) {
    %c8_i32 = arith.constant 8 : i32
    %0 = arith.muli %arg1, %c8_i32 : i32
    %c1_i32 = arith.constant 1 : i32
    %1 = arith.subi %0, %c1_i32 : i32
    %c0_i32 = arith.constant 0 : i32
    %2 = arith.maxsi %1, %c0_i32 : i32
    %c0_i32_0 = arith.constant 0 : i32
    %c0_i32_1 = arith.constant 0 : i32
    %c0_i32_2 = arith.constant 0 : i32
    return %arg0, %2, %c0_i32_0, %c0_i32_1 : i32, i32, i32, i32
  }
  func.func @transform_2(%arg0: i32, %arg1: i32) -> (i32, i32, i32, i32) {
    %c8_i32 = arith.constant 8 : i32
    %0 = arith.muli %arg1, %c8_i32 : i32
    %c8_i32_0 = arith.constant 8 : i32
    %1 = arith.addi %0, %c8_i32_0 : i32
    %c15_i32 = arith.constant 15 : i32
    %2 = arith.minsi %1, %c15_i32 : i32
    %c0_i32 = arith.constant 0 : i32
    %c0_i32_1 = arith.constant 0 : i32
    %c0_i32_2 = arith.constant 0 : i32
    return %arg0, %2, %c0_i32, %c0_i32_1 : i32, i32, i32, i32
  }
  func.func @transform_3(%arg0: i32, %arg1: i32) -> (i32, i32, i32) {
    %c0_i32 = arith.constant 0 : i32
    %c0_i32_0 = arith.constant 0 : i32
    %c0_i32_1 = arith.constant 0 : i32
    %c0_i32_2 = arith.constant 0 : i32
    return %c0_i32, %c0_i32_0, %c0_i32_1 : i32, i32, i32
  }
  func.func @transform_4(%arg0: i32, %arg1: i32) -> (i32, i32) {
    %c0_i32 = arith.constant 0 : i32
    %c0_i32_0 = arith.constant 0 : i32
    %c0_i32_1 = arith.constant 0 : i32
    return %c0_i32, %c0_i32_0 : i32, i32
  }
  func.func @transform_5(%arg0: i32, %arg1: i32) -> (i32, i32, i32, i32) {
    %c0_i32 = arith.constant 0 : i32
    %c0_i32_0 = arith.constant 0 : i32
    %c0_i32_1 = arith.constant 0 : i32
    return %arg0, %arg1, %c0_i32, %c0_i32_0 : i32, i32, i32, i32
  }
}

module attributes {stable_mosaic.version = 11 : i64} {
  func.func @kernel(%arg0: i32, %arg1: i32, %arg2: memref<1x8x16x32xf32, #tpu.memory_space<vmem>>, %arg3: memref<1x1x16x32xf32, #tpu.memory_space<vmem>>, %arg4: memref<1x1x16x32xf32, #tpu.memory_space<vmem>>, %arg5: memref<1x1x16x32xf32, #tpu.memory_space<vmem>>, %arg6: memref<1x1x16x32xf32, #tpu.memory_space<vmem>>, %arg7: memref<3x96x32xf32, #tpu.memory_space<vmem>>, %arg8: memref<1x32xf32, #tpu.memory_space<vmem>>, %arg9: memref<1x32xf32, #tpu.memory_space<vmem>>, %arg10: memref<1x32xf32, #tpu.memory_space<vmem>>, %arg11: memref<32x32xf32, #tpu.memory_space<vmem>>, %arg12: memref<1x32xf32, #tpu.memory_space<vmem>>, %arg13: memref<3x96x32xf32, #tpu.memory_space<vmem>>, %arg14: memref<1x32xf32, #tpu.memory_space<vmem>>, %arg15: memref<1x32xf32, #tpu.memory_space<vmem>>, %arg16: memref<1x32xf32, #tpu.memory_space<vmem>>, %arg17: memref<32x32xf32, #tpu.memory_space<vmem>>, %arg18: memref<1x32xf32, #tpu.memory_space<vmem>>, %arg19: memref<1x8x16x32xf32, #tpu.memory_space<vmem>>, %arg20: memref<1x8x16x32xf32, #tpu.memory_space<vmem>>, %arg21: memref<12x16x96xf32, #tpu.memory_space<vmem>>, %arg22: memref<10x16x96xf32, #tpu.memory_space<vmem>>, %arg23: memref<10x16x32xf32, #tpu.memory_space<vmem>>) attributes {dimension_semantics = [#tpu.dimension_semantics<parallel>, #tpu.dimension_semantics<parallel>], iteration_bounds = array<i64: 2, 2>, scalar_prefetch = 0 : i64, scratch_operands = 3 : i64, tpu.core_type = #tpu.core_type<tc>, window_params = [{transform_indices = @transform_0, window_bounds = array<i64: 1, 8, 16, 32>}, {transform_indices = @transform_1, window_bounds = array<i64: 1, 1, 16, 32>}, {transform_indices = @transform_2, window_bounds = array<i64: 1, 1, 16, 32>}, {transform_indices = @transform_3, window_bounds = array<i64: 1, 1, 16, 32>}, {transform_indices = @transform_4, window_bounds = array<i64: 1, 1, 16, 32>}, {pipeline_mode = #tpu.pipeline_mode<synchronous>, transform_indices = @transform_5, window_bounds = array<i64: 3, 96, 32>}, {pipeline_mode = #tpu.pipeline_mode<synchronous>, transform_indices = @transform_6, window_bounds = array<i64: 1, 32>}, {pipeline_mode = #tpu.pipeline_mode<synchronous>, transform_indices = @transform_7, window_bounds = array<i64: 1, 32>}, {pipeline_mode = #tpu.pipeline_mode<synchronous>, transform_indices = @transform_8, window_bounds = array<i64: 1, 32>}, {pipeline_mode = #tpu.pipeline_mode<synchronous>, transform_indices = @transform_9, window_bounds = array<i64: 32, 32>}, {pipeline_mode = #tpu.pipeline_mode<synchronous>, transform_indices = @transform_10, window_bounds = array<i64: 1, 32>}, {pipeline_mode = #tpu.pipeline_mode<synchronous>, transform_indices = @transform_11, window_bounds = array<i64: 3, 96, 32>}, {pipeline_mode = #tpu.pipeline_mode<synchronous>, transform_indices = @transform_12, window_bounds = array<i64: 1, 32>}, {pipeline_mode = #tpu.pipeline_mode<synchronous>, transform_indices = @transform_13, window_bounds = array<i64: 1, 32>}, {pipeline_mode = #tpu.pipeline_mode<synchronous>, transform_indices = @transform_14, window_bounds = array<i64: 1, 32>}, {pipeline_mode = #tpu.pipeline_mode<synchronous>, transform_indices = @transform_15, window_bounds = array<i64: 32, 32>}, {pipeline_mode = #tpu.pipeline_mode<synchronous>, transform_indices = @transform_16, window_bounds = array<i64: 1, 32>}, {transform_indices = @transform_17, window_bounds = array<i64: 1, 8, 16, 32>}, {transform_indices = @transform_18, window_bounds = array<i64: 1, 8, 16, 32>}]} {
    %c0 = arith.constant 0 : index
    %c0_0 = arith.constant 0 : index
    %c0_1 = arith.constant 0 : index
    %c0_2 = arith.constant 0 : index
    %0 = vector.load %arg3[%c0, %c0_0, %c0_1, %c0_2] : memref<1x1x16x32xf32, #tpu.memory_space<vmem>>, vector<1x1x16x32xf32>
    %1 = vector.shape_cast %0 : vector<1x1x16x32xf32> to vector<1x16x32xf32>
    %c0_3 = arith.constant 0 : index
    %c0_4 = arith.constant 0 : index
    %c32 = arith.constant 32 : index
    %2 = vector.load %arg21[%c0_3, %c0_4, %c32] : memref<12x16x96xf32, #tpu.memory_space<vmem>>, vector<1x16x32xf32>
    tpu.vector_store %arg21[%c0_3, %c0_4, %c32], %1 {strides = array<i32>} : memref<12x16x96xf32, #tpu.memory_space<vmem>>, vector<1x16x32xf32>,
    %c0_5 = arith.constant 0 : index
    %c0_6 = arith.constant 0 : index
    %c0_7 = arith.constant 0 : index
    %c0_8 = arith.constant 0 : index
    %3 = vector.load %arg4[%c0_5, %c0_6, %c0_7, %c0_8] : memref<1x1x16x32xf32, #tpu.memory_space<vmem>>, vector<1x1x16x32xf32>
    %4 = vector.shape_cast %3 : vector<1x1x16x32xf32> to vector<1x16x32xf32>
    %c1 = arith.constant 1 : index
    %c0_9 = arith.constant 0 : index
    %c32_10 = arith.constant 32 : index
    %5 = vector.load %arg21[%c1, %c0_9, %c32_10] : memref<12x16x96xf32, #tpu.memory_space<vmem>>, vector<1x16x32xf32>
    tpu.vector_store %arg21[%c1, %c0_9, %c32_10], %4 {strides = array<i32>} : memref<12x16x96xf32, #tpu.memory_space<vmem>>, vector<1x16x32xf32>,
    %c0_11 = arith.constant 0 : index
    %c0_12 = arith.constant 0 : index
    %c0_13 = arith.constant 0 : index
    %c0_14 = arith.constant 0 : index
    %6 = vector.load %arg2[%c0_11, %c0_12, %c0_13, %c0_14] : memref<1x8x16x32xf32, #tpu.memory_space<vmem>>, vector<1x8x16x32xf32>
    %7 = vector.shape_cast %6 : vector<1x8x16x32xf32> to vector<8x16x32xf32>
    %c2 = arith.constant 2 : index
    %c0_15 = arith.constant 0 : index
    %c32_16 = arith.constant 32 : index
    %8 = vector.load %arg21[%c2, %c0_15, %c32_16] : memref<12x16x96xf32, #tpu.memory_space<vmem>>, vector<8x16x32xf32>
    tpu.vector_store %arg21[%c2, %c0_15, %c32_16], %7 {strides = array<i32>} : memref<12x16x96xf32, #tpu.memory_space<vmem>>, vector<8x16x32xf32>,
    %c0_17 = arith.constant 0 : index
    %c0_18 = arith.constant 0 : index
    %c0_19 = arith.constant 0 : index
    %c0_20 = arith.constant 0 : index
    %9 = vector.load %arg5[%c0_17, %c0_18, %c0_19, %c0_20] : memref<1x1x16x32xf32, #tpu.memory_space<vmem>>, vector<1x1x16x32xf32>
    %10 = vector.shape_cast %9 : vector<1x1x16x32xf32> to vector<1x16x32xf32>
    %c10 = arith.constant 10 : index
    %c0_21 = arith.constant 0 : index
    %c32_22 = arith.constant 32 : index
    %11 = vector.load %arg21[%c10, %c0_21, %c32_22] : memref<12x16x96xf32, #tpu.memory_space<vmem>>, vector<1x16x32xf32>
    tpu.vector_store %arg21[%c10, %c0_21, %c32_22], %10 {strides = array<i32>} : memref<12x16x96xf32, #tpu.memory_space<vmem>>, vector<1x16x32xf32>,
    %c0_23 = arith.constant 0 : index
    %c0_24 = arith.constant 0 : index
    %c0_25 = arith.constant 0 : index
    %c0_26 = arith.constant 0 : index
    %12 = vector.load %arg6[%c0_23, %c0_24, %c0_25, %c0_26] : memref<1x1x16x32xf32, #tpu.memory_space<vmem>>, vector<1x1x16x32xf32>
    %13 = vector.shape_cast %12 : vector<1x1x16x32xf32> to vector<1x16x32xf32>
    %c11 = arith.constant 11 : index
    %c0_27 = arith.constant 0 : index
    %c32_28 = arith.constant 32 : index
    %14 = vector.load %arg21[%c11, %c0_27, %c32_28] : memref<12x16x96xf32, #tpu.memory_space<vmem>>, vector<1x16x32xf32>
    tpu.vector_store %arg21[%c11, %c0_27, %c32_28], %13 {strides = array<i32>} : memref<12x16x96xf32, #tpu.memory_space<vmem>>, vector<1x16x32xf32>,
    %c0_i32 = arith.constant 0 : i32
    %15 = arith.cmpi eq, %arg1, %c0_i32 : i32
    %16 = arith.extui %15 : i1 to i32
    %c0_i32_29 = arith.constant 0 : i32
    %17 = arith.cmpi ne, %16, %c0_i32_29 : i32
    scf.if %17 {
      %cst_166 = arith.constant 0.000000e+00 : f32
      %146 = vector.broadcast %cst_166 : f32 to vector<2x16x32xf32>
      %c0_167 = arith.constant 0 : index
      %c0_168 = arith.constant 0 : index
      %c32_169 = arith.constant 32 : index
      %147 = vector.load %arg21[%c0_167, %c0_168, %c32_169] : memref<12x16x96xf32, #tpu.memory_space<vmem>>, vector<2x16x32xf32>
      tpu.vector_store %arg21[%c0_167, %c0_168, %c32_169], %146 {strides = array<i32>} : memref<12x16x96xf32, #tpu.memory_space<vmem>>, vector<2x16x32xf32>,
    } else {
    }
    %c1_i32 = arith.constant 1 : i32
    %18 = arith.cmpi eq, %arg1, %c1_i32 : i32
    %19 = arith.extui %18 : i1 to i32
    %c0_i32_30 = arith.constant 0 : i32
    %20 = arith.cmpi ne, %19, %c0_i32_30 : i32
    scf.if %20 {
      %cst_166 = arith.constant 0.000000e+00 : f32
      %146 = vector.broadcast %cst_166 : f32 to vector<2x16x32xf32>
      %c10_167 = arith.constant 10 : index
      %c0_168 = arith.constant 0 : index
      %c32_169 = arith.constant 32 : index
      %147 = vector.load %arg21[%c10_167, %c0_168, %c32_169] : memref<12x16x96xf32, #tpu.memory_space<vmem>>, vector<2x16x32xf32>
      tpu.vector_store %arg21[%c10_167, %c0_168, %c32_169], %146 {strides = array<i32>} : memref<12x16x96xf32, #tpu.memory_space<vmem>>, vector<2x16x32xf32>,
    } else {
    }
    %c0_31 = arith.constant 0 : index
    %c0_32 = arith.constant 0 : index
    %c32_33 = arith.constant 32 : index
    %21 = vector.load %arg21[%c0_31, %c0_32, %c32_33] : memref<12x16x96xf32, #tpu.memory_space<vmem>>, vector<12x16x32xf32>
    %cst = arith.constant 0.000000e+00 : f32
    %22 = vector.broadcast %cst : f32 to vector<12x1x32xf32>
    %23 = vector.extract_strided_slice %21 {offsets = [0, 0, 0], sizes = [12, 15, 32], strides = [1, 1, 1]} : vector<12x16x32xf32> to vector<12x15x32xf32>
    %24 = tpu.concatenate %22, %23 in 1 : vector<12x1x32xf32>, vector<12x15x32xf32> -> vector<12x16x32xf32>
    %c0_34 = arith.constant 0 : index
    %c0_35 = arith.constant 0 : index
    %c0_36 = arith.constant 0 : index
    %25 = vector.load %arg21[%c0_34, %c0_35, %c0_36] : memref<12x16x96xf32, #tpu.memory_space<vmem>>, vector<12x16x32xf32>
    tpu.vector_store %arg21[%c0_34, %c0_35, %c0_36], %24 {strides = array<i32>} : memref<12x16x96xf32, #tpu.memory_space<vmem>>, vector<12x16x32xf32>,
    %26 = vector.extract_strided_slice %21 {offsets = [0, 1, 0], sizes = [12, 15, 32], strides = [1, 1, 1]} : vector<12x16x32xf32> to vector<12x15x32xf32>
    %27 = tpu.concatenate %26, %22 in 1 : vector<12x15x32xf32>, vector<12x1x32xf32> -> vector<12x16x32xf32>
    %c0_37 = arith.constant 0 : index
    %c0_38 = arith.constant 0 : index
    %c64 = arith.constant 64 : index
    %28 = vector.load %arg21[%c0_37, %c0_38, %c64] : memref<12x16x96xf32, #tpu.memory_space<vmem>>, vector<12x16x32xf32>
    tpu.vector_store %arg21[%c0_37, %c0_38, %c64], %27 {strides = array<i32>} : memref<12x16x96xf32, #tpu.memory_space<vmem>>, vector<12x16x32xf32>,
    %c0_39 = arith.constant 0 : index
    %c0_40 = arith.constant 0 : index
    %c0_41 = arith.constant 0 : index
    %29 = vector.load %arg21[%c0_39, %c0_40, %c0_41] : memref<12x16x96xf32, #tpu.memory_space<vmem>>, vector<10x16x96xf32>
    %30 = vector.shape_cast %29 : vector<10x16x96xf32> to vector<160x96xf32>
    %c0_42 = arith.constant 0 : index
    %c0_43 = arith.constant 0 : index
    %c0_44 = arith.constant 0 : index
    %31 = vector.load %arg7[%c0_42, %c0_43, %c0_44] : memref<3x96x32xf32, #tpu.memory_space<vmem>>, vector<1x96x32xf32>
    %32 = vector.shape_cast %31 : vector<1x96x32xf32> to vector<96x32xf32>
    %cst_45 = arith.constant dense<0.000000e+00> : vector<160x32xf32>
    %33 = tpu.matmul %30, %32, %cst_45 {dimension_numbers = #tpu.dot_dimension_numbers<[1], [0], [0], [1], [0, 0, 1, 1], [], []>} : vector<160x96xf32>, vector<96x32xf32>, vector<160x32xf32> -> vector<160x32xf32>
    %34 = vector.shape_cast %33 : vector<160x32xf32> to vector<10x16x32xf32>
    %c0_46 = arith.constant 0 : index
    %c0_47 = arith.constant 0 : index
    %c0_48 = arith.constant 0 : index
    %35 = vector.load %arg23[%c0_46, %c0_47, %c0_48] : memref<10x16x32xf32, #tpu.memory_space<vmem>>, vector<10x16x32xf32>
    tpu.vector_store %arg23[%c0_46, %c0_47, %c0_48], %34 {strides = array<i32>} : memref<10x16x32xf32, #tpu.memory_space<vmem>>, vector<10x16x32xf32>,
    %c1_49 = arith.constant 1 : index
    %c0_50 = arith.constant 0 : index
    %c0_51 = arith.constant 0 : index
    %36 = vector.load %arg21[%c1_49, %c0_50, %c0_51] : memref<12x16x96xf32, #tpu.memory_space<vmem>>, vector<10x16x96xf32>
    %37 = vector.shape_cast %36 : vector<10x16x96xf32> to vector<160x96xf32>
    %c1_52 = arith.constant 1 : index
    %c0_53 = arith.constant 0 : index
    %c0_54 = arith.constant 0 : index
    %38 = vector.load %arg7[%c1_52, %c0_53, %c0_54] : memref<3x96x32xf32, #tpu.memory_space<vmem>>, vector<1x96x32xf32>
    %39 = vector.shape_cast %38 : vector<1x96x32xf32> to vector<96x32xf32>
    %cst_55 = arith.constant dense<0.000000e+00> : vector<160x32xf32>
    %40 = tpu.matmul %37, %39, %cst_55 {dimension_numbers = #tpu.dot_dimension_numbers<[1], [0], [0], [1], [0, 0, 1, 1], [], []>} : vector<160x96xf32>, vector<96x32xf32>, vector<160x32xf32> -> vector<160x32xf32>
    %41 = vector.shape_cast %40 : vector<160x32xf32> to vector<10x16x32xf32>
    %c0_56 = arith.constant 0 : index
    %c0_57 = arith.constant 0 : index
    %c0_58 = arith.constant 0 : index
    %42 = vector.load %arg23[%c0_56, %c0_57, %c0_58] : memref<10x16x32xf32, #tpu.memory_space<vmem>>, vector<10x16x32xf32>
    %43 = arith.addf %42, %41 : vector<10x16x32xf32>
    %c0_59 = arith.constant 0 : index
    %c0_60 = arith.constant 0 : index
    %c0_61 = arith.constant 0 : index
    %44 = vector.load %arg23[%c0_59, %c0_60, %c0_61] : memref<10x16x32xf32, #tpu.memory_space<vmem>>, vector<10x16x32xf32>
    tpu.vector_store %arg23[%c0_59, %c0_60, %c0_61], %43 {strides = array<i32>} : memref<10x16x32xf32, #tpu.memory_space<vmem>>, vector<10x16x32xf32>,
    %c2_62 = arith.constant 2 : index
    %c0_63 = arith.constant 0 : index
    %c0_64 = arith.constant 0 : index
    %45 = vector.load %arg21[%c2_62, %c0_63, %c0_64] : memref<12x16x96xf32, #tpu.memory_space<vmem>>, vector<10x16x96xf32>
    %46 = vector.shape_cast %45 : vector<10x16x96xf32> to vector<160x96xf32>
    %c2_65 = arith.constant 2 : index
    %c0_66 = arith.constant 0 : index
    %c0_67 = arith.constant 0 : index
    %47 = vector.load %arg7[%c2_65, %c0_66, %c0_67] : memref<3x96x32xf32, #tpu.memory_space<vmem>>, vector<1x96x32xf32>
    %48 = vector.shape_cast %47 : vector<1x96x32xf32> to vector<96x32xf32>
    %cst_68 = arith.constant dense<0.000000e+00> : vector<160x32xf32>
    %49 = tpu.matmul %46, %48, %cst_68 {dimension_numbers = #tpu.dot_dimension_numbers<[1], [0], [0], [1], [0, 0, 1, 1], [], []>} : vector<160x96xf32>, vector<96x32xf32>, vector<160x32xf32> -> vector<160x32xf32>
    %50 = vector.shape_cast %49 : vector<160x32xf32> to vector<10x16x32xf32>
    %c0_69 = arith.constant 0 : index
    %c0_70 = arith.constant 0 : index
    %c0_71 = arith.constant 0 : index
    %51 = vector.load %arg23[%c0_69, %c0_70, %c0_71] : memref<10x16x32xf32, #tpu.memory_space<vmem>>, vector<10x16x32xf32>
    %52 = arith.addf %51, %50 : vector<10x16x32xf32>
    %c0_72 = arith.constant 0 : index
    %c0_73 = arith.constant 0 : index
    %c0_74 = arith.constant 0 : index
    %53 = vector.load %arg23[%c0_72, %c0_73, %c0_74] : memref<10x16x32xf32, #tpu.memory_space<vmem>>, vector<10x16x32xf32>
    tpu.vector_store %arg23[%c0_72, %c0_73, %c0_74], %52 {strides = array<i32>} : memref<10x16x32xf32, #tpu.memory_space<vmem>>, vector<10x16x32xf32>,
    %c0_75 = arith.constant 0 : index
    %c0_76 = arith.constant 0 : index
    %c0_77 = arith.constant 0 : index
    %54 = vector.load %arg23[%c0_75, %c0_76, %c0_77] : memref<10x16x32xf32, #tpu.memory_space<vmem>>, vector<10x16x32xf32>
    %c0_78 = arith.constant 0 : index
    %c0_79 = arith.constant 0 : index
    %55 = vector.load %arg8[%c0_78, %c0_79] : memref<1x32xf32, #tpu.memory_space<vmem>>, vector<1x32xf32>
    %56 = vector.shape_cast %55 : vector<1x32xf32> to vector<1x1x32xf32>
    %57 = vector.broadcast %56 : vector<1x1x32xf32> to vector<10x16x32xf32>
    %58 = arith.addf %54, %57 : vector<10x16x32xf32>
    %c0_80 = arith.constant 0 : index
    %c0_81 = arith.constant 0 : index
    %59 = vector.load %arg9[%c0_80, %c0_81] : memref<1x32xf32, #tpu.memory_space<vmem>>, vector<1x32xf32>
    %60 = vector.shape_cast %59 : vector<1x32xf32> to vector<1x1x32xf32>
    %61 = vector.broadcast %60 : vector<1x1x32xf32> to vector<10x16x32xf32>
    %62 = arith.mulf %58, %61 : vector<10x16x32xf32>
    %c0_82 = arith.constant 0 : index
    %c0_83 = arith.constant 0 : index
    %63 = vector.load %arg10[%c0_82, %c0_83] : memref<1x32xf32, #tpu.memory_space<vmem>>, vector<1x32xf32>
    %64 = vector.shape_cast %63 : vector<1x32xf32> to vector<1x1x32xf32>
    %65 = vector.broadcast %64 : vector<1x1x32xf32> to vector<10x16x32xf32>
    %66 = arith.addf %62, %65 : vector<10x16x32xf32>
    %cst_84 = arith.constant 0.000000e+00 : f32
    %67 = vector.broadcast %cst_84 : f32 to vector<10x16x32xf32>
    %68 = arith.maximumf %66, %67 : vector<10x16x32xf32>
    %69 = vector.shape_cast %68 : vector<10x16x32xf32> to vector<160x32xf32>
    %c0_85 = arith.constant 0 : index
    %c0_86 = arith.constant 0 : index
    %70 = vector.load %arg11[%c0_85, %c0_86] : memref<32x32xf32, #tpu.memory_space<vmem>>, vector<32x32xf32>
    %cst_87 = arith.constant dense<0.000000e+00> : vector<160x32xf32>
    %71 = tpu.matmul %69, %70, %cst_87 {dimension_numbers = #tpu.dot_dimension_numbers<[1], [0], [0], [1], [0, 0, 1, 1], [], []>} : vector<160x32xf32>, vector<32x32xf32>, vector<160x32xf32> -> vector<160x32xf32>
    %72 = vector.shape_cast %71 : vector<160x32xf32> to vector<10x16x32xf32>
    %c0_88 = arith.constant 0 : index
    %c0_89 = arith.constant 0 : index
    %73 = vector.load %arg12[%c0_88, %c0_89] : memref<1x32xf32, #tpu.memory_space<vmem>>, vector<1x32xf32>
    %74 = vector.shape_cast %73 : vector<1x32xf32> to vector<1x1x32xf32>
    %75 = vector.broadcast %74 : vector<1x1x32xf32> to vector<10x16x32xf32>
    %76 = arith.addf %72, %75 : vector<10x16x32xf32>
    %c0_90 = arith.constant 0 : index
    %c0_91 = arith.constant 0 : index
    %c32_92 = arith.constant 32 : index
    %77 = vector.load %arg22[%c0_90, %c0_91, %c32_92] : memref<10x16x96xf32, #tpu.memory_space<vmem>>, vector<10x16x32xf32>
    tpu.vector_store %arg22[%c0_90, %c0_91, %c32_92], %76 {strides = array<i32>} : memref<10x16x96xf32, #tpu.memory_space<vmem>>, vector<10x16x32xf32>,
    %c0_i32_93 = arith.constant 0 : i32
    %78 = arith.cmpi eq, %arg1, %c0_i32_93 : i32
    %79 = arith.extui %78 : i1 to i32
    %c0_i32_94 = arith.constant 0 : i32
    %80 = arith.cmpi ne, %79, %c0_i32_94 : i32
    scf.if %80 {
      %cst_166 = arith.constant 0.000000e+00 : f32
      %146 = vector.broadcast %cst_166 : f32 to vector<1x16x32xf32>
      %c0_167 = arith.constant 0 : index
      %c0_168 = arith.constant 0 : index
      %c32_169 = arith.constant 32 : index
      %147 = vector.load %arg22[%c0_167, %c0_168, %c32_169] : memref<10x16x96xf32, #tpu.memory_space<vmem>>, vector<1x16x32xf32>
      tpu.vector_store %arg22[%c0_167, %c0_168, %c32_169], %146 {strides = array<i32>} : memref<10x16x96xf32, #tpu.memory_space<vmem>>, vector<1x16x32xf32>,
    } else {
    }
    %c1_i32_95 = arith.constant 1 : i32
    %81 = arith.cmpi eq, %arg1, %c1_i32_95 : i32
    %82 = arith.extui %81 : i1 to i32
    %c0_i32_96 = arith.constant 0 : i32
    %83 = arith.cmpi ne, %82, %c0_i32_96 : i32
    scf.if %83 {
      %cst_166 = arith.constant 0.000000e+00 : f32
      %146 = vector.broadcast %cst_166 : f32 to vector<1x16x32xf32>
      %c9 = arith.constant 9 : index
      %c0_167 = arith.constant 0 : index
      %c32_168 = arith.constant 32 : index
      %147 = vector.load %arg22[%c9, %c0_167, %c32_168] : memref<10x16x96xf32, #tpu.memory_space<vmem>>, vector<1x16x32xf32>
      tpu.vector_store %arg22[%c9, %c0_167, %c32_168], %146 {strides = array<i32>} : memref<10x16x96xf32, #tpu.memory_space<vmem>>, vector<1x16x32xf32>,
    } else {
    }
    %c0_97 = arith.constant 0 : index
    %c0_98 = arith.constant 0 : index
    %c32_99 = arith.constant 32 : index
    %84 = vector.load %arg22[%c0_97, %c0_98, %c32_99] : memref<10x16x96xf32, #tpu.memory_space<vmem>>, vector<10x16x32xf32>
    %cst_100 = arith.constant 0.000000e+00 : f32
    %85 = vector.broadcast %cst_100 : f32 to vector<10x1x32xf32>
    %86 = vector.extract_strided_slice %84 {offsets = [0, 0, 0], sizes = [10, 15, 32], strides = [1, 1, 1]} : vector<10x16x32xf32> to vector<10x15x32xf32>
    %87 = tpu.concatenate %85, %86 in 1 : vector<10x1x32xf32>, vector<10x15x32xf32> -> vector<10x16x32xf32>
    %c0_101 = arith.constant 0 : index
    %c0_102 = arith.constant 0 : index
    %c0_103 = arith.constant 0 : index
    %88 = vector.load %arg22[%c0_101, %c0_102, %c0_103] : memref<10x16x96xf32, #tpu.memory_space<vmem>>, vector<10x16x32xf32>
    tpu.vector_store %arg22[%c0_101, %c0_102, %c0_103], %87 {strides = array<i32>} : memref<10x16x96xf32, #tpu.memory_space<vmem>>, vector<10x16x32xf32>,
    %89 = vector.extract_strided_slice %84 {offsets = [0, 1, 0], sizes = [10, 15, 32], strides = [1, 1, 1]} : vector<10x16x32xf32> to vector<10x15x32xf32>
    %90 = tpu.concatenate %89, %85 in 1 : vector<10x15x32xf32>, vector<10x1x32xf32> -> vector<10x16x32xf32>
    %c0_104 = arith.constant 0 : index
    %c0_105 = arith.constant 0 : index
    %c64_106 = arith.constant 64 : index
    %91 = vector.load %arg22[%c0_104, %c0_105, %c64_106] : memref<10x16x96xf32, #tpu.memory_space<vmem>>, vector<10x16x32xf32>
    tpu.vector_store %arg22[%c0_104, %c0_105, %c64_106], %90 {strides = array<i32>} : memref<10x16x96xf32, #tpu.memory_space<vmem>>, vector<10x16x32xf32>,
    %c0_107 = arith.constant 0 : index
    %c0_108 = arith.constant 0 : index
    %c0_109 = arith.constant 0 : index
    %92 = vector.load %arg22[%c0_107, %c0_108, %c0_109] : memref<10x16x96xf32, #tpu.memory_space<vmem>>, vector<8x16x96xf32>
    %93 = vector.shape_cast %92 : vector<8x16x96xf32> to vector<128x96xf32>
    %c0_110 = arith.constant 0 : index
    %c0_111 = arith.constant 0 : index
    %c0_112 = arith.constant 0 : index
    %94 = vector.load %arg13[%c0_110, %c0_111, %c0_112] : memref<3x96x32xf32, #tpu.memory_space<vmem>>, vector<1x96x32xf32>
    %95 = vector.shape_cast %94 : vector<1x96x32xf32> to vector<96x32xf32>
    %cst_113 = arith.constant dense<0.000000e+00> : vector<128x32xf32>
    %96 = tpu.matmul %93, %95, %cst_113 {dimension_numbers = #tpu.dot_dimension_numbers<[1], [0], [0], [1], [0, 0, 1, 1], [], []>} : vector<128x96xf32>, vector<96x32xf32>, vector<128x32xf32> -> vector<128x32xf32>
    %97 = vector.shape_cast %96 : vector<128x32xf32> to vector<8x16x32xf32>
    %c0_114 = arith.constant 0 : index
    %c0_115 = arith.constant 0 : index
    %c0_116 = arith.constant 0 : index
    %98 = vector.load %arg23[%c0_114, %c0_115, %c0_116] : memref<10x16x32xf32, #tpu.memory_space<vmem>>, vector<8x16x32xf32>
    tpu.vector_store %arg23[%c0_114, %c0_115, %c0_116], %97 {strides = array<i32>} : memref<10x16x32xf32, #tpu.memory_space<vmem>>, vector<8x16x32xf32>,
    %c1_117 = arith.constant 1 : index
    %c0_118 = arith.constant 0 : index
    %c0_119 = arith.constant 0 : index
    %99 = vector.load %arg22[%c1_117, %c0_118, %c0_119] : memref<10x16x96xf32, #tpu.memory_space<vmem>>, vector<8x16x96xf32>
    %100 = vector.shape_cast %99 : vector<8x16x96xf32> to vector<128x96xf32>
    %c1_120 = arith.constant 1 : index
    %c0_121 = arith.constant 0 : index
    %c0_122 = arith.constant 0 : index
    %101 = vector.load %arg13[%c1_120, %c0_121, %c0_122] : memref<3x96x32xf32, #tpu.memory_space<vmem>>, vector<1x96x32xf32>
    %102 = vector.shape_cast %101 : vector<1x96x32xf32> to vector<96x32xf32>
    %cst_123 = arith.constant dense<0.000000e+00> : vector<128x32xf32>
    %103 = tpu.matmul %100, %102, %cst_123 {dimension_numbers = #tpu.dot_dimension_numbers<[1], [0], [0], [1], [0, 0, 1, 1], [], []>} : vector<128x96xf32>, vector<96x32xf32>, vector<128x32xf32> -> vector<128x32xf32>
    %104 = vector.shape_cast %103 : vector<128x32xf32> to vector<8x16x32xf32>
    %c0_124 = arith.constant 0 : index
    %c0_125 = arith.constant 0 : index
    %c0_126 = arith.constant 0 : index
    %105 = vector.load %arg23[%c0_124, %c0_125, %c0_126] : memref<10x16x32xf32, #tpu.memory_space<vmem>>, vector<8x16x32xf32>
    %106 = arith.addf %105, %104 : vector<8x16x32xf32>
    %c0_127 = arith.constant 0 : index
    %c0_128 = arith.constant 0 : index
    %c0_129 = arith.constant 0 : index
    %107 = vector.load %arg23[%c0_127, %c0_128, %c0_129] : memref<10x16x32xf32, #tpu.memory_space<vmem>>, vector<8x16x32xf32>
    tpu.vector_store %arg23[%c0_127, %c0_128, %c0_129], %106 {strides = array<i32>} : memref<10x16x32xf32, #tpu.memory_space<vmem>>, vector<8x16x32xf32>,
    %c2_130 = arith.constant 2 : index
    %c0_131 = arith.constant 0 : index
    %c0_132 = arith.constant 0 : index
    %108 = vector.load %arg22[%c2_130, %c0_131, %c0_132] : memref<10x16x96xf32, #tpu.memory_space<vmem>>, vector<8x16x96xf32>
    %109 = vector.shape_cast %108 : vector<8x16x96xf32> to vector<128x96xf32>
    %c2_133 = arith.constant 2 : index
    %c0_134 = arith.constant 0 : index
    %c0_135 = arith.constant 0 : index
    %110 = vector.load %arg13[%c2_133, %c0_134, %c0_135] : memref<3x96x32xf32, #tpu.memory_space<vmem>>, vector<1x96x32xf32>
    %111 = vector.shape_cast %110 : vector<1x96x32xf32> to vector<96x32xf32>
    %cst_136 = arith.constant dense<0.000000e+00> : vector<128x32xf32>
    %112 = tpu.matmul %109, %111, %cst_136 {dimension_numbers = #tpu.dot_dimension_numbers<[1], [0], [0], [1], [0, 0, 1, 1], [], []>} : vector<128x96xf32>, vector<96x32xf32>, vector<128x32xf32> -> vector<128x32xf32>
    %113 = vector.shape_cast %112 : vector<128x32xf32> to vector<8x16x32xf32>
    %c0_137 = arith.constant 0 : index
    %c0_138 = arith.constant 0 : index
    %c0_139 = arith.constant 0 : index
    %114 = vector.load %arg23[%c0_137, %c0_138, %c0_139] : memref<10x16x32xf32, #tpu.memory_space<vmem>>, vector<8x16x32xf32>
    %115 = arith.addf %114, %113 : vector<8x16x32xf32>
    %c0_140 = arith.constant 0 : index
    %c0_141 = arith.constant 0 : index
    %c0_142 = arith.constant 0 : index
    %116 = vector.load %arg23[%c0_140, %c0_141, %c0_142] : memref<10x16x32xf32, #tpu.memory_space<vmem>>, vector<8x16x32xf32>
    tpu.vector_store %arg23[%c0_140, %c0_141, %c0_142], %115 {strides = array<i32>} : memref<10x16x32xf32, #tpu.memory_space<vmem>>, vector<8x16x32xf32>,
    %c0_143 = arith.constant 0 : index
    %c0_144 = arith.constant 0 : index
    %c0_145 = arith.constant 0 : index
    %117 = vector.load %arg23[%c0_143, %c0_144, %c0_145] : memref<10x16x32xf32, #tpu.memory_space<vmem>>, vector<8x16x32xf32>
    %c0_146 = arith.constant 0 : index
    %c0_147 = arith.constant 0 : index
    %118 = vector.load %arg14[%c0_146, %c0_147] : memref<1x32xf32, #tpu.memory_space<vmem>>, vector<1x32xf32>
    %119 = vector.shape_cast %118 : vector<1x32xf32> to vector<1x1x32xf32>
    %120 = vector.broadcast %119 : vector<1x1x32xf32> to vector<8x16x32xf32>
    %121 = arith.addf %117, %120 : vector<8x16x32xf32>
    %c0_148 = arith.constant 0 : index
    %c0_149 = arith.constant 0 : index
    %122 = vector.load %arg15[%c0_148, %c0_149] : memref<1x32xf32, #tpu.memory_space<vmem>>, vector<1x32xf32>
    %123 = vector.shape_cast %122 : vector<1x32xf32> to vector<1x1x32xf32>
    %124 = vector.broadcast %123 : vector<1x1x32xf32> to vector<8x16x32xf32>
    %125 = arith.mulf %121, %124 : vector<8x16x32xf32>
    %c0_150 = arith.constant 0 : index
    %c0_151 = arith.constant 0 : index
    %126 = vector.load %arg16[%c0_150, %c0_151] : memref<1x32xf32, #tpu.memory_space<vmem>>, vector<1x32xf32>
    %127 = vector.shape_cast %126 : vector<1x32xf32> to vector<1x1x32xf32>
    %128 = vector.broadcast %127 : vector<1x1x32xf32> to vector<8x16x32xf32>
    %129 = arith.addf %125, %128 : vector<8x16x32xf32>
    %cst_152 = arith.constant 0.000000e+00 : f32
    %130 = vector.broadcast %cst_152 : f32 to vector<8x16x32xf32>
    %131 = arith.maximumf %129, %130 : vector<8x16x32xf32>
    %132 = vector.shape_cast %131 : vector<8x16x32xf32> to vector<128x32xf32>
    %c0_153 = arith.constant 0 : index
    %c0_154 = arith.constant 0 : index
    %133 = vector.load %arg17[%c0_153, %c0_154] : memref<32x32xf32, #tpu.memory_space<vmem>>, vector<32x32xf32>
    %cst_155 = arith.constant dense<0.000000e+00> : vector<128x32xf32>
    %134 = tpu.matmul %132, %133, %cst_155 {dimension_numbers = #tpu.dot_dimension_numbers<[1], [0], [0], [1], [0, 0, 1, 1], [], []>} : vector<128x32xf32>, vector<32x32xf32>, vector<128x32xf32> -> vector<128x32xf32>
    %135 = vector.shape_cast %134 : vector<128x32xf32> to vector<8x16x32xf32>
    %c0_156 = arith.constant 0 : index
    %c0_157 = arith.constant 0 : index
    %136 = vector.load %arg18[%c0_156, %c0_157] : memref<1x32xf32, #tpu.memory_space<vmem>>, vector<1x32xf32>
    %137 = vector.shape_cast %136 : vector<1x32xf32> to vector<1x1x32xf32>
    %138 = vector.broadcast %137 : vector<1x1x32xf32> to vector<8x16x32xf32>
    %139 = arith.addf %135, %138 : vector<8x16x32xf32>
    %c0_158 = arith.constant 0 : index
    %c0_159 = arith.constant 0 : index
    %c0_160 = arith.constant 0 : index
    %c0_161 = arith.constant 0 : index
    %140 = vector.load %arg19[%c0_158, %c0_159, %c0_160, %c0_161] : memref<1x8x16x32xf32, #tpu.memory_space<vmem>>, vector<1x8x16x32xf32>
    %141 = vector.shape_cast %140 : vector<1x8x16x32xf32> to vector<8x16x32xf32>
    %142 = arith.addf %139, %141 : vector<8x16x32xf32>
    %c0_162 = arith.constant 0 : index
    %c0_163 = arith.constant 0 : index
    %c0_164 = arith.constant 0 : index
    %c0_165 = arith.constant 0 : index
    %143 = vector.load %arg20[%c0_162, %c0_163, %c0_164, %c0_165] : memref<1x8x16x32xf32, #tpu.memory_space<vmem>>, vector<1x8x16x32xf32>
    %144 = vector.shape_cast %143 : vector<1x8x16x32xf32> to vector<8x16x32xf32>
    %145 = vector.shape_cast %142 : vector<8x16x32xf32> to vector<1x8x16x32xf32>
    tpu.vector_store %arg20[%c0_162, %c0_163, %c0_164, %c0_165], %145 {strides = array<i32>} : memref<1x8x16x32xf32, #tpu.memory_space<vmem>>, vector<1x8x16x32xf32>,
    return
  }
  func.func @transform_0(%arg0: i32, %arg1: i32) -> (i32, i32, i32, i32) {
    %c0_i32 = arith.constant 0 : i32
    %c0_i32_0 = arith.constant 0 : i32
    %c0_i32_1 = arith.constant 0 : i32
    return %arg0, %arg1, %c0_i32, %c0_i32_0 : i32, i32, i32, i32
  }
  func.func @transform_1(%arg0: i32, %arg1: i32) -> (i32, i32, i32, i32) {
    %c8_i32 = arith.constant 8 : i32
    %0 = arith.muli %arg1, %c8_i32 : i32
    %c2_i32 = arith.constant 2 : i32
    %1 = arith.subi %0, %c2_i32 : i32
    %c0_i32 = arith.constant 0 : i32
    %2 = arith.maxsi %1, %c0_i32 : i32
    %c0_i32_0 = arith.constant 0 : i32
    %c0_i32_1 = arith.constant 0 : i32
    %c0_i32_2 = arith.constant 0 : i32
    return %arg0, %2, %c0_i32_0, %c0_i32_1 : i32, i32, i32, i32
  }
  func.func @transform_2(%arg0: i32, %arg1: i32) -> (i32, i32, i32, i32) {
    %c8_i32 = arith.constant 8 : i32
    %0 = arith.muli %arg1, %c8_i32 : i32
    %c1_i32 = arith.constant 1 : i32
    %1 = arith.subi %0, %c1_i32 : i32
    %c0_i32 = arith.constant 0 : i32
    %2 = arith.maxsi %1, %c0_i32 : i32
    %c0_i32_0 = arith.constant 0 : i32
    %c0_i32_1 = arith.constant 0 : i32
    %c0_i32_2 = arith.constant 0 : i32
    return %arg0, %2, %c0_i32_0, %c0_i32_1 : i32, i32, i32, i32
  }
  func.func @transform_3(%arg0: i32, %arg1: i32) -> (i32, i32, i32, i32) {
    %c8_i32 = arith.constant 8 : i32
    %0 = arith.muli %arg1, %c8_i32 : i32
    %c8_i32_0 = arith.constant 8 : i32
    %1 = arith.addi %0, %c8_i32_0 : i32
    %c15_i32 = arith.constant 15 : i32
    %2 = arith.minsi %1, %c15_i32 : i32
    %c0_i32 = arith.constant 0 : i32
    %c0_i32_1 = arith.constant 0 : i32
    %c0_i32_2 = arith.constant 0 : i32
    return %arg0, %2, %c0_i32, %c0_i32_1 : i32, i32, i32, i32
  }
  func.func @transform_4(%arg0: i32, %arg1: i32) -> (i32, i32, i32, i32) {
    %c8_i32 = arith.constant 8 : i32
    %0 = arith.muli %arg1, %c8_i32 : i32
    %c8_i32_0 = arith.constant 8 : i32
    %1 = arith.addi %0, %c8_i32_0 : i32
    %c1_i32 = arith.constant 1 : i32
    %2 = arith.addi %1, %c1_i32 : i32
    %c15_i32 = arith.constant 15 : i32
    %3 = arith.minsi %2, %c15_i32 : i32
    %c0_i32 = arith.constant 0 : i32
    %c0_i32_1 = arith.constant 0 : i32
    %c0_i32_2 = arith.constant 0 : i32
    return %arg0, %3, %c0_i32, %c0_i32_1 : i32, i32, i32, i32
  }
  func.func @transform_5(%arg0: i32, %arg1: i32) -> (i32, i32, i32) {
    %c0_i32 = arith.constant 0 : i32
    %c0_i32_0 = arith.constant 0 : i32
    %c0_i32_1 = arith.constant 0 : i32
    %c0_i32_2 = arith.constant 0 : i32
    return %c0_i32, %c0_i32_0, %c0_i32_1 : i32, i32, i32
  }
  func.func @transform_6(%arg0: i32, %arg1: i32) -> (i32, i32) {
    %c0_i32 = arith.constant 0 : i32
    %c0_i32_0 = arith.constant 0 : i32
    %c0_i32_1 = arith.constant 0 : i32
    return %c0_i32, %c0_i32_0 : i32, i32
  }
  func.func @transform_7(%arg0: i32, %arg1: i32) -> (i32, i32) {
    %c0_i32 = arith.constant 0 : i32
    %c0_i32_0 = arith.constant 0 : i32
    %c0_i32_1 = arith.constant 0 : i32
    return %c0_i32, %c0_i32_0 : i32, i32
  }
  func.func @transform_8(%arg0: i32, %arg1: i32) -> (i32, i32) {
    %c0_i32 = arith.constant 0 : i32
    %c0_i32_0 = arith.constant 0 : i32
    %c0_i32_1 = arith.constant 0 : i32
    return %c0_i32, %c0_i32_0 : i32, i32
  }
  func.func @transform_9(%arg0: i32, %arg1: i32) -> (i32, i32) {
    %c0_i32 = arith.constant 0 : i32
    %c0_i32_0 = arith.constant 0 : i32
    %c0_i32_1 = arith.constant 0 : i32
    return %c0_i32, %c0_i32_0 : i32, i32
  }
  func.func @transform_10(%arg0: i32, %arg1: i32) -> (i32, i32) {
    %c0_i32 = arith.constant 0 : i32
    %c0_i32_0 = arith.constant 0 : i32
    %c0_i32_1 = arith.constant 0 : i32
    return %c0_i32, %c0_i32_0 : i32, i32
  }
  func.func @transform_11(%arg0: i32, %arg1: i32) -> (i32, i32, i32) {
    %c0_i32 = arith.constant 0 : i32
    %c0_i32_0 = arith.constant 0 : i32
    %c0_i32_1 = arith.constant 0 : i32
    %c0_i32_2 = arith.constant 0 : i32
    return %c0_i32, %c0_i32_0, %c0_i32_1 : i32, i32, i32
  }
  func.func @transform_12(%arg0: i32, %arg1: i32) -> (i32, i32) {
    %c0_i32 = arith.constant 0 : i32
    %c0_i32_0 = arith.constant 0 : i32
    %c0_i32_1 = arith.constant 0 : i32
    return %c0_i32, %c0_i32_0 : i32, i32
  }
  func.func @transform_13(%arg0: i32, %arg1: i32) -> (i32, i32) {
    %c0_i32 = arith.constant 0 : i32
    %c0_i32_0 = arith.constant 0 : i32
    %c0_i32_1 = arith.constant 0 : i32
    return %c0_i32, %c0_i32_0 : i32, i32
  }
  func.func @transform_14(%arg0: i32, %arg1: i32) -> (i32, i32) {
    %c0_i32 = arith.constant 0 : i32
    %c0_i32_0 = arith.constant 0 : i32
    %c0_i32_1 = arith.constant 0 : i32
    return %c0_i32, %c0_i32_0 : i32, i32
  }
  func.func @transform_15(%arg0: i32, %arg1: i32) -> (i32, i32) {
    %c0_i32 = arith.constant 0 : i32
    %c0_i32_0 = arith.constant 0 : i32
    %c0_i32_1 = arith.constant 0 : i32
    return %c0_i32, %c0_i32_0 : i32, i32
  }
  func.func @transform_16(%arg0: i32, %arg1: i32) -> (i32, i32) {
    %c0_i32 = arith.constant 0 : i32
    %c0_i32_0 = arith.constant 0 : i32
    %c0_i32_1 = arith.constant 0 : i32
    return %c0_i32, %c0_i32_0 : i32, i32
  }
  func.func @transform_17(%arg0: i32, %arg1: i32) -> (i32, i32, i32, i32) {
    %c0_i32 = arith.constant 0 : i32
    %c0_i32_0 = arith.constant 0 : i32
    %c0_i32_1 = arith.constant 0 : i32
    return %arg0, %arg1, %c0_i32, %c0_i32_0 : i32, i32, i32, i32
  }
  func.func @transform_18(%arg0: i32, %arg1: i32) -> (i32, i32, i32, i32) {
    %c0_i32 = arith.constant 0 : i32
    %c0_i32_0 = arith.constant 0 : i32
    %c0_i32_1 = arith.constant 0 : i32
    return %arg0, %arg1, %c0_i32, %c0_i32_0 : i32, i32, i32, i32
  }
}

module attributes {stable_mosaic.version = 11 : i64} {
  func.func @kernel(%arg0: i32, %arg1: i32, %arg2: memref<1x8x16x32xf32, #tpu.memory_space<vmem>>, %arg3: memref<1x1x16x32xf32, #tpu.memory_space<vmem>>, %arg4: memref<1x1x16x32xf32, #tpu.memory_space<vmem>>, %arg5: memref<3x3x32xf32, #tpu.memory_space<vmem>>, %arg6: memref<1x1xf32, #tpu.memory_space<vmem>>, %arg7: memref<1x8x16xf32, #tpu.memory_space<vmem>>, %arg8: memref<1x8x16xf32, #tpu.memory_space<vmem>>, %arg9: memref<10x16x32xf32, #tpu.memory_space<vmem>>, %arg10: memref<8x16xf32, #tpu.memory_space<vmem>>) attributes {dimension_semantics = [#tpu.dimension_semantics<parallel>, #tpu.dimension_semantics<parallel>], iteration_bounds = array<i64: 2, 2>, scalar_prefetch = 0 : i64, scratch_operands = 2 : i64, tpu.core_type = #tpu.core_type<tc>, window_params = [{transform_indices = @transform_0, window_bounds = array<i64: 1, 8, 16, 32>}, {transform_indices = @transform_1, window_bounds = array<i64: 1, 1, 16, 32>}, {transform_indices = @transform_2, window_bounds = array<i64: 1, 1, 16, 32>}, {pipeline_mode = #tpu.pipeline_mode<synchronous>, transform_indices = @transform_3, window_bounds = array<i64: 3, 3, 32>}, {pipeline_mode = #tpu.pipeline_mode<synchronous>, transform_indices = @transform_4, window_bounds = array<i64: 1, 1>}, {transform_indices = @transform_5, window_bounds = array<i64: 1, 8, 16>}, {transform_indices = @transform_6, window_bounds = array<i64: 1, 8, 16>}]} {
    %c0 = arith.constant 0 : index
    %c0_0 = arith.constant 0 : index
    %c0_1 = arith.constant 0 : index
    %c0_2 = arith.constant 0 : index
    %0 = vector.load %arg2[%c0, %c0_0, %c0_1, %c0_2] : memref<1x8x16x32xf32, #tpu.memory_space<vmem>>, vector<1x8x16x32xf32>
    %1 = vector.shape_cast %0 : vector<1x8x16x32xf32> to vector<8x16x32xf32>
    %c1 = arith.constant 1 : index
    %c0_3 = arith.constant 0 : index
    %c0_4 = arith.constant 0 : index
    %2 = vector.load %arg9[%c1, %c0_3, %c0_4] : memref<10x16x32xf32, #tpu.memory_space<vmem>>, vector<8x16x32xf32>
    tpu.vector_store %arg9[%c1, %c0_3, %c0_4], %1 {strides = array<i32>} : memref<10x16x32xf32, #tpu.memory_space<vmem>>, vector<8x16x32xf32>,
    %c0_5 = arith.constant 0 : index
    %c0_6 = arith.constant 0 : index
    %c0_7 = arith.constant 0 : index
    %c0_8 = arith.constant 0 : index
    %3 = vector.load %arg3[%c0_5, %c0_6, %c0_7, %c0_8] : memref<1x1x16x32xf32, #tpu.memory_space<vmem>>, vector<1x1x16x32xf32>
    %4 = vector.shape_cast %3 : vector<1x1x16x32xf32> to vector<1x16x32xf32>
    %c0_9 = arith.constant 0 : index
    %c0_10 = arith.constant 0 : index
    %c0_11 = arith.constant 0 : index
    %5 = vector.load %arg9[%c0_9, %c0_10, %c0_11] : memref<10x16x32xf32, #tpu.memory_space<vmem>>, vector<1x16x32xf32>
    tpu.vector_store %arg9[%c0_9, %c0_10, %c0_11], %4 {strides = array<i32>} : memref<10x16x32xf32, #tpu.memory_space<vmem>>, vector<1x16x32xf32>,
    %c0_12 = arith.constant 0 : index
    %c0_13 = arith.constant 0 : index
    %c0_14 = arith.constant 0 : index
    %c0_15 = arith.constant 0 : index
    %6 = vector.load %arg4[%c0_12, %c0_13, %c0_14, %c0_15] : memref<1x1x16x32xf32, #tpu.memory_space<vmem>>, vector<1x1x16x32xf32>
    %7 = vector.shape_cast %6 : vector<1x1x16x32xf32> to vector<1x16x32xf32>
    %c9 = arith.constant 9 : index
    %c0_16 = arith.constant 0 : index
    %c0_17 = arith.constant 0 : index
    %8 = vector.load %arg9[%c9, %c0_16, %c0_17] : memref<10x16x32xf32, #tpu.memory_space<vmem>>, vector<1x16x32xf32>
    tpu.vector_store %arg9[%c9, %c0_16, %c0_17], %7 {strides = array<i32>} : memref<10x16x32xf32, #tpu.memory_space<vmem>>, vector<1x16x32xf32>,
    %c0_i32 = arith.constant 0 : i32
    %9 = arith.cmpi eq, %arg1, %c0_i32 : i32
    %10 = arith.extui %9 : i1 to i32
    %c0_i32_18 = arith.constant 0 : i32
    %11 = arith.cmpi ne, %10, %c0_i32_18 : i32
    scf.if %11 {
      %cst_112 = arith.constant 0.000000e+00 : f32
      %99 = vector.broadcast %cst_112 : f32 to vector<1x16x32xf32>
      %c0_113 = arith.constant 0 : index
      %c0_114 = arith.constant 0 : index
      %c0_115 = arith.constant 0 : index
      %100 = vector.load %arg9[%c0_113, %c0_114, %c0_115] : memref<10x16x32xf32, #tpu.memory_space<vmem>>, vector<1x16x32xf32>
      tpu.vector_store %arg9[%c0_113, %c0_114, %c0_115], %99 {strides = array<i32>} : memref<10x16x32xf32, #tpu.memory_space<vmem>>, vector<1x16x32xf32>,
    } else {
    }
    %c1_i32 = arith.constant 1 : i32
    %12 = arith.cmpi eq, %arg1, %c1_i32 : i32
    %13 = arith.extui %12 : i1 to i32
    %c0_i32_19 = arith.constant 0 : i32
    %14 = arith.cmpi ne, %13, %c0_i32_19 : i32
    scf.if %14 {
      %cst_112 = arith.constant 0.000000e+00 : f32
      %99 = vector.broadcast %cst_112 : f32 to vector<1x16x32xf32>
      %c9_113 = arith.constant 9 : index
      %c0_114 = arith.constant 0 : index
      %c0_115 = arith.constant 0 : index
      %100 = vector.load %arg9[%c9_113, %c0_114, %c0_115] : memref<10x16x32xf32, #tpu.memory_space<vmem>>, vector<1x16x32xf32>
      tpu.vector_store %arg9[%c9_113, %c0_114, %c0_115], %99 {strides = array<i32>} : memref<10x16x32xf32, #tpu.memory_space<vmem>>, vector<1x16x32xf32>,
    } else {
    }
    %cst = arith.constant 0.000000e+00 : f32
    %15 = vector.broadcast %cst : f32 to vector<8x16xf32>
    %c0_20 = arith.constant 0 : index
    %c0_21 = arith.constant 0 : index
    %16 = vector.load %arg10[%c0_20, %c0_21] : memref<8x16xf32, #tpu.memory_space<vmem>>, vector<8x16xf32>
    tpu.vector_store %arg10[%c0_20, %c0_21], %15 {strides = array<i32>} : memref<8x16xf32, #tpu.memory_space<vmem>>, vector<8x16xf32>,
    %c0_22 = arith.constant 0 : index
    %c0_23 = arith.constant 0 : index
    %c0_24 = arith.constant 0 : index
    %17 = vector.load %arg9[%c0_22, %c0_23, %c0_24] : memref<10x16x32xf32, #tpu.memory_space<vmem>>, vector<8x16x32xf32>
    %c0_25 = arith.constant 0 : index
    %c0_26 = arith.constant 0 : index
    %c0_27 = arith.constant 0 : index
    %18 = vector.load %arg5[%c0_25, %c0_26, %c0_27] : memref<3x3x32xf32, #tpu.memory_space<vmem>>, vector<1x1x32xf32>
    %19 = vector.broadcast %18 : vector<1x1x32xf32> to vector<8x16x32xf32>
    %20 = arith.mulf %17, %19 : vector<8x16x32xf32>
    %cst_28 = arith.constant dense<0.000000e+00> : vector<8x16xf32>
    %21 = vector.multi_reduction <add>, %20, %cst_28 [2] : vector<8x16x32xf32> to vector<8x16xf32>
    %c0_29 = arith.constant 0 : index
    %c1_30 = arith.constant 1 : index
    %22 = vector.load %arg10[%c0_29, %c1_30] : memref<8x16xf32, #tpu.memory_space<vmem>>, vector<8x15xf32>
    %23 = vector.extract_strided_slice %21 {offsets = [0, 0], sizes = [8, 15], strides = [1, 1]} : vector<8x16xf32> to vector<8x15xf32>
    %24 = arith.addf %22, %23 : vector<8x15xf32>
    %c0_31 = arith.constant 0 : index
    %c1_32 = arith.constant 1 : index
    %25 = vector.load %arg10[%c0_31, %c1_32] : memref<8x16xf32, #tpu.memory_space<vmem>>, vector<8x15xf32>
    tpu.vector_store %arg10[%c0_31, %c1_32], %24 {strides = array<i32>} : memref<8x16xf32, #tpu.memory_space<vmem>>, vector<8x15xf32>,
    %c0_33 = arith.constant 0 : index
    %c1_34 = arith.constant 1 : index
    %c0_35 = arith.constant 0 : index
    %26 = vector.load %arg5[%c0_33, %c1_34, %c0_35] : memref<3x3x32xf32, #tpu.memory_space<vmem>>, vector<1x1x32xf32>
    %27 = vector.broadcast %26 : vector<1x1x32xf32> to vector<8x16x32xf32>
    %28 = arith.mulf %17, %27 : vector<8x16x32xf32>
    %cst_36 = arith.constant dense<0.000000e+00> : vector<8x16xf32>
    %29 = vector.multi_reduction <add>, %28, %cst_36 [2] : vector<8x16x32xf32> to vector<8x16xf32>
    %c0_37 = arith.constant 0 : index
    %c0_38 = arith.constant 0 : index
    %30 = vector.load %arg10[%c0_37, %c0_38] : memref<8x16xf32, #tpu.memory_space<vmem>>, vector<8x16xf32>
    %31 = arith.addf %30, %29 : vector<8x16xf32>
    %c0_39 = arith.constant 0 : index
    %c0_40 = arith.constant 0 : index
    %32 = vector.load %arg10[%c0_39, %c0_40] : memref<8x16xf32, #tpu.memory_space<vmem>>, vector<8x16xf32>
    tpu.vector_store %arg10[%c0_39, %c0_40], %31 {strides = array<i32>} : memref<8x16xf32, #tpu.memory_space<vmem>>, vector<8x16xf32>,
    %c0_41 = arith.constant 0 : index
    %c2 = arith.constant 2 : index
    %c0_42 = arith.constant 0 : index
    %33 = vector.load %arg5[%c0_41, %c2, %c0_42] : memref<3x3x32xf32, #tpu.memory_space<vmem>>, vector<1x1x32xf32>
    %34 = vector.broadcast %33 : vector<1x1x32xf32> to vector<8x16x32xf32>
    %35 = arith.mulf %17, %34 : vector<8x16x32xf32>
    %cst_43 = arith.constant dense<0.000000e+00> : vector<8x16xf32>
    %36 = vector.multi_reduction <add>, %35, %cst_43 [2] : vector<8x16x32xf32> to vector<8x16xf32>
    %c0_44 = arith.constant 0 : index
    %c0_45 = arith.constant 0 : index
    %37 = vector.load %arg10[%c0_44, %c0_45] : memref<8x16xf32, #tpu.memory_space<vmem>>, vector<8x15xf32>
    %38 = vector.extract_strided_slice %36 {offsets = [0, 1], sizes = [8, 15], strides = [1, 1]} : vector<8x16xf32> to vector<8x15xf32>
    %39 = arith.addf %37, %38 : vector<8x15xf32>
    %c0_46 = arith.constant 0 : index
    %c0_47 = arith.constant 0 : index
    %40 = vector.load %arg10[%c0_46, %c0_47] : memref<8x16xf32, #tpu.memory_space<vmem>>, vector<8x15xf32>
    tpu.vector_store %arg10[%c0_46, %c0_47], %39 {strides = array<i32>} : memref<8x16xf32, #tpu.memory_space<vmem>>, vector<8x15xf32>,
    %c1_48 = arith.constant 1 : index
    %c0_49 = arith.constant 0 : index
    %c0_50 = arith.constant 0 : index
    %41 = vector.load %arg9[%c1_48, %c0_49, %c0_50] : memref<10x16x32xf32, #tpu.memory_space<vmem>>, vector<8x16x32xf32>
    %c1_51 = arith.constant 1 : index
    %c0_52 = arith.constant 0 : index
    %c0_53 = arith.constant 0 : index
    %42 = vector.load %arg5[%c1_51, %c0_52, %c0_53] : memref<3x3x32xf32, #tpu.memory_space<vmem>>, vector<1x1x32xf32>
    %43 = vector.broadcast %42 : vector<1x1x32xf32> to vector<8x16x32xf32>
    %44 = arith.mulf %41, %43 : vector<8x16x32xf32>
    %cst_54 = arith.constant dense<0.000000e+00> : vector<8x16xf32>
    %45 = vector.multi_reduction <add>, %44, %cst_54 [2] : vector<8x16x32xf32> to vector<8x16xf32>
    %c0_55 = arith.constant 0 : index
    %c1_56 = arith.constant 1 : index
    %46 = vector.load %arg10[%c0_55, %c1_56] : memref<8x16xf32, #tpu.memory_space<vmem>>, vector<8x15xf32>
    %47 = vector.extract_strided_slice %45 {offsets = [0, 0], sizes = [8, 15], strides = [1, 1]} : vector<8x16xf32> to vector<8x15xf32>
    %48 = arith.addf %46, %47 : vector<8x15xf32>
    %c0_57 = arith.constant 0 : index
    %c1_58 = arith.constant 1 : index
    %49 = vector.load %arg10[%c0_57, %c1_58] : memref<8x16xf32, #tpu.memory_space<vmem>>, vector<8x15xf32>
    tpu.vector_store %arg10[%c0_57, %c1_58], %48 {strides = array<i32>} : memref<8x16xf32, #tpu.memory_space<vmem>>, vector<8x15xf32>,
    %c1_59 = arith.constant 1 : index
    %c1_60 = arith.constant 1 : index
    %c0_61 = arith.constant 0 : index
    %50 = vector.load %arg5[%c1_59, %c1_60, %c0_61] : memref<3x3x32xf32, #tpu.memory_space<vmem>>, vector<1x1x32xf32>
    %51 = vector.broadcast %50 : vector<1x1x32xf32> to vector<8x16x32xf32>
    %52 = arith.mulf %41, %51 : vector<8x16x32xf32>
    %cst_62 = arith.constant dense<0.000000e+00> : vector<8x16xf32>
    %53 = vector.multi_reduction <add>, %52, %cst_62 [2] : vector<8x16x32xf32> to vector<8x16xf32>
    %c0_63 = arith.constant 0 : index
    %c0_64 = arith.constant 0 : index
    %54 = vector.load %arg10[%c0_63, %c0_64] : memref<8x16xf32, #tpu.memory_space<vmem>>, vector<8x16xf32>
    %55 = arith.addf %54, %53 : vector<8x16xf32>
    %c0_65 = arith.constant 0 : index
    %c0_66 = arith.constant 0 : index
    %56 = vector.load %arg10[%c0_65, %c0_66] : memref<8x16xf32, #tpu.memory_space<vmem>>, vector<8x16xf32>
    tpu.vector_store %arg10[%c0_65, %c0_66], %55 {strides = array<i32>} : memref<8x16xf32, #tpu.memory_space<vmem>>, vector<8x16xf32>,
    %c1_67 = arith.constant 1 : index
    %c2_68 = arith.constant 2 : index
    %c0_69 = arith.constant 0 : index
    %57 = vector.load %arg5[%c1_67, %c2_68, %c0_69] : memref<3x3x32xf32, #tpu.memory_space<vmem>>, vector<1x1x32xf32>
    %58 = vector.broadcast %57 : vector<1x1x32xf32> to vector<8x16x32xf32>
    %59 = arith.mulf %41, %58 : vector<8x16x32xf32>
    %cst_70 = arith.constant dense<0.000000e+00> : vector<8x16xf32>
    %60 = vector.multi_reduction <add>, %59, %cst_70 [2] : vector<8x16x32xf32> to vector<8x16xf32>
    %c0_71 = arith.constant 0 : index
    %c0_72 = arith.constant 0 : index
    %61 = vector.load %arg10[%c0_71, %c0_72] : memref<8x16xf32, #tpu.memory_space<vmem>>, vector<8x15xf32>
    %62 = vector.extract_strided_slice %60 {offsets = [0, 1], sizes = [8, 15], strides = [1, 1]} : vector<8x16xf32> to vector<8x15xf32>
    %63 = arith.addf %61, %62 : vector<8x15xf32>
    %c0_73 = arith.constant 0 : index
    %c0_74 = arith.constant 0 : index
    %64 = vector.load %arg10[%c0_73, %c0_74] : memref<8x16xf32, #tpu.memory_space<vmem>>, vector<8x15xf32>
    tpu.vector_store %arg10[%c0_73, %c0_74], %63 {strides = array<i32>} : memref<8x16xf32, #tpu.memory_space<vmem>>, vector<8x15xf32>,
    %c2_75 = arith.constant 2 : index
    %c0_76 = arith.constant 0 : index
    %c0_77 = arith.constant 0 : index
    %65 = vector.load %arg9[%c2_75, %c0_76, %c0_77] : memref<10x16x32xf32, #tpu.memory_space<vmem>>, vector<8x16x32xf32>
    %c2_78 = arith.constant 2 : index
    %c0_79 = arith.constant 0 : index
    %c0_80 = arith.constant 0 : index
    %66 = vector.load %arg5[%c2_78, %c0_79, %c0_80] : memref<3x3x32xf32, #tpu.memory_space<vmem>>, vector<1x1x32xf32>
    %67 = vector.broadcast %66 : vector<1x1x32xf32> to vector<8x16x32xf32>
    %68 = arith.mulf %65, %67 : vector<8x16x32xf32>
    %cst_81 = arith.constant dense<0.000000e+00> : vector<8x16xf32>
    %69 = vector.multi_reduction <add>, %68, %cst_81 [2] : vector<8x16x32xf32> to vector<8x16xf32>
    %c0_82 = arith.constant 0 : index
    %c1_83 = arith.constant 1 : index
    %70 = vector.load %arg10[%c0_82, %c1_83] : memref<8x16xf32, #tpu.memory_space<vmem>>, vector<8x15xf32>
    %71 = vector.extract_strided_slice %69 {offsets = [0, 0], sizes = [8, 15], strides = [1, 1]} : vector<8x16xf32> to vector<8x15xf32>
    %72 = arith.addf %70, %71 : vector<8x15xf32>
    %c0_84 = arith.constant 0 : index
    %c1_85 = arith.constant 1 : index
    %73 = vector.load %arg10[%c0_84, %c1_85] : memref<8x16xf32, #tpu.memory_space<vmem>>, vector<8x15xf32>
    tpu.vector_store %arg10[%c0_84, %c1_85], %72 {strides = array<i32>} : memref<8x16xf32, #tpu.memory_space<vmem>>, vector<8x15xf32>,
    %c2_86 = arith.constant 2 : index
    %c1_87 = arith.constant 1 : index
    %c0_88 = arith.constant 0 : index
    %74 = vector.load %arg5[%c2_86, %c1_87, %c0_88] : memref<3x3x32xf32, #tpu.memory_space<vmem>>, vector<1x1x32xf32>
    %75 = vector.broadcast %74 : vector<1x1x32xf32> to vector<8x16x32xf32>
    %76 = arith.mulf %65, %75 : vector<8x16x32xf32>
    %cst_89 = arith.constant dense<0.000000e+00> : vector<8x16xf32>
    %77 = vector.multi_reduction <add>, %76, %cst_89 [2] : vector<8x16x32xf32> to vector<8x16xf32>
    %c0_90 = arith.constant 0 : index
    %c0_91 = arith.constant 0 : index
    %78 = vector.load %arg10[%c0_90, %c0_91] : memref<8x16xf32, #tpu.memory_space<vmem>>, vector<8x16xf32>
    %79 = arith.addf %78, %77 : vector<8x16xf32>
    %c0_92 = arith.constant 0 : index
    %c0_93 = arith.constant 0 : index
    %80 = vector.load %arg10[%c0_92, %c0_93] : memref<8x16xf32, #tpu.memory_space<vmem>>, vector<8x16xf32>
    tpu.vector_store %arg10[%c0_92, %c0_93], %79 {strides = array<i32>} : memref<8x16xf32, #tpu.memory_space<vmem>>, vector<8x16xf32>,
    %c2_94 = arith.constant 2 : index
    %c2_95 = arith.constant 2 : index
    %c0_96 = arith.constant 0 : index
    %81 = vector.load %arg5[%c2_94, %c2_95, %c0_96] : memref<3x3x32xf32, #tpu.memory_space<vmem>>, vector<1x1x32xf32>
    %82 = vector.broadcast %81 : vector<1x1x32xf32> to vector<8x16x32xf32>
    %83 = arith.mulf %65, %82 : vector<8x16x32xf32>
    %cst_97 = arith.constant dense<0.000000e+00> : vector<8x16xf32>
    %84 = vector.multi_reduction <add>, %83, %cst_97 [2] : vector<8x16x32xf32> to vector<8x16xf32>
    %c0_98 = arith.constant 0 : index
    %c0_99 = arith.constant 0 : index
    %85 = vector.load %arg10[%c0_98, %c0_99] : memref<8x16xf32, #tpu.memory_space<vmem>>, vector<8x15xf32>
    %86 = vector.extract_strided_slice %84 {offsets = [0, 1], sizes = [8, 15], strides = [1, 1]} : vector<8x16xf32> to vector<8x15xf32>
    %87 = arith.addf %85, %86 : vector<8x15xf32>
    %c0_100 = arith.constant 0 : index
    %c0_101 = arith.constant 0 : index
    %88 = vector.load %arg10[%c0_100, %c0_101] : memref<8x16xf32, #tpu.memory_space<vmem>>, vector<8x15xf32>
    tpu.vector_store %arg10[%c0_100, %c0_101], %87 {strides = array<i32>} : memref<8x16xf32, #tpu.memory_space<vmem>>, vector<8x15xf32>,
    %c0_102 = arith.constant 0 : index
    %c0_103 = arith.constant 0 : index
    %89 = vector.load %arg10[%c0_102, %c0_103] : memref<8x16xf32, #tpu.memory_space<vmem>>, vector<8x16xf32>
    %c0_104 = arith.constant 0 : index
    %c0_105 = arith.constant 0 : index
    %90 = vector.load %arg6[%c0_104, %c0_105] : memref<1x1xf32, #tpu.memory_space<vmem>>, vector<1x1xf32>
    %91 = vector.broadcast %90 : vector<1x1xf32> to vector<8x16xf32>
    %92 = arith.addf %89, %91 : vector<8x16xf32>
    %c0_106 = arith.constant 0 : index
    %c0_107 = arith.constant 0 : index
    %c0_108 = arith.constant 0 : index
    %93 = vector.load %arg7[%c0_106, %c0_107, %c0_108] : memref<1x8x16xf32, #tpu.memory_space<vmem>>, vector<1x8x16xf32>
    %94 = vector.shape_cast %93 : vector<1x8x16xf32> to vector<8x16xf32>
    %95 = arith.addf %92, %94 : vector<8x16xf32>
    %c0_109 = arith.constant 0 : index
    %c0_110 = arith.constant 0 : index
    %c0_111 = arith.constant 0 : index
    %96 = vector.load %arg8[%c0_109, %c0_110, %c0_111] : memref<1x8x16xf32, #tpu.memory_space<vmem>>, vector<1x8x16xf32>
    %97 = vector.shape_cast %96 : vector<1x8x16xf32> to vector<8x16xf32>
    %98 = vector.shape_cast %95 : vector<8x16xf32> to vector<1x8x16xf32>
    tpu.vector_store %arg8[%c0_109, %c0_110, %c0_111], %98 {strides = array<i32>} : memref<1x8x16xf32, #tpu.memory_space<vmem>>, vector<1x8x16xf32>,
    return
  }
  func.func @transform_0(%arg0: i32, %arg1: i32) -> (i32, i32, i32, i32) {
    %c0_i32 = arith.constant 0 : i32
    %c0_i32_0 = arith.constant 0 : i32
    %c0_i32_1 = arith.constant 0 : i32
    return %arg0, %arg1, %c0_i32, %c0_i32_0 : i32, i32, i32, i32
  }
  func.func @transform_1(%arg0: i32, %arg1: i32) -> (i32, i32, i32, i32) {
    %c8_i32 = arith.constant 8 : i32
    %0 = arith.muli %arg1, %c8_i32 : i32
    %c1_i32 = arith.constant 1 : i32
    %1 = arith.subi %0, %c1_i32 : i32
    %c0_i32 = arith.constant 0 : i32
    %2 = arith.maxsi %1, %c0_i32 : i32
    %c0_i32_0 = arith.constant 0 : i32
    %c0_i32_1 = arith.constant 0 : i32
    %c0_i32_2 = arith.constant 0 : i32
    return %arg0, %2, %c0_i32_0, %c0_i32_1 : i32, i32, i32, i32
  }
  func.func @transform_2(%arg0: i32, %arg1: i32) -> (i32, i32, i32, i32) {
    %c8_i32 = arith.constant 8 : i32
    %0 = arith.muli %arg1, %c8_i32 : i32
    %c8_i32_0 = arith.constant 8 : i32
    %1 = arith.addi %0, %c8_i32_0 : i32
    %c15_i32 = arith.constant 15 : i32
    %2 = arith.minsi %1, %c15_i32 : i32
    %c0_i32 = arith.constant 0 : i32
    %c0_i32_1 = arith.constant 0 : i32
    %c0_i32_2 = arith.constant 0 : i32
    return %arg0, %2, %c0_i32, %c0_i32_1 : i32, i32, i32, i32
  }
  func.func @transform_3(%arg0: i32, %arg1: i32) -> (i32, i32, i32) {
    %c0_i32 = arith.constant 0 : i32
    %c0_i32_0 = arith.constant 0 : i32
    %c0_i32_1 = arith.constant 0 : i32
    %c0_i32_2 = arith.constant 0 : i32
    return %c0_i32, %c0_i32_0, %c0_i32_1 : i32, i32, i32
  }
  func.func @transform_4(%arg0: i32, %arg1: i32) -> (i32, i32) {
    %c0_i32 = arith.constant 0 : i32
    %c0_i32_0 = arith.constant 0 : i32
    %c0_i32_1 = arith.constant 0 : i32
    return %c0_i32, %c0_i32_0 : i32, i32
  }
  func.func @transform_5(%arg0: i32, %arg1: i32) -> (i32, i32, i32) {
    %c0_i32 = arith.constant 0 : i32
    %c0_i32_0 = arith.constant 0 : i32
    return %arg0, %arg1, %c0_i32 : i32, i32, i32
  }
  func.func @transform_6(%arg0: i32, %arg1: i32) -> (i32, i32, i32) {
    %c0_i32 = arith.constant 0 : i32
    %c0_i32_0 = arith.constant 0 : i32
    return %arg0, %arg1, %c0_i32 : i32, i32, i32
  }
}

</mosaic_0001>

<bundles_post_ra>
// kernel: drrn_forward_pallas.7
= control target key start
LH: loop header
LB: loop body
LE: loop exit
PB: predicated region body
PF: predicated region fallthrough
CT: control target
= control target key end

     0   :  { %s3535_s0 = inlined_call_operand.vmem [shape: f32[2,16,16,32], index: 0, kind: input, shape index: {}, may-alias: {0,1,2}]   ;;  %s3536_s1 = inlined_call_operand.vmem [shape: f32[2,16,16,32], index: 1, kind: input, shape index: {}, may-alias: {0,1,2}]   ;;  %s3537_s2 = inlined_call_operand.vmem [shape: f32[2,16,16,32], index: 2, kind: input, shape index: {}, may-alias: {0,1,2}]   ;;  %s3538_s3 = inlined_call_operand.vmem [shape: f32[3,3,32], index: 3, kind: input, shape index: {}]   ;;  %s3539_s4 = inlined_call_operand.<no memory space> [shape: f32[1,1], index: 4, kind: input, shape index: {}]   ;;  %s3540_s5 = inlined_call_operand.vmem [shape: f32[2,16,16], index: 5, kind: input, shape index: {}]   ;;  %s3541_s6 = inlined_call_operand.hbm [shape: f32[2,16,16], index: 6, kind: output, shape index: {}]  }
   0x1   :  { %3545 = sst [smem:[#allocation10_spill]] %s3535_s0  ;;  %v11_v0 = vstv %s3539_s4 }
   0x2   :  { %3546 = sst [smem:[#allocation11_spill]] %s3540_s5  ;;  %12 = vst [vmem:[#allocation4] sm:$0x1] %v11_v0 }
   0x3   :  { %13 = vsyncpa [#allocation6], 0 }
   0x4   :  { %15 = vsyncpa [#allocation6 + $0x1], 0  ;;  %s2538_s23 = smov 0   ;;  %s2540_s24 = smov 0  }
   0x5   :  { %s2542_s25 = smov 0   ;;  %s2544_s26 = smov 0  }
   0x6   :  { %s2546_s27 = smov 0   ;;  %s2548_s28 = smov 0  }
   0x7   :  { %s2550_s29 = smov 0   ;;  %s2552_s30 = smov 0  }
   0x8 LB: > { %s2251_s4 = sadd.s32 4294967295, %s2493_s30   ;;  %s2252_s7 = sadd.s32 4294967294, %s2493_s30   ;;  %s2493_s30 = sphi %s2552_s30, %s21_s30   ;;  %s2489_s29 = sphi %s2550_s29, %s3563_s29   ;;  %s2485_s28 = sphi %s2548_s28, %s3562_s28   ;;  %s2481_s27 = sphi %s2546_s27, %s3561_s27   ;;  %s2477_s26 = sphi %s2544_s26, %s3560_s26   ;;  %s2473_s25 = sphi %s2542_s25, %s3559_s25   ;;  %s2469_s24 = sphi %s2540_s24, %s3558_s24   ;;  %s2465_s23 = sphi %s2538_s23, %s3557_s23  }
   0x9   : > { %s30_s8 = sadd.s32 1, %s2485_s28  ;;  %s33_s9 = sadd.s32 1, %s2489_s29 }
   0xa   : > { %p31_p0 = scmp.ge.s32.totalorder %s30_s8, 2  ;;  %p222_p1 = scmp.ne.s32.totalorder %s2473_s25, %s2469_s24 }
   0xb   : > { %p223_p2 = scmp.eq.s32.totalorder %s2251_s4, 3  ;;  %p228_p5 = scmp.ne.s32.totalorder %s2469_s24, %s2465_s23 }
   0xc   : > { %s3565_s8 = smov (%p31_p0, %s30_s8), 0  ;;  %s3567_s9 = smov (!%p31_p0, %s33_s9), %s2489_s29 }
   0xd   : > { %3547 = sst [smem:[#allocation8_spill]] %s3565_s8  ;;  %s208_s10 = ssub.s32 %s2485_s28, %s3565_s8 }
   0xe   : > { %p2589_p3 = por %p223_p2, %p222_p1  ;;  %p35_p4 = scmp.ge.s32.totalorder %s3567_s9, 2 }
   0xf   : > { %p229_p6 = scmp.eq.s32.totalorder %s2252_s7, 3  ;;  %p2261_p7 = scmp.ge.s32.totalorder %s2493_s30, 1 }
  0x10   : > { %s3569_s9 = smov (%p35_p4, %s3567_s9), 0  ;;  %p318_p9 = scmp.lt.s32.totalorder %s2493_s30, 5 }
  0x11   : > { %3549 = sst [smem:[#allocation9_spill]] %s3569_s9  ;;  %p2598_p8 = por %p229_p6, %p228_p5 }
  0x12   : > { %s207_s13 = ssub.s32 %s2489_s29, %s3569_s9  ;;  %s212_s14 = sadd.s32 1, %s2473_s25 }
  0x13   : > { %s209_s15 = sor.u32 %s208_s10, %s207_s13  ;;  %p319_p10 = pnand %p2261_p7, %p318_p9 }
  0x14   : > { %p210_p11 = scmp.eq.s32.totalorder %s209_s15, 0  ;;  %s3542_s17 = sand.u32 (!%p319_p10), 1, %s2469_s24   ;;  %vm457_vm0 = vcmask (!%p319_p10), 261120  }
  0x15   : > { %322 = sbr.rel (%p319_p10) target bundleno = 520 (0x208), region = 44  ;;  %s2611_s18 = sshll.u32 (!%p319_p10), %s2477_s26, 3 }
  0x16   : > { %s2607_s16 = scalar_select %p210_p11, %s2473_s25, %s212_s14  }
  0x17   : > { %s2615_s19 = sshll.u32 (!%p319_p10), %s3542_s17, 3  ;;  %p388_p12 = scmp.lt.s32.totalorder (!%p319_p10), %s2481_s27, 1 }
  0x18   : > { %p390_p13 = scmp.lt.s32.totalorder (!%p319_p10), %s2611_s18, 15  ;;  %p434_p0 = scmp.lt.s32.totalorder (!%p319_p10), %s2477_s26, 1 }
  0x19   : > { %s2626_s13 = sadd.s32 (!%p319_p10), 4294967295, %s2611_s18  ;;  %s3551_s0 = sld [smem:[#allocation10_spill]] (!%p319_p10) }
  0x1a   : > { %p400_p1 = scmp.gt.s32.totalorder (!%p319_p10), %s2626_s13, 0  ;;  %p2269_p2 = scmp.lt.s32.totalorder (!%p319_p10), %s2626_s13, 15 }
  0x1b   : > { %s3553_s5 = sld [smem:[#allocation11_spill]] (!%p319_p10)  ;;  %p2286_p5 = scmp.ne.s32.totalorder (!%p319_p10), %s2477_s26, 0 }
  0x1c   : > { %s389_s20 = scalar_select %p388_p12, %s2481_s27, 1 }
  0x1d   : > { %s391_s21 = scalar_select %p390_p13, %s2611_s18, 15 }
  0x1e   : > { %s2621_s22 = sshll.u32 %s389_s20, 5  ;;  %s2284_s7 = sshll.u32 %s389_s20, 1  ;;  %v2495_v21 = vmov (!%p2286_p5), 0.0  }
  0x1f   : > { %s2264_s4 = sshll.u32 %s391_s21, 1 }
  0x20   : > { %s394_s10 = sadd.s32 %s2621_s22, %s2264_s4  ;;  %s416_s4 = sadd.s32 8, %s2611_s18 }
  0x21   : > { %s2266_s14 = sshll.u32 %s394_s10, 3  ;;  %p2659_p4 = scmp.lt.s32.totalorder %s416_s4, 15 }
  0x22   : > { %s2632_s9 = scalar_lea.vmem %s3551_s0, %s2266_s14 }
  0x23   : > { %s435_s20 = scalar_select %p434_p0, %s2477_s26, 1  ;;  %v440_v1 = vld [vmem:[%s2632_s9] sm:$0xff]  ;;  %v441_v2 = vld [vmem:[%s2632_s9 + $0x8] sm:$0xff]  ;;  %v442_v3 = vld [vmem:[%s2632_s9 + $0x10] sm:$0xff] }
  0x24   : > { %458 = vst.msk [vmem:[#allocation2 + $0x10] sm:$0xff] %vm457_vm0, %v440_v1  ;;  %459 = vst.msk [vmem:[#allocation2 + $0x18] sm:$0xff] %vm457_vm0, %v441_v2  ;;  %v443_v4 = vld [vmem:[%s2632_s9 + $0x18] sm:$0xff]  ;;  %v444_v5 = vld [vmem:[%s2632_s9 + $0x20] sm:$0xff]  ;;  %s401_s17 = scalar_select %p400_p1, %s2626_s13, 0 }
  0x25   : > { %460 = vst.msk [vmem:[#allocation2 + $0x20] sm:$0xff] %vm457_vm0, %v442_v3  ;;  %v445_v6 = vld [vmem:[%s2632_s9 + $0x28] sm:$0xff]  ;;  %s437_s21 = sadd.s32 %s2284_s7, %s435_s20  ;;  %461 = vst.msk [vmem:[#allocation2 + $0x28] sm:$0xff] %vm457_vm0, %v443_v4  ;;  %v446_v7 = vld [vmem:[%s2632_s9 + $0x30] sm:$0xff]  ;;  %s3573_s4 = smov (!%p2659_p4, %s416_s4), 15 }
  0x26   : > { %462 = vst.msk [vmem:[#allocation2 + $0x30] sm:$0xff] %vm457_vm0, %v444_v5  ;;  %463 = vst.msk [vmem:[#allocation2 + $0x38] sm:$0xff] %vm457_vm0, %v445_v6  ;;  %v447_v8 = vld [vmem:[%s2632_s9 + $0x38] sm:$0xff]  ;;  %v448_v9 = vld [vmem:[%s2632_s9 + $0x40] sm:$0xff]  ;;  %s2285_s10 = sshll.u32 %s437_s21, 3  ;;  %s3571_s17 = smov (!%p2269_p2, %s401_s17), 15 }
  0x27   : > { %464 = vst.msk [vmem:[#allocation2 + $0x40] sm:$0xff] %vm457_vm0, %v446_v7  ;;  %465 = vst.msk [vmem:[#allocation2 + $0x48] sm:$0xff] %vm457_vm0, %v447_v8  ;;  %v449_v10 = vld [vmem:[%s2632_s9 + $0x48] sm:$0xff]  ;;  %v450_v11 = vld [vmem:[%s2632_s9 + $0x50] sm:$0xff]  ;;  %s2666_s18 = scalar_lea.vmem %s3553_s5, %s2285_s10  ;;  %s2274_s20 = sshll.u32 %s3571_s17, 1 }
  0x28   : > { %466 = vst.msk [vmem:[#allocation2 + $0x50] sm:$0xff] %vm457_vm0, %v448_v9  ;;  %v451_v12 = vld [vmem:[%s2632_s9 + $0x58] sm:$0xff]  ;;  %467 = vst.msk [vmem:[#allocation2 + $0x58] sm:$0xff] %vm457_vm0, %v449_v10  ;;  %v452_v13 = vld [vmem:[%s2632_s9 + $0x60] sm:$0xff]  ;;  %s408_s21 = sadd.s32 %s2274_s20, %s2621_s22  ;;  %s3575_s4 = smov (!%p2659_p4, %s3573_s4), 15 }
  0x29   : > { %468 = vst.msk [vmem:[#allocation2 + $0x60] sm:$0xff] %vm457_vm0, %v450_v11  ;;  %469 = vst.msk [vmem:[#allocation2 + $0x68] sm:$0xff] %vm457_vm0, %v451_v12  ;;  %v453_v14 = vld [vmem:[%s2632_s9 + $0x68] sm:$0xff]  ;;  %v454_v15 = vld [vmem:[%s2632_s9 + $0x70] sm:$0xff]  ;;  %s2276_s10 = sshll.u32 %s408_s21, 3  ;;  %486 = sbr.rel (%p2286_p5) target bundleno = 48 (0x30), region = 48 }
  0x2a   : > { %470 = vst.msk [vmem:[#allocation2 + $0x70] sm:$0xff] %vm457_vm0, %v452_v13  ;;  %471 = vst.msk [vmem:[#allocation2 + $0x78] sm:$0xff] %vm457_vm0, %v453_v14  ;;  %v455_v16 = vld [vmem:[%s2632_s9 + $0x78] sm:$0xff]  ;;  %s410_s0 = scalar_lea.vmem %s3536_s1, %s2276_s10  ;;  %s2281_s9 = sshll.u32 %s3575_s4, 1 }
  0x2b   : > { %472 = vst.msk [vmem:[#allocation2 + $0x80] sm:$0xff] %vm457_vm0, %v454_v15  ;;  %473 = vst.msk [vmem:[#allocation2 + $0x88] sm:$0xff] %vm457_vm0, %v455_v16  ;;  %v474_v17 = vld [vmem:[%s410_s0] sm:$0xff]  ;;  %v475_v18 = vld [vmem:[%s410_s0 + $0x8] sm:$0xff]  ;;  %s425_s13 = sadd.s32 %s2281_s9, %s2621_s22  ;;  %s386_s0 = scalar_lea.vmem [#allocation5], %s2615_s19 }
  0x2c   : > { %476 = vst.msk [vmem:[#allocation2] sm:$0xff] %vm457_vm0, %v474_v17  ;;  %477 = vst.msk [vmem:[#allocation2 + $0x8] sm:$0xff] %vm457_vm0, %v475_v18  ;;  %s2283_s5 = sshll.u32 %s425_s13, 3 }
  0x2d   : > { %s427_s20 = scalar_lea.vmem %s3537_s2, %s2283_s5  ;;  %487 = vst.msk [vmem:[#allocation2] sm:$0xff] (!%p2286_p5), %vm457_vm0, %v2495_v21  ;;  %488 = vst.msk [vmem:[#allocation2 + $0x8] sm:$0xff] (!%p2286_p5), %vm457_vm0, %v2495_v21 }
  0x2e   : > { %v478_v19 = vld [vmem:[%s427_s20] sm:$0xff]  ;;  %v479_v20 = vld [vmem:[%s427_s20 + $0x8] sm:$0xff] }
  0x2f   : > { %481 = vst.msk [vmem:[#allocation2 + $0x90] sm:$0xff] %vm457_vm0, %v478_v19  ;;  %482 = vst.msk [vmem:[#allocation2 + $0x98] sm:$0xff] %vm457_vm0, %v479_v20 }
  0x30 PF: > { %p2287_p6 = scmp.ne.s32.totalorder %s2477_s26, 1 }
  0x31   : > { %v2496_v22 = vmov (!%p2287_p6), 0.0  }
  0x32   : > { %492 = sbr.rel (%p2287_p6) target bundleno = 57 (0x39), region = 52  ;;  %493 = vst.msk [vmem:[#allocation2 + $0x90] sm:$0xff] (!%p2287_p6), %vm457_vm0, %v2496_v22  ;;  %494 = vst.msk [vmem:[#allocation2 + $0x98] sm:$0xff] (!%p2287_p6), %vm457_vm0, %v2496_v22 }
  0x39 PF: > { %v2704_v23 = vld [vmem:[#allocation2 + $0x10] sm:$0xff]  ;;  %v2288_v24 = vld [vmem:[%s3538_s3] ss:$0 sm:$0xff]  ;;  %v2713_v28 = vld [vmem:[#allocation2 + $0x18] sm:$0xff]  ;;  %vm495_vm1 = vcmask 130048   ;;  %vm611_vm2 = vcmask 138312  }
  0x3a   : > { %v2709_v25 = vld [vmem:[#allocation2] sm:$0xff]  ;;  %v520_v26 = vmul.f32 %v2288_v24, %v2704_v23  ;;  %v2715_v29 = vld [vmem:[#allocation2 + $0x8] sm:$0xff]  ;;  %v521_v30 = vmul.f32 %v2288_v24, %v2713_v28  ;;  %v2729_v40 = vld [vmem:[#allocation2 + $0x38] sm:$0xff]  ;;  %vm676_vm3 = vcmask 1041409   ;;  %vm678_vm4 = vcmask 1042434   ;;  %s2305_s21 = sshll.u32 %s2481_s27, 1 }
  0x3b   : > { %v518_v27 = vmul.f32 %v2288_v24, %v2709_v25  ;;  %v519_v31 = vmul.f32 %v2288_v24, %v2715_v29  ;;  %v2719_v32 = vld [vmem:[#allocation2 + $0x28] sm:$0xff]  ;;  %v2721_v33 = vld [vmem:[#allocation2 + $0x20] sm:$0xff]  ;;  %v2731_v41 = vld [vmem:[#allocation2 + $0x30] sm:$0xff]  ;;  %v525_v44 = vmul.f32 %v2288_v24, %v2729_v40  ;;  %vm680_vm5 = vcmask 1043459   ;;  %s2106_s10 = sadd.s32 %s2477_s26, %s2305_s21  ;;  %s2110_s15 = sshll.u32 %s386_s0, 4  ;;  %s3479_s15 = int_to_ptr.vmem [resolvable:$true] %s2110_s15 }
  0x3c   : > { %v540_v34 = vsel %vm457_vm0, %v520_v26, 0.0  ;;  %v543_v36 = vsel %vm457_vm0, %v521_v30, 0.0  ;;  %v523_v38 = vmul.f32 %v2288_v24, %v2719_v32  ;;  %v522_v39 = vmul.f32 %v2288_v24, %v2721_v33  ;;  %v2737_v46 = vld [vmem:[#allocation2 + $0x48] sm:$0xff]  ;;  %v2739_v47 = vld [vmem:[#allocation2 + $0x40] sm:$0xff]  ;;  %v2745_v52 = vld [vmem:[#allocation2 + $0x58] sm:$0xff]  ;;  %s2306_s14 = sshll.u32 %s2106_s10, 7 }
  0x3d   : > { %v534_v35 = vsel %vm457_vm0, %v518_v27, 0.0  ;;  %541 = vadd.xlane.f32.xlu1 %v540_v34  ;;  %v537_v37 = vsel %vm457_vm0, %v519_v31, 0.0  ;;  %v524_v45 = vmul.f32 %v2288_v24, %v2731_v41  ;;  %v555_v48 = vsel %vm457_vm0, %v525_v44, 0.0  ;;  %v2747_v53 = vld [vmem:[#allocation2 + $0x50] sm:$0xff]  ;;  %v2753_v58 = vld [vmem:[#allocation2 + $0x68] sm:$0xff]  ;;  %v2755_v59 = vld [vmem:[#allocation2 + $0x60] sm:$0xff]  ;;  %s3477_s17 = scalar_lea.hbm %s3541_s6, %s2306_s14 }
  0x3e   : > { %535 = vadd.xlane.f32.xlu0 %v534_v35  ;;  %v549_v42 = vsel %vm457_vm0, %v523_v38, 0.0  ;;  %v546_v43 = vsel %vm457_vm0, %v522_v39, 0.0  ;;  %v527_v50 = vmul.f32 %v2288_v24, %v2737_v46  ;;  %v526_v51 = vmul.f32 %v2288_v24, %v2739_v47  ;;  %v2761_v0 = vld [vmem:[#allocation2 + $0x78] sm:$0xff]  ;;  %v2763_v1 = vld [vmem:[#allocation2 + $0x70] sm:$0xff]  ;;  %v2289_v6 = vld [vmem:[%s3538_s3 + $0x1] ss:$0 sm:$0xff] }
  0x3f   : > { %v552_v49 = vsel %vm457_vm0, %v524_v45, 0.0  ;;  %v529_v56 = vmul.f32 %v2288_v24, %v2745_v52  ;;  %v528_v57 = vmul.f32 %v2288_v24, %v2747_v53  ;;  %v531_v62 = vmul.f32 %v2288_v24, %v2753_v58  ;;  %s3554_s26 = sand.u32 1, %s2469_s24   ;;  %s2499_s20 = smov [#allocation5]  }
  0x40   : > { %v561_v54 = vsel %vm457_vm0, %v527_v50, 0.0  ;;  %v558_v55 = vsel %vm457_vm0, %v526_v51, 0.0  ;;  %v530_v63 = vmul.f32 %v2288_v24, %v2755_v59  ;;  %v533_v4 = vmul.f32 %v2288_v24, %v2761_v0  ;;  %v2290_v50 = vld [vmem:[%s3538_s3 + $0x2] ss:$0 sm:$0xff]  ;;  %s2095_s27 = scalar_lea.sflag [#allocation6], %s3554_s26  ;;  %s2403_s5 = sshll.u32 %s2499_s20, 4  ;;  %s2404_s5 = int_to_ptr.vmem [resolvable:$false] %s2403_s5 }
  0x41   : > { %544 = vadd.xlane.f32.xlu1 %v543_v36  ;;  %v567_v60 = vsel %vm457_vm0, %v529_v56, 0.0  ;;  %v564_v61 = vsel %vm457_vm0, %v528_v57, 0.0  ;;  %v573_v2 = vsel %vm457_vm0, %v531_v62, 0.0  ;;  %v532_v5 = vmul.f32 %v2288_v24, %v2763_v1  ;;  %s2405_s8 = scalar_lea.vmem %s2404_s5, 256  ;;  %p2406_p11 = scmp.lt.s32.totalorder %s3479_s15, %s2404_s5 }
  0x42   : > { %538 = vadd.xlane.f32.xlu0 %v537_v37  ;;  %v570_v3 = vsel %vm457_vm0, %v530_v63, 0.0  ;;  %v579_v7 = vsel %vm457_vm0, %v533_v4, 0.0  ;;  %v700_v9 = vmul.f32 %v2289_v6, %v2715_v29  ;;  %v699_v10 = vmul.f32 %v2289_v6, %v2709_v25 }
  0x43   : > { %v576_v8 = vsel %vm457_vm0, %v532_v5, 0.0  ;;  %v702_v13 = vmul.f32 %v2289_v6, %v2713_v28  ;;  %v701_v14 = vmul.f32 %v2289_v6, %v2704_v23  ;;  %v704_v17 = vmul.f32 %v2289_v6, %v2719_v32 }
  0x44   : > { %v718_v11 = vsel %vm457_vm0, %v700_v9, 0.0  ;;  %v715_v12 = vsel %vm457_vm0, %v699_v10, 0.0  ;;  %v703_v18 = vmul.f32 %v2289_v6, %v2721_v33  ;;  %v706_v21 = vmul.f32 %v2289_v6, %v2729_v40 }
  0x45   : > { %550 = vadd.xlane.f32.xlu1 %v549_v42  ;;  %v724_v15 = vsel %vm457_vm0, %v702_v13, 0.0  ;;  %v721_v16 = vsel %vm457_vm0, %v701_v14, 0.0  ;;  %v730_v19 = vsel %vm457_vm0, %v704_v17, 0.0  ;;  %v705_v22 = vmul.f32 %v2289_v6, %v2731_v41 }
  0x46   : > { %547 = vadd.xlane.f32.xlu0 %v546_v43  ;;  %v727_v20 = vsel %vm457_vm0, %v703_v18, 0.0  ;;  %v736_v24 = vsel %vm457_vm0, %v706_v21, 0.0  ;;  %v708_v27 = vmul.f32 %v2289_v6, %v2737_v46  ;;  %v707_v30 = vmul.f32 %v2289_v6, %v2739_v47 }
  0x47   : > { %v733_v26 = vsel %vm457_vm0, %v705_v22, 0.0  ;;  %v710_v35 = vmul.f32 %v2289_v6, %v2745_v52  ;;  %v709_v36 = vmul.f32 %v2289_v6, %v2747_v53  ;;  %v2497_v37 = vmov 0.0  }
  0x48   : > { %v742_v31 = vsel %vm457_vm0, %v708_v27, 0.0  ;;  %v739_v34 = vsel %vm457_vm0, %v707_v30, 0.0  ;;  %496 = vst.msk [vmem:[#allocation3] sm:$0xff] %vm495_vm1, %v2497_v37  ;;  %v712_v42 = vmul.f32 %v2289_v6, %v2753_v58  ;;  %v711_v43 = vmul.f32 %v2289_v6, %v2755_v59 }
  0x49   : > { %556 = vadd.xlane.f32.xlu1 %v555_v48  ;;  %v748_v38 = vsel %vm457_vm0, %v710_v35, 0.0  ;;  %v745_v39 = vsel %vm457_vm0, %v709_v36, 0.0  ;;  %v714_v48 = vmul.f32 %v2289_v6, %v2761_v0  ;;  %v869_v56 = vmul.f32 %v2290_v50, %v2709_v25  ;;  %v2292_v36 = vld [vmem:[%s3538_s3 + $0x4] ss:$0 sm:$0xff] }
  0x4a   : > { %553 = vadd.xlane.f32.xlu0 %v552_v49  ;;  %v754_v44 = vsel %vm457_vm0, %v712_v42, 0.0  ;;  %v751_v45 = vsel %vm457_vm0, %v711_v43, 0.0  ;;  %v713_v49 = vmul.f32 %v2289_v6, %v2763_v1  ;;  %v871_v62 = vmul.f32 %v2290_v50, %v2704_v23 }
  0x4b   : > { %v760_v51 = vsel %vm457_vm0, %v714_v48, 0.0  ;;  %v873_v25 = vmul.f32 %v2290_v50, %v2721_v33  ;;  %v876_v6 = vmul.f32 %v2290_v50, %v2729_v40  ;;  %v879_v21 = vmul.f32 %v2290_v50, %v2747_v53 }
  0x4c   : > { %v881_v27 = vmul.f32 %v2290_v50, %v2755_v59  ;;  %v883_v35 = vmul.f32 %v2290_v50, %v2763_v1  ;;  %v1058_v42 = vmul.f32 %v2292_v36, %v2704_v23  ;;  %v1060_v48 = vmul.f32 %v2292_v36, %v2721_v33 }
  0x4d   : > { %562 = vadd.xlane.f32.xlu1 %v561_v54  ;;  %v757_v54 = vsel %vm457_vm0, %v713_v49, 0.0  ;;  %v897_v5 = vsel %vm457_vm0, %v873_v25, 0.0  ;;  %v906_v9 = vsel %vm457_vm0, %v876_v6, 0.0  ;;  %vm682_vm6 = vcmask 1044484  }
  0x4e   : > { %559 = vadd.xlane.f32.xlu0 %v558_v55  ;;  %v870_v55 = vmul.f32 %v2290_v50, %v2715_v29  ;;  %v874_v29 = vmul.f32 %v2290_v50, %v2719_v32  ;;  %vm684_vm7 = vcmask 1045509   ;;  %vm686_vm8 = vcmask 1046534  }
  0x4f   : > { %vm688_vm9 = vcmask 1047559   ;;  %vm692_vm10 = vcmask 130056   ;;  %vm789_vm11 = vcmask 130112   ;;  %vm960_vm12 = vcmask 121912  }
  0x50   : > { %v888_v57 = vsel %vm457_vm0, %v870_v55, 0.0  ;;  %v900_v4 = vsel %vm457_vm0, %v874_v29, 0.0  ;;  %vm1034_vm13 = vcmask 121856  }
  0x51   : > { %568 = vadd.xlane.f32.xlu1 %v567_v60  ;;  %v885_v60 = vsel %vm457_vm0, %v869_v56, 0.0 }
  0x52   : > { %565 = vadd.xlane.f32.xlu0 %v564_v61  ;;  %v872_v61 = vmul.f32 %v2290_v50, %v2713_v28 }
  0x54   : > { %v894_v63 = vsel %vm457_vm0, %v872_v61, 0.0 }
  0x55   : > { %574 = vadd.xlane.f32.xlu1 %v573_v2  ;;  %v891_v2 = vsel %vm457_vm0, %v871_v62, 0.0 }
  0x56   : > { %571 = vadd.xlane.f32.xlu0 %v570_v3  ;;  %v599_v3 = vlaneseq }
  0x58   : > { %v2830_v13 = vshrl.u32 %v599_v3, 7 }
  0x59   : > { %580 = vadd.xlane.f32.xlu1 %v579_v7  ;;  %v875_v7 = vmul.f32 %v2290_v50, %v2731_v41 }
  0x5a   : > { %577 = vadd.xlane.f32.xlu0 %v576_v8  ;;  %v2824_v8 = vand.u32 127, %v599_v3  ;;  %v1069_v3 = vmul.f32 %v2292_v36, %v2753_v58 }
  0x5b   : > { %v903_v10 = vsel %vm457_vm0, %v875_v7, 0.0  ;;  %v1071_v7 = vmul.f32 %v2292_v36, %v2761_v0 }
  0x5c   : > { %v955_v14 = vadd.s32 4294967289, %v2824_v8 }
  0x5d   : > { %719 = vadd.xlane.f32.xlu1 %v718_v11  ;;  %v878_v11 = vmul.f32 %v2290_v50, %v2737_v46 }
  0x5e   : > { %716 = vadd.xlane.f32.xlu0 %v715_v12  ;;  %v877_v12 = vmul.f32 %v2290_v50, %v2739_v47 }
  0x5f   : > { %v912_v18 = vsel %vm457_vm0, %v878_v11, 0.0  ;;  %v2885_v11 = vld [vmem:[#allocation2 + $0x80] sm:$0xff] }
  0x61   : > { %725 = vadd.xlane.f32.xlu1 %v724_v15  ;;  %v950_v15 = vadd.s32 1, %v2824_v8 }
  0x62   : > { %722 = vadd.xlane.f32.xlu0 %v721_v16  ;;  %v2835_v16 = vsub.s32 %v955_v14, %v2830_v13 }
  0x63   : > { %v2838_v17 = vsub.s32 %v950_v15, %v2830_v13 }
  0x65   : > { %731 = vadd.xlane.f32.xlu1 %v730_v19  ;;  %v909_v19 = vsel %vm457_vm0, %v877_v12, 0.0  ;;  %v1113_v12 = vsel %vm457_vm0, %v1071_v7, 0.0 }
  0x66   : > { %728 = vadd.xlane.f32.xlu0 %v727_v20  ;;  %v880_v20 = vmul.f32 %v2290_v50, %v2745_v52 }
  0x68   : > { %v918_v22 = vsel %vm457_vm0, %v880_v20, 0.0 }
  0x69   : > { %737 = vadd.xlane.f32.xlu1 %v736_v24  ;;  %v915_v24 = vsel %vm457_vm0, %v879_v21, 0.0 }
  0x6a   : > { %734 = vadd.xlane.f32.xlu0 %v733_v26  ;;  %v882_v26 = vmul.f32 %v2290_v50, %v2753_v58 }
  0x6c   : > { %v924_v30 = vsel %vm457_vm0, %v882_v26, 0.0 }
  0x6d   : > { %743 = vadd.xlane.f32.xlu1 %v742_v31  ;;  %v921_v31 = vsel %vm457_vm0, %v881_v27, 0.0 }
  0x6e   : > { %740 = vadd.xlane.f32.xlu0 %v739_v34  ;;  %v884_v34 = vmul.f32 %v2290_v50, %v2761_v0  ;;  %v1080_v50 = vsel %vm457_vm0, %v1060_v48, 0.0 }
  0x70   : > { %v930_v37 = vsel %vm457_vm0, %v884_v34, 0.0 }
  0x71   : > { %749 = vadd.xlane.f32.xlu1 %v748_v38  ;;  %v927_v38 = vsel %vm457_vm0, %v883_v35, 0.0 }
  0x72   : > { %746 = vadd.xlane.f32.xlu0 %v745_v39  ;;  %v1059_v39 = vmul.f32 %v2292_v36, %v2713_v28 }
  0x74   : > { %v1077_v43 = vsel %vm457_vm0, %v1059_v39, 0.0 }
  0x75   : > { %755 = vadd.xlane.f32.xlu1 %v754_v44  ;;  %v1074_v44 = vsel %vm457_vm0, %v1058_v42, 0.0 }
  0x76   : > { %752 = vadd.xlane.f32.xlu0 %v751_v45  ;;  %v1061_v45 = vmul.f32 %v2292_v36, %v2719_v32 }
  0x78   : > { %v1083_v49 = vsel %vm457_vm0, %v1061_v45, 0.0 }
  0x79   : > { %761 = vadd.xlane.f32.xlu1 %v760_v51  ;;  %v1063_v51 = vmul.f32 %v2292_v36, %v2729_v40 }
  0x7a   : > { %758 = vadd.xlane.f32.xlu0 %v757_v54  ;;  %v1062_v54 = vmul.f32 %v2292_v36, %v2731_v41 }
  0x7b   : > { %v1089_v55 = vsel %vm457_vm0, %v1063_v51, 0.0 }
  0x7c   : > { %v1086_v56 = vsel %vm457_vm0, %v1062_v54, 0.0 }
  0x7d   : > { %889 = vadd.xlane.f32.xlu1 %v888_v57  ;;  %v1065_v57 = vmul.f32 %v2292_v36, %v2737_v46 }
  0x7e   : > { %886 = vadd.xlane.f32.xlu0 %v885_v60  ;;  %v1064_v60 = vmul.f32 %v2292_v36, %v2739_v47 }
  0x7f   : > { %v1095_v61 = vsel %vm457_vm0, %v1065_v57, 0.0 }
  0x80   : > { %v1092_v62 = vsel %vm457_vm0, %v1064_v60, 0.0 }
  0x81   : > { %895 = vadd.xlane.f32.xlu1 %v894_v63  ;;  %v1067_v63 = vmul.f32 %v2292_v36, %v2745_v52 }
  0x82   : > { %892 = vadd.xlane.f32.xlu0 %v891_v2  ;;  %v1066_v2 = vmul.f32 %v2292_v36, %v2747_v53 }
  0x83   : > { %v1101_v29 = vsel %vm457_vm0, %v1067_v63, 0.0 }
  0x84   : > { %v1098_v25 = vsel %vm457_vm0, %v1066_v2, 0.0 }
  0x85   : > { %901 = vadd.xlane.f32.xlu1 %v900_v4  ;;  %v1068_v4 = vmul.f32 %v2292_v36, %v2755_v59 }
  0x86   : > { %898 = vadd.xlane.f32.xlu0 %v897_v5  ;;  %v1107_v5 = vsel %vm457_vm0, %v1069_v3, 0.0 }
  0x87   : > { %v1104_v6 = vsel %vm457_vm0, %v1068_v4, 0.0 }
  0x89   : > { %907 = vadd.xlane.f32.xlu1 %v906_v9  ;;  %v1070_v9 = vmul.f32 %v2292_v36, %v2763_v1 }
  0x8a   : > { %904 = vadd.xlane.f32.xlu0 %v903_v10  ;;  %v2883_v10 = vld [vmem:[#allocation2 + $0x88] sm:$0xff] }
  0x8b   : > { %v1110_v14 = vsel %vm457_vm0, %v1070_v9, 0.0  ;;  %v1073_v15 = vmul.f32 %v2292_v36, %v2883_v10  ;;  %v2933_v9 = vld [vmem:[%s3538_s3 + $0x6] ss:$0 sm:$0xff] }
  0x8d   : > { %913 = vadd.xlane.f32.xlu1 %v912_v18  ;;  %v1072_v18 = vmul.f32 %v2292_v36, %v2885_v11  ;;  %v1119_v20 = vsel %vm457_vm0, %v1073_v15, 0.0 }
  0x8e   : > { %910 = vadd.xlane.f32.xlu0 %v909_v19  ;;  %v2294_v19 = vld [vmem:[%s3538_s3 + $0x5] ss:$0 sm:$0xff] }
  0x8f   : > { %v1116_v21 = vsel %vm457_vm0, %v1072_v18, 0.0  ;;  %v1231_v36 = vmul.f32 %v2294_v19, %v2729_v40  ;;  %v1233_v42 = vmul.f32 %v2294_v19, %v2737_v46  ;;  %v1235_v48 = vmul.f32 %v2294_v19, %v2745_v52 }
  0x90   : > { %v1236_v57 = vmul.f32 %v2294_v19, %v2755_v59  ;;  %v1239_v2 = vmul.f32 %v2294_v19, %v2761_v0  ;;  %v1240_v7 = vmul.f32 %v2294_v19, %v2885_v11 }
  0x91   : > { %919 = vadd.xlane.f32.xlu1 %v918_v22  ;;  %v1227_v22 = vmul.f32 %v2294_v19, %v2713_v28  ;;  %v1269_v54 = vsel %vm457_vm0, %v1235_v48, 0.0 }
  0x92   : > { %916 = vadd.xlane.f32.xlu0 %v915_v24  ;;  %v1226_v24 = vmul.f32 %v2294_v19, %v2704_v23  ;;  %v1272_v63 = vsel %vm457_vm0, %v1236_v57, 0.0  ;;  %v1281_v4 = vsel %vm457_vm0, %v1239_v2, 0.0 }
  0x93   : > { %v1245_v26 = vsel %vm457_vm0, %v1227_v22, 0.0  ;;  %v1394_v22 = vmul.f32 %v2933_v9, %v2704_v23 }
  0x94   : > { %v1242_v27 = vsel %vm457_vm0, %v1226_v24, 0.0 }
  0x95   : > { %925 = vadd.xlane.f32.xlu1 %v924_v30  ;;  %v1229_v30 = vmul.f32 %v2294_v19, %v2719_v32  ;;  %v1410_v23 = vsel %vm457_vm0, %v1394_v22, 0.0 }
  0x96   : > { %922 = vadd.xlane.f32.xlu0 %v921_v31  ;;  %v1228_v31 = vmul.f32 %v2294_v19, %v2721_v33 }
  0x97   : > { %v1251_v34 = vsel %vm457_vm0, %v1229_v30, 0.0 }
  0x98   : > { %v1248_v35 = vsel %vm457_vm0, %v1228_v31, 0.0 }
  0x99   : > { %931 = vadd.xlane.f32.xlu1 %v930_v37  ;;  %v1230_v37 = vmul.f32 %v2294_v19, %v2731_v41 }
  0x9a   : > { %928 = vadd.xlane.f32.xlu0 %v927_v38  ;;  %v1257_v38 = vsel %vm457_vm0, %v1231_v36, 0.0 }
  0x9b   : > { %v1254_v39 = vsel %vm457_vm0, %v1230_v37, 0.0 }
  0x9d   : > { %1078 = vadd.xlane.f32.xlu1 %v1077_v43  ;;  %v1232_v43 = vmul.f32 %v2294_v19, %v2739_v47 }
  0x9e   : > { %1075 = vadd.xlane.f32.xlu0 %v1074_v44  ;;  %v1263_v44 = vsel %vm457_vm0, %v1233_v42, 0.0 }
  0x9f   : > { %v1260_v45 = vsel %vm457_vm0, %v1232_v43, 0.0 }
  0xa1   : > { %1084 = vadd.xlane.f32.xlu1 %v1083_v49  ;;  %v1234_v49 = vmul.f32 %v2294_v19, %v2747_v53 }
  0xa2   : > { %1081 = vadd.xlane.f32.xlu0 %v1080_v50 }
  0xa5   : > { %1090 = vadd.xlane.f32.xlu1 %v1089_v55  ;;  %v1266_v55 = vsel %vm457_vm0, %v1234_v49, 0.0  ;;  %v1398_v49 = vmul.f32 %v2933_v9, %v2731_v41 }
  0xa6   : > { %1087 = vadd.xlane.f32.xlu0 %v1086_v56  ;;  %v1237_v56 = vmul.f32 %v2294_v19, %v2753_v58 }
  0xa9   : > { %1096 = vadd.xlane.f32.xlu1 %v1095_v61 }
  0xaa   : > { %1093 = vadd.xlane.f32.xlu0 %v1092_v62  ;;  %v1275_v62 = vsel %vm457_vm0, %v1237_v56, 0.0 }
  0xad   : > { %1102 = vadd.xlane.f32.xlu1 %v1101_v29  ;;  %v1238_v29 = vmul.f32 %v2294_v19, %v2763_v1 }
  0xae   : > { %1099 = vadd.xlane.f32.xlu0 %v1098_v25 }
  0xb1   : > { %1108 = vadd.xlane.f32.xlu1 %v1107_v5  ;;  %v1278_v5 = vsel %vm457_vm0, %v1238_v29, 0.0 }
  0xb2   : > { %1105 = vadd.xlane.f32.xlu0 %v1104_v6  ;;  %v1241_v6 = vmul.f32 %v2294_v19, %v2883_v10  ;;  %v1395_v19 = vmul.f32 %v2933_v9, %v2713_v28 }
  0xb4   : > { %v1413_v28 = vsel %vm457_vm0, %v1395_v19, 0.0  ;;  %v1402_v19 = vmul.f32 %v2933_v9, %v2747_v53 }
  0xb5   : > { %1114 = vadd.xlane.f32.xlu1 %v1113_v12  ;;  %v606_v12 = vadd.s32 4294967287, %v2824_v8 }
  0xb6   : > { %1111 = vadd.xlane.f32.xlu0 %v1110_v14  ;;  %v601_v14 = vadd.s32 4294967295, %v2824_v8 }
  0xb7   : > { %v2944_v24 = vsub.s32 %v606_v12, %v2830_v13 }
  0xb8   : > { %v2951_v30 = vsub.s32 %v601_v14, %v2830_v13 }
  0xb9   : > { %1120 = vadd.xlane.f32.xlu1 %v1119_v20  ;;  %v1287_v20 = vsel %vm457_vm0, %v1241_v6, 0.0 }
  0xba   : > { %1117 = vadd.xlane.f32.xlu0 %v1116_v21  ;;  %v1284_v21 = vsel %vm457_vm0, %v1240_v7, 0.0 }
  0xbd   : > { %1246 = vadd.xlane.f32.xlu1 %v1245_v26  ;;  %v1397_v26 = vmul.f32 %v2933_v9, %v2719_v32 }
  0xbe   : > { %1243 = vadd.xlane.f32.xlu0 %v1242_v27  ;;  %v1396_v27 = vmul.f32 %v2933_v9, %v2721_v33 }
  0xbf   : > { %v1419_v37 = vsel %vm457_vm0, %v1397_v26, 0.0 }
  0xc1   : > { %1252 = vadd.xlane.f32.xlu1 %v1251_v34 }
  0xc2   : > { %1249 = vadd.xlane.f32.xlu0 %v1248_v35 }
  0xc5   : > { %1258 = vadd.xlane.f32.xlu1 %v1257_v38  ;;  %v1416_v38 = vsel %vm457_vm0, %v1396_v27, 0.0 }
  0xc6   : > { %1255 = vadd.xlane.f32.xlu0 %v1254_v39  ;;  %v1399_v39 = vmul.f32 %v2933_v9, %v2729_v40 }
  0xc9   : > { %1264 = vadd.xlane.f32.xlu1 %v1263_v44 }
  0xca   : > { %1261 = vadd.xlane.f32.xlu0 %v1260_v45  ;;  %v2914_v50 = vpop.xlane.xlu1 %541 }
  0xcb   : > { %v2916_v51 = vpop.xlane.xlu0 %535  ;;  %v616_v42 = vrot.slane %v2914_v50, %v2951_v30 }
  0xcd   : > { %1270 = vadd.xlane.f32.xlu1 %v1269_v54  ;;  %v605_v54 = vrot.slane %v2916_v51, %v2951_v30  ;;  %v1425_v51 = vsel %vm457_vm0, %v1399_v39, 0.0 }
  0xce   : > { %1267 = vadd.xlane.f32.xlu0 %v1266_v55  ;;  %v545_v60 = vpop.xlane.xlu1 %544 }
  0xcf   : > { %v539_v61 = vpop.xlane.xlu0 %538  ;;  %v620_v35 = vrot.slane %v545_v60, %v2944_v24 }
  0xd0   : > { %v610_v36 = vrot.slane %v539_v61, %v2944_v24 }
  0xd1   : > { %1276 = vadd.xlane.f32.xlu1 %v1275_v62  ;;  %v621_v57 = vsel %vm611_vm2, %v620_v35, %v616_v42 }
  0xd2   : > { %1273 = vadd.xlane.f32.xlu0 %v1272_v63  ;;  %v551_v25 = vpop.xlane.xlu1 %550  ;;  %v612_v61 = vsel %vm611_vm2, %v610_v36, %v605_v54  ;;  %v1405_v54 = vmul.f32 %v2933_v9, %v2753_v58 }
  0xd3   : > { %v548_v3 = vpop.xlane.xlu0 %547  ;;  %v629_v43 = vrot.slane %v551_v25, %v2944_v24  ;;  %v677_v14 = vsel %vm676_vm3, %v621_v57, %v612_v61 }
  0xd4   : > { %v625_v44 = vrot.slane %v548_v3, %v2951_v30  ;;  %v1422_v3 = vsel %vm457_vm0, %v1398_v49, 0.0  ;;  %v1434_v49 = vsel %vm457_vm0, %v1402_v19, 0.0 }
  0xd5   : > { %1282 = vadd.xlane.f32.xlu1 %v1281_v4  ;;  %v1401_v4 = vmul.f32 %v2933_v9, %v2737_v46 }
  0xd6   : > { %1279 = vadd.xlane.f32.xlu0 %v1278_v5  ;;  %v557_v15 = vpop.xlane.xlu1 %556  ;;  %v630_v2 = vsel %vm611_vm2, %v629_v43, %v625_v44  ;;  %v1400_v5 = vmul.f32 %v2933_v9, %v2739_v47 }
  0xd7   : > { %v554_v18 = vpop.xlane.xlu0 %553  ;;  %v638_v55 = vrot.slane %v557_v15, %v2944_v24 }
  0xd8   : > { %v634_v56 = vrot.slane %v554_v18, %v2951_v30  ;;  %v1403_v18 = vmul.f32 %v2933_v9, %v2745_v52 }
  0xd9   : > { %1288 = vadd.xlane.f32.xlu1 %v1287_v20  ;;  %v679_v20 = vsel %vm678_vm4, %v630_v2, %v677_v14 }
  0xda   : > { %1285 = vadd.xlane.f32.xlu0 %v1284_v21  ;;  %v563_v31 = vpop.xlane.xlu1 %562  ;;  %v639_v6 = vsel %vm611_vm2, %v638_v55, %v634_v56  ;;  %v1437_v43 = vsel %vm457_vm0, %v1403_v18, 0.0  ;;  %v1404_v55 = vmul.f32 %v2933_v9, %v2755_v59 }
  0xdb   : > { %v560_v34 = vpop.xlane.xlu0 %559  ;;  %v647_v50 = vrot.slane %v563_v31, %v2944_v24  ;;  %v681_v22 = vsel %vm680_vm5, %v639_v6, %v679_v20  ;;  %v2498_v6 = vmov 0   ;;  %v784_v20 = vadd.s32 4294967288, %v2824_v8 }
  0xdc   : > { %v643_v60 = vrot.slane %v560_v34, %v2951_v30  ;;  %v1431_v34 = vsel %vm457_vm0, %v1401_v4, 0.0  ;;  %v1440_v61 = vsel %vm457_vm0, %v1404_v55, 0.0  ;;  %v1408_v4 = vmul.f32 %v2933_v9, %v2885_v11  ;;  %2386 = vset.pattern.permute.xlu0 %v2498_v6 }
  0xdd   : > { %1414 = vadd.xlane.f32.xlu1 %v1413_v28  ;;  %v1428_v28 = vsel %vm457_vm0, %v1400_v5, 0.0  ;;  %v3032_v5 = vld [vmem:[%s3538_s3 + $0x8] ss:$0 sm:$0xff] }
  0xde   : > { %1411 = vadd.xlane.f32.xlu0 %v1410_v23  ;;  %v569_v45 = vpop.xlane.xlu1 %568  ;;  %v648_v15 = vsel %vm611_vm2, %v647_v50, %v643_v60  ;;  %v1443_v60 = vsel %vm457_vm0, %v1405_v54, 0.0  ;;  %v1581_v18 = vmul.f32 %v3032_v5, %v2719_v32  ;;  %v1582_v19 = vmul.f32 %v3032_v5, %v2731_v41 }
  0xdf   : > { %v566_v48 = vpop.xlane.xlu0 %565  ;;  %v656_v62 = vrot.slane %v569_v45, %v2944_v24  ;;  %v683_v23 = vsel %vm682_vm6, %v648_v15, %v681_v22  ;;  %v1452_v15 = vsel %vm457_vm0, %v1408_v4, 0.0 }
  0xe0   : > { %v652_v63 = vrot.slane %v566_v48, %v2951_v30 }
  0xe1   : > { %1420 = vadd.xlane.f32.xlu1 %v1419_v37 }
  0xe2   : > { %1417 = vadd.xlane.f32.xlu0 %v1416_v38  ;;  %v575_v29 = vpop.xlane.xlu1 %574  ;;  %v657_v21 = vsel %vm611_vm2, %v656_v62, %v652_v63  ;;  %v582_v38 = vld [vmem:[#allocation3] sm:$0xff]  ;;  %v1407_v62 = vmul.f32 %v2933_v9, %v2761_v0  ;;  %v1406_v63 = vmul.f32 %v2933_v9, %v2763_v1 }
  0xe3   : > { %v572_v25 = vpop.xlane.xlu0 %571  ;;  %v665_v7 = vrot.slane %v575_v29, %v2944_v24  ;;  %v685_v37 = vsel %vm684_vm7, %v657_v21, %v683_v23  ;;  %v1583_v21 = vmul.f32 %v3032_v5, %v2729_v40 }
  0xe4   : > { %v661_v12 = vrot.slane %v572_v25, %v2951_v30  ;;  %v1449_v29 = vsel %vm457_vm0, %v1407_v62, 0.0  ;;  %v1446_v25 = vsel %vm457_vm0, %v1406_v63, 0.0 }
  0xe5   : > { %1426 = vadd.xlane.f32.xlu1 %v1425_v51 }
  0xe6   : > { %1423 = vadd.xlane.f32.xlu0 %v1422_v3  ;;  %v666_v26 = vsel %vm611_vm2, %v665_v7, %v661_v12  ;;  %v581_v27 = vpop.xlane.xlu1 %580  ;;  %v1409_v3 = vmul.f32 %v2933_v9, %v2883_v10  ;;  %v1580_v9 = vmul.f32 %v3032_v5, %v2721_v33 }
  0xe7   : > { %v578_v31 = vpop.xlane.xlu0 %577  ;;  %v674_v35 = vrot.slane %v581_v27, %v2944_v24  ;;  %v687_v39 = vsel %vm686_vm8, %v666_v26, %v685_v37  ;;  %v1599_v27 = vsel %vm457_vm0, %v1581_v18, 0.0  ;;  %v1602_v37 = vsel %vm457_vm0, %v1582_v19, 0.0 }
  0xe8   : > { %v670_v36 = vrot.slane %v578_v31, %v2951_v30  ;;  %v1455_v14 = vsel %vm457_vm0, %v1409_v3, 0.0  ;;  %v1596_v31 = vsel %vm457_vm0, %v1580_v9, 0.0  ;;  %v1589_v9 = vmul.f32 %v3032_v5, %v2753_v58 }
  0xe9   : > { %1432 = vadd.xlane.f32.xlu1 %v1431_v34  ;;  %v3048_v34 = vsub.s32 %v784_v20, %v2830_v13 }
  0xea   : > { %v675_v42 = vsel %vm611_vm2, %v674_v35, %v670_v36  ;;  %1429 = vadd.xlane.f32.xlu0 %v1428_v28  ;;  %v3007_v45 = vpop.xlane.xlu1 %719  ;;  %v3052_v28 = vsub.s32 %v2824_v8, %v2830_v13  ;;  %v1605_v36 = vsel %vm457_vm0, %v1583_v21, 0.0  ;;  %v1585_v8 = vmul.f32 %v3032_v5, %v2737_v46 }
  0xeb   : > { %v689_v44 = vsel %vm688_vm9, %v675_v42, %v687_v39  ;;  %v3009_v48 = vpop.xlane.xlu0 %716  ;;  %v1584_v13 = vmul.f32 %v3032_v5, %v2739_v47 }
  0xec   : > { %v691_v56 = vadd.f32 %v689_v44, %v582_v38  ;;  %v788_v44 = vrot.slane %v3007_v45, %v3048_v34 }
  0xed   : > { %1438 = vadd.xlane.f32.xlu1 %v1437_v43 }
  0xee   : > { %693 = vst.msk [vmem:[#allocation3] sm:$0xff] %vm692_vm10, %v691_v56  ;;  %1435 = vadd.xlane.f32.xlu0 %v1434_v49  ;;  %v726_v57 = vpop.xlane.xlu1 %725  ;;  %v783_v49 = vrot.slane %v3009_v48, %v3052_v28 }
  0xef   : > { %v723_v50 = vpop.xlane.xlu0 %722  ;;  %v798_v23 = vrot.slane %v726_v57, %v3048_v34 }
  0xf0   : > { %v794_v35 = vrot.slane %v723_v50, %v3052_v28  ;;  %v1587_v50 = vmul.f32 %v3032_v5, %v2745_v52 }
  0xf1   : > { %1444 = vadd.xlane.f32.xlu1 %v1443_v60 }
  0xf2   : > { %1441 = vadd.xlane.f32.xlu0 %v1440_v61  ;;  %v732_v51 = vpop.xlane.xlu1 %731  ;;  %v799_v60 = vsel %vm789_vm11, %v798_v23, %v794_v35  ;;  %v1617_v18 = vsel %vm457_vm0, %v1587_v50, 0.0 }
  0xf3   : > { %v729_v2 = vpop.xlane.xlu0 %728  ;;  %v807_v38 = vrot.slane %v732_v51, %v3048_v34  ;;  %v1611_v51 = vsel %vm457_vm0, %v1585_v8, 0.0 }
  0xf4   : > { %v803_v39 = vrot.slane %v729_v2, %v3052_v28  ;;  %v1608_v2 = vsel %vm457_vm0, %v1584_v13, 0.0 }
  0xf5   : > { %1450 = vadd.xlane.f32.xlu1 %v1449_v29  ;;  %v1586_v29 = vmul.f32 %v3032_v5, %v2747_v53 }
  0xf6   : > { %1447 = vadd.xlane.f32.xlu0 %v1446_v25  ;;  %v738_v7 = vpop.xlane.xlu1 %737  ;;  %v808_v48 = vsel %vm789_vm11, %v807_v38, %v803_v39  ;;  %v790_v25 = vsel %vm789_vm11, %v788_v44, %v783_v49  ;;  %v1623_v39 = vsel %vm457_vm0, %v1589_v9, 0.0  ;;  %v1591_v44 = vmul.f32 %v3032_v5, %v2761_v0 }
  0xf7   : > { %v735_v12 = vpop.xlane.xlu0 %734  ;;  %v816_v54 = vrot.slane %v738_v7, %v3048_v34  ;;  %v854_v7 = vsel %vm676_vm3, %v799_v60, %v790_v25  ;;  %v1590_v49 = vmul.f32 %v3032_v5, %v2763_v1  ;;  %v1593_v60 = vmul.f32 %v3032_v5, %v2883_v10  ;;  %v3124_v1 = vld [vmem:[#allocation2 + $0x90] sm:$0xff] }
  0xf8   : > { %v812_v55 = vrot.slane %v735_v12, %v3052_v28  ;;  %v1592_v0 = vmul.f32 %v3032_v5, %v2885_v11 }
  0xf9   : > { %1456 = vadd.xlane.f32.xlu1 %v1455_v14  ;;  %v855_v14 = vsel %vm678_vm4, %v808_v48, %v854_v7  ;;  %v1626_v50 = vsel %vm457_vm0, %v1590_v49, 0.0 }
  0xfa   : > { %1453 = vadd.xlane.f32.xlu0 %v1452_v15  ;;  %v744_v22 = vpop.xlane.xlu1 %743  ;;  %v817_v3 = vsel %vm789_vm11, %v816_v54, %v812_v55 }
  0xfb   : > { %v741_v26 = vpop.xlane.xlu0 %740  ;;  %v825_v56 = vrot.slane %v744_v22, %v3048_v34  ;;  %v856_v20 = vsel %vm680_vm5, %v817_v3, %v855_v14 }
  0xfc   : > { %v821_v57 = vrot.slane %v741_v26, %v3052_v28  ;;  %v1614_v26 = vsel %vm457_vm0, %v1586_v29, 0.0  ;;  %v3135_v29 = vld [vmem:[%s3538_s3 + $0x9] ss:$0 sm:$0xff] }
  0xfd   : > { %1600 = vadd.xlane.f32.xlu1 %v1599_v27  ;;  %v1588_v27 = vmul.f32 %v3032_v5, %v2755_v59  ;;  %v1749_v7 = vmul.f32 %v3135_v29, %v2719_v32  ;;  %v1750_v14 = vmul.f32 %v3135_v29, %v2731_v41 }
  0xfe   : > { %1597 = vadd.xlane.f32.xlu0 %v1596_v31  ;;  %v750_v42 = vpop.xlane.xlu1 %749  ;;  %v826_v12 = vsel %vm789_vm11, %v825_v56, %v821_v57  ;;  %v1629_v57 = vsel %vm457_vm0, %v1591_v44, 0.0 }
  0xff   : > { %v747_v43 = vpop.xlane.xlu0 %746  ;;  %v834_v61 = vrot.slane %v750_v42, %v3048_v34  ;;  %v857_v31 = vsel %vm682_vm6, %v826_v12, %v856_v20  ;;  %v763_v42 = vld [vmem:[#allocation3] sm:$0xff]  ;;  %v1620_v13 = vsel %vm457_vm0, %v1588_v27, 0.0  ;;  %v1748_v12 = vmul.f32 %v3135_v29, %v2721_v33 }
 0x100   : > { %v830_v45 = vrot.slane %v747_v43, %v3052_v28  ;;  %v1767_v9 = vsel %vm457_vm0, %v1749_v7, 0.0  ;;  %v1753_v27 = vmul.f32 %v3135_v29, %v2737_v46  ;;  %v1755_v46 = vmul.f32 %v3135_v29, %v2745_v52 }
 0x101   : > { %1606 = vadd.xlane.f32.xlu1 %v1605_v36  ;;  %v1764_v20 = vsel %vm457_vm0, %v1748_v12, 0.0 }
 0x102   : > { %1603 = vadd.xlane.f32.xlu0 %v1602_v37  ;;  %v756_v62 = vpop.xlane.xlu1 %755  ;;  %v835_v15 = vsel %vm789_vm11, %v834_v61, %v830_v45  ;;  %v3122_v61 = vld [vmem:[#allocation2 + $0x98] sm:$0xff]  ;;  %v1779_v44 = vsel %vm457_vm0, %v1753_v27, 0.0 }
 0x103   : > { %v753_v63 = vpop.xlane.xlu0 %752  ;;  %v843_v4 = vrot.slane %v756_v62, %v3048_v34  ;;  %v858_v36 = vsel %vm684_vm7, %v835_v15, %v857_v31  ;;  %v1635_v62 = vsel %vm457_vm0, %v1593_v60, 0.0  ;;  %v1752_v31 = vmul.f32 %v3135_v29, %v2739_v47 }
 0x104   : > { %v839_v6 = vrot.slane %v753_v63, %v3052_v28  ;;  %v1632_v63 = vsel %vm457_vm0, %v1592_v0, 0.0 }
 0x105   : > { %1612 = vadd.xlane.f32.xlu1 %v1611_v51  ;;  %v1595_v51 = vmul.f32 %v3032_v5, %v3122_v61  ;;  %v1776_v49 = vsel %vm457_vm0, %v1752_v31, 0.0 }
 0x106   : > { %1609 = vadd.xlane.f32.xlu0 %v1608_v2  ;;  %v844_v21 = vsel %vm789_vm11, %v843_v4, %v839_v6  ;;  %v762_v19 = vpop.xlane.xlu1 %761  ;;  %v1594_v2 = vmul.f32 %v3032_v5, %v3124_v1  ;;  %v1751_v5 = vmul.f32 %v3135_v29, %v2729_v40 }
 0x107   : > { %v759_v22 = vpop.xlane.xlu0 %758  ;;  %v852_v23 = vrot.slane %v762_v19, %v3048_v34  ;;  %v859_v37 = vsel %vm686_vm8, %v844_v21, %v858_v36  ;;  %v1641_v4 = vsel %vm457_vm0, %v1595_v51, 0.0  ;;  %v1770_v19 = vsel %vm457_vm0, %v1750_v14, 0.0 }
 0x108   : > { %v848_v35 = vrot.slane %v759_v22, %v3052_v28  ;;  %v1638_v6 = vsel %vm457_vm0, %v1594_v2, 0.0  ;;  %v1773_v33 = vsel %vm457_vm0, %v1751_v5, 0.0 }
 0x109   : > { %1618 = vadd.xlane.f32.xlu1 %v1617_v18 }
 0x10a   : > { %v853_v38 = vsel %vm789_vm11, %v852_v23, %v848_v35  ;;  %1615 = vadd.xlane.f32.xlu0 %v1614_v26  ;;  %v3106_v59 = vpop.xlane.xlu1 %889 }
 0x10b   : > { %v860_v43 = vsel %vm688_vm9, %v853_v38, %v859_v37  ;;  %v3108_v8 = vpop.xlane.xlu0 %886  ;;  %v959_v23 = vrot.slane %v3106_v59, %v2835_v16 }
 0x10c   : > { %v862_v54 = vadd.f32 %v860_v43, %v763_v42  ;;  %v954_v35 = vrot.slane %v3108_v8, %v2838_v17 }
 0x10d   : > { %1624 = vadd.xlane.f32.xlu1 %v1623_v39 }
 0x10e   : > { %863 = vst.msk [vmem:[#allocation3] sm:$0xff] %vm495_vm1, %v862_v54  ;;  %1621 = vadd.xlane.f32.xlu0 %v1620_v13  ;;  %v896_v55 = vpop.xlane.xlu1 %895  ;;  %v1754_v54 = vmul.f32 %v3135_v29, %v2747_v53  ;;  %v961_v52 = vsel %vm960_vm12, %v959_v23, %v954_v35  ;;  %v1785_v53 = vsel %vm457_vm0, %v1755_v46, 0.0  ;;  %v1761_v35 = vmul.f32 %v3135_v29, %v2883_v10 }
 0x10f   : > { %v893_v56 = vpop.xlane.xlu0 %892  ;;  %v969_v21 = vrot.slane %v896_v55, %v2835_v16 }
 0x110   : > { %v965_v32 = vrot.slane %v893_v56, %v2838_v17 }
 0x111   : > { %1630 = vadd.xlane.f32.xlu1 %v1629_v57 }
 0x112   : > { %1627 = vadd.xlane.f32.xlu0 %v1626_v50  ;;  %v902_v45 = vpop.xlane.xlu1 %901  ;;  %v970_v47 = vsel %vm960_vm12, %v969_v21, %v965_v32 }
 0x113   : > { %v899_v48 = vpop.xlane.xlu0 %898  ;;  %v978_v40 = vrot.slane %v902_v45, %v2835_v16  ;;  %v1025_v50 = vsel %vm676_vm3, %v970_v47, %v961_v52  ;;  %v1763_v47 = vmul.f32 %v3135_v29, %v3122_v61  ;;  %v2391_v52 = vld [vmem:[#allocation2 + $0x20] sm:$0xff] }
 0x114   : > { %v974_v41 = vrot.slane %v899_v48, %v2838_v17  ;;  %v1757_v48 = vmul.f32 %v3135_v29, %v2753_v58 }
 0x115   : > { %1636 = vadd.xlane.f32.xlu1 %v1635_v62 }
 0x116   : > { %1633 = vadd.xlane.f32.xlu0 %v1632_v63  ;;  %v908_v25 = vpop.xlane.xlu1 %907  ;;  %v979_v59 = vsel %vm960_vm12, %v978_v40, %v974_v41  ;;  %v3212_v40 = vld [vmem:[#allocation2 + $0x70] sm:$0xff] }
 0x117   : > { %v905_v3 = vpop.xlane.xlu0 %904  ;;  %v987_v36 = vrot.slane %v908_v25, %v2835_v16  ;;  %v1026_v0 = vsel %vm678_vm4, %v979_v59, %v1025_v50  ;;  %v1782_v25 = vsel %vm457_vm0, %v1754_v54, 0.0  ;;  %v1758_v41 = vmul.f32 %v3212_v40, %v3135_v29 }
 0x118   : > { %v983_v37 = vrot.slane %v905_v3, %v2838_v17  ;;  %v3191_v3 = vld [vmem:[#allocation2 + $0x60] sm:$0xff] }
 0x119   : > { %1642 = vadd.xlane.f32.xlu1 %v1641_v4  ;;  %v1756_v4 = vmul.f32 %v3191_v3, %v3135_v29  ;;  %v1794_v23 = vsel %vm457_vm0, %v1758_v41, 0.0  ;;  %v2396_v41 = vld [vmem:[#allocation2 + $0x58] sm:$0xff] }
 0x11a   : > { %1639 = vadd.xlane.f32.xlu0 %v1638_v6  ;;  %v914_v15 = vpop.xlane.xlu1 %913  ;;  %v988_v55 = vsel %vm960_vm12, %v987_v36, %v983_v37  ;;  %v1760_v36 = vmul.f32 %v3135_v29, %v2885_v11 }
 0x11b   : > { %v911_v18 = vpop.xlane.xlu0 %910  ;;  %v996_v38 = vrot.slane %v914_v15, %v2835_v16  ;;  %v1027_v62 = vsel %vm680_vm5, %v988_v55, %v1026_v0  ;;  %v1791_v15 = vsel %vm457_vm0, %v1757_v48, 0.0  ;;  %v1788_v32 = vsel %vm457_vm0, %v1756_v4, 0.0 }
 0x11c   : > { %v992_v39 = vrot.slane %v911_v18, %v2838_v17  ;;  %v933_v18 = vld [vmem:[#allocation3] sm:$0xff]  ;;  %v1800_v46 = vsel %vm457_vm0, %v1760_v36, 0.0 }
 0x11d   : > { %1768 = vadd.xlane.f32.xlu1 %v1767_v9 }
 0x11e   : > { %1765 = vadd.xlane.f32.xlu0 %v1764_v20  ;;  %v920_v22 = vpop.xlane.xlu1 %919  ;;  %v997_v60 = vsel %vm960_vm12, %v996_v38, %v992_v39  ;;  %v1803_v39 = vsel %vm457_vm0, %v1761_v35, 0.0 }
 0x11f   : > { %v917_v26 = vpop.xlane.xlu0 %916  ;;  %v1005_v42 = vrot.slane %v920_v22, %v2835_v16  ;;  %v1028_v6 = vsel %vm682_vm6, %v997_v60, %v1027_v62 }
 0x120   : > { %v1001_v43 = vrot.slane %v917_v26, %v2838_v17 }
 0x121   : > { %1774 = vadd.xlane.f32.xlu1 %v1773_v33  ;;  %v3208_v33 = vld [vmem:[#allocation2 + $0x78] sm:$0xff] }
 0x122   : > { %1771 = vadd.xlane.f32.xlu0 %v1770_v19  ;;  %v926_v8 = vpop.xlane.xlu1 %925  ;;  %v1006_v45 = vsel %vm960_vm12, %v1005_v42, %v1001_v43  ;;  %v1759_v19 = vmul.f32 %v3208_v33, %v3135_v29  ;;  %v1762_v42 = vmul.f32 %v3135_v29, %v3124_v1  ;;  %v3232_v43 = vld [vmem:[%s3538_s3 + $0xa] ss:$0 sm:$0xff]  ;;  %v2392_v29 = vld [vmem:[#allocation2 + $0x38] sm:$0xff] }
 0x123   : > { %v923_v13 = vpop.xlane.xlu0 %922  ;;  %v1014_v56 = vrot.slane %v926_v8, %v2835_v16  ;;  %v1029_v58 = vsel %vm684_vm7, %v1006_v45, %v1028_v6  ;;  %v1916_v55 = vmul.f32 %v2391_v52, %v3232_v43 }
 0x124   : > { %v1010_v57 = vrot.slane %v923_v13, %v2838_v17  ;;  %v1797_v31 = vsel %vm457_vm0, %v1759_v19, 0.0  ;;  %v1809_v13 = vsel %vm457_vm0, %v1763_v47, 0.0 }
 0x125   : > { %1780 = vadd.xlane.f32.xlu1 %v1779_v44  ;;  %v1806_v44 = vsel %vm457_vm0, %v1762_v42, 0.0 }
 0x126   : > { %1777 = vadd.xlane.f32.xlu0 %v1776_v49  ;;  %v1015_v63 = vsel %vm960_vm12, %v1014_v56, %v1010_v57  ;;  %v932_v51 = vpop.xlane.xlu1 %931  ;;  %v2390_v49 = vld [vmem:[#allocation2 + $0x28] sm:$0xff]  ;;  %v1919_v56 = vmul.f32 %v2392_v29, %v3232_v43  ;;  %v2393_v57 = vld [vmem:[#allocation2 + $0x30] sm:$0xff] }
 0x127   : > { %v929_v2 = vpop.xlane.xlu0 %928  ;;  %v1023_v7 = vrot.slane %v932_v51, %v2835_v16  ;;  %v1030_v5 = vsel %vm686_vm8, %v1015_v63, %v1029_v58  ;;  %v1917_v54 = vmul.f32 %v2390_v49, %v3232_v43  ;;  %v1918_v50 = vmul.f32 %v2393_v57, %v3232_v43  ;;  %v2395_v58 = vld [vmem:[#allocation2 + $0x40] sm:$0xff] }
 0x128   : > { %v1019_v12 = vrot.slane %v929_v2, %v2838_v17  ;;  %v1941_v63 = vsel %vm457_vm0, %v1919_v56, 0.0 }
 0x129   : > { %1786 = vadd.xlane.f32.xlu1 %v1785_v53  ;;  %v1935_v45 = vsel %vm457_vm0, %v1917_v54, 0.0  ;;  %v1932_v53 = vsel %vm457_vm0, %v1916_v55, 0.0  ;;  %v1938_v51 = vsel %vm457_vm0, %v1918_v50, 0.0  ;;  %v2398_v54 = vld [vmem:[#allocation2 + $0x68] sm:$0xff] }
 0x12a   : > { %v1024_v14 = vsel %vm960_vm12, %v1023_v7, %v1019_v12  ;;  %1783 = vadd.xlane.f32.xlu0 %v1782_v25  ;;  %v3203_v20 = vpop.xlane.xlu1 %1078  ;;  %v2394_v7 = vld [vmem:[#allocation2 + $0x48] sm:$0xff]  ;;  %v1925_v52 = vmul.f32 %v2398_v54, %v3232_v43 }
 0x12b   : > { %v1031_v9 = vsel %vm688_vm9, %v1024_v14, %v1030_v5  ;;  %v3205_v21 = vpop.xlane.xlu0 %1075  ;;  %v1921_v12 = vmul.f32 %v2394_v7, %v3232_v43  ;;  %v1920_v5 = vmul.f32 %v2395_v58, %v3232_v43  ;;  %v1146_v14 = vrot.slane %v3203_v20, %v2944_v24 }
 0x12c   : > { %v1033_v22 = vadd.f32 %v1031_v9, %v933_v18  ;;  %v1927_v7 = vmul.f32 %v3208_v33, %v3232_v43  ;;  %v1928_v33 = vmul.f32 %v3232_v43, %v2885_v11 }
 0x12d   : > { %1792 = vadd.xlane.f32.xlu1 %v1791_v15  ;;  %v1142_v15 = vrot.slane %v3205_v21, %v2951_v30  ;;  %v1947_v35 = vsel %vm457_vm0, %v1921_v12, 0.0  ;;  %v1944_v36 = vsel %vm457_vm0, %v1920_v5, 0.0  ;;  %v1926_v12 = vmul.f32 %v3212_v40, %v3232_v43 }
 0x12e   : > { %1035 = vst.msk [vmem:[#allocation3] sm:$0xff] %vm1034_vm13, %v1033_v22  ;;  %1789 = vadd.xlane.f32.xlu0 %v1788_v32  ;;  %v1085_v26 = vpop.xlane.xlu1 %1084  ;;  %v1923_v22 = vmul.f32 %v2396_v41, %v3232_v43  ;;  %v1968_v41 = vsel %vm457_vm0, %v1928_v33, 0.0 }
 0x12f   : > { %v1082_v27 = vpop.xlane.xlu0 %1081  ;;  %v1155_v48 = vrot.slane %v1085_v26, %v2944_v24 }
 0x130   : > { %v1151_v62 = vrot.slane %v1082_v27, %v2951_v30  ;;  %v1953_v49 = vsel %vm457_vm0, %v1923_v22, 0.0  ;;  %v1931_v22 = vmul.f32 %v3232_v43, %v3122_v61 }
 0x131   : > { %1798 = vadd.xlane.f32.xlu1 %v1797_v31 }
 0x132   : > { %1795 = vadd.xlane.f32.xlu0 %v1794_v23  ;;  %v1091_v37 = vpop.xlane.xlu1 %1090  ;;  %v1156_v26 = vsel %vm611_vm2, %v1155_v48, %v1151_v62  ;;  %v1977_v11 = vsel %vm457_vm0, %v1931_v22, 0.0 }
 0x133   : > { %v1088_v38 = vpop.xlane.xlu0 %1087  ;;  %v1164_v2 = vrot.slane %v1091_v37, %v2944_v24  ;;  %v2397_v37 = vld [vmem:[#allocation2 + $0x50] sm:$0xff] }
 0x134   : > { %v1160_v25 = vrot.slane %v1088_v38, %v2951_v30  ;;  %v1922_v38 = vmul.f32 %v2397_v37, %v3232_v43 }
 0x135   : > { %1804 = vadd.xlane.f32.xlu1 %v1803_v39  ;;  %v1147_v39 = vsel %vm611_vm2, %v1146_v14, %v1142_v15  ;;  %v1965_v15 = vsel %vm457_vm0, %v1927_v7, 0.0 }
 0x136   : > { %1801 = vadd.xlane.f32.xlu0 %v1800_v46  ;;  %v1097_v59 = vpop.xlane.xlu1 %1096  ;;  %v1165_v21 = vsel %vm611_vm2, %v1164_v2, %v1160_v25  ;;  %v1950_v50 = vsel %vm457_vm0, %v1922_v38, 0.0  ;;  %v1122_v2 = vld [vmem:[#allocation3] sm:$0xff] }
 0x137   : > { %v1094_v8 = vpop.xlane.xlu0 %1093  ;;  %v1173_v18 = vrot.slane %v1097_v59, %v2944_v24  ;;  %v1211_v59 = vsel %vm676_vm3, %v1156_v26, %v1147_v39  ;;  %v1930_v26 = vmul.f32 %v3232_v43, %v3124_v1 }
 0x138   : > { %v1169_v9 = vrot.slane %v1094_v8, %v2951_v30 }
 0x139   : > { %1810 = vadd.xlane.f32.xlu1 %v1809_v13  ;;  %v1212_v13 = vsel %vm678_vm4, %v1165_v21, %v1211_v59 }
 0x13a   : > { %1807 = vadd.xlane.f32.xlu0 %v1806_v44  ;;  %v1103_v60 = vpop.xlane.xlu1 %1102  ;;  %v1174_v46 = vsel %vm611_vm2, %v1173_v18, %v1169_v9  ;;  %v1962_v18 = vsel %vm457_vm0, %v1926_v12, 0.0  ;;  %v1929_v9 = vmul.f32 %v3232_v43, %v2883_v10 }
 0x13b   : > { %v1100_v0 = vpop.xlane.xlu0 %1099  ;;  %v1182_v32 = vrot.slane %v1103_v60, %v2944_v24  ;;  %v1213_v55 = vsel %vm680_vm5, %v1174_v46, %v1212_v13  ;;  %v1924_v60 = vmul.f32 %v3191_v3, %v3232_v43 }
 0x13c   : > { %v1178_v19 = vrot.slane %v1100_v0, %v2951_v30 }
 0x13d   : > { %1936 = vadd.xlane.f32.xlu1 %v1935_v45 }
 0x13e   : > { %1933 = vadd.xlane.f32.xlu0 %v1932_v53  ;;  %v1109_v4 = vpop.xlane.xlu1 %1108  ;;  %v1183_v8 = vsel %vm611_vm2, %v1182_v32, %v1178_v19  ;;  %v1971_v19 = vsel %vm457_vm0, %v1929_v9, 0.0 }
 0x13f   : > { %v1106_v6 = vpop.xlane.xlu0 %1105  ;;  %v1191_v27 = vrot.slane %v1109_v4, %v2944_v24  ;;  %v1214_v0 = vsel %vm682_vm6, %v1183_v8, %v1213_v55 }
 0x140   : > { %v1187_v20 = vrot.slane %v1106_v6, %v2951_v30  ;;  %v1956_v6 = vsel %vm457_vm0, %v1924_v60, 0.0 }
 0x141   : > { %1942 = vadd.xlane.f32.xlu1 %v1941_v63 }
 0x142   : > { %1939 = vadd.xlane.f32.xlu0 %v1938_v51  ;;  %v1115_v31 = vpop.xlane.xlu1 %1114  ;;  %v1192_v44 = vsel %vm611_vm2, %v1191_v27, %v1187_v20  ;;  %v1959_v51 = vsel %vm457_vm0, %v1925_v52, 0.0  ;;  %v1974_v20 = vsel %vm457_vm0, %v1930_v26, 0.0 }
 0x143   : > { %v1112_v23 = vpop.xlane.xlu0 %1111  ;;  %v1200_v47 = vrot.slane %v1115_v31, %v2944_v24  ;;  %v1215_v48 = vsel %vm684_vm7, %v1192_v44, %v1214_v0 }
 0x144   : > { %v1196_v42 = vrot.slane %v1112_v23, %v2951_v30 }
 0x145   : > { %1948 = vadd.xlane.f32.xlu1 %v1947_v35 }
 0x146   : > { %1945 = vadd.xlane.f32.xlu0 %v1944_v36  ;;  %v1201_v29 = vsel %vm611_vm2, %v1200_v47, %v1196_v42  ;;  %v1121_v56 = vpop.xlane.xlu1 %1120 }
 0x147   : > { %v1118_v57 = vpop.xlane.xlu0 %1117  ;;  %v1209_v45 = vrot.slane %v1121_v56, %v2944_v24  ;;  %v1216_v62 = vsel %vm686_vm8, %v1201_v29, %v1215_v48 }
 0x148   : > { %v1205_v53 = vrot.slane %v1118_v57, %v2951_v30 }
 0x149   : > { %1954 = vadd.xlane.f32.xlu1 %v1953_v49 }
 0x14a   : > { %v1210_v63 = vsel %vm611_vm2, %v1209_v45, %v1205_v53  ;;  %1951 = vadd.xlane.f32.xlu0 %v1950_v50  ;;  %v1247_v3 = vpop.xlane.xlu1 %1246 }
 0x14b   : > { %v1217_v25 = vsel %vm688_vm9, %v1210_v63, %v1216_v62  ;;  %v1244_v4 = vpop.xlane.xlu0 %1243  ;;  %v1314_v37 = vrot.slane %v1247_v3, %v3048_v34 }
 0x14c   : > { %v1219_v58 = vadd.f32 %v1217_v25, %v1122_v2  ;;  %v1310_v38 = vrot.slane %v1244_v4, %v3052_v28 }
 0x14d   : > { %1960 = vadd.xlane.f32.xlu1 %v1959_v51 }
 0x14e   : > { %1220 = vst.msk [vmem:[#allocation3] sm:$0xff] %vm692_vm10, %v1219_v58  ;;  %1957 = vadd.xlane.f32.xlu0 %v1956_v6  ;;  %v1253_v5 = vpop.xlane.xlu1 %1252  ;;  %v1315_v52 = vsel %vm789_vm11, %v1314_v37, %v1310_v38 }
 0x14f   : > { %v1250_v14 = vpop.xlane.xlu0 %1249  ;;  %v1323_v23 = vrot.slane %v1253_v5, %v3048_v34 }
 0x150   : > { %v1319_v35 = vrot.slane %v1250_v14, %v3052_v28  ;;  %v2303_v14 = vld [vmem:[#allocation4] ss:$0 sm:$0xff] }
 0x151   : > { %1966 = vadd.xlane.f32.xlu1 %v1965_v15 }
 0x152   : > { %1963 = vadd.xlane.f32.xlu0 %v1962_v18  ;;  %v1259_v40 = vpop.xlane.xlu1 %1258  ;;  %v1324_v59 = vsel %vm789_vm11, %v1323_v23, %v1319_v35 }
 0x153   : > { %v1256_v32 = vpop.xlane.xlu0 %1255  ;;  %v1332_v61 = vrot.slane %v1259_v40, %v3048_v34  ;;  %v1379_v57 = vsel %vm676_vm3, %v1324_v59, %v1315_v52 }
 0x154   : > { %v1328_v1 = vrot.slane %v1256_v32, %v3052_v28 }
 0x155   : > { %1972 = vadd.xlane.f32.xlu1 %v1971_v19  ;;  %v1290_v6 = vld [vmem:[#allocation3] sm:$0xff] }
 0x156   : > { %1969 = vadd.xlane.f32.xlu0 %v1968_v41  ;;  %v1265_v10 = vpop.xlane.xlu1 %1264  ;;  %v1333_v44 = vsel %vm789_vm11, %v1332_v61, %v1328_v1 }
 0x157   : > { %v1262_v27 = vpop.xlane.xlu0 %1261  ;;  %v1341_v39 = vrot.slane %v1265_v10, %v3048_v34  ;;  %v1380_v60 = vsel %vm678_vm4, %v1333_v44, %v1379_v57 }
 0x158   : > { %v1337_v46 = vrot.slane %v1262_v27, %v3052_v28 }
 0x159   : > { %1978 = vadd.xlane.f32.xlu1 %v1977_v11 }
 0x15a   : > { %1975 = vadd.xlane.f32.xlu0 %v1974_v20  ;;  %v1271_v21 = vpop.xlane.xlu1 %1270  ;;  %v1342_v55 = vsel %vm789_vm11, %v1341_v39, %v1337_v46 }
 0x15b   : > { %v1268_v31 = vpop.xlane.xlu0 %1267  ;;  %v1350_v47 = vrot.slane %v1271_v21, %v3048_v34  ;;  %v1381_v45 = vsel %vm680_vm5, %v1342_v55, %v1380_v60 }
 0x15c   : > { %v1346_v42 = vrot.slane %v1268_v31, %v3052_v28 }
 0x15e   : > { %v1277_v43 = vpop.xlane.xlu1 %1276  ;;  %v1351_v50 = vsel %vm789_vm11, %v1350_v47, %v1346_v42 }
 0x15f   : > { %v1274_v36 = vpop.xlane.xlu0 %1273  ;;  %v1359_v8 = vrot.slane %v1277_v43, %v3048_v34  ;;  %v1382_v63 = vsel %vm682_vm6, %v1351_v50, %v1381_v45 }
 0x160   : > { %v1355_v13 = vrot.slane %v1274_v36, %v3052_v28 }
 0x162   : > { %v1283_v49 = vpop.xlane.xlu1 %1282  ;;  %v1360_v0 = vsel %vm789_vm11, %v1359_v8, %v1355_v13 }
 0x163   : > { %v1280_v54 = vpop.xlane.xlu0 %1279  ;;  %v1368_v29 = vrot.slane %v1283_v49, %v3048_v34  ;;  %v1383_v25 = vsel %vm684_vm7, %v1360_v0, %v1382_v63 }
 0x164   : > { %v1364_v56 = vrot.slane %v1280_v54, %v3052_v28 }
 0x166   : > { %v1369_v53 = vsel %vm789_vm11, %v1368_v29, %v1364_v56  ;;  %v1289_v48 = vpop.xlane.xlu1 %1288 }
 0x167   : > { %v1286_v62 = vpop.xlane.xlu0 %1285  ;;  %v1377_v51 = vrot.slane %v1289_v48, %v3048_v34  ;;  %v1384_v3 = vsel %vm686_vm8, %v1369_v53, %v1383_v25 }
 0x168   : > { %v1373_v2 = vrot.slane %v1286_v62, %v3052_v28 }
 0x16a   : > { %v1378_v4 = vsel %vm789_vm11, %v1377_v51, %v1373_v2  ;;  %v1415_v12 = vpop.xlane.xlu1 %1414 }
 0x16b   : > { %v1385_v7 = vsel %vm688_vm9, %v1378_v4, %v1384_v3  ;;  %v1412_v58 = vpop.xlane.xlu0 %1411  ;;  %v1482_v21 = vrot.slane %v1415_v12, %v2835_v16 }
 0x16c   : > { %v1387_v5 = vadd.f32 %v1385_v7, %v1290_v6  ;;  %v1478_v31 = vrot.slane %v1412_v58, %v2838_v17 }
 0x16e   : > { %1388 = vst.msk [vmem:[#allocation3] sm:$0xff] %vm495_vm1, %v1387_v5  ;;  %v1421_v15 = vpop.xlane.xlu1 %1420  ;;  %v1483_v47 = vsel %vm960_vm12, %v1482_v21, %v1478_v31 }
 0x16f   : > { %v1418_v18 = vpop.xlane.xlu0 %1417  ;;  %v1491_v22 = vrot.slane %v1421_v15, %v2835_v16 }
 0x170   : > { %2087 = vperm.xlu0 %2386, %v2303_v14   ;;  %v1487_v26 = vrot.slane %v1418_v18, %v2838_v17 }
 0x172   : > { %v1427_v9 = vpop.xlane.xlu1 %1426  ;;  %v1492_v43 = vsel %vm960_vm12, %v1491_v22, %v1487_v26 }
 0x173   : > { %v1424_v33 = vpop.xlane.xlu0 %1423  ;;  %v1500_v10 = vrot.slane %v1427_v9, %v2835_v16  ;;  %v1547_v13 = vsel %vm676_vm3, %v1492_v43, %v1483_v47 }
 0x174   : > { %v1496_v27 = vrot.slane %v1424_v33, %v2838_v17 }
 0x175   : > { %v1458_v48 = vld [vmem:[#allocation3] sm:$0xff] }
 0x176   : > { %v1433_v40 = vpop.xlane.xlu1 %1432  ;;  %v1501_v38 = vsel %vm960_vm12, %v1500_v10, %v1496_v27 }
 0x177   : > { %v1430_v32 = vpop.xlane.xlu0 %1429  ;;  %v1509_v23 = vrot.slane %v1433_v40, %v2835_v16  ;;  %v1548_v49 = vsel %vm678_vm4, %v1501_v38, %v1547_v13 }
 0x178   : > { %v1505_v35 = vrot.slane %v1430_v32, %v2838_v17 }
 0x17a   : > { %v1439_v19 = vpop.xlane.xlu1 %1438  ;;  %v1510_v42 = vsel %vm960_vm12, %v1509_v23, %v1505_v35 }
 0x17b   : > { %v1436_v41 = vpop.xlane.xlu0 %1435  ;;  %v1518_v61 = vrot.slane %v1439_v19, %v2835_v16  ;;  %v1549_v52 = vsel %vm680_vm5, %v1510_v42, %v1548_v49 }
 0x17c   : > { %v1514_v1 = vrot.slane %v1436_v41, %v2838_v17 }
 0x17e   : > { %v1445_v11 = vpop.xlane.xlu1 %1444  ;;  %v1519_v44 = vsel %vm960_vm12, %v1518_v61, %v1514_v1 }
 0x17f   : > { %v1442_v20 = vpop.xlane.xlu0 %1441  ;;  %v1527_v36 = vrot.slane %v1445_v11, %v2835_v16  ;;  %v1550_v57 = vsel %vm682_vm6, %v1519_v44, %v1549_v52 }
 0x180   : > { %v1523_v37 = vrot.slane %v1442_v20, %v2838_v17 }
 0x182   : > { %v1451_v39 = vpop.xlane.xlu1 %1450  ;;  %v1528_v54 = vsel %vm960_vm12, %v1527_v36, %v1523_v37 }
 0x183   : > { %v1448_v46 = vpop.xlane.xlu0 %1447  ;;  %v1536_v59 = vrot.slane %v1451_v39, %v2835_v16  ;;  %v1551_v0 = vsel %vm684_vm7, %v1528_v54, %v1550_v57 }
 0x184   : > { %v1532_v8 = vrot.slane %v1448_v46, %v2838_v17 }
 0x186   : > { %v1537_v55 = vsel %vm960_vm12, %v1536_v59, %v1532_v8  ;;  %v1457_v29 = vpop.xlane.xlu1 %1456 }
 0x187   : > { %v1454_v56 = vpop.xlane.xlu0 %1453  ;;  %v1545_v50 = vrot.slane %v1457_v29, %v2835_v16  ;;  %v1552_v45 = vsel %vm686_vm8, %v1537_v55, %v1551_v0 }
 0x188   : > { %v1541_v60 = vrot.slane %v1454_v56, %v2838_v17 }
 0x18a   : > { %v1546_v53 = vsel %vm960_vm12, %v1545_v50, %v1541_v60  ;;  %v1601_v63 = vpop.xlane.xlu1 %1600 }
 0x18b   : > { %v1553_v62 = vsel %vm688_vm9, %v1546_v53, %v1552_v45  ;;  %v1598_v51 = vpop.xlane.xlu0 %1597  ;;  %v1668_v32 = vrot.slane %v1601_v63, %v2944_v24 }
 0x18c   : > { %v1555_v2 = vadd.f32 %v1553_v62, %v1458_v48  ;;  %v1664_v19 = vrot.slane %v1598_v51, %v2951_v30 }
 0x18e   : > { %1556 = vst.msk [vmem:[#allocation3] sm:$0xff] %vm1034_vm13, %v1555_v2  ;;  %v1607_v25 = vpop.xlane.xlu1 %1606  ;;  %v1669_v35 = vsel %vm611_vm2, %v1668_v32, %v1664_v19 }
 0x18f   : > { %v1604_v3 = vpop.xlane.xlu0 %1603  ;;  %v1677_v14 = vrot.slane %v1607_v25, %v2944_v24 }
 0x190   : > { %v1673_v15 = vrot.slane %v1604_v3, %v2951_v30 }
 0x192   : > { %v1613_v4 = vpop.xlane.xlu1 %1612  ;;  %v1678_v27 = vsel %vm611_vm2, %v1677_v14, %v1673_v15 }
 0x193   : > { %v1610_v6 = vpop.xlane.xlu0 %1609  ;;  %v1686_v18 = vrot.slane %v1613_v4, %v2944_v24  ;;  %v1733_v36 = vsel %vm676_vm3, %v1678_v27, %v1669_v35 }
 0x194   : > { %v1682_v9 = vrot.slane %v1610_v6, %v2951_v30 }
 0x195   : > { %v1644_v55 = vld [vmem:[#allocation3] sm:$0xff] }
 0x196   : > { %v1619_v7 = vpop.xlane.xlu1 %1618  ;;  %v1687_v21 = vsel %vm611_vm2, %v1686_v18, %v1682_v9 }
 0x197   : > { %v1616_v12 = vpop.xlane.xlu0 %1615  ;;  %v1695_v41 = vrot.slane %v1619_v7, %v2944_v24  ;;  %v1734_v38 = vsel %vm678_vm4, %v1687_v21, %v1733_v36 }
 0x198   : > { %v1691_v22 = vrot.slane %v1616_v12, %v2951_v30 }
 0x19a   : > { %v1625_v58 = vpop.xlane.xlu1 %1624  ;;  %v1696_v61 = vsel %vm611_vm2, %v1695_v41, %v1691_v22 }
 0x19b   : > { %v1622_v5 = vpop.xlane.xlu0 %1621  ;;  %v1704_v26 = vrot.slane %v1625_v58, %v2944_v24  ;;  %v1735_v46 = vsel %vm680_vm5, %v1696_v61, %v1734_v38 }
 0x19c   : > { %v1700_v10 = vrot.slane %v1622_v5, %v2951_v30 }
 0x19e   : > { %v1631_v33 = vpop.xlane.xlu1 %1630  ;;  %v1705_v37 = vsel %vm611_vm2, %v1704_v26, %v1700_v10 }
 0x19f   : > { %v1628_v40 = vpop.xlane.xlu0 %1627  ;;  %v1713_v11 = vrot.slane %v1631_v33, %v2944_v24  ;;  %v1736_v8 = vsel %vm682_vm6, %v1705_v37, %v1735_v46 }
 0x1a0   : > { %v1709_v20 = vrot.slane %v1628_v40, %v2951_v30 }
 0x1a2   : > { %v1637_v31 = vpop.xlane.xlu1 %1636  ;;  %v1714_v39 = vsel %vm611_vm2, %v1713_v11, %v1709_v20 }
 0x1a3   : > { %v1634_v23 = vpop.xlane.xlu0 %1633  ;;  %v1722_v1 = vrot.slane %v1637_v31, %v2944_v24  ;;  %v1737_v49 = vsel %vm684_vm7, %v1714_v39, %v1736_v8 }
 0x1a4   : > { %v1718_v43 = vrot.slane %v1634_v23, %v2951_v30 }
 0x1a6   : > { %v1723_v47 = vsel %vm611_vm2, %v1722_v1, %v1718_v43  ;;  %v1643_v42 = vpop.xlane.xlu1 %1642 }
 0x1a7   : > { %v1640_v59 = vpop.xlane.xlu0 %1639  ;;  %v1731_v13 = vrot.slane %v1643_v42, %v2944_v24  ;;  %v1738_v54 = vsel %vm686_vm8, %v1723_v47, %v1737_v49 }
 0x1a8   : > { %v1727_v44 = vrot.slane %v1640_v59, %v2951_v30 }
 0x1aa   : > { %v1732_v52 = vsel %vm611_vm2, %v1731_v13, %v1727_v44  ;;  %v1769_v56 = vpop.xlane.xlu1 %1768 }
 0x1ab   : > { %v1739_v29 = vsel %vm688_vm9, %v1732_v52, %v1738_v54  ;;  %v1766_v57 = vpop.xlane.xlu0 %1765  ;;  %v1836_v6 = vrot.slane %v1769_v56, %v3048_v34 }
 0x1ac   : > { %v1741_v50 = vadd.f32 %v1739_v29, %v1644_v55  ;;  %v1832_v7 = vrot.slane %v1766_v57, %v3052_v28 }
 0x1ae   : > { %1742 = vst.msk [vmem:[#allocation3] sm:$0xff] %vm692_vm10, %v1741_v50  ;;  %v1775_v60 = vpop.xlane.xlu1 %1774  ;;  %v1837_v19 = vsel %vm789_vm11, %v1836_v6, %v1832_v7 }
 0x1af   : > { %v1772_v0 = vpop.xlane.xlu0 %1771  ;;  %v1845_v63 = vrot.slane %v1775_v60, %v3048_v34 }
 0x1b0   : > { %v1841_v51 = vrot.slane %v1772_v0, %v3052_v28 }
 0x1b2   : > { %v1781_v45 = vpop.xlane.xlu1 %1780  ;;  %v1846_v15 = vsel %vm789_vm11, %v1845_v63, %v1841_v51 }
 0x1b3   : > { %v1778_v24 = vpop.xlane.xlu0 %1777  ;;  %v1854_v2 = vrot.slane %v1781_v45, %v3048_v34  ;;  %v1901_v10 = vsel %vm676_vm3, %v1846_v15, %v1837_v19 }
 0x1b4   : > { %v1850_v25 = vrot.slane %v1778_v24, %v3052_v28 }
 0x1b5   : > { %v1812_v39 = vld [vmem:[#allocation3] sm:$0xff] }
 0x1b6   : > { %v1787_v53 = vpop.xlane.xlu1 %1786  ;;  %v1855_v33 = vsel %vm789_vm11, %v1854_v2, %v1850_v25 }
 0x1b7   : > { %v1784_v30 = vpop.xlane.xlu0 %1783  ;;  %v1863_v12 = vrot.slane %v1787_v53, %v3048_v34  ;;  %v1902_v11 = vsel %vm678_vm4, %v1855_v33, %v1901_v10 }
 0x1b8   : > { %v1859_v58 = vrot.slane %v1784_v30, %v3052_v28 }
 0x1ba   : > { %v1793_v48 = vpop.xlane.xlu1 %1792  ;;  %v1864_v41 = vsel %vm789_vm11, %v1863_v12, %v1859_v58 }
 0x1bb   : > { %v1790_v62 = vpop.xlane.xlu0 %1789  ;;  %v1872_v5 = vrot.slane %v1793_v48, %v3048_v34  ;;  %v1903_v21 = vsel %vm680_vm5, %v1864_v41, %v1902_v11 }
 0x1bc   : > { %v1868_v14 = vrot.slane %v1790_v62, %v3052_v28 }
 0x1be   : > { %v1799_v3 = vpop.xlane.xlu1 %1798  ;;  %v1873_v27 = vsel %vm789_vm11, %v1872_v5, %v1868_v14 }
 0x1bf   : > { %v1796_v4 = vpop.xlane.xlu0 %1795  ;;  %v1881_v18 = vrot.slane %v1799_v3, %v3048_v34  ;;  %v1904_v61 = vsel %vm682_vm6, %v1873_v27, %v1903_v21  ;;  %v2091_v21 = vld [vmem:[%s2666_s18] sm:$0xff]  ;;  %s2399_s18 = scalar_lea.vmem %s3479_s15, 128 }
 0x1c0   : > { %v1877_v9 = vrot.slane %v1796_v4, %v3052_v28  ;;  %p2400_p7 = scmp.ne.s32.totalorder %s3479_s15, %s2399_s18  ;;  %p2407_p12 = scmp.lt.s32.totalorder %s2405_s8, %s2399_s18 }
 0x1c2   : > { %v1805_v40 = vpop.xlane.xlu1 %1804  ;;  %v1882_v20 = vsel %vm789_vm11, %v1881_v18, %v1877_v9  ;;  %p2401_p9 = pnand %p2400_p7, %p2589_p3  ;;  %p2408_p13 = por %p2407_p12, %p2406_p11 }
 0x1c3   : > { %v1802_v32 = vpop.xlane.xlu0 %1801  ;;  %v1890_v22 = vrot.slane %v1805_v40, %v3048_v34  ;;  %v1905_v36 = vsel %vm684_vm7, %v1882_v20, %v1904_v61 }
 0x1c4   : > { %v1886_v26 = vrot.slane %v1802_v32, %v3052_v28  ;;  %p2402_p10 = pneg %p2401_p9 }
 0x1c6   : > { %v1891_v31 = vsel %vm789_vm11, %v1890_v22, %v1886_v26  ;;  %v1811_v23 = vpop.xlane.xlu1 %1810  ;;  %p2409_p0 = pnand %p2408_p13, %p2402_p10 }
 0x1c7   : > { %v1808_v35 = vpop.xlane.xlu0 %1807  ;;  %v1899_v1 = vrot.slane %v1811_v23, %v3048_v34  ;;  %v1906_v37 = vsel %vm686_vm8, %v1891_v31, %v1905_v36 }
 0x1c8   : > { %v1895_v43 = vrot.slane %v1808_v35, %v3052_v28 }
 0x1ca   : > { %v1900_v38 = vsel %vm789_vm11, %v1899_v1, %v1895_v43  ;;  %v1937_v47 = vpop.xlane.xlu1 %1936 }
 0x1cb   : > { %v1907_v46 = vsel %vm688_vm9, %v1900_v38, %v1906_v37  ;;  %v1934_v42 = vpop.xlane.xlu0 %1933  ;;  %v2004_v0 = vrot.slane %v1937_v47, %v2835_v16 }
 0x1cc   : > { %v1909_v59 = vadd.f32 %v1907_v46, %v1812_v39  ;;  %v2000_v45 = vrot.slane %v1934_v42, %v2838_v17 }
 0x1ce   : > { %1910 = vst.msk [vmem:[#allocation3] sm:$0xff] %vm495_vm1, %v1909_v59  ;;  %v1943_v8 = vpop.xlane.xlu1 %1942  ;;  %v2005_v4 = vsel %vm960_vm12, %v2004_v0, %v2000_v45 }
 0x1cf   : > { %v1940_v13 = vpop.xlane.xlu0 %1939  ;;  %v2013_v55 = vrot.slane %v1943_v8, %v2835_v16 }
 0x1d0   : > { %v2009_v29 = vrot.slane %v1940_v13, %v2838_v17 }
 0x1d2   : > { %v1949_v44 = vpop.xlane.xlu1 %1948  ;;  %v2014_v62 = vsel %vm960_vm12, %v2013_v55, %v2009_v29 }
 0x1d3   : > { %v1946_v34 = vpop.xlane.xlu0 %1945  ;;  %v2022_v56 = vrot.slane %v1949_v44, %v2835_v16  ;;  %v2069_v58 = vsel %vm676_vm3, %v2014_v62, %v2005_v4 }
 0x1d4   : > { %v2018_v57 = vrot.slane %v1946_v34, %v2838_v17 }
 0x1d5   : > { %v1980_v27 = vld [vmem:[#allocation3] sm:$0xff] }
 0x1d6   : > { %v1955_v49 = vpop.xlane.xlu1 %1954  ;;  %v2023_v2 = vsel %vm960_vm12, %v2022_v56, %v2018_v57 }
 0x1d7   : > { %v1952_v28 = vpop.xlane.xlu0 %1951  ;;  %v2031_v24 = vrot.slane %v1955_v49, %v2835_v16  ;;  %v2070_v14 = vsel %vm678_vm4, %v2023_v2, %v2069_v58 }
 0x1d8   : > { %v2027_v53 = vrot.slane %v1952_v28, %v2838_v17 }
 0x1da   : > { %v1961_v54 = vpop.xlane.xlu1 %1960  ;;  %v2032_v6 = vsel %vm960_vm12, %v2031_v24, %v2027_v53 }
 0x1db   : > { %v1958_v52 = vpop.xlane.xlu0 %1957  ;;  %v2040_v30 = vrot.slane %v1961_v54, %v2835_v16  ;;  %v2071_v18 = vsel %vm680_vm5, %v2032_v6, %v2070_v14 }
 0x1dc   : > { %v2036_v48 = vrot.slane %v1958_v52, %v2838_v17 }
 0x1de   : > { %v1967_v50 = vpop.xlane.xlu1 %1966  ;;  %v2041_v5 = vsel %vm960_vm12, %v2040_v30, %v2036_v48 }
 0x1df   : > { %v1964_v60 = vpop.xlane.xlu0 %1963  ;;  %v2049_v63 = vrot.slane %v1967_v50, %v2835_v16  ;;  %v2072_v32 = vsel %vm682_vm6, %v2041_v5, %v2071_v18 }
 0x1e0   : > { %v2045_v51 = vrot.slane %v1964_v60, %v2838_v17 }
 0x1e2   : > { %v1973_v25 = vpop.xlane.xlu1 %1972  ;;  %v2050_v15 = vsel %vm960_vm12, %v2049_v63, %v2045_v51 }
 0x1e3   : > { %v1970_v3 = vpop.xlane.xlu0 %1969  ;;  %v2058_v7 = vrot.slane %v1973_v25, %v2835_v16  ;;  %v2073_v22 = vsel %vm684_vm7, %v2050_v15, %v2072_v32 }
 0x1e4   : > { %v2054_v12 = vrot.slane %v1970_v3, %v2838_v17 }
 0x1e6   : > { %v2059_v9 = vsel %vm960_vm12, %v2058_v7, %v2054_v12  ;;  %v1979_v33 = vpop.xlane.xlu1 %1978 }
 0x1e7   : > { %v1976_v40 = vpop.xlane.xlu0 %1975  ;;  %v2067_v19 = vrot.slane %v1979_v33, %v2835_v16  ;;  %v2074_v26 = vsel %vm686_vm8, %v2059_v9, %v2073_v22 }
 0x1e8   : > { %v2063_v41 = vrot.slane %v1976_v40, %v2838_v17 }
 0x1ea   : > { %v2068_v10 = vsel %vm960_vm12, %v2067_v19, %v2063_v41 }
 0x1eb   : > { %v2075_v11 = vsel %vm688_vm9, %v2068_v10, %v2074_v26 }
 0x1ec   : > { %v2077_v20 = vadd.f32 %v2075_v11, %v1980_v27 }
 0x1ee   : > { %2078 = vst.msk [vmem:[#allocation3] sm:$0xff] %vm1034_vm13, %v2077_v20 }
 0x1ef   : > { %v2088_v16 = vpop.permute.xlu0 %2087 }
 0x1f5   : > { %v2079_v17 = vld [vmem:[#allocation3] sm:$0xff] }
 0x1f6   : > { %v2090_v31 = vadd.f32 %v2088_v16, %v2079_v17 }
 0x1f8   : > { %v2092_v23 = vadd.f32 %v2091_v21, %v2090_v31 }
 0x1fa   : > { %2093 = vst.msk [vmem:[%s386_s0] sm:$0xff] %vm495_vm1, %v2092_v23 }
 0x1fb   : > { %2412 = shalt.err (!%p2409_p0)
}
 0x1fc   : > { %s2413_s19 = scalar_lea.hbm %s3477_s17, 128  ;;  %s2417_s4 = scalar_lea.hbm %s3541_s6, 512 }
 0x1fd   : > { %p2414_p1 = scmp.ne.s32.totalorder %s3477_s17, %s2413_s19  ;;  %p2418_p5 = scmp.lt.u32.totalorder %s3477_s17, %s3541_s6 }
 0x1fe   : > { %p2419_p6 = scmp.lt.u32.totalorder %s2417_s4, %s2413_s19  ;;  %p2421_p9 = scmp.lt.u32.totalorder %s2413_s19, %s3477_s17 }
 0x1ff   : > { %p2415_p2 = pnand %p2414_p1, %p2589_p3 }
 0x200   : > { %p2420_p7 = por %p2419_p6, %p2418_p5 }
 0x201   : > { %p2416_p4 = pneg %p2415_p2 }
 0x202   : > { %p2422_p10 = por %p2421_p9, %p2420_p7 }
 0x204   : > { %p2423_p11 = pnand %p2422_p10, %p2416_p4 }
 0x206   : > { %2426 = shalt.err (!%p2423_p11)
}
 0x207   : > { %2311 = dma.vmem_to_hbm [thread:$0]  (%p2589_p3), %s3479_s15, 128, %s3477_s17, %s2095_s27  }
 0x208 PF: > { %p2317_p12 = scmp.ge.s32.totalorder %s2493_s30, 2  ;;  %s2122_s10 = sand.u32 1, %s2465_s23  }
 0x209   : > { %s2123_s14 = scalar_lea.sflag [#allocation6], %s2122_s10 }
 0x20a   : > { %p2314_p13 = pnand %p2317_p12, %p2598_p8 }
 0x20c   : > { %2460 = dma.done.wait (!%p2314_p13), %s2123_s14, 128  }
 0x20d   : > { %2462 = vsyncadd (!%p2314_p13), %s2123_s14, 4294967168  ;;  %s21_s30 = sadd.s32 1, %s2493_s30   ;;  %s3555_s11 = sld [smem:[#allocation8_spill]] }
 0x20e   : > { %p18_p0 = scmp.ge.s32.totalorder %s21_s30, 6   ;;  %s3556_s15 = sld [smem:[#allocation9_spill]] }
 0x20f   : > { %s3557_s23 = smov %s2469_s24  ;;  %s3558_s24 = smov %s2473_s25 }
 0x210   : > { %s3559_s25 = smov %s2607_s16  ;;  %s3560_s26 = smov %s2485_s28 }
 0x211   : > { %s3561_s27 = smov %s2489_s29  ;;  %20 = sbr.rel (!%p18_p0) target bundleno = 8 (0x8), region = 101 }
 0x213   : > { %s3562_s28 = smov %s3555_s11 }
 0x214   : > { %s3563_s29 = smov %s3556_s15 }
 0x218   :  { %2128 = vsyncpa [#allocation6], 1 }
 0x219   :  { %2130 = vsyncpa [#allocation6 + $0x1], 1 }

// kernel: drrn_forward_pallas.4
= control target key start
LH: loop header
LB: loop body
LE: loop exit
PB: predicated region body
PF: predicated region fallthrough
CT: control target
= control target key end

     0   :  { %s1921_s18 = smov 0   ;;  %s1923_s19 = smov 0   ;;  %s2796_s0 = inlined_call_operand.vmem [shape: f32[2,16,16,1], index: 0, kind: input, shape index: {}, may-alias: {0,1,2}]   ;;  %s2797_s1 = inlined_call_operand.vmem [shape: f32[2,16,16,1], index: 1, kind: input, shape index: {}, may-alias: {0,1,2}]   ;;  %s2798_s2 = inlined_call_operand.vmem [shape: f32[2,16,16,1], index: 2, kind: input, shape index: {}, may-alias: {0,1,2}]   ;;  %s2799_s3 = inlined_call_operand.vmem [shape: f32[3,3,32], index: 3, kind: input, shape index: {}]   ;;  %s2800_s4 = inlined_call_operand.vmem [shape: f32[1,32], index: 4, kind: input, shape index: {}]   ;;  %s2801_s5 = inlined_call_operand.vmem [shape: f32[2,16,16,32], index: 5, kind: output, shape index: {}]  }
   0x1   :  { %s1925_s20 = smov 0   ;;  %s1927_s21 = smov 0  }
   0x2   :  { %s1929_s22 = smov 0  }
   0x3 LB: > { %s24_s23 = sadd.s32 1, %s1877_s20  ;;  %s27_s24 = sadd.s32 1, %s1881_s21  ;;  %s1885_s22 = sphi %s1929_s22, %s15_s22   ;;  %s1881_s21 = sphi %s1927_s21, %s2806_s21   ;;  %s1877_s20 = sphi %s1925_s20, %s2805_s20   ;;  %s1873_s19 = sphi %s1923_s19, %s2804_s19   ;;  %s1869_s18 = sphi %s1921_s18, %s2803_s18  }
   0x4   : > { %p25_p0 = scmp.ge.s32.totalorder %s24_s23, 2  ;;  %p1753_p1 = scmp.ge.s32.totalorder %s1885_s22, 1 }
   0x5   : > { %p273_p2 = scmp.lt.s32.totalorder %s1885_s22, 5 }
   0x6   : > { %s2808_s23 = smov (%p25_p0, %s24_s23), 0  ;;  %s2810_s24 = smov (!%p25_p0, %s27_s24), %s1881_s21 }
   0x7   : > { %p274_p3 = pnand %p1753_p1, %p273_p2  ;;  %p29_p4 = scmp.ge.s32.totalorder %s2810_s24, 2 }
   0x8   : > { %s1754_s25 = sshll.u32 (!%p274_p3), %s1869_s18, 3  ;;  %p338_p5 = scmp.lt.s32.totalorder (!%p274_p3), %s1873_s19, 1  ;;  %vm410_vm0 = vcmask (!%p274_p3), 7168  }
   0x9   : > { %s2812_s24 = smov (%p29_p4, %s2810_s24), 0  ;;  %277 = sbr.rel (%p274_p3) target bundleno = 308 (0x134), region = 40 }
   0xa   : > { %p340_p6 = scmp.lt.s32.totalorder (!%p274_p3), %s1754_s25, 15  ;;  %s1954_s26 = sadd.s32 (!%p274_p3), 4294967295, %s1754_s25 }
   0xb   : > { %p350_p7 = scmp.gt.s32.totalorder (!%p274_p3), %s1954_s26, 0  ;;  %p1760_p8 = scmp.lt.s32.totalorder (!%p274_p3), %s1954_s26, 15 }
   0xc   : > { %s366_s6 = sadd.s32 (!%p274_p3), 8, %s1754_s25  ;;  %p1779_p10 = scmp.ne.s32.totalorder (!%p274_p3), %s1869_s18, 0 }
   0xd   : > { %p1961_p9 = scmp.lt.s32.totalorder (!%p274_p3), %s366_s6, 15 }
  0x10   : > { %s2814_s19 = smov (!%p338_p5, %s1873_s19), 1  ;;  %s2816_s6 = smov (!%p1961_p9, %s366_s6), 15 }
  0x11   : > { %s341_s27 = scalar_select %p340_p6, %s1754_s25, 15 }
  0x12   : > { %s1956_s28 = sshll.u32 %s2814_s19, 5  ;;  %s2820_s6 = smov (!%p1961_p9, %s2816_s6), 15  ;;  %v1887_v20 = vmov (!%p1779_p10), 0.0  }
  0x13   : > { %s1755_s29 = sshll.u32 %s341_s27, 1  ;;  %s1772_s19 = sshll.u32 %s2820_s6, 1 }
  0x14   : > { %s344_s30 = sadd.s32 %s1956_s28, %s1755_s29 }
  0x15   : > { %s1757_s7 = sshll.u32 %s344_s30, 3 }
  0x16   : > { %s1968_s11 = scalar_lea.vmem %s2796_s0, %s1757_s7  ;;  %s1973_s14 = scalar_lea.vmem %s2801_s5, %s1757_s7 }
  0x17   : > { %v393_v0 = vld [vmem:[%s1968_s11] sm:$0xff]  ;;  %v394_v1 = vld [vmem:[%s1968_s11 + $0x8] sm:$0xff]  ;;  %v395_v2 = vld [vmem:[%s1968_s11 + $0x10] sm:$0xff]  ;;  %s351_s15 = scalar_select %p350_p7, %s1954_s26, 0 }
  0x18   : > { %411 = vst.msk [vmem:[#allocation2 + $0x10] sm:$0xff] %vm410_vm0, %v393_v0  ;;  %412 = vst.msk [vmem:[#allocation2 + $0x18] sm:$0xff] %vm410_vm0, %v394_v1  ;;  %v396_v3 = vld [vmem:[%s1968_s11 + $0x18] sm:$0xff]  ;;  %v397_v4 = vld [vmem:[%s1968_s11 + $0x20] sm:$0xff]  ;;  %s375_s26 = sadd.s32 %s1772_s19, %s1956_s28 }
  0x19   : > { %413 = vst.msk [vmem:[#allocation2 + $0x20] sm:$0xff] %vm410_vm0, %v395_v2  ;;  %v398_v5 = vld [vmem:[%s1968_s11 + $0x28] sm:$0xff]  ;;  %414 = vst.msk [vmem:[#allocation2 + $0x28] sm:$0xff] %vm410_vm0, %v396_v3  ;;  %v399_v6 = vld [vmem:[%s1968_s11 + $0x30] sm:$0xff]  ;;  %s2818_s15 = smov (!%p1760_p8, %s351_s15), 15  ;;  %s1774_s7 = sshll.u32 %s375_s26, 3 }
  0x1a   : > { %415 = vst.msk [vmem:[#allocation2 + $0x30] sm:$0xff] %vm410_vm0, %v397_v4  ;;  %416 = vst.msk [vmem:[#allocation2 + $0x38] sm:$0xff] %vm410_vm0, %v398_v5  ;;  %v400_v7 = vld [vmem:[%s1968_s11 + $0x38] sm:$0xff]  ;;  %v401_v8 = vld [vmem:[%s1968_s11 + $0x40] sm:$0xff]  ;;  %s1765_s16 = sshll.u32 %s2818_s15, 1  ;;  %s377_s10 = scalar_lea.vmem %s2798_s2, %s1774_s7 }
  0x1b   : > { %417 = vst.msk [vmem:[#allocation2 + $0x40] sm:$0xff] %vm410_vm0, %v399_v6  ;;  %418 = vst.msk [vmem:[#allocation2 + $0x48] sm:$0xff] %vm410_vm0, %v400_v7  ;;  %v402_v9 = vld [vmem:[%s1968_s11 + $0x48] sm:$0xff]  ;;  %v403_v10 = vld [vmem:[%s1968_s11 + $0x50] sm:$0xff]  ;;  %s358_s17 = sadd.s32 %s1765_s16, %s1956_s28  ;;  %439 = sbr.rel (%p1779_p10) target bundleno = 35 (0x23), region = 44 }
  0x1c   : > { %419 = vst.msk [vmem:[#allocation2 + $0x50] sm:$0xff] %vm410_vm0, %v401_v8  ;;  %v404_v11 = vld [vmem:[%s1968_s11 + $0x58] sm:$0xff]  ;;  %420 = vst.msk [vmem:[#allocation2 + $0x58] sm:$0xff] %vm410_vm0, %v402_v9  ;;  %v405_v12 = vld [vmem:[%s1968_s11 + $0x60] sm:$0xff]  ;;  %s1767_s25 = sshll.u32 %s358_s17, 3 }
  0x1d   : > { %421 = vst.msk [vmem:[#allocation2 + $0x60] sm:$0xff] %vm410_vm0, %v403_v10  ;;  %422 = vst.msk [vmem:[#allocation2 + $0x68] sm:$0xff] %vm410_vm0, %v404_v11  ;;  %v406_v13 = vld [vmem:[%s1968_s11 + $0x68] sm:$0xff]  ;;  %v407_v14 = vld [vmem:[%s1968_s11 + $0x70] sm:$0xff]  ;;  %s360_s30 = scalar_lea.vmem %s2797_s1, %s1767_s25 }
  0x1e   : > { %423 = vst.msk [vmem:[#allocation2 + $0x70] sm:$0xff] %vm410_vm0, %v405_v12  ;;  %424 = vst.msk [vmem:[#allocation2 + $0x78] sm:$0xff] %vm410_vm0, %v406_v13  ;;  %v408_v15 = vld [vmem:[%s1968_s11 + $0x78] sm:$0xff]  ;;  %v427_v16 = vld [vmem:[%s360_s30] sm:$0xff] }
  0x1f   : > { %425 = vst.msk [vmem:[#allocation2 + $0x80] sm:$0xff] %vm410_vm0, %v407_v14  ;;  %426 = vst.msk [vmem:[#allocation2 + $0x88] sm:$0xff] %vm410_vm0, %v408_v15  ;;  %v428_v17 = vld [vmem:[%s360_s30 + $0x8] sm:$0xff]  ;;  %v431_v18 = vld [vmem:[%s377_s10] sm:$0xff] }
  0x20   : > { %429 = vst.msk [vmem:[#allocation2] sm:$0xff] %vm410_vm0, %v427_v16  ;;  %430 = vst.msk [vmem:[#allocation2 + $0x8] sm:$0xff] %vm410_vm0, %v428_v17  ;;  %v432_v19 = vld [vmem:[%s377_s10 + $0x8] sm:$0xff] }
  0x21   : > { %434 = vst.msk [vmem:[#allocation2 + $0x90] sm:$0xff] %vm410_vm0, %v431_v18  ;;  %435 = vst.msk [vmem:[#allocation2 + $0x98] sm:$0xff] %vm410_vm0, %v432_v19 }
  0x22   : > { %440 = vst.msk [vmem:[#allocation2] sm:$0xff] %vm410_vm0, %v1887_v20  ;;  %441 = vst.msk [vmem:[#allocation2 + $0x8] sm:$0xff] %vm410_vm0, %v1887_v20 }
  0x23 PF: > { %p1780_p11 = scmp.ne.s32.totalorder %s1869_s18, 1 }
  0x24   : > { %v1888_v21 = vmov (!%p1780_p11), 0.0  }
  0x25   : > { %445 = sbr.rel (%p1780_p11) target bundleno = 44 (0x2c), region = 48  ;;  %446 = vst.msk [vmem:[#allocation2 + $0x90] sm:$0xff] (!%p1780_p11), %vm410_vm0, %v1888_v21  ;;  %447 = vst.msk [vmem:[#allocation2 + $0x98] sm:$0xff] (!%p1780_p11), %vm410_vm0, %v1888_v21 }
  0x2c PF: > { %v467_v22 = vld [vmem:[#allocation2 + $0x10] sm:$0xff]  ;;  %v465_v23 = vld [vmem:[#allocation2] sm:$0xff]  ;;  %vm448_vm1 = vcmask 261120   ;;  %v1889_v24 = vmov 0   ;;  %v1890_v25 = vmov 0.0   ;;  %v468_v26 = vld [vmem:[#allocation2 + $0x18] sm:$0xff] }
  0x2d   : > { %1846 = vset.pattern.permute.xlu1 %v1889_v24  ;;  %1845 = vset.pattern.permute.xlu0 %v1889_v24  ;;  %451 = vst.msk [vmem:[#allocation3 + $0x10] sm:$0xff] %vm448_vm1, %v1890_v25  ;;  %452 = vst.msk [vmem:[#allocation3 + $0x18] sm:$0xff] %vm448_vm1, %v1890_v25  ;;  %v466_v27 = vld [vmem:[#allocation2 + $0x8] sm:$0xff]  ;;  %v469_v29 = vld [vmem:[#allocation2 + $0x20] sm:$0xff]  ;;  %vm615_vm2 = vcmask 260096   ;;  %vm753_vm3 = vcmask 1046528  }
  0x2e   : > { %449 = vst.msk [vmem:[#allocation3] sm:$0xff] %vm448_vm1, %v1890_v25  ;;  %450 = vst.msk [vmem:[#allocation3 + $0x8] sm:$0xff] %vm448_vm1, %v1890_v25  ;;  %494 = vperm.xlu1 %1846, %v467_v22   ;;  %484 = vperm.xlu0 %1845, %v465_v23   ;;  %v470_v28 = vld [vmem:[#allocation2 + $0x28] sm:$0xff]  ;;  %v472_v30 = vld [vmem:[#allocation2 + $0x38] sm:$0xff] }
  0x2f   : > { %453 = vst.msk [vmem:[#allocation3 + $0x20] sm:$0xff] %vm448_vm1, %v1890_v25  ;;  %454 = vst.msk [vmem:[#allocation3 + $0x28] sm:$0xff] %vm448_vm1, %v1890_v25  ;;  %v471_v31 = vld [vmem:[#allocation2 + $0x30] sm:$0xff]  ;;  %v474_v32 = vld [vmem:[#allocation2 + $0x48] sm:$0xff] }
  0x30   : > { %455 = vst.msk [vmem:[#allocation3 + $0x30] sm:$0xff] %vm448_vm1, %v1890_v25  ;;  %456 = vst.msk [vmem:[#allocation3 + $0x38] sm:$0xff] %vm448_vm1, %v1890_v25  ;;  %v473_v33 = vld [vmem:[#allocation2 + $0x40] sm:$0xff]  ;;  %v476_v34 = vld [vmem:[#allocation2 + $0x58] sm:$0xff] }
  0x31   : > { %457 = vst.msk [vmem:[#allocation3 + $0x40] sm:$0xff] %vm448_vm1, %v1890_v25  ;;  %458 = vst.msk [vmem:[#allocation3 + $0x48] sm:$0xff] %vm448_vm1, %v1890_v25  ;;  %v475_v35 = vld [vmem:[#allocation2 + $0x50] sm:$0xff]  ;;  %v478_v36 = vld [vmem:[#allocation2 + $0x68] sm:$0xff] }
  0x32   : > { %459 = vst.msk [vmem:[#allocation3 + $0x50] sm:$0xff] %vm448_vm1, %v1890_v25  ;;  %460 = vst.msk [vmem:[#allocation3 + $0x58] sm:$0xff] %vm448_vm1, %v1890_v25  ;;  %499 = vperm.xlu1 %1846, %v468_v26   ;;  %489 = vperm.xlu0 %1845, %v466_v27   ;;  %v477_v37 = vld [vmem:[#allocation2 + $0x60] sm:$0xff]  ;;  %v480_v38 = vld [vmem:[#allocation2 + $0x78] sm:$0xff] }
  0x33   : > { %461 = vst.msk [vmem:[#allocation3 + $0x60] sm:$0xff] %vm448_vm1, %v1890_v25  ;;  %462 = vst.msk [vmem:[#allocation3 + $0x68] sm:$0xff] %vm448_vm1, %v1890_v25  ;;  %v479_v39 = vld [vmem:[#allocation2 + $0x70] sm:$0xff]  ;;  %v841_v40 = vld [vmem:[#allocation2 + $0x88] sm:$0xff] }
  0x34   : > { %463 = vst.msk [vmem:[#allocation3 + $0x70] sm:$0xff] %vm448_vm1, %v1890_v25  ;;  %464 = vst.msk [vmem:[#allocation3 + $0x78] sm:$0xff] %vm448_vm1, %v1890_v25  ;;  %v840_v41 = vld [vmem:[#allocation2 + $0x80] sm:$0xff]  ;;  %v1202_v42 = vld [vmem:[#allocation2 + $0x98] sm:$0xff] }
  0x35   : > { %v1201_v43 = vld [vmem:[#allocation2 + $0x90] sm:$0xff]  ;;  %v2051_v44 = vld [vmem:[%s2799_s3] ss:$0 sm:$0xff]  ;;  %v582_v48 = vld [vmem:[#allocation3 + $0x1] sm:$0xff] }
  0x36   : > { %509 = vperm.xlu1 %1846, %v470_v28   ;;  %504 = vperm.xlu0 %1845, %v469_v29   ;;  %v584_v46 = vld [vmem:[#allocation3 + $0x11] sm:$0xff]  ;;  %v585_v54 = vld [vmem:[#allocation3 + $0x19] sm:$0x7f]  ;;  %v583_v56 = vld [vmem:[#allocation3 + $0x9] sm:$0x7f] }
  0x37   : > { %v2062_v61 = vld [vmem:[%s2799_s3 + $0x1] ss:$0 sm:$0xff]  ;;  %v587_v63 = vld [vmem:[#allocation3 + $0x29] sm:$0x7f]  ;;  %v2077_v4 = vld [vmem:[%s2799_s3 + $0x2] ss:$0 sm:$0xff] }
  0x38   : > { %v586_v2 = vld [vmem:[#allocation3 + $0x21] sm:$0xff]  ;;  %v589_v12 = vld [vmem:[#allocation3 + $0x39] sm:$0x7f]  ;;  %v588_v18 = vld [vmem:[#allocation3 + $0x31] sm:$0xff] }
  0x3a   : > { %519 = vperm.xlu1 %1846, %v472_v30   ;;  %514 = vperm.xlu0 %1845, %v471_v31  }
  0x3e   : > { %529 = vperm.xlu1 %1846, %v474_v32   ;;  %524 = vperm.xlu0 %1845, %v473_v33  }
  0x42   : > { %539 = vperm.xlu1 %1846, %v476_v34   ;;  %534 = vperm.xlu0 %1845, %v475_v35  }
  0x46   : > { %549 = vperm.xlu1 %1846, %v478_v36   ;;  %544 = vperm.xlu0 %1845, %v477_v37  }
  0x4a   : > { %559 = vperm.xlu1 %1846, %v480_v38   ;;  %554 = vperm.xlu0 %1845, %v479_v39  }
  0x4e   : > { %851 = vperm.xlu1 %1846, %v468_v26   ;;  %846 = vperm.xlu0 %1845, %v467_v22  }
  0x52   : > { %861 = vperm.xlu1 %1846, %v470_v28   ;;  %856 = vperm.xlu0 %1845, %v469_v29  }
  0x56   : > { %871 = vperm.xlu1 %1846, %v472_v30   ;;  %866 = vperm.xlu0 %1845, %v471_v31  }
  0x5a   : > { %881 = vperm.xlu1 %1846, %v474_v32   ;;  %876 = vperm.xlu0 %1845, %v473_v33  }
  0x5e   : > { %891 = vperm.xlu1 %1846, %v476_v34   ;;  %886 = vperm.xlu0 %1845, %v475_v35  }
  0x62   : > { %901 = vperm.xlu1 %1846, %v478_v36   ;;  %896 = vperm.xlu0 %1845, %v477_v37  }
  0x66   : > { %911 = vperm.xlu1 %1846, %v480_v38   ;;  %906 = vperm.xlu0 %1845, %v479_v39  }
  0x6a   : > { %921 = vperm.xlu1 %1846, %v841_v40   ;;  %916 = vperm.xlu0 %1845, %v840_v41  }
  0x6e   : > { %1212 = vperm.xlu1 %1846, %v470_v28   ;;  %1207 = vperm.xlu0 %1845, %v469_v29  }
  0x72   : > { %1222 = vperm.xlu1 %1846, %v472_v30   ;;  %1217 = vperm.xlu0 %1845, %v471_v31   ;;  %v591_v30 = vld [vmem:[#allocation3 + $0x49] sm:$0x7f] }
  0x76   : > { %1232 = vperm.xlu1 %1846, %v474_v32   ;;  %1227 = vperm.xlu0 %1845, %v473_v33  }
  0x7a   : > { %1242 = vperm.xlu1 %1846, %v476_v34   ;;  %1237 = vperm.xlu0 %1845, %v475_v35  }
  0x7e   : > { %1252 = vperm.xlu1 %1846, %v478_v36   ;;  %1247 = vperm.xlu0 %1845, %v477_v37   ;;  %v590_v36 = vld [vmem:[#allocation3 + $0x41] sm:$0xff] }
  0x82   : > { %1262 = vperm.xlu1 %1846, %v480_v38   ;;  %1257 = vperm.xlu0 %1845, %v479_v39  }
  0x86   : > { %1272 = vperm.xlu1 %1846, %v841_v40   ;;  %1267 = vperm.xlu0 %1845, %v840_v41  }
  0x8a   : > { %1282 = vperm.xlu1 %1846, %v1202_v42   ;;  %1277 = vperm.xlu0 %1845, %v1201_v43  }
  0xad   : > { %v495_v45 = vpop.permute.xlu1 %494  ;;  %v485_v47 = vpop.permute.xlu0 %484 }
  0xae   : > { %v568_v49 = vmul.f32 %v2051_v44, %v495_v45  ;;  %v566_v50 = vmul.f32 %v2051_v44, %v485_v47  ;;  %v638_v5 = vmul.f32 %v2062_v61, %v495_v45  ;;  %v636_v6 = vmul.f32 %v2062_v61, %v485_v47 }
  0xaf   : > { %v707_v21 = vmul.f32 %v2077_v4, %v495_v45  ;;  %v705_v25 = vmul.f32 %v2077_v4, %v485_v47  ;;  %v593_v47 = vld [vmem:[#allocation3 + $0x59] sm:$0x7f] }
  0xb0   : > { %v600_v51 = vadd.f32 %v584_v46, %v568_v49  ;;  %v598_v52 = vadd.f32 %v582_v48, %v566_v50 }
  0xb1   : > { %v500_v53 = vpop.permute.xlu1 %499  ;;  %v490_v55 = vpop.permute.xlu0 %489  ;;  %v757_v39 = vrot.slane %v707_v21, 1  ;;  %v754_v41 = vrot.slane %v705_v25, 1 }
  0xb2   : > { %617 = vst.msk [vmem:[#allocation3 + $0x11] sm:$0xff] %vm448_vm1, %v600_v51  ;;  %614 = vst.msk [vmem:[#allocation3 + $0x1] sm:$0xff] %vm448_vm1, %v598_v52  ;;  %v569_v57 = vmul.f32 %v2051_v44, %v500_v53  ;;  %v567_v58 = vmul.f32 %v2051_v44, %v490_v55  ;;  %v2086_v16 = vmul.f32 %v2077_v4, %v500_v53 }
  0xb3   : > { %v2092_v19 = vmul.f32 %v2077_v4, %v490_v55  ;;  %v639_v22 = vmul.f32 %v2062_v61, %v500_v53  ;;  %v637_v23 = vmul.f32 %v2062_v61, %v490_v55 }
  0xb4   : > { %v601_v59 = vadd.f32 %v585_v54, %v569_v57  ;;  %v599_v60 = vadd.f32 %v583_v56, %v567_v58  ;;  %v758_v33 = vrot.slane %v2086_v16, 1  ;;  %v592_v54 = vld [vmem:[#allocation3 + $0x51] sm:$0xff]  ;;  %v597_v16 = vld [vmem:[#allocation3 + $0x79] sm:$0x7f] }
  0xb5   : > { %v2064_v62 = vpop.permute.xlu1 %509  ;;  %v2066_v0 = vpop.permute.xlu0 %504  ;;  %v755_v37 = vrot.slane %v2092_v19, 1 }
  0xb6   : > { %618 = vst.msk [vmem:[#allocation3 + $0x19] sm:$0x7f] %vm615_vm2, %v601_v59  ;;  %616 = vst.msk [vmem:[#allocation3 + $0x9] sm:$0x7f] %vm615_vm2, %v599_v60  ;;  %v571_v1 = vmul.f32 %v2051_v44, %v2064_v62  ;;  %v570_v3 = vmul.f32 %v2051_v44, %v2066_v0  ;;  %v641_v42 = vmul.f32 %v2062_v61, %v2064_v62 }
  0xb7   : > { %v640_v43 = vmul.f32 %v2062_v61, %v2066_v0  ;;  %v759_v49 = vsel %vm753_vm3, %v757_v39, %v758_v33  ;;  %v2130_v50 = vmul.f32 %v2077_v4, %v2064_v62  ;;  %v756_v57 = vsel %vm753_vm3, %v754_v41, %v755_v37 }
  0xb8   : > { %v603_v7 = vadd.f32 %v587_v63, %v571_v1  ;;  %v602_v10 = vadd.f32 %v586_v2, %v570_v3  ;;  %v709_v1 = vmul.f32 %v2077_v4, %v2066_v0 }
  0xb9   : > { %v654_v8 = vld [vmem:[#allocation3 + $0x10] sm:$0xff]  ;;  %v652_v9 = vld [vmem:[#allocation3] sm:$0xff]  ;;  %v2081_v11 = vpop.permute.xlu1 %519  ;;  %v2083_v13 = vpop.permute.xlu0 %514  ;;  %v761_v21 = vrot.slane %v2130_v50, 1 }
  0xba   : > { %v670_v14 = vadd.f32 %v654_v8, %v638_v5  ;;  %v668_v15 = vadd.f32 %v652_v9, %v636_v6  ;;  %620 = vst.msk [vmem:[#allocation3 + $0x29] sm:$0x7f] %vm615_vm2, %v603_v7  ;;  %v573_v17 = vmul.f32 %v2051_v44, %v2081_v11  ;;  %v572_v20 = vmul.f32 %v2051_v44, %v2083_v13  ;;  %v595_v9 = vld [vmem:[#allocation3 + $0x69] sm:$0x7f] }
  0xbb   : > { %619 = vst.msk [vmem:[#allocation3 + $0x21] sm:$0xff] %vm448_vm1, %v602_v10  ;;  %v643_v3 = vmul.f32 %v2062_v61, %v2081_v11  ;;  %v2147_v5 = vmul.f32 %v2077_v4, %v2081_v11  ;;  %v642_v6 = vmul.f32 %v2062_v61, %v2083_v13 }
  0xbc   : > { %686 = vst.msk [vmem:[#allocation3 + $0x10] sm:$0xff] %vm448_vm1, %v670_v14  ;;  %684 = vst.msk [vmem:[#allocation3] sm:$0xff] %vm448_vm1, %v668_v15  ;;  %v605_v24 = vadd.f32 %v589_v12, %v573_v17  ;;  %v604_v28 = vadd.f32 %v588_v18, %v572_v20  ;;  %v711_v14 = vmul.f32 %v2077_v4, %v2083_v13  ;;  %v594_v18 = vld [vmem:[#allocation3 + $0x61] sm:$0xff] }
  0xbd   : > { %v655_v26 = vld [vmem:[#allocation3 + $0x18] sm:$0xff]  ;;  %v653_v27 = vld [vmem:[#allocation3 + $0x8] sm:$0xff]  ;;  %v2103_v29 = vpop.permute.xlu1 %529  ;;  %v2105_v31 = vpop.permute.xlu0 %524 }
  0xbe   : > { %v671_v32 = vadd.f32 %v655_v26, %v639_v22  ;;  %v669_v34 = vadd.f32 %v653_v27, %v637_v23  ;;  %622 = vst.msk [vmem:[#allocation3 + $0x39] sm:$0x7f] %vm615_vm2, %v605_v24  ;;  %v575_v35 = vmul.f32 %v2051_v44, %v2103_v29  ;;  %v574_v38 = vmul.f32 %v2051_v44, %v2105_v31 }
  0xbf   : > { %621 = vst.msk [vmem:[#allocation3 + $0x31] sm:$0xff] %vm448_vm1, %v604_v28  ;;  %v2161_v11 = vmul.f32 %v2077_v4, %v2103_v29  ;;  %v713_v13 = vmul.f32 %v2077_v4, %v2105_v31  ;;  %v760_v26 = vrot.slane %v709_v1, 1  ;;  %v764_v28 = vrot.slane %v2147_v5, 1 }
  0xc0   : > { %687 = vst.msk [vmem:[#allocation3 + $0x18] sm:$0xff] %vm448_vm1, %v671_v32  ;;  %685 = vst.msk [vmem:[#allocation3 + $0x8] sm:$0xff] %vm448_vm1, %v669_v34  ;;  %v607_v40 = vadd.f32 %v591_v30, %v575_v35  ;;  %v606_v45 = vadd.f32 %v590_v36, %v574_v38  ;;  %v645_v30 = vmul.f32 %v2062_v61, %v2103_v29  ;;  %v596_v36 = vld [vmem:[#allocation3 + $0x71] sm:$0xff] }
  0xc1   : > { %v2121_v46 = vpop.permute.xlu1 %539  ;;  %v2123_v48 = vpop.permute.xlu0 %534  ;;  %v644_v32 = vmul.f32 %v2062_v61, %v2105_v31  ;;  %v767_v38 = vrot.slane %v2161_v11, 1  ;;  %v762_v50 = vsel %vm753_vm3, %v760_v26, %v761_v21  ;;  %v2286_v11 = vld [vmem:[%s2799_s3 + $0x6] ss:$0 sm:$0xff] }
  0xc2   : > { %v656_v51 = vld [vmem:[#allocation3 + $0x20] sm:$0xff]  ;;  %v657_v52 = vld [vmem:[#allocation3 + $0x28] sm:$0xff]  ;;  %624 = vst.msk [vmem:[#allocation3 + $0x49] sm:$0x7f] %vm615_vm2, %v607_v40  ;;  %v577_v53 = vmul.f32 %v2051_v44, %v2121_v46  ;;  %v576_v60 = vmul.f32 %v2051_v44, %v2123_v48 }
  0xc3   : > { %v723_v55 = vld [vmem:[#allocation3 + $0x10] sm:$0xff]  ;;  %v721_v56 = vld [vmem:[#allocation3] sm:$0xff]  ;;  %v672_v58 = vadd.f32 %v656_v51, %v640_v43  ;;  %v673_v59 = vadd.f32 %v657_v52, %v641_v42  ;;  %623 = vst.msk [vmem:[#allocation3 + $0x41] sm:$0xff] %vm448_vm1, %v606_v45  ;;  %v766_v43 = vrot.slane %v713_v13, 1  ;;  %v2195_v45 = vmul.f32 %v2077_v4, %v2121_v46 }
  0xc4   : > { %v796_v62 = vadd.f32 %v759_v49, %v723_v55  ;;  %v794_v63 = vadd.f32 %v756_v57, %v721_v56  ;;  %v609_v2 = vadd.f32 %v593_v47, %v577_v53  ;;  %v608_v7 = vadd.f32 %v592_v54, %v576_v60  ;;  %v2212_v57 = vld [vmem:[%s2799_s3 + $0x4] ss:$0 sm:$0xff] }
  0xc5   : > { %688 = vst.msk [vmem:[#allocation3 + $0x20] sm:$0xff] %vm448_vm1, %v672_v58  ;;  %689 = vst.msk [vmem:[#allocation3 + $0x28] sm:$0xff] %vm448_vm1, %v673_v59  ;;  %v2151_v8 = vpop.permute.xlu1 %549  ;;  %v2153_v0 = vpop.permute.xlu0 %544  ;;  %v647_v51 = vmul.f32 %v2062_v61, %v2121_v46  ;;  %v646_v55 = vmul.f32 %v2062_v61, %v2123_v48  ;;  %v2207_v56 = vmul.f32 %v2077_v4, %v2123_v48 }
  0xc6   : > { %812 = vst.msk [vmem:[#allocation3 + $0x10] sm:$0xff] %vm448_vm1, %v796_v62  ;;  %810 = vst.msk [vmem:[#allocation3] sm:$0xff] %vm448_vm1, %v794_v63  ;;  %v658_v10 = vld [vmem:[#allocation3 + $0x30] sm:$0xff]  ;;  %v659_v12 = vld [vmem:[#allocation3 + $0x38] sm:$0xff]  ;;  %v579_v15 = vmul.f32 %v2051_v44, %v2151_v8  ;;  %v578_v17 = vmul.f32 %v2051_v44, %v2153_v0  ;;  %v768_v48 = vsel %vm753_vm3, %v766_v43, %v767_v38  ;;  %v770_v63 = vrot.slane %v2195_v45, 1 }
  0xc7   : > { %626 = vst.msk [vmem:[#allocation3 + $0x59] sm:$0x7f] %vm615_vm2, %v609_v2  ;;  %v724_v19 = vld [vmem:[#allocation3 + $0x18] sm:$0x7f]  ;;  %v722_v20 = vld [vmem:[#allocation3 + $0x8] sm:$0x7f]  ;;  %v674_v22 = vadd.f32 %v658_v10, %v642_v6  ;;  %v675_v23 = vadd.f32 %v659_v12, %v643_v3  ;;  %v649_v6 = vmul.f32 %v2062_v61, %v2151_v8 }
  0xc8   : > { %625 = vst.msk [vmem:[#allocation3 + $0x51] sm:$0xff] %vm448_vm1, %v608_v7  ;;  %v797_v24 = vadd.f32 %v758_v33, %v724_v19  ;;  %v795_v25 = vadd.f32 %v755_v37, %v722_v20  ;;  %v611_v27 = vadd.f32 %v595_v9, %v579_v15  ;;  %v610_v34 = vadd.f32 %v594_v18, %v578_v17  ;;  %v2281_v43 = vld [vmem:[%s2799_s3 + $0x5] ss:$0 sm:$0xff] }
  0xc9   : > { %690 = vst.msk [vmem:[#allocation3 + $0x30] sm:$0xff] %vm448_vm1, %v674_v22  ;;  %691 = vst.msk [vmem:[#allocation3 + $0x38] sm:$0xff] %vm448_vm1, %v675_v23  ;;  %v2181_v35 = vpop.permute.xlu1 %559  ;;  %v2183_v33 = vpop.permute.xlu0 %554  ;;  %v763_v37 = vrot.slane %v711_v14, 1  ;;  %v2231_v7 = vmul.f32 %v2077_v4, %v2151_v8  ;;  %v769_v15 = vrot.slane %v2207_v56, 1  ;;  %v648_v17 = vmul.f32 %v2062_v61, %v2153_v0 }
  0xca   : > { %813 = vst.msk [vmem:[#allocation3 + $0x18] sm:$0x7f] %vm615_vm2, %v797_v24  ;;  %811 = vst.msk [vmem:[#allocation3 + $0x8] sm:$0x7f] %vm615_vm2, %v795_v25  ;;  %v660_v39 = vld [vmem:[#allocation3 + $0x40] sm:$0xff]  ;;  %v661_v40 = vld [vmem:[#allocation3 + $0x48] sm:$0xff]  ;;  %v581_v29 = vmul.f32 %v2051_v44, %v2181_v35  ;;  %v580_v31 = vmul.f32 %v2051_v44, %v2183_v33  ;;  %v2248_v23 = vmul.f32 %v2077_v4, %v2153_v0 }
  0xcb   : > { %628 = vst.msk [vmem:[#allocation3 + $0x69] sm:$0x7f] %vm615_vm2, %v611_v27  ;;  %v676_v41 = vadd.f32 %v660_v39, %v644_v32  ;;  %v677_v42 = vadd.f32 %v661_v40, %v645_v30  ;;  %v765_v59 = vsel %vm753_vm3, %v763_v37, %v764_v28  ;;  %v2258_v30 = vmul.f32 %v2077_v4, %v2181_v35 }
  0xcc   : > { %627 = vst.msk [vmem:[#allocation3 + $0x61] sm:$0xff] %vm448_vm1, %v610_v34  ;;  %v725_v47 = vld [vmem:[#allocation3 + $0x20] sm:$0xff]  ;;  %v726_v49 = vld [vmem:[#allocation3 + $0x28] sm:$0x7f]  ;;  %v613_v52 = vadd.f32 %v597_v16, %v581_v29  ;;  %v612_v53 = vadd.f32 %v596_v36, %v580_v31  ;;  %v650_v16 = vmul.f32 %v2062_v61, %v2183_v33  ;;  %v2264_v36 = vmul.f32 %v2077_v4, %v2183_v33 }
  0xcd   : > { %v798_v54 = vadd.f32 %v762_v50, %v725_v47  ;;  %v799_v44 = vadd.f32 %v761_v21, %v726_v49  ;;  %692 = vst.msk [vmem:[#allocation3 + $0x40] sm:$0xff] %vm448_vm1, %v676_v41  ;;  %693 = vst.msk [vmem:[#allocation3 + $0x48] sm:$0xff] %vm448_vm1, %v677_v42  ;;  %v2214_v46 = vpop.permute.xlu1 %851  ;;  %v2216_v58 = vpop.permute.xlu0 %846  ;;  %v771_v49 = vsel %vm753_vm3, %v769_v15, %v770_v63  ;;  %v773_v50 = vrot.slane %v2231_v7, 1 }
  0xce   : > { %630 = vst.msk [vmem:[#allocation3 + $0x79] sm:$0x7f] %vm615_vm2, %v613_v52  ;;  %v929_v9 = vmul.f32 %v2212_v57, %v2214_v46  ;;  %v928_v10 = vmul.f32 %v2212_v57, %v2216_v58  ;;  %v775_v56 = vrot.slane %v2264_v36, 1  ;;  %v1066_v7 = vmul.f32 %v2286_v11, %v2216_v58 }
  0xcf   : > { %v662_v60 = vld [vmem:[#allocation3 + $0x50] sm:$0xff]  ;;  %v663_v62 = vld [vmem:[#allocation3 + $0x58] sm:$0xff]  ;;  %629 = vst.msk [vmem:[#allocation3 + $0x71] sm:$0xff] %vm448_vm1, %v612_v53  ;;  %814 = vst.msk [vmem:[#allocation3 + $0x20] sm:$0xff] %vm448_vm1, %v798_v54 }
  0xd0   : > { %815 = vst.msk [vmem:[#allocation3 + $0x28] sm:$0x7f] %vm615_vm2, %v799_v44  ;;  %v678_v1 = vadd.f32 %v662_v60, %v646_v55  ;;  %v679_v2 = vadd.f32 %v663_v62, %v647_v51  ;;  %v727_v3 = vld [vmem:[#allocation3 + $0x30] sm:$0xff]  ;;  %v728_v5 = vld [vmem:[#allocation3 + $0x38] sm:$0x7f]  ;;  %v772_v44 = vrot.slane %v2248_v23, 1 }
  0xd1   : > { %v800_v12 = vadd.f32 %v765_v59, %v727_v3  ;;  %v801_v14 = vadd.f32 %v764_v28, %v728_v5  ;;  %v945_v18 = vld [vmem:[#allocation3 + $0x9] sm:$0x7f]  ;;  %v944_v8 = vld [vmem:[#allocation3 + $0x1] sm:$0xff]  ;;  %v2242_v19 = vpop.permute.xlu1 %861  ;;  %v2244_v20 = vpop.permute.xlu0 %856  ;;  %v651_v28 = vmul.f32 %v2062_v61, %v2181_v35  ;;  %v947_v0 = vld [vmem:[#allocation3 + $0x19] sm:$0x7f]  ;;  %v776_v55 = vrot.slane %v2258_v30, 1 }
  0xd2   : > { %694 = vst.msk [vmem:[#allocation3 + $0x50] sm:$0xff] %vm448_vm1, %v678_v1  ;;  %695 = vst.msk [vmem:[#allocation3 + $0x58] sm:$0xff] %vm448_vm1, %v679_v2  ;;  %v961_v13 = vadd.f32 %v945_v18, %v929_v9  ;;  %v960_v24 = vadd.f32 %v944_v8, %v928_v10  ;;  %v931_v25 = vmul.f32 %v2212_v57, %v2242_v19  ;;  %v946_v4 = vld [vmem:[#allocation3 + $0x11] sm:$0xff] }
  0xd3   : > { %v664_v21 = vld [vmem:[#allocation3 + $0x60] sm:$0xff]  ;;  %v665_v22 = vld [vmem:[#allocation3 + $0x68] sm:$0xff]  ;;  %816 = vst.msk [vmem:[#allocation3 + $0x30] sm:$0xff] %vm448_vm1, %v800_v12  ;;  %v930_v39 = vmul.f32 %v2212_v57, %v2244_v20  ;;  %v2311_v1 = vmul.f32 %v2286_v11, %v2214_v46  ;;  %v999_v30 = vmul.f32 %v2281_v43, %v2244_v20  ;;  %v2349_v36 = vmul.f32 %v2286_v11, %v2242_v19 }
  0xd4   : > { %817 = vst.msk [vmem:[#allocation3 + $0x38] sm:$0x7f] %vm615_vm2, %v801_v14  ;;  %v680_v26 = vadd.f32 %v664_v21, %v648_v17  ;;  %v681_v27 = vadd.f32 %v665_v22, %v649_v6  ;;  %v729_v32 = vld [vmem:[#allocation3 + $0x40] sm:$0xff]  ;;  %v730_v34 = vld [vmem:[#allocation3 + $0x48] sm:$0x7f]  ;;  %v963_v37 = vadd.f32 %v947_v0, %v931_v25  ;;  %v997_v6 = vmul.f32 %v2281_v43, %v2216_v58 }
  0xd5   : > { %977 = vst.msk [vmem:[#allocation3 + $0x9] sm:$0x7f] %vm615_vm2, %v961_v13  ;;  %v802_v35 = vadd.f32 %v768_v48, %v729_v32  ;;  %v803_v40 = vadd.f32 %v767_v38, %v730_v34  ;;  %v2274_v33 = vpop.permute.xlu1 %871  ;;  %v2276_v31 = vpop.permute.xlu0 %866  ;;  %v962_v38 = vadd.f32 %v946_v4, %v930_v39  ;;  %v998_v48 = vmul.f32 %v2281_v43, %v2214_v46 }
  0xd6   : > { %976 = vst.msk [vmem:[#allocation3 + $0x1] sm:$0xff] %vm448_vm1, %v960_v24  ;;  %696 = vst.msk [vmem:[#allocation3 + $0x60] sm:$0xff] %vm448_vm1, %v680_v26  ;;  %v666_v61 = vld [vmem:[#allocation3 + $0x70] sm:$0xff]  ;;  %v667_v29 = vld [vmem:[#allocation3 + $0x78] sm:$0xff]  ;;  %v933_v47 = vmul.f32 %v2212_v57, %v2274_v33  ;;  %v932_v52 = vmul.f32 %v2212_v57, %v2276_v31  ;;  %v774_v58 = vsel %vm753_vm3, %v772_v44, %v773_v50 }
  0xd7   : > { %697 = vst.msk [vmem:[#allocation3 + $0x68] sm:$0xff] %vm448_vm1, %v681_v27  ;;  %v682_v41 = vadd.f32 %v666_v61, %v650_v16  ;;  %v683_v42 = vadd.f32 %v667_v29, %v651_v28  ;;  %818 = vst.msk [vmem:[#allocation3 + $0x40] sm:$0xff] %vm448_vm1, %v802_v35  ;;  %v949_v51 = vld [vmem:[#allocation3 + $0x29] sm:$0x7f]  ;;  %v948_v2 = vld [vmem:[#allocation3 + $0x21] sm:$0xff]  ;;  %v777_v13 = vsel %vm753_vm3, %v775_v56, %v776_v55  ;;  %v1115_v27 = vrot.slane %v2311_v1, 1 }
  0xd8   : > { %979 = vst.msk [vmem:[#allocation3 + $0x19] sm:$0x7f] %vm615_vm2, %v963_v37  ;;  %819 = vst.msk [vmem:[#allocation3 + $0x48] sm:$0x7f] %vm615_vm2, %v803_v40  ;;  %v965_v59 = vadd.f32 %v949_v51, %v933_v47  ;;  %v964_v45 = vadd.f32 %v948_v2, %v932_v52  ;;  %v1114_v28 = vrot.slane %v1066_v7, 1  ;;  %v1000_v16 = vmul.f32 %v2281_v43, %v2242_v19 }
  0xd9   : > { %v731_v53 = vld [vmem:[#allocation3 + $0x50] sm:$0xff]  ;;  %v732_v54 = vld [vmem:[#allocation3 + $0x58] sm:$0x7f]  ;;  %698 = vst.msk [vmem:[#allocation3 + $0x70] sm:$0xff] %vm448_vm1, %v682_v41  ;;  %699 = vst.msk [vmem:[#allocation3 + $0x78] sm:$0xff] %vm448_vm1, %v683_v42  ;;  %v2313_v3 = vpop.permute.xlu1 %881  ;;  %v2315_v5 = vpop.permute.xlu0 %876  ;;  %v1068_v39 = vmul.f32 %v2286_v11, %v2244_v20  ;;  %v1002_v20 = vmul.f32 %v2281_v43, %v2274_v33  ;;  %v1001_v51 = vmul.f32 %v2281_v43, %v2276_v31 }
  0xda   : > { %978 = vst.msk [vmem:[#allocation3 + $0x11] sm:$0xff] %vm448_vm1, %v962_v38  ;;  %v804_v60 = vadd.f32 %v771_v49, %v731_v53  ;;  %v805_v62 = vadd.f32 %v770_v63, %v732_v54  ;;  %v935_v63 = vmul.f32 %v2212_v57, %v2313_v3  ;;  %v934_v12 = vmul.f32 %v2212_v57, %v2315_v5 }
  0xdb   : > { %981 = vst.msk [vmem:[#allocation3 + $0x29] sm:$0x7f] %vm615_vm2, %v965_v59  ;;  %v951_v10 = vld [vmem:[#allocation3 + $0x39] sm:$0x7f]  ;;  %v950_v21 = vld [vmem:[#allocation3 + $0x31] sm:$0xff]  ;;  %v1116_v53 = vsel %vm753_vm3, %v1114_v28, %v1115_v27  ;;  %v1118_v54 = vrot.slane %v2349_v36, 1 }
  0xdc   : > { %820 = vst.msk [vmem:[#allocation3 + $0x50] sm:$0xff] %vm448_vm1, %v804_v60  ;;  %980 = vst.msk [vmem:[#allocation3 + $0x21] sm:$0xff] %vm448_vm1, %v964_v45  ;;  %v967_v8 = vadd.f32 %v951_v10, %v935_v63  ;;  %v966_v24 = vadd.f32 %v950_v21, %v934_v12  ;;  %v1117_v44 = vrot.slane %v1068_v39, 1  ;;  %v1070_v63 = vmul.f32 %v2286_v11, %v2276_v31 }
  0xdd   : > { %821 = vst.msk [vmem:[#allocation3 + $0x58] sm:$0x7f] %vm615_vm2, %v805_v62  ;;  %v1013_v46 = vld [vmem:[#allocation3] sm:$0xff]  ;;  %v1014_v9 = vld [vmem:[#allocation3 + $0x8] sm:$0xff]  ;;  %v2331_v25 = vpop.permute.xlu1 %891  ;;  %v2333_v26 = vpop.permute.xlu0 %886  ;;  %v2378_v62 = vmul.f32 %v2286_v11, %v2274_v33  ;;  %v2394_v31 = vmul.f32 %v2286_v11, %v2313_v3 }
  0xde   : > { %v733_v14 = vld [vmem:[#allocation3 + $0x60] sm:$0xff]  ;;  %v734_v15 = vld [vmem:[#allocation3 + $0x68] sm:$0x7f]  ;;  %v1029_v17 = vadd.f32 %v1013_v46, %v997_v6  ;;  %v1030_v18 = vadd.f32 %v1014_v9, %v998_v48  ;;  %983 = vst.msk [vmem:[#allocation3 + $0x39] sm:$0x7f] %vm615_vm2, %v967_v8  ;;  %v937_v0 = vmul.f32 %v2212_v57, %v2331_v25  ;;  %v936_v35 = vmul.f32 %v2212_v57, %v2333_v26 }
  0xdf   : > { %v806_v22 = vadd.f32 %v774_v58, %v733_v14  ;;  %v807_v23 = vadd.f32 %v773_v50, %v734_v15  ;;  %982 = vst.msk [vmem:[#allocation3 + $0x31] sm:$0xff] %vm448_vm1, %v966_v24  ;;  %v953_v41 = vld [vmem:[#allocation3 + $0x49] sm:$0x7f]  ;;  %v952_v42 = vld [vmem:[#allocation3 + $0x41] sm:$0xff]  ;;  %v1004_v46 = vmul.f32 %v2281_v43, %v2313_v3  ;;  %v1003_v9 = vmul.f32 %v2281_v43, %v2315_v5 }
  0xe0   : > { %1045 = vst.msk [vmem:[#allocation3] sm:$0xff] %vm448_vm1, %v1029_v17  ;;  %1046 = vst.msk [vmem:[#allocation3 + $0x8] sm:$0xff] %vm448_vm1, %v1030_v18  ;;  %v735_v32 = vld [vmem:[#allocation3 + $0x70] sm:$0xff]  ;;  %v736_v34 = vld [vmem:[#allocation3 + $0x78] sm:$0x7f]  ;;  %v969_v47 = vadd.f32 %v953_v41, %v937_v0  ;;  %v968_v49 = vadd.f32 %v952_v42, %v936_v35  ;;  %v1119_v3 = vsel %vm753_vm3, %v1117_v44, %v1118_v54  ;;  %v1121_v28 = vrot.slane %v2378_v62, 1 }
  0xe1   : > { %822 = vst.msk [vmem:[#allocation3 + $0x60] sm:$0xff] %vm448_vm1, %v806_v22  ;;  %v1015_v37 = vld [vmem:[#allocation3 + $0x10] sm:$0xff]  ;;  %v808_v40 = vadd.f32 %v777_v13, %v735_v32  ;;  %v809_v61 = vadd.f32 %v776_v55, %v736_v34  ;;  %v1016_v29 = vld [vmem:[#allocation3 + $0x18] sm:$0xff]  ;;  %v2356_v19 = vpop.permute.xlu1 %901  ;;  %v2358_v50 = vpop.permute.xlu0 %896  ;;  %v2401_v22 = vmul.f32 %v2286_v11, %v2315_v5  ;;  %v1006_v5 = vmul.f32 %v2281_v43, %v2331_v25 }
  0xe2   : > { %823 = vst.msk [vmem:[#allocation3 + $0x68] sm:$0x7f] %vm615_vm2, %v807_v23  ;;  %v1031_v4 = vadd.f32 %v1015_v37, %v999_v30  ;;  %v1032_v38 = vadd.f32 %v1016_v29, %v1000_v16  ;;  %v939_v52 = vmul.f32 %v2212_v57, %v2356_v19  ;;  %985 = vst.msk [vmem:[#allocation3 + $0x49] sm:$0x7f] %vm615_vm2, %v969_v47  ;;  %v1120_v30 = vrot.slane %v1070_v63, 1 }
  0xe3   : > { %824 = vst.msk [vmem:[#allocation3 + $0x70] sm:$0xff] %vm448_vm1, %v808_v40  ;;  %v1017_v55 = vld [vmem:[#allocation3 + $0x20] sm:$0xff]  ;;  %v1018_v56 = vld [vmem:[#allocation3 + $0x28] sm:$0xff]  ;;  %984 = vst.msk [vmem:[#allocation3 + $0x41] sm:$0xff] %vm448_vm1, %v968_v49  ;;  %v938_v60 = vmul.f32 %v2212_v57, %v2358_v50  ;;  %v1005_v0 = vmul.f32 %v2281_v43, %v2333_v26  ;;  %v1124_v39 = vrot.slane %v2394_v31, 1  ;;  %v1123_v41 = vrot.slane %v2401_v22, 1 }
  0xe4   : > { %825 = vst.msk [vmem:[#allocation3 + $0x78] sm:$0x7f] %vm615_vm2, %v809_v61  ;;  %v955_v59 = vld [vmem:[#allocation3 + $0x59] sm:$0x7f]  ;;  %v1033_v48 = vadd.f32 %v1017_v55, %v1001_v51  ;;  %v1034_v1 = vadd.f32 %v1018_v56, %v1002_v20  ;;  %v954_v6 = vld [vmem:[#allocation3 + $0x51] sm:$0xff]  ;;  %v2428_v49 = vmul.f32 %v2286_v11, %v2331_v25  ;;  %v2432_v20 = vmul.f32 %v2286_v11, %v2333_v26 }
  0xe5   : > { %1047 = vst.msk [vmem:[#allocation3 + $0x10] sm:$0xff] %vm448_vm1, %v1031_v4  ;;  %1048 = vst.msk [vmem:[#allocation3 + $0x18] sm:$0xff] %vm448_vm1, %v1032_v38  ;;  %v971_v2 = vadd.f32 %v955_v59, %v939_v52  ;;  %v970_v10 = vadd.f32 %v954_v6, %v938_v60  ;;  %v2386_v12 = vpop.permute.xlu1 %911  ;;  %v2388_v33 = vpop.permute.xlu0 %906  ;;  %v1122_v44 = vsel %vm753_vm3, %v1120_v30, %v1121_v28 }
  0xe6   : > { %1049 = vst.msk [vmem:[#allocation3 + $0x20] sm:$0xff] %vm448_vm1, %v1033_v48  ;;  %1050 = vst.msk [vmem:[#allocation3 + $0x28] sm:$0xff] %vm448_vm1, %v1034_v1  ;;  %v1019_v58 = vld [vmem:[#allocation3 + $0x30] sm:$0xff]  ;;  %v1020_v17 = vld [vmem:[#allocation3 + $0x38] sm:$0xff]  ;;  %v941_v18 = vmul.f32 %v2212_v57, %v2386_v12  ;;  %v940_v24 = vmul.f32 %v2212_v57, %v2388_v33  ;;  %v1008_v26 = vmul.f32 %v2281_v43, %v2356_v19  ;;  %v1127_v31 = vrot.slane %v2428_v49, 1 }
  0xe7   : > { %v1082_v7 = vld [vmem:[#allocation3] sm:$0xff]  ;;  %v1083_v45 = vld [vmem:[#allocation3 + $0x8] sm:$0x7f]  ;;  %987 = vst.msk [vmem:[#allocation3 + $0x59] sm:$0x7f] %vm615_vm2, %v971_v2  ;;  %v1035_v8 = vadd.f32 %v1019_v58, %v1003_v9  ;;  %v1036_v21 = vadd.f32 %v1020_v17, %v1004_v46  ;;  %v1007_v55 = vmul.f32 %v2281_v43, %v2358_v50  ;;  %v1126_v58 = vrot.slane %v2432_v20, 1 }
  0xe8   : > { %v1154_v14 = vadd.f32 %v1116_v53, %v1082_v7  ;;  %v1155_v15 = vadd.f32 %v1115_v27, %v1083_v45  ;;  %986 = vst.msk [vmem:[#allocation3 + $0x51] sm:$0xff] %vm448_vm1, %v970_v10  ;;  %v2440_v53 = vld [vmem:[%s2799_s3 + $0x8] ss:$0 sm:$0xff]  ;;  %v2488_v30 = vmul.f32 %v2286_v11, %v2386_v12  ;;  %v2510_v20 = vld [vmem:[%s2799_s3 + $0x9] ss:$0 sm:$0xff] }
  0xe9   : > { %v957_v23 = vld [vmem:[#allocation3 + $0x69] sm:$0x7f]  ;;  %1051 = vst.msk [vmem:[#allocation3 + $0x30] sm:$0xff] %vm448_vm1, %v1035_v8  ;;  %1052 = vst.msk [vmem:[#allocation3 + $0x38] sm:$0xff] %vm448_vm1, %v1036_v21  ;;  %v956_v32 = vld [vmem:[#allocation3 + $0x61] sm:$0xff]  ;;  %v2416_v34 = vpop.permute.xlu1 %921  ;;  %v2418_v16 = vpop.permute.xlu0 %916 }
  0xea   : > { %1170 = vst.msk [vmem:[#allocation3] sm:$0xff] %vm448_vm1, %v1154_v14  ;;  %v973_v13 = vadd.f32 %v957_v23, %v941_v18  ;;  %v1021_v35 = vld [vmem:[#allocation3 + $0x40] sm:$0xff]  ;;  %v1022_v40 = vld [vmem:[#allocation3 + $0x48] sm:$0xff]  ;;  %v972_v61 = vadd.f32 %v956_v32, %v940_v24  ;;  %v943_v29 = vmul.f32 %v2212_v57, %v2416_v34  ;;  %v942_v52 = vmul.f32 %v2212_v57, %v2418_v16 }
  0xeb   : > { %1171 = vst.msk [vmem:[#allocation3 + $0x8] sm:$0x7f] %vm615_vm2, %v1155_v15  ;;  %v1037_v42 = vadd.f32 %v1021_v35, %v1005_v0  ;;  %v1038_v38 = vadd.f32 %v1022_v40, %v1006_v5  ;;  %v959_v47 = vld [vmem:[#allocation3 + $0x79] sm:$0x7f]  ;;  %v2450_v57 = vmul.f32 %v2286_v11, %v2356_v19  ;;  %v958_v56 = vld [vmem:[#allocation3 + $0x71] sm:$0xff]  ;;  %v1076_v19 = vmul.f32 %v2286_v11, %v2358_v50 }
  0xec   : > { %v1084_v27 = vld [vmem:[#allocation3 + $0x10] sm:$0xff]  ;;  %v1085_v36 = vld [vmem:[#allocation3 + $0x18] sm:$0x7f]  ;;  %989 = vst.msk [vmem:[#allocation3 + $0x69] sm:$0x7f] %vm615_vm2, %v973_v13  ;;  %v975_v51 = vadd.f32 %v959_v47, %v943_v29  ;;  %v974_v6 = vadd.f32 %v958_v56, %v942_v52  ;;  %v1125_v15 = vsel %vm753_vm3, %v1123_v41, %v1124_v39  ;;  %v1009_v13 = vmul.f32 %v2281_v43, %v2388_v33 }
  0xed   : > { %v1156_v37 = vadd.f32 %v1119_v3, %v1084_v27  ;;  %v1157_v4 = vadd.f32 %v1118_v54, %v1085_v36  ;;  %988 = vst.msk [vmem:[#allocation3 + $0x61] sm:$0xff] %vm448_vm1, %v972_v61  ;;  %v1086_v54 = vld [vmem:[#allocation3 + $0x20] sm:$0xff]  ;;  %v1087_v25 = vld [vmem:[#allocation3 + $0x28] sm:$0x7f]  ;;  %1053 = vst.msk [vmem:[#allocation3 + $0x40] sm:$0xff] %vm448_vm1, %v1037_v42  ;;  %v2454_v59 = vpop.permute.xlu1 %1212  ;;  %v2456_v60 = vpop.permute.xlu0 %1207  ;;  %v1130_v8 = vrot.slane %v2450_v57, 1  ;;  %v1010_v3 = vmul.f32 %v2281_v43, %v2386_v12 }
  0xee   : > { %1054 = vst.msk [vmem:[#allocation3 + $0x48] sm:$0xff] %vm448_vm1, %v1038_v38  ;;  %v1158_v62 = vadd.f32 %v1122_v44, %v1086_v54  ;;  %v1159_v48 = vadd.f32 %v1121_v28, %v1087_v25  ;;  %v1290_v63 = vmul.f32 %v2440_v53, %v2454_v59  ;;  %990 = vst.msk [vmem:[#allocation3 + $0x71] sm:$0xff] %vm448_vm1, %v974_v6  ;;  %v1129_v28 = vrot.slane %v1076_v19, 1 }
  0xef   : > { %1172 = vst.msk [vmem:[#allocation3 + $0x10] sm:$0xff] %vm448_vm1, %v1156_v37  ;;  %v1023_v1 = vld [vmem:[#allocation3 + $0x50] sm:$0xff]  ;;  %v1024_v2 = vld [vmem:[#allocation3 + $0x58] sm:$0xff]  ;;  %v1289_v50 = vmul.f32 %v2440_v53, %v2456_v60  ;;  %v1078_v32 = vmul.f32 %v2286_v11, %v2388_v33  ;;  %v1128_v35 = vsel %vm753_vm3, %v1126_v58, %v1127_v31  ;;  %v1012_v47 = vmul.f32 %v2281_v43, %v2416_v34 }
  0xf0   : > { %1173 = vst.msk [vmem:[#allocation3 + $0x18] sm:$0x7f] %vm615_vm2, %v1157_v4  ;;  %991 = vst.msk [vmem:[#allocation3 + $0x79] sm:$0x7f] %vm615_vm2, %v975_v51  ;;  %v1039_v7 = vadd.f32 %v1023_v1, %v1007_v55  ;;  %v1040_v45 = vadd.f32 %v1024_v2, %v1008_v26  ;;  %v1088_v10 = vld [vmem:[#allocation3 + $0x30] sm:$0xff]  ;;  %v1011_v49 = vmul.f32 %v2281_v43, %v2418_v16  ;;  %v1133_v25 = vrot.slane %v2488_v30, 1 }
  0xf1   : > { %1174 = vst.msk [vmem:[#allocation3 + $0x20] sm:$0xff] %vm448_vm1, %v1158_v62  ;;  %v1089_v14 = vld [vmem:[#allocation3 + $0x38] sm:$0x7f]  ;;  %v1160_v17 = vadd.f32 %v1125_v15, %v1088_v10  ;;  %v2474_v22 = vpop.permute.xlu1 %1222  ;;  %v2476_v23 = vpop.permute.xlu0 %1217  ;;  %v2515_v51 = vld [vmem:[%s2799_s3 + $0xa] ss:$0 sm:$0xff]  ;;  %v1131_v43 = vsel %vm753_vm3, %v1129_v28, %v1130_v8  ;;  %v1132_v44 = vrot.slane %v1078_v32, 1  ;;  %v2528_v1 = vmul.f32 %v2286_v11, %v2416_v34 }
  0xf2   : > { %v1306_v46 = vld [vmem:[#allocation3 + $0x9] sm:$0x7f]  ;;  %v1305_v9 = vld [vmem:[#allocation3 + $0x1] sm:$0xff]  ;;  %1175 = vst.msk [vmem:[#allocation3 + $0x28] sm:$0x7f] %vm615_vm2, %v1159_v48  ;;  %v1161_v18 = vadd.f32 %v1124_v39, %v1089_v14  ;;  %v1292_v27 = vmul.f32 %v2440_v53, %v2474_v22  ;;  %v1291_v36 = vmul.f32 %v2440_v53, %v2476_v23  ;;  %v1359_v34 = vmul.f32 %v2510_v20, %v2454_v59 }
  0xf3   : > { %1055 = vst.msk [vmem:[#allocation3 + $0x50] sm:$0xff] %vm448_vm1, %v1039_v7  ;;  %1056 = vst.msk [vmem:[#allocation3 + $0x58] sm:$0xff] %vm448_vm1, %v1040_v45  ;;  %v1322_v21 = vadd.f32 %v1306_v46, %v1290_v63  ;;  %v1321_v24 = vadd.f32 %v1305_v9, %v1289_v50  ;;  %v1080_v46 = vmul.f32 %v2286_v11, %v2418_v16 }
  0xf4   : > { %1176 = vst.msk [vmem:[#allocation3 + $0x30] sm:$0xff] %vm448_vm1, %v1160_v17  ;;  %v1025_v5 = vld [vmem:[#allocation3 + $0x60] sm:$0xff]  ;;  %v1026_v0 = vld [vmem:[#allocation3 + $0x68] sm:$0xff]  ;;  %v1358_v15 = vmul.f32 %v2510_v20, %v2456_v60  ;;  %v1134_v16 = vsel %vm753_vm3, %v1132_v44, %v1133_v25  ;;  %v2555_v17 = vmul.f32 %v2515_v51, %v2456_v60  ;;  %v2565_v60 = vmul.f32 %v2515_v51, %v2474_v22 }
  0xf5   : > { %1177 = vst.msk [vmem:[#allocation3 + $0x38] sm:$0x7f] %vm615_vm2, %v1161_v18  ;;  %1338 = vst.msk [vmem:[#allocation3 + $0x9] sm:$0x7f] %vm615_vm2, %v1322_v21  ;;  %v1090_v37 = vld [vmem:[#allocation3 + $0x40] sm:$0xff]  ;;  %v1041_v40 = vadd.f32 %v1025_v5, %v1009_v13  ;;  %v1042_v61 = vadd.f32 %v1026_v0, %v1010_v3  ;;  %v2497_v38 = vpop.permute.xlu1 %1232  ;;  %v2499_v33 = vpop.permute.xlu0 %1227  ;;  %v1027_v26 = vld [vmem:[#allocation3 + $0x70] sm:$0xff]  ;;  %v1361_v5 = vmul.f32 %v2510_v20, %v2474_v22 }
  0xf6   : > { %v1091_v39 = vld [vmem:[#allocation3 + $0x48] sm:$0x7f]  ;;  %1337 = vst.msk [vmem:[#allocation3 + $0x1] sm:$0xff] %vm448_vm1, %v1321_v24  ;;  %v1162_v29 = vadd.f32 %v1128_v35, %v1090_v37  ;;  %v1294_v54 = vmul.f32 %v2440_v53, %v2497_v38  ;;  %v1293_v56 = vmul.f32 %v2440_v53, %v2499_v33  ;;  %v1043_v2 = vadd.f32 %v1027_v26, %v1011_v49 }
  0xf7   : > { %v1308_v12 = vld [vmem:[#allocation3 + $0x19] sm:$0x7f]  ;;  %v1163_v4 = vadd.f32 %v1127_v31, %v1091_v39  ;;  %v1307_v42 = vld [vmem:[#allocation3 + $0x11] sm:$0xff]  ;;  %1057 = vst.msk [vmem:[#allocation3 + $0x60] sm:$0xff] %vm448_vm1, %v1041_v40  ;;  %1058 = vst.msk [vmem:[#allocation3 + $0x68] sm:$0xff] %vm448_vm1, %v1042_v61  ;;  %v2551_v31 = vmul.f32 %v2515_v51, %v2454_v59  ;;  %v1136_v21 = vrot.slane %v2528_v1, 1  ;;  %v1360_v35 = vmul.f32 %v2510_v20, %v2476_v23 }
  0xf8   : > { %v1324_v41 = vadd.f32 %v1308_v12, %v1292_v27  ;;  %v1323_v52 = vadd.f32 %v1307_v42, %v1291_v36  ;;  %1178 = vst.msk [vmem:[#allocation3 + $0x40] sm:$0xff] %vm448_vm1, %v1162_v29  ;;  %v1028_v57 = vld [vmem:[#allocation3 + $0x78] sm:$0xff]  ;;  %1059 = vst.msk [vmem:[#allocation3 + $0x70] sm:$0xff] %vm448_vm1, %v1043_v2  ;;  %v1135_v30 = vrot.slane %v1080_v46, 1  ;;  %v1475_v61 = vrot.slane %v2555_v17, 1 }
  0xf9   : > { %1179 = vst.msk [vmem:[#allocation3 + $0x48] sm:$0x7f] %vm615_vm2, %v1163_v4  ;;  %v1310_v55 = vld [vmem:[#allocation3 + $0x29] sm:$0x7f]  ;;  %v1044_v6 = vadd.f32 %v1028_v57, %v1012_v47  ;;  %v1309_v45 = vld [vmem:[#allocation3 + $0x21] sm:$0xff]  ;;  %v2533_v10 = vpop.permute.xlu1 %1242  ;;  %v2535_v14 = vpop.permute.xlu0 %1237  ;;  %v1476_v40 = vrot.slane %v2551_v31, 1  ;;  %v2587_v49 = vmul.f32 %v2515_v51, %v2476_v23  ;;  %v1363_v44 = vmul.f32 %v2510_v20, %v2497_v38 }
  0xfa   : > { %1340 = vst.msk [vmem:[#allocation3 + $0x19] sm:$0x7f] %vm615_vm2, %v1324_v41  ;;  %v1092_v62 = vld [vmem:[#allocation3 + $0x50] sm:$0xff]  ;;  %v1093_v48 = vld [vmem:[#allocation3 + $0x58] sm:$0x7f]  ;;  %v1326_v7 = vadd.f32 %v1310_v55, %v1294_v54  ;;  %v1325_v9 = vadd.f32 %v1309_v45, %v1293_v56  ;;  %v1296_v11 = vmul.f32 %v2440_v53, %v2533_v10  ;;  %v1362_v26 = vmul.f32 %v2510_v20, %v2499_v33 }
  0xfb   : > { %1339 = vst.msk [vmem:[#allocation3 + $0x11] sm:$0xff] %vm448_vm1, %v1323_v52  ;;  %v1164_v19 = vadd.f32 %v1131_v43, %v1092_v62  ;;  %v1165_v63 = vadd.f32 %v1130_v8, %v1093_v48  ;;  %1060 = vst.msk [vmem:[#allocation3 + $0x78] sm:$0xff] %vm448_vm1, %v1044_v6  ;;  %v1295_v8 = vmul.f32 %v2440_v53, %v2535_v14  ;;  %v1479_v62 = vrot.slane %v2565_v60, 1 }
  0xfc   : > { %1342 = vst.msk [vmem:[#allocation3 + $0x29] sm:$0x7f] %vm615_vm2, %v1326_v7  ;;  %v1312_v18 = vld [vmem:[#allocation3 + $0x39] sm:$0x7f]  ;;  %v1311_v27 = vld [vmem:[#allocation3 + $0x31] sm:$0xff]  ;;  %v2608_v45 = vmul.f32 %v2515_v51, %v2497_v38  ;;  %v1364_v17 = vmul.f32 %v2510_v20, %v2535_v14 }
  0xfd   : > { %1180 = vst.msk [vmem:[#allocation3 + $0x50] sm:$0xff] %vm448_vm1, %v1164_v19  ;;  %v1374_v58 = vld [vmem:[#allocation3] sm:$0xff]  ;;  %v1375_v50 = vld [vmem:[#allocation3 + $0x8] sm:$0xff]  ;;  %1341 = vst.msk [vmem:[#allocation3 + $0x21] sm:$0xff] %vm448_vm1, %v1325_v9  ;;  %v1328_v24 = vadd.f32 %v1312_v18, %v1296_v11  ;;  %v1327_v0 = vadd.f32 %v1311_v27, %v1295_v8  ;;  %v2567_v32 = vpop.permute.xlu1 %1252  ;;  %v2569_v36 = vpop.permute.xlu0 %1247  ;;  %v1431_v11 = vmul.f32 %v2515_v51, %v2499_v33 }
  0xfe   : > { %1181 = vst.msk [vmem:[#allocation3 + $0x58] sm:$0x7f] %vm615_vm2, %v1165_v63  ;;  %v1390_v3 = vadd.f32 %v1374_v58, %v1358_v15  ;;  %v1391_v13 = vadd.f32 %v1375_v50, %v1359_v34  ;;  %v1094_v59 = vld [vmem:[#allocation3 + $0x60] sm:$0xff]  ;;  %v1095_v28 = vld [vmem:[#allocation3 + $0x68] sm:$0x7f]  ;;  %v1298_v22 = vmul.f32 %v2440_v53, %v2567_v32  ;;  %v1297_v41 = vmul.f32 %v2440_v53, %v2569_v36 }
  0xff   : > { %v1166_v37 = vadd.f32 %v1134_v16, %v1094_v59  ;;  %v1167_v39 = vadd.f32 %v1133_v25, %v1095_v28  ;;  %1344 = vst.msk [vmem:[#allocation3 + $0x39] sm:$0x7f] %vm615_vm2, %v1328_v24  ;;  %v1096_v43 = vld [vmem:[#allocation3 + $0x70] sm:$0xff]  ;;  %v1137_v25 = vsel %vm753_vm3, %v1135_v30, %v1136_v21  ;;  %v1477_v34 = vsel %vm753_vm3, %v1475_v61, %v1476_v40 }
 0x100   : > { %1406 = vst.msk [vmem:[#allocation3] sm:$0xff] %vm448_vm1, %v1390_v3  ;;  %1407 = vst.msk [vmem:[#allocation3 + $0x8] sm:$0xff] %vm448_vm1, %v1391_v13  ;;  %v1314_v4 = vld [vmem:[#allocation3 + $0x49] sm:$0x7f]  ;;  %v1313_v54 = vld [vmem:[#allocation3 + $0x41] sm:$0xff]  ;;  %v1168_v23 = vadd.f32 %v1137_v25, %v1096_v43  ;;  %v1478_v15 = vrot.slane %v2587_v49, 1  ;;  %v1365_v50 = vmul.f32 %v2510_v20, %v2533_v10  ;;  %v1367_v61 = vmul.f32 %v2510_v20, %v2567_v32 }
 0x101   : > { %1343 = vst.msk [vmem:[#allocation3 + $0x31] sm:$0xff] %vm448_vm1, %v1327_v0  ;;  %1182 = vst.msk [vmem:[#allocation3 + $0x60] sm:$0xff] %vm448_vm1, %v1166_v37  ;;  %v1330_v52 = vadd.f32 %v1314_v4, %v1298_v22  ;;  %v1329_v57 = vadd.f32 %v1313_v54, %v1297_v41  ;;  %v2596_v55 = vpop.permute.xlu1 %1262  ;;  %v2598_v56 = vpop.permute.xlu0 %1257  ;;  %v1482_v30 = vrot.slane %v2608_v45, 1  ;;  %v1433_v37 = vmul.f32 %v2515_v51, %v2535_v14 }
 0x102   : > { %v1376_v12 = vld [vmem:[#allocation3 + $0x10] sm:$0xff]  ;;  %v1377_v29 = vld [vmem:[#allocation3 + $0x18] sm:$0xff]  ;;  %1183 = vst.msk [vmem:[#allocation3 + $0x68] sm:$0x7f] %vm615_vm2, %v1167_v39  ;;  %v1300_v6 = vmul.f32 %v2440_v53, %v2596_v55  ;;  %v1299_v9 = vmul.f32 %v2440_v53, %v2598_v56  ;;  %v1366_v14 = vmul.f32 %v2510_v20, %v2569_v36  ;;  %v1435_v54 = vmul.f32 %v2515_v51, %v2569_v36 }
 0x103   : > { %v1392_v42 = vadd.f32 %v1376_v12, %v1360_v35  ;;  %v1393_v47 = vadd.f32 %v1377_v29, %v1361_v5  ;;  %1346 = vst.msk [vmem:[#allocation3 + $0x49] sm:$0x7f] %vm615_vm2, %v1330_v52  ;;  %v1097_v7 = vld [vmem:[#allocation3 + $0x78] sm:$0x7f]  ;;  %v2636_v5 = vmul.f32 %v2515_v51, %v2533_v10  ;;  %v2653_v12 = vmul.f32 %v2515_v51, %v2567_v32 }
 0x104   : > { %v1378_v48 = vld [vmem:[#allocation3 + $0x20] sm:$0xff]  ;;  %v1379_v2 = vld [vmem:[#allocation3 + $0x28] sm:$0xff]  ;;  %1345 = vst.msk [vmem:[#allocation3 + $0x41] sm:$0xff] %vm448_vm1, %v1329_v57  ;;  %1184 = vst.msk [vmem:[#allocation3 + $0x70] sm:$0xff] %vm448_vm1, %v1168_v23  ;;  %v1169_v33 = vadd.f32 %v1136_v21, %v1097_v7  ;;  %v1481_v21 = vrot.slane %v1431_v11, 1  ;;  %v1369_v45 = vmul.f32 %v2510_v20, %v2596_v55 }
 0x105   : > { %1408 = vst.msk [vmem:[#allocation3 + $0x10] sm:$0xff] %vm448_vm1, %v1392_v42  ;;  %1409 = vst.msk [vmem:[#allocation3 + $0x18] sm:$0xff] %vm448_vm1, %v1393_v47  ;;  %v1394_v19 = vadd.f32 %v1378_v48, %v1362_v26  ;;  %v1395_v63 = vadd.f32 %v1379_v2, %v1363_v44  ;;  %v1316_v46 = vld [vmem:[#allocation3 + $0x59] sm:$0x7f]  ;;  %v1315_v38 = vld [vmem:[#allocation3 + $0x51] sm:$0xff]  ;;  %v2624_v8 = vpop.permute.xlu1 %1272  ;;  %v2626_v3 = vpop.permute.xlu0 %1267  ;;  %v1484_v48 = vrot.slane %v1433_v37, 1 }
 0x106   : > { %v1332_v16 = vadd.f32 %v1316_v46, %v1300_v6  ;;  %v1331_v18 = vadd.f32 %v1315_v38, %v1299_v9  ;;  %v1302_v28 = vmul.f32 %v2440_v53, %v2624_v8  ;;  %1185 = vst.msk [vmem:[#allocation3 + $0x78] sm:$0x7f] %vm615_vm2, %v1169_v33  ;;  %v1301_v10 = vmul.f32 %v2440_v53, %v2626_v3  ;;  %v2676_v2 = vld [vmem:[%s2800_s4] ss:$0 sm:$0xff] }
 0x107   : > { %v1443_v31 = vld [vmem:[#allocation3] sm:$0xff]  ;;  %v1444_v58 = vld [vmem:[#allocation3 + $0x8] sm:$0x7f]  ;;  %1410 = vst.msk [vmem:[#allocation3 + $0x20] sm:$0xff] %vm448_vm1, %v1394_v19  ;;  %1411 = vst.msk [vmem:[#allocation3 + $0x28] sm:$0xff] %vm448_vm1, %v1395_v63  ;;  %v1483_v23 = vsel %vm753_vm3, %v1481_v21, %v1482_v30  ;;  %v1368_v19 = vmul.f32 %v2510_v20, %v2598_v56  ;;  %v1488_v63 = vrot.slane %v2653_v12, 1  ;;  %v2687_v46 = vmul.f32 %v2515_v51, %v2596_v55 }
 0x108   : > { %v1515_v13 = vadd.f32 %v1477_v34, %v1443_v31  ;;  %v1516_v24 = vadd.f32 %v1476_v40, %v1444_v58  ;;  %v1380_v27 = vld [vmem:[#allocation3 + $0x30] sm:$0xff]  ;;  %v1381_v59 = vld [vmem:[#allocation3 + $0x38] sm:$0xff]  ;;  %1348 = vst.msk [vmem:[#allocation3 + $0x59] sm:$0x7f] %vm615_vm2, %v1332_v16  ;;  %v1480_v40 = vsel %vm753_vm3, %v1478_v15, %v1479_v62  ;;  %v1437_v58 = vmul.f32 %v2515_v51, %v2598_v56 }
 0x109   : > { %v1396_v60 = vadd.f32 %v1380_v27, %v1364_v17  ;;  %v1397_v0 = vadd.f32 %v1381_v59, %v1365_v50  ;;  %1347 = vst.msk [vmem:[#allocation3 + $0x51] sm:$0xff] %vm448_vm1, %v1331_v18  ;;  %v1318_v1 = vld [vmem:[#allocation3 + $0x69] sm:$0x7f]  ;;  %v1317_v29 = vld [vmem:[#allocation3 + $0x61] sm:$0xff]  ;;  %v2657_v4 = vpop.permute.xlu1 %1282  ;;  %v2659_v41 = vpop.permute.xlu0 %1277  ;;  %v1370_v56 = vmul.f32 %v2510_v20, %v2626_v3  ;;  %v1371_v21 = vmul.f32 %v2510_v20, %v2624_v8 }
 0x10a   : > { %1531 = vst.msk [vmem:[#allocation3] sm:$0xff] %vm448_vm1, %v1515_v13  ;;  %v1334_v39 = vadd.f32 %v1318_v1, %v1302_v28  ;;  %v1333_v43 = vadd.f32 %v1317_v29, %v1301_v10  ;;  %v1304_v44 = vmul.f32 %v2440_v53, %v2657_v4  ;;  %v1303_v36 = vmul.f32 %v2440_v53, %v2659_v41 }
 0x10b   : > { %1532 = vst.msk [vmem:[#allocation3 + $0x8] sm:$0x7f] %vm615_vm2, %v1516_v24  ;;  %v1382_v49 = vld [vmem:[#allocation3 + $0x40] sm:$0xff]  ;;  %v1383_v52 = vld [vmem:[#allocation3 + $0x48] sm:$0xff]  ;;  %v1487_v53 = vrot.slane %v1435_v54, 1  ;;  %v1490_v1 = vrot.slane %v1437_v58, 1 }
 0x10c   : > { %v1445_v35 = vld [vmem:[#allocation3 + $0x10] sm:$0xff]  ;;  %v1446_v22 = vld [vmem:[#allocation3 + $0x18] sm:$0x7f]  ;;  %1412 = vst.msk [vmem:[#allocation3 + $0x30] sm:$0xff] %vm448_vm1, %v1396_v60  ;;  %1413 = vst.msk [vmem:[#allocation3 + $0x38] sm:$0xff] %vm448_vm1, %v1397_v0  ;;  %v1398_v32 = vadd.f32 %v1382_v49, %v1366_v14  ;;  %v1399_v25 = vadd.f32 %v1383_v52, %v1367_v61  ;;  %v1491_v0 = vrot.slane %v2687_v46, 1  ;;  %v1441_v46 = vmul.f32 %v2515_v51, %v2659_v41 }
 0x10d   : > { %v1517_v42 = vadd.f32 %v1480_v40, %v1445_v35  ;;  %v1518_v47 = vadd.f32 %v1479_v62, %v1446_v22  ;;  %1350 = vst.msk [vmem:[#allocation3 + $0x69] sm:$0x7f] %vm615_vm2, %v1334_v39  ;;  %v1485_v62 = vrot.slane %v2636_v5, 1  ;;  %v1320_v15 = vld [vmem:[#allocation3 + $0x79] sm:$0x7f]  ;;  %v1319_v17 = vld [vmem:[#allocation3 + $0x71] sm:$0xff]  ;;  %v1489_v60 = vsel %vm753_vm3, %v1487_v53, %v1488_v63 }
 0x10e   : > { %v1447_v26 = vld [vmem:[#allocation3 + $0x20] sm:$0xff]  ;;  %v1448_v57 = vld [vmem:[#allocation3 + $0x28] sm:$0x7f]  ;;  %1349 = vst.msk [vmem:[#allocation3 + $0x61] sm:$0xff] %vm448_vm1, %v1333_v43  ;;  %1414 = vst.msk [vmem:[#allocation3 + $0x40] sm:$0xff] %vm448_vm1, %v1398_v32  ;;  %v1336_v50 = vadd.f32 %v1320_v15, %v1304_v44  ;;  %v1335_v27 = vadd.f32 %v1319_v17, %v1303_v36  ;;  %v1440_v40 = vmul.f32 %v2515_v51, %v2624_v8  ;;  %v1496_v58 = vrot.slane %v1441_v46, 1 }
 0x10f   : > { %1533 = vst.msk [vmem:[#allocation3 + $0x10] sm:$0xff] %vm448_vm1, %v1517_v42  ;;  %v1519_v6 = vadd.f32 %v1483_v23, %v1447_v26  ;;  %v1520_v7 = vadd.f32 %v1482_v30, %v1448_v57  ;;  %1415 = vst.msk [vmem:[#allocation3 + $0x48] sm:$0xff] %vm448_vm1, %v1399_v25  ;;  %v1486_v24 = vsel %vm753_vm3, %v1484_v48, %v1485_v62 }
 0x110   : > { %1534 = vst.msk [vmem:[#allocation3 + $0x18] sm:$0x7f] %vm615_vm2, %v1518_v47  ;;  %v1384_v9 = vld [vmem:[#allocation3 + $0x50] sm:$0xff]  ;;  %v1385_v34 = vld [vmem:[#allocation3 + $0x58] sm:$0xff]  ;;  %1352 = vst.msk [vmem:[#allocation3 + $0x79] sm:$0x7f] %vm615_vm2, %v1336_v50  ;;  %v1439_v47 = vmul.f32 %v2515_v51, %v2626_v3  ;;  %v1492_v32 = vsel %vm753_vm3, %v1490_v1, %v1491_v0  ;;  %v1373_v25 = vmul.f32 %v2510_v20, %v2657_v4 }
 0x111   : > { %v1547_v11 = vld [vmem:[#allocation3] sm:$0xff]  ;;  %1535 = vst.msk [vmem:[#allocation3 + $0x20] sm:$0xff] %vm448_vm1, %v1519_v6  ;;  %v1400_v38 = vadd.f32 %v1384_v9, %v1368_v19  ;;  %v1401_v31 = vadd.f32 %v1385_v34, %v1369_v45  ;;  %1351 = vst.msk [vmem:[#allocation3 + $0x71] sm:$0xff] %vm448_vm1, %v1335_v27  ;;  %v1372_v44 = vmul.f32 %v2510_v20, %v2659_v41  ;;  %v1494_v23 = vrot.slane %v1440_v40, 1 }
 0x112   : > { %v1548_v16 = vld [vmem:[#allocation3 + $0x8] sm:$0xff]  ;;  %1536 = vst.msk [vmem:[#allocation3 + $0x28] sm:$0x7f] %vm615_vm2, %v1520_v7  ;;  %v1570_v55 = vadd.f32 %v2676_v2, %v1547_v11  ;;  %v1442_v45 = vmul.f32 %v2515_v51, %v2657_v4 }
 0x113   : > { %v1571_v18 = vadd.f32 %v2676_v2, %v1548_v16  ;;  %v1449_v33 = vld [vmem:[#allocation3 + $0x30] sm:$0xff]  ;;  %v1450_v13 = vld [vmem:[#allocation3 + $0x38] sm:$0x7f]  ;;  %1416 = vst.msk [vmem:[#allocation3 + $0x50] sm:$0xff] %vm448_vm1, %v1400_v38  ;;  %1417 = vst.msk [vmem:[#allocation3 + $0x58] sm:$0xff] %vm448_vm1, %v1401_v31 }
 0x114   : > { %v1521_v59 = vadd.f32 %v1486_v24, %v1449_v33  ;;  %v1522_v28 = vadd.f32 %v1485_v62, %v1450_v13  ;;  %1586 = vst.msk [vmem:[%s1973_s14] sm:$0xff] %vm448_vm1, %v1570_v55  ;;  %v1493_v62 = vrot.slane %v1439_v47, 1  ;;  %v1497_v38 = vrot.slane %v1442_v45, 1 }
 0x115   : > { %1587 = vst.msk [vmem:[%s1973_s14 + $0x8] sm:$0xff] %vm448_vm1, %v1571_v18  ;;  %v1386_v37 = vld [vmem:[#allocation3 + $0x60] sm:$0xff]  ;;  %v1387_v61 = vld [vmem:[#allocation3 + $0x68] sm:$0xff] }
 0x116   : > { %v1549_v30 = vld [vmem:[#allocation3 + $0x10] sm:$0xff]  ;;  %1537 = vst.msk [vmem:[#allocation3 + $0x30] sm:$0xff] %vm448_vm1, %v1521_v59  ;;  %v1451_v35 = vld [vmem:[#allocation3 + $0x40] sm:$0xff]  ;;  %v1452_v22 = vld [vmem:[#allocation3 + $0x48] sm:$0x7f]  ;;  %v1402_v12 = vadd.f32 %v1386_v37, %v1370_v56  ;;  %v1403_v42 = vadd.f32 %v1387_v61, %v1371_v21  ;;  %v1495_v9 = vsel %vm753_vm3, %v1493_v62, %v1494_v23  ;;  %v1498_v24 = vsel %vm753_vm3, %v1496_v58, %v1497_v38 }
 0x117   : > { %v1550_v5 = vld [vmem:[#allocation3 + $0x18] sm:$0xff]  ;;  %1538 = vst.msk [vmem:[#allocation3 + $0x38] sm:$0x7f] %vm615_vm2, %v1522_v28  ;;  %v1572_v39 = vadd.f32 %v2676_v2, %v1549_v30  ;;  %v1523_v14 = vadd.f32 %v1489_v60, %v1451_v35  ;;  %v1524_v29 = vadd.f32 %v1488_v63, %v1452_v22 }
 0x118   : > { %v1573_v10 = vadd.f32 %v2676_v2, %v1550_v5  ;;  %v1551_v49 = vld [vmem:[#allocation3 + $0x20] sm:$0xff]  ;;  %1418 = vst.msk [vmem:[#allocation3 + $0x60] sm:$0xff] %vm448_vm1, %v1402_v12  ;;  %1419 = vst.msk [vmem:[#allocation3 + $0x68] sm:$0xff] %vm448_vm1, %v1403_v42  ;;  %v1388_v48 = vld [vmem:[#allocation3 + $0x70] sm:$0xff] }
 0x119   : > { %1588 = vst.msk [vmem:[%s1973_s14 + $0x10] sm:$0xff] %vm448_vm1, %v1572_v39  ;;  %v1552_v52 = vld [vmem:[#allocation3 + $0x28] sm:$0xff]  ;;  %v1574_v8 = vadd.f32 %v2676_v2, %v1551_v49  ;;  %1539 = vst.msk [vmem:[#allocation3 + $0x40] sm:$0xff] %vm448_vm1, %v1523_v14  ;;  %v1389_v36 = vld [vmem:[#allocation3 + $0x78] sm:$0xff]  ;;  %v1404_v19 = vadd.f32 %v1388_v48, %v1372_v44 }
 0x11a   : > { %1589 = vst.msk [vmem:[%s1973_s14 + $0x18] sm:$0xff] %vm448_vm1, %v1573_v10  ;;  %v1575_v54 = vadd.f32 %v2676_v2, %v1552_v52  ;;  %v1453_v3 = vld [vmem:[#allocation3 + $0x50] sm:$0xff]  ;;  %v1454_v43 = vld [vmem:[#allocation3 + $0x58] sm:$0x7f]  ;;  %v1405_v63 = vadd.f32 %v1389_v36, %v1373_v25 }
 0x11b   : > { %1540 = vst.msk [vmem:[#allocation3 + $0x48] sm:$0x7f] %vm615_vm2, %v1524_v29  ;;  %v1525_v26 = vadd.f32 %v1492_v32, %v1453_v3  ;;  %v1526_v57 = vadd.f32 %v1491_v0, %v1454_v43 }
 0x11c   : > { %1590 = vst.msk [vmem:[%s1973_s14 + $0x20] sm:$0xff] %vm448_vm1, %v1574_v8  ;;  %1591 = vst.msk [vmem:[%s1973_s14 + $0x28] sm:$0xff] %vm448_vm1, %v1575_v54 }
 0x11d   : > { %v1553_v6 = vld [vmem:[#allocation3 + $0x30] sm:$0xff]  ;;  %1541 = vst.msk [vmem:[#allocation3 + $0x50] sm:$0xff] %vm448_vm1, %v1525_v26  ;;  %1420 = vst.msk [vmem:[#allocation3 + $0x70] sm:$0xff] %vm448_vm1, %v1404_v19 }
 0x11e   : > { %v1554_v7 = vld [vmem:[#allocation3 + $0x38] sm:$0xff]  ;;  %v1576_v20 = vadd.f32 %v2676_v2, %v1553_v6  ;;  %1542 = vst.msk [vmem:[#allocation3 + $0x58] sm:$0x7f] %vm615_vm2, %v1526_v57 }
 0x11f   : > { %v1577_v53 = vadd.f32 %v2676_v2, %v1554_v7  ;;  %1421 = vst.msk [vmem:[#allocation3 + $0x78] sm:$0xff] %vm448_vm1, %v1405_v63  ;;  %v1455_v4 = vld [vmem:[#allocation3 + $0x60] sm:$0xff]  ;;  %v1456_v11 = vld [vmem:[#allocation3 + $0x68] sm:$0x7f] }
 0x120   : > { %1592 = vst.msk [vmem:[%s1973_s14 + $0x30] sm:$0xff] %vm448_vm1, %v1576_v20  ;;  %v1555_v34 = vld [vmem:[#allocation3 + $0x40] sm:$0xff]  ;;  %v1527_v16 = vadd.f32 %v1495_v9, %v1455_v4  ;;  %v1528_v31 = vadd.f32 %v1494_v23, %v1456_v11 }
 0x121   : > { %1593 = vst.msk [vmem:[%s1973_s14 + $0x38] sm:$0xff] %vm448_vm1, %v1577_v53  ;;  %v1578_v51 = vadd.f32 %v2676_v2, %v1555_v34 }
 0x122   : > { %v1556_v15 = vld [vmem:[#allocation3 + $0x48] sm:$0xff]  ;;  %1543 = vst.msk [vmem:[#allocation3 + $0x60] sm:$0xff] %vm448_vm1, %v1527_v16 }
 0x123   : > { %v1579_v41 = vadd.f32 %v2676_v2, %v1556_v15  ;;  %1594 = vst.msk [vmem:[%s1973_s14 + $0x40] sm:$0xff] %vm448_vm1, %v1578_v51 }
 0x124   : > { %1544 = vst.msk [vmem:[#allocation3 + $0x68] sm:$0x7f] %vm615_vm2, %v1528_v31  ;;  %v1557_v50 = vld [vmem:[#allocation3 + $0x50] sm:$0xff] }
 0x125   : > { %1595 = vst.msk [vmem:[%s1973_s14 + $0x48] sm:$0xff] %vm448_vm1, %v1579_v41  ;;  %v1558_v17 = vld [vmem:[#allocation3 + $0x58] sm:$0xff]  ;;  %v1580_v55 = vadd.f32 %v2676_v2, %v1557_v50  ;;  %v1457_v33 = vld [vmem:[#allocation3 + $0x70] sm:$0xff] }
 0x126   : > { %v1581_v18 = vadd.f32 %v2676_v2, %v1558_v17  ;;  %v1458_v13 = vld [vmem:[#allocation3 + $0x78] sm:$0x7f]  ;;  %v1529_v27 = vadd.f32 %v1498_v24, %v1457_v33 }
 0x127   : > { %v1530_v59 = vadd.f32 %v1497_v38, %v1458_v13  ;;  %1596 = vst.msk [vmem:[%s1973_s14 + $0x50] sm:$0xff] %vm448_vm1, %v1580_v55 }
 0x128   : > { %1597 = vst.msk [vmem:[%s1973_s14 + $0x58] sm:$0xff] %vm448_vm1, %v1581_v18  ;;  %1545 = vst.msk [vmem:[#allocation3 + $0x70] sm:$0xff] %vm448_vm1, %v1529_v27 }
 0x129   : > { %1546 = vst.msk [vmem:[#allocation3 + $0x78] sm:$0x7f] %vm615_vm2, %v1530_v59  ;;  %v1559_v28 = vld [vmem:[#allocation3 + $0x60] sm:$0xff] }
 0x12a   : > { %v1582_v30 = vadd.f32 %v2676_v2, %v1559_v28 }
 0x12b   : > { %v1560_v56 = vld [vmem:[#allocation3 + $0x68] sm:$0xff] }
 0x12c   : > { %v1583_v5 = vadd.f32 %v2676_v2, %v1560_v56  ;;  %1598 = vst.msk [vmem:[%s1973_s14 + $0x60] sm:$0xff] %vm448_vm1, %v1582_v30 }
 0x12e   : > { %1599 = vst.msk [vmem:[%s1973_s14 + $0x68] sm:$0xff] %vm448_vm1, %v1583_v5 }
 0x12f   : > { %v1561_v60 = vld [vmem:[#allocation3 + $0x70] sm:$0xff] }
 0x130   : > { %v1562_v0 = vld [vmem:[#allocation3 + $0x78] sm:$0xff]  ;;  %v1584_v1 = vadd.f32 %v2676_v2, %v1561_v60 }
 0x131   : > { %v1585_v21 = vadd.f32 %v2676_v2, %v1562_v0 }
 0x132   : > { %1600 = vst.msk [vmem:[%s1973_s14 + $0x70] sm:$0xff] %vm448_vm1, %v1584_v1 }
 0x133   : > { %1601 = vst.msk [vmem:[%s1973_s14 + $0x78] sm:$0xff] %vm448_vm1, %v1585_v21 }
 0x134 PF: > { %s15_s22 = sadd.s32 1, %s1885_s22   ;;  %s2803_s18 = smov %s1877_s20 }
 0x135   : > { %p12_p12 = scmp.ge.s32.totalorder %s15_s22, 6   ;;  %s2804_s19 = smov %s1881_s21 }
 0x136   : > { %s2805_s20 = smov %s2808_s23  ;;  %s2806_s21 = smov %s2812_s24 }
 0x137   :  { %14 = sbr.rel (!%p12_p12) target bundleno = 3 (0x3), region = 89 }

// kernel: drrn_forward_pallas.5
= control target key start
LH: loop header
LB: loop body
LE: loop exit
PB: predicated region body
PF: predicated region fallthrough
CT: control target
= control target key end

     0   :  { %s5710_s27 = smov 0   ;;  %s5712_s28 = smov 0   ;;  %s6998_s0 = inlined_call_operand.vmem [shape: f32[2,16,16,32], index: 0, kind: input, shape index: {}, may-alias: {0,1,2,3,4,17}]   ;;  %s6999_s1 = inlined_call_operand.vmem [shape: f32[2,16,16,32], index: 1, kind: input, shape index: {}, may-alias: {0,1,2,3,4,17}]   ;;  %s7000_s2 = inlined_call_operand.vmem [shape: f32[2,16,16,32], index: 2, kind: input, shape index: {}, may-alias: {0,1,2,3,4,17}]   ;;  %s7001_s3 = inlined_call_operand.vmem [shape: f32[2,16,16,32], index: 3, kind: input, shape index: {}, may-alias: {0,1,2,3,4,17}]   ;;  %s7002_s4 = inlined_call_operand.vmem [shape: f32[2,16,16,32], index: 4, kind: input, shape index: {}, may-alias: {0,1,2,3,4,17}]   ;;  %s7003_s5 = inlined_call_operand.vmem [shape: f32[3,96,32], index: 5, kind: input, shape index: {}]   ;;  %s7004_s6 = inlined_call_operand.vmem [shape: f32[1,32], index: 6, kind: input, shape index: {}]   ;;  %s7005_s7 = inlined_call_operand.vmem [shape: f32[1,32], index: 7, kind: input, shape index: {}]   ;;  %s7006_s8 = inlined_call_operand.vmem [shape: f32[1,32], index: 8, kind: input, shape index: {}]   ;;  %s7007_s9 = inlined_call_operand.vmem [shape: f32[32,32], index: 9, kind: input, shape index: {}]   ;;  %s7008_s10 = inlined_call_operand.vmem [shape: f32[1,32], index: 10, kind: input, shape index: {}]   ;;  %s7009_s11 = inlined_call_operand.vmem [shape: f32[3,96,32], index: 11, kind: input, shape index: {}]   ;;  %s7010_s12 = inlined_call_operand.vmem [shape: f32[1,32], index: 12, kind: input, shape index: {}]   ;;  %s7011_s13 = inlined_call_operand.vmem [shape: f32[1,32], index: 13, kind: input, shape index: {}]   ;;  %s7012_s14 = inlined_call_operand.vmem [shape: f32[1,32], index: 14, kind: input, shape index: {}]   ;;  %s7013_s15 = inlined_call_operand.vmem [shape: f32[32,32], index: 15, kind: input, shape index: {}]   ;;  %s7014_s16 = inlined_call_operand.vmem [shape: f32[1,32], index: 16, kind: input, shape index: {}]   ;;  %s7015_s17 = inlined_call_operand.vmem [shape: f32[2,16,16,32], index: 17, kind: input, shape index: {}, may-alias: {0,1,2,3,4,17}]   ;;  %s7016_s18 = inlined_call_operand.vmem [shape: f32[2,16,16,32], index: 18, kind: output, shape index: {}]  }
   0x1   :  { %7022 = sst [smem:[#allocation12_spill]] %s6998_s0  ;;  %s5714_s29 = smov 0  }
   0x2   :  { %7023 = sst [smem:[#allocation13_spill]] %s6999_s1  ;;  %s5716_s30 = smov 0  }
   0x3   :  { %7024 = sst [smem:[#allocation14_spill]] %s7000_s2  ;;  %s5718_s0 = smov 0  }
   0x4   :  { %7025 = sst [smem:[#allocation15_spill]] %s7012_s14 }
   0x5   :  { %7026 = sst [smem:[#allocation16_spill]] %s7014_s16 }
   0x6   :  { %7027 = sst [smem:[#allocation17_spill]] %s7015_s17 }
   0x7   :  { %7028 = sst [smem:[#allocation18_spill]] %s7016_s18 }
   0x8 LB: > { %7029 = sst [smem:[#allocation5_spill]] %s5599_s29  ;;  %s37_s19 = sadd.s32 1, %s5599_s29  ;;  %s5607_s0 = sphi %s5718_s0, %s28_s0   ;;  %s5603_s30 = sphi %s5716_s30, %s7051_s30   ;;  %s5599_s29 = sphi %s5714_s29, %s7050_s29   ;;  %s5595_s28 = sphi %s5712_s28, %s7049_s28   ;;  %s5591_s27 = sphi %s5710_s27, %s7048_s27  }
   0x9   : > { %7030 = sst [smem:[#allocation6_spill]] %s5603_s30  ;;  %s40_s1 = sadd.s32 1, %s5603_s30 }
   0xa   : > { %7031 = sst [smem:[#allocation7_spill]] %s5607_s0  ;;  %p38_p0 = scmp.ge.s32.totalorder %s37_s19, 2 }
   0xb   : > { %p4506_p1 = scmp.ge.s32.totalorder %s5607_s0, 1  ;;  %p680_p2 = scmp.lt.s32.totalorder %s5607_s0, 5 }
   0xc   : > { %s7053_s19 = smov (%p38_p0, %s37_s19), 0  ;;  %s7055_s1 = smov (!%p38_p0, %s40_s1), %s5603_s30 }
   0xd   : > { %7032 = sst [smem:[#allocation8_spill]] %s7053_s19  ;;  %p681_p3 = pnand %p4506_p1, %p680_p2 }
   0xe   : > { %p42_p4 = scmp.ge.s32.totalorder %s7055_s1, 2 }
   0xf   : > { %684 = sbr.rel (%p681_p3) target bundleno = 1691 (0x69b), region = 92 }
  0x10   : > { %s7057_s1 = smov (%p42_p4, %s7055_s1), 0 }
  0x11   : > { %7033 = sst [smem:[#allocation9_spill]] %s7057_s1 }
  0x16   : > { %s5743_s20 = sshll.u32 %s5591_s27, 3  ;;  %p807_p5 = scmp.lt.s32.totalorder %s5595_s28, 1  ;;  %vm917_vm0 = vcmask 523520  }
  0x17   : > { %p809_p6 = scmp.lt.s32.totalorder %s5743_s20, 15  ;;  %s4522_s2 = sadd.s32 4294967295, %s5743_s20 }
  0x18   : > { %s7059_s28 = smov (!%p807_p5, %s5595_s28), 1  ;;  %p836_p7 = scmp.gt.s32.totalorder %s4522_s2, 0 }
  0x19   : > { %s810_s21 = scalar_select %p809_p6, %s5743_s20, 15 }
  0x1a   : > { %s5747_s22 = sshll.u32 %s7059_s28, 5  ;;  %p4523_p8 = scmp.lt.s32.totalorder %s4522_s2, 15 }
  0x1b   : > { %s4508_s23 = sshll.u32 %s810_s21, 1  ;;  %s4512_s26 = sadd.s32 4294967294, %s5743_s20 }
  0x1c   : > { %s813_s24 = sadd.s32 %s5747_s22, %s4508_s23  ;;  %s7034_s30 = sld [smem:[#allocation12_spill]] }
  0x1d   : > { %s4510_s25 = sshll.u32 %s813_s24, 3  ;;  %s7035_s17 = sld [smem:[#allocation17_spill]] }
  0x1e   : > { %s7037_s18 = sld [smem:[#allocation18_spill]]  ;;  %p819_p9 = scmp.gt.s32.totalorder %s4512_s26, 0 }
  0x1f   : > { %s837_s16 = scalar_select %p836_p7, %s4522_s2, 0 }
  0x20   : > { %s820_s14 = scalar_select %p819_p9, %s4512_s26, 0 }
  0x21   : > { %s7061_s16 = smov (!%p4523_p8, %s837_s16), 15  ;;  %p4513_p10 = scmp.lt.s32.totalorder %s4512_s26, 15 }
  0x22   : > { %s5755_s29 = scalar_lea.vmem %s7034_s30, %s4510_s25  ;;  %s5609_s30 = smov 32  }
  0x23   : > { %s5760_s28 = scalar_lea.vmem %s7035_s17, %s4510_s25  ;;  %v934_v0 = vld [vmem:[%s5755_s29 + $0x8] sm:$0xff]  ;;  %v933_v1 = vld [vmem:[%s5755_s29] sm:$0xff]  ;;  %v936_v2 = vld [vmem:[%s5755_s29 + $0x18] sm:$0xff]  ;;  %s4528_s0 = sshll.u32 %s7061_s16, 1 }
  0x24   : > { %7036 = sst [smem:[#allocation10_spill]] %s5760_s28  ;;  %s5765_s23 = scalar_lea.vmem %s7037_s18, %s4510_s25  ;;  %967 = vrot.lane.b32.xlu1 %v934_v0, %s5609_s30  ;;  %965 = vrot.lane.b32.xlu0 %v933_v1, %s5609_s30  ;;  %v935_v3 = vld [vmem:[%s5755_s29 + $0x10] sm:$0xff]  ;;  %v938_v7 = vld [vmem:[%s5755_s29 + $0x28] sm:$0xff] }
  0x25   : > { %7038 = sst [smem:[#allocation11_spill]] %s5765_s23  ;;  %s844_s19 = sadd.s32 %s4528_s0, %s5747_s22  ;;  %v940_v9 = vld [vmem:[%s5755_s29 + $0x38] sm:$0xff]  ;;  %v937_v10 = vld [vmem:[%s5755_s29 + $0x20] sm:$0xff]  ;;  %v942_v11 = vld [vmem:[%s5755_s29 + $0x48] sm:$0xff] }
  0x26   : > { %s4530_s1 = sshll.u32 %s844_s19, 3  ;;  %s7039_s21 = sld [smem:[#allocation14_spill]]  ;;  %v939_v12 = vld [vmem:[%s5755_s29 + $0x30] sm:$0xff]  ;;  %v944_v13 = vld [vmem:[%s5755_s29 + $0x58] sm:$0xff]  ;;  %v941_v14 = vld [vmem:[%s5755_s29 + $0x40] sm:$0xff] }
  0x27   : > { %s7063_s14 = smov (!%p4513_p10, %s820_s14), 15  ;;  %s852_s18 = sadd.s32 8, %s5743_s20  ;;  %v946_v15 = vld [vmem:[%s5755_s29 + $0x68] sm:$0xff]  ;;  %v943_v16 = vld [vmem:[%s5755_s29 + $0x50] sm:$0xff]  ;;  %v948_v17 = vld [vmem:[%s5755_s29 + $0x78] sm:$0xff] }
  0x28   : > { %971 = vrot.lane.b32.xlu1 %v936_v2, %s5609_s30  ;;  %969 = vrot.lane.b32.xlu0 %v935_v3, %s5609_s30  ;;  %s4518_s2 = sshll.u32 %s7063_s14, 1  ;;  %s7040_s0 = sld [smem:[#allocation13_spill]]  ;;  %v945_v18 = vld [vmem:[%s5755_s29 + $0x60] sm:$0xff]  ;;  %v947_v20 = vld [vmem:[%s5755_s29 + $0x70] sm:$0xff] }
  0x29   : > { %s827_s23 = sadd.s32 %s4518_s2, %s5747_s22  ;;  %p5788_p11 = scmp.lt.s32.totalorder %s852_s18, 15 }
  0x2a   : > { %s4520_s16 = sshll.u32 %s827_s23, 3  ;;  %p4553_p13 = scmp.ne.s32.totalorder %s5591_s27, 0 }
  0x2b   : > { %s7065_s18 = smov (!%p5788_p11, %s852_s18), 15  ;;  %v5610_v48 = vmov (!%p4553_p13), 0.0  }
  0x2c   : > { %s846_s17 = scalar_lea.vmem %s7039_s21, %s4530_s1  ;;  %s7067_s18 = smov (!%p5788_p11, %s7065_s18), 15 }
  0x2d   : > { %v920_v4 = vld [vmem:[%s846_s17] sm:$0xff]  ;;  %v921_v5 = vld [vmem:[%s846_s17 + $0x8] sm:$0xff]  ;;  %s869_s17 = sadd.s32 9, %s5743_s20  ;;  %s4535_s20 = sshll.u32 %s7067_s18, 1 }
  0x2e   : > { %924 = vrot.lane.b32.xlu1 %v920_v4, %s5609_s30  ;;  %s829_s19 = scalar_lea.vmem %s7040_s0, %s4520_s16  ;;  %p5799_p12 = scmp.lt.s32.totalorder %s869_s17, 15 }
  0x2f   : > { %v907_v6 = vld [vmem:[%s829_s19] sm:$0xff]  ;;  %v908_v8 = vld [vmem:[%s829_s19 + $0x8] sm:$0xff]  ;;  %s861_s23 = sadd.s32 %s4535_s20, %s5747_s22 }
  0x30   : > { %911 = vrot.lane.b32.xlu0 %v907_v6, %s5609_s30  ;;  %s7069_s17 = smov (!%p5799_p12, %s869_s17), 15  ;;  %s4537_s24 = sshll.u32 %s861_s23, 3 }
  0x31   : > { %s7071_s17 = smov (!%p5799_p12, %s7069_s17), 15  ;;  %s863_s2 = scalar_lea.vmem %s7001_s3, %s4537_s24 }
  0x32   : > { %926 = vrot.lane.b32.xlu1 %v921_v5, %s5609_s30  ;;  %s4542_s14 = sshll.u32 %s7071_s17, 1  ;;  %v1031_v19 = vld [vmem:[%s863_s2 + $0x8] sm:$0xff]  ;;  %v1030_v22 = vld [vmem:[%s863_s2] sm:$0xff] }
  0x33   : > { %s878_s18 = sadd.s32 %s4542_s14, %s5747_s22 }
  0x34   : > { %913 = vrot.lane.b32.xlu0 %v908_v8, %s5609_s30  ;;  %s4544_s16 = sshll.u32 %s878_s18, 3 }
  0x35   : > { %s880_s19 = scalar_lea.vmem %s7002_s4, %s4544_s16 }
  0x36   : > { %975 = vrot.lane.b32.xlu1 %v938_v7, %s5609_s30  ;;  %v1044_v21 = vld [vmem:[%s880_s19 + $0x8] sm:$0xff]  ;;  %v1043_v23 = vld [vmem:[%s880_s19] sm:$0xff] }
  0x38   : > { %973 = vrot.lane.b32.xlu0 %v937_v10, %s5609_s30 }
  0x3a   : > { %979 = vrot.lane.b32.xlu1 %v940_v9, %s5609_s30 }
  0x3c   : > { %977 = vrot.lane.b32.xlu0 %v939_v12, %s5609_s30 }
  0x3e   : > { %983 = vrot.lane.b32.xlu1 %v942_v11, %s5609_s30 }
  0x40   : > { %981 = vrot.lane.b32.xlu0 %v941_v14, %s5609_s30 }
  0x42   : > { %987 = vrot.lane.b32.xlu1 %v944_v13, %s5609_s30 }
  0x44   : > { %985 = vrot.lane.b32.xlu0 %v943_v16, %s5609_s30 }
  0x46   : > { %991 = vrot.lane.b32.xlu1 %v946_v15, %s5609_s30 }
  0x48   : > { %989 = vrot.lane.b32.xlu0 %v945_v18, %s5609_s30 }
  0x4a   : > { %995 = vrot.lane.b32.xlu1 %v948_v17, %s5609_s30 }
  0x4c   : > { %993 = vrot.lane.b32.xlu0 %v947_v20, %s5609_s30 }
  0x4e   : > { %1036 = vrot.lane.b32.xlu1 %v1031_v19, %s5609_s30 }
  0x50   : > { %1034 = vrot.lane.b32.xlu0 %v1030_v22, %s5609_s30 }
  0x52   : > { %1049 = vrot.lane.b32.xlu1 %v1044_v21, %s5609_s30 }
  0x54   : > { %1047 = vrot.lane.b32.xlu0 %v1043_v23, %s5609_s30 }
  0x96   : > { %v968_v24 = vpop.permute.xlu1 %967  ;;  %v966_v25 = vpop.permute.xlu0 %965 }
  0x97   : > { %1015 = vst.msk [vmem:[#allocation2 + $0x28] sm:$0xff] %vm917_vm0, %v968_v24  ;;  %1014 = vst.msk [vmem:[#allocation2 + $0x20] sm:$0xff] %vm917_vm0, %v966_v25 }
  0x9a   : > { %v972_v26 = vpop.permute.xlu1 %971  ;;  %v970_v27 = vpop.permute.xlu0 %969 }
  0x9b   : > { %1017 = vst.msk [vmem:[#allocation2 + $0x38] sm:$0xff] %vm917_vm0, %v972_v26  ;;  %1016 = vst.msk [vmem:[#allocation2 + $0x30] sm:$0xff] %vm917_vm0, %v970_v27 }
  0xa0   : > { %v925_v28 = vpop.permute.xlu1 %924 }
  0xa1   : > { %931 = vst.msk [vmem:[#allocation2 + $0x10] sm:$0xff] %vm917_vm0, %v925_v28 }
  0xa2   : > { %v912_v30 = vpop.permute.xlu0 %911  ;;  %1062 = vst.msk [vmem:[#allocation2 + $0x10] sm:$0xff] (!%p4553_p13), %vm917_vm0, %v5610_v48 }
  0xa3   : > { %918 = vst.msk [vmem:[#allocation2] sm:$0xff] %vm917_vm0, %v912_v30 }
  0xa4   : > { %v927_v29 = vpop.permute.xlu1 %926  ;;  %1060 = vst.msk [vmem:[#allocation2] sm:$0xff] (!%p4553_p13), %vm917_vm0, %v5610_v48 }
  0xa5   : > { %932 = vst.msk [vmem:[#allocation2 + $0x18] sm:$0xff] %vm917_vm0, %v927_v29 }
  0xa6   : > { %v914_v32 = vpop.permute.xlu0 %913  ;;  %1063 = vst.msk [vmem:[#allocation2 + $0x18] sm:$0xff] (!%p4553_p13), %vm917_vm0, %v5610_v48 }
  0xa7   : > { %919 = vst.msk [vmem:[#allocation2 + $0x8] sm:$0xff] %vm917_vm0, %v914_v32 }
  0xa8   : > { %v976_v31 = vpop.permute.xlu1 %975  ;;  %1061 = vst.msk [vmem:[#allocation2 + $0x8] sm:$0xff] (!%p4553_p13), %vm917_vm0, %v5610_v48 }
  0xa9   : > { %1019 = vst.msk [vmem:[#allocation2 + $0x48] sm:$0xff] %vm917_vm0, %v976_v31 }
  0xaa   : > { %v974_v34 = vpop.permute.xlu0 %973 }
  0xab   : > { %1018 = vst.msk [vmem:[#allocation2 + $0x40] sm:$0xff] %vm917_vm0, %v974_v34 }
  0xac   : > { %v980_v33 = vpop.permute.xlu1 %979 }
  0xad   : > { %1021 = vst.msk [vmem:[#allocation2 + $0x58] sm:$0xff] %vm917_vm0, %v980_v33 }
  0xae   : > { %v978_v36 = vpop.permute.xlu0 %977 }
  0xaf   : > { %1020 = vst.msk [vmem:[#allocation2 + $0x50] sm:$0xff] %vm917_vm0, %v978_v36 }
  0xb0   : > { %v984_v35 = vpop.permute.xlu1 %983 }
  0xb1   : > { %1023 = vst.msk [vmem:[#allocation2 + $0x68] sm:$0xff] %vm917_vm0, %v984_v35 }
  0xb2   : > { %v982_v38 = vpop.permute.xlu0 %981 }
  0xb3   : > { %1022 = vst.msk [vmem:[#allocation2 + $0x60] sm:$0xff] %vm917_vm0, %v982_v38 }
  0xb4   : > { %v988_v37 = vpop.permute.xlu1 %987 }
  0xb5   : > { %1025 = vst.msk [vmem:[#allocation2 + $0x78] sm:$0xff] %vm917_vm0, %v988_v37 }
  0xb6   : > { %v986_v40 = vpop.permute.xlu0 %985 }
  0xb7   : > { %1024 = vst.msk [vmem:[#allocation2 + $0x70] sm:$0xff] %vm917_vm0, %v986_v40 }
  0xb8   : > { %v992_v39 = vpop.permute.xlu1 %991 }
  0xb9   : > { %1027 = vst.msk [vmem:[#allocation2 + $0x88] sm:$0xff] %vm917_vm0, %v992_v39 }
  0xba   : > { %v990_v42 = vpop.permute.xlu0 %989 }
  0xbb   : > { %1026 = vst.msk [vmem:[#allocation2 + $0x80] sm:$0xff] %vm917_vm0, %v990_v42 }
  0xbc   : > { %v996_v41 = vpop.permute.xlu1 %995 }
  0xbd   : > { %1029 = vst.msk [vmem:[#allocation2 + $0x98] sm:$0xff] %vm917_vm0, %v996_v41 }
  0xbe   : > { %v994_v44 = vpop.permute.xlu0 %993 }
  0xbf   : > { %1028 = vst.msk [vmem:[#allocation2 + $0x90] sm:$0xff] %vm917_vm0, %v994_v44 }
  0xc0   : > { %v1037_v43 = vpop.permute.xlu1 %1036 }
  0xc1   : > { %1042 = vst.msk [vmem:[#allocation2 + $0xa8] sm:$0xff] %vm917_vm0, %v1037_v43  ;;  %1059 = sbr.rel (%p4553_p13) target bundleno = 200 (0xc8), region = 96 }
  0xc2   : > { %v1035_v46 = vpop.permute.xlu0 %1034 }
  0xc3   : > { %1041 = vst.msk [vmem:[#allocation2 + $0xa0] sm:$0xff] %vm917_vm0, %v1035_v46 }
  0xc4   : > { %v1050_v45 = vpop.permute.xlu1 %1049 }
  0xc5   : > { %1055 = vst.msk [vmem:[#allocation2 + $0xb8] sm:$0xff] %vm917_vm0, %v1050_v45 }
  0xc6   : > { %v1048_v47 = vpop.permute.xlu0 %1047 }
  0xc7   : > { %1054 = vst.msk [vmem:[#allocation2 + $0xb0] sm:$0xff] %vm917_vm0, %v1048_v47 }
  0xc8 PF: > { %p4554_p0 = scmp.ne.s32.totalorder %s5591_s27, 1 }
  0xc9   : > { %v5611_v49 = vmov (!%p4554_p0), 0.0  }
  0xca   : > { %1067 = sbr.rel (%p4554_p0) target bundleno = 209 (0xd1), region = 100  ;;  %1068 = vst.msk [vmem:[#allocation2 + $0xa0] sm:$0xff] (!%p4554_p0), %vm917_vm0, %v5611_v49  ;;  %1069 = vst.msk [vmem:[#allocation2 + $0xa8] sm:$0xff] (!%p4554_p0), %vm917_vm0, %v5611_v49 }
  0xcb   : > { %1070 = vst.msk [vmem:[#allocation2 + $0xb0] sm:$0xff] (!%p4554_p0), %vm917_vm0, %v5611_v49  ;;  %1071 = vst.msk [vmem:[#allocation2 + $0xb8] sm:$0xff] (!%p4554_p0), %vm917_vm0, %v5611_v49 }
  0xd1 PF: > { %v1072_v50 = vld [vmem:[#allocation2] sm:$0xff]  ;;  %v1073_v51 = vld [vmem:[#allocation2 + $0x8] sm:$0xff]  ;;  %vm1266_vm1 = vcmask 1046528   ;;  %vm1120_vm2 = vcmask 1040384   ;;  %v1074_v56 = vld [vmem:[#allocation2 + $0x10] sm:$0xff]  ;;  %s5612_s29 = smov 96  }
  0xd2   : > { %v1121_v52 = vrot.slane %v1072_v50, 7  ;;  %v1267_v53 = vrot.slane %v1072_v50, 1  ;;  %v1268_v54 = vrot.slane %v1073_v51, 1  ;;  %v1122_v55 = vrot.slane %v1073_v51, 7  ;;  %v1075_v57 = vld [vmem:[#allocation2 + $0x18] sm:$0xff]  ;;  %v1076_v2 = vld [vmem:[#allocation2 + $0x20] sm:$0xff] }
  0xd3   : > { %v1124_v61 = vrot.slane %v1074_v56, 7  ;;  %v1125_v62 = vrot.slane %v1075_v57, 7  ;;  %v1270_v63 = vrot.slane %v1074_v56, 1  ;;  %v1271_v0 = vrot.slane %v1075_v57, 1  ;;  %v1077_v3 = vld [vmem:[#allocation2 + $0x28] sm:$0xff]  ;;  %v1456_v8 = vld [vmem:[%s7003_s5] sm:$0xff] }
  0xd4   : > { %1157 = vrot.lane.b32.xlu0 %v1121_v52, %s5612_s29  ;;  %v1269_v58 = vsel %vm1266_vm1, %v1267_v53, %v1268_v54  ;;  %v1123_v59 = vsel %vm1120_vm2, %v1121_v52, %v1122_v55  ;;  %v1315_v60 = vsel %vm1266_vm1, %v1268_v54, 0.0  ;;  %v1127_v6 = vrot.slane %v1076_v2, 7  ;;  %v1457_v11 = vld [vmem:[%s7003_s5 + $0x8] sm:$0xff]  ;;  %v1458_v12 = vld [vmem:[%s7003_s5 + $0x10] sm:$0xff]  ;;  %v1459_v13 = vld [vmem:[%s7003_s5 + $0x18] sm:$0xff] }
  0xd5   : > { %1339 = vrot.lane.b32.xlu1 %v1269_v58, %s5609_s30  ;;  %v1126_v1 = vsel %vm1120_vm2, %v1124_v61, %v1125_v62  ;;  %v1272_v4 = vsel %vm1266_vm1, %v1270_v63, %v1271_v0  ;;  %v1316_v5 = vsel %vm1266_vm1, %v1271_v0, 0.0  ;;  %v1128_v7 = vrot.slane %v1077_v3, 7  ;;  %v1078_v15 = vld [vmem:[#allocation2 + $0x30] sm:$0xff]  ;;  %v1079_v16 = vld [vmem:[#allocation2 + $0x38] sm:$0xff]  ;;  %v4575_v17 = vld [vmem:[%s7003_s5 + $0x60] sm:$0xff] }
  0xd6   : > { %v1273_v9 = vrot.slane %v1076_v2, 1  ;;  %v1274_v10 = vrot.slane %v1077_v3, 1  ;;  %v4576_v18 = vld [vmem:[%s7003_s5 + $0x68] sm:$0xff]  ;;  %v5363_v19 = vpack.c.bf16 %v1457_v11, %v1456_v8  ;;  %v5367_v20 = vpack.c.bf16 %v1459_v13, %v1458_v12  ;;  %v4577_v21 = vld [vmem:[%s7003_s5 + $0x70] sm:$0xff]  ;;  %v4578_v22 = vld [vmem:[%s7003_s5 + $0x78] sm:$0xff] }
  0xd7   : > { %v1129_v14 = vsel %vm1120_vm2, %v1127_v6, %v1128_v7  ;;  %v1460_v24 = vld [vmem:[%s7003_s5 + $0x20] sm:$0xff]  ;;  %v1461_v25 = vld [vmem:[%s7003_s5 + $0x28] sm:$0xff]  ;;  %v1130_v27 = vrot.slane %v1078_v15, 7  ;;  %v1131_v28 = vrot.slane %v1079_v16, 7  ;;  %v5387_v29 = vpack.c.bf16 %v4576_v18, %v4575_v17  ;;  %v1462_v36 = vld [vmem:[%s7003_s5 + $0x30] sm:$0xff] }
  0xd8   : > { %1159 = vrot.lane.b32.xlu0 %v1123_v59, %s5612_s29  ;;  %v1275_v23 = vsel %vm1266_vm1, %v1273_v9, %v1274_v10  ;;  %v1317_v26 = vsel %vm1266_vm1, %v1274_v10, 0.0  ;;  %5364 = vmatprep.subr.bf16.mxu0 %v5363_v19  ;;  %v5391_v30 = vpack.c.bf16 %v4578_v22, %v4577_v21  ;;  %v5371_v31 = vpack.c.bf16 %v1461_v25, %v1460_v24  ;;  %v4579_v32 = vld [vmem:[%s7003_s5 + $0x80] sm:$0xff]  ;;  %v4580_v33 = vld [vmem:[%s7003_s5 + $0x88] sm:$0xff]  ;;  %v1463_v37 = vld [vmem:[%s7003_s5 + $0x38] sm:$0xff] }
  0xd9   : > { %1341 = vrot.lane.b32.xlu1 %v1315_v60, %s5609_s30  ;;  %5366 = vmatpush3.bf16.msra.mxu0 %v5363_v19  ;;  %v1276_v34 = vrot.slane %v1078_v15, 1  ;;  %v1277_v35 = vrot.slane %v1079_v16, 1  ;;  %v1132_v38 = vsel %vm1120_vm2, %v1130_v27, %v1131_v28  ;;  %v1080_v39 = vld [vmem:[#allocation2 + $0x40] sm:$0xff]  ;;  %v1081_v40 = vld [vmem:[#allocation2 + $0x48] sm:$0xff]  ;;  %v5395_v41 = vpack.c.bf16 %v4580_v33, %v4579_v32  ;;  %v4581_v43 = vld [vmem:[%s7003_s5 + $0x90] sm:$0xff] }
  0xda   : > { %5368 = vmatprep.subr.bf16.mxu0 %v5367_v20  ;;  %5388 = vmatprep.subr.bf16.mxu1 %v5387_v29  ;;  %v5375_v42 = vpack.c.bf16 %v1463_v37, %v1462_v36  ;;  %v4582_v44 = vld [vmem:[%s7003_s5 + $0x98] sm:$0xff]  ;;  %v1464_v46 = vld [vmem:[%s7003_s5 + $0x40] sm:$0xff]  ;;  %v1465_v47 = vld [vmem:[%s7003_s5 + $0x48] sm:$0xff]  ;;  %v1133_v49 = vrot.slane %v1080_v39, 7  ;;  %v1134_v50 = vrot.slane %v1081_v40, 7  ;;  %v1279_v55 = vrot.slane %v1080_v39, 1 }
  0xdb   : > { %5390 = vmatpush3.bf16.msra.mxu1 %v5387_v29  ;;  %v1278_v45 = vsel %vm1266_vm1, %v1276_v34, %v1277_v35  ;;  %v1318_v48 = vsel %vm1266_vm1, %v1277_v35, 0.0  ;;  %v5399_v51 = vpack.c.bf16 %v4582_v44, %v4581_v43  ;;  %v5379_v52 = vpack.c.bf16 %v1465_v47, %v1464_v46  ;;  %v4583_v53 = vld [vmem:[%s7003_s5 + $0xa0] sm:$0xff]  ;;  %v4584_v54 = vld [vmem:[%s7003_s5 + $0xa8] sm:$0xff]  ;;  %v1466_v57 = vld [vmem:[%s7003_s5 + $0x50] sm:$0xff] }
  0xdc   : > { %1161 = vrot.lane.b32.xlu0 %v1124_v61, %s5612_s29  ;;  %5392 = vmatprep.subr.bf16.mxu1 %v5391_v30  ;;  %v1280_v56 = vrot.slane %v1081_v40, 1  ;;  %v1467_v58 = vld [vmem:[%s7003_s5 + $0x58] sm:$0xff]  ;;  %v1135_v59 = vsel %vm1120_vm2, %v1133_v49, %v1134_v50  ;;  %v1082_v60 = vld [vmem:[#allocation2 + $0x50] sm:$0xff]  ;;  %v5403_v62 = vpack.c.bf16 %v4584_v54, %v4583_v53  ;;  %v4607_v7 = vld [vmem:[%s7003_s5 + $0xc0] sm:$0xff]  ;;  %vm1241_vm3 = vcmask 261120  }
  0xdd   : > { %1163 = vrot.lane.b32.xlu1 %v1126_v1, %s5612_s29  ;;  %5370 = vmatpush3.bf16.msra.mxu0 %v5367_v20  ;;  %v1083_v61 = vld [vmem:[#allocation2 + $0x58] sm:$0xff]  ;;  %v5383_v63 = vpack.c.bf16 %v1467_v58, %v1466_v57  ;;  %v4585_v0 = vld [vmem:[%s7003_s5 + $0xb0] sm:$0xff]  ;;  %v4608_v8 = vld [vmem:[%s7003_s5 + $0xc8] sm:$0xff]  ;;  %v1282_v9 = vrot.slane %v1082_v60, 1  ;;  %vm1411_vm4 = vcmask 785920   ;;  %vm1468_vm5 = vcmask 785408  }
  0xde   : > { %5372 = vmatprep.subr.bf16.mxu0 %v5371_v31  ;;  %v4586_v1 = vld [vmem:[%s7003_s5 + $0xb8] sm:$0xff]  ;;  %v1281_v2 = vsel %vm1266_vm1, %v1279_v55, %v1280_v56  ;;  %v1319_v3 = vsel %vm1266_vm1, %v1280_v56, 0.0  ;;  %v1283_v10 = vrot.slane %v1083_v61, 1  ;;  %v5994_v11 = vpack.c.bf16 %v4608_v8, %v4607_v7  ;;  %v1084_v13 = vld [vmem:[#allocation2 + $0x60] sm:$0xff]  ;;  %v1086_v22 = vld [vmem:[#allocation2 + $0x70] sm:$0xff] }
  0xdf   : > { %5394 = vmatpush3.bf16.msra.mxu1 %v5391_v30  ;;  %v1139_v17 = vrot.slane %v1084_v13, 7  ;;  %v1285_v19 = vrot.slane %v1084_v13, 1  ;;  %v1288_v28 = vrot.slane %v1086_v22, 1  ;;  %v1089_v32 = vld [vmem:[#allocation2 + $0x88] sm:$0xff]  ;;  %v1090_v40 = vld [vmem:[#allocation2 + $0x90] sm:$0xff] }
  0xe0   : > { %1343 = vrot.lane.b32.xlu0 %v1272_v4, %s5609_s30  ;;  %5396 = vmatprep.subr.bf16.mxu1 %v5395_v41  ;;  %v1136_v4 = vrot.slane %v1082_v60, 7  ;;  %v1284_v15 = vsel %vm1266_vm1, %v1282_v9, %v1283_v10  ;;  %v1320_v16 = vsel %vm1266_vm1, %v1283_v10, 0.0  ;;  %v1146_v36 = vrot.slane %v1089_v32, 7  ;;  %v1093_v50 = vld [vmem:[#allocation2 + $0xa8] sm:$0xff]  ;;  %v1094_v58 = vld [vmem:[#allocation2 + $0xb0] sm:$0xff] }
  0xe1   : > { %1345 = vrot.lane.b32.xlu1 %v1316_v5, %s5609_s30  ;;  %5374 = vmatpush3.bf16.msra.mxu0 %v5371_v31  ;;  %v1137_v5 = vrot.slane %v1083_v61, 7  ;;  %v1088_v31 = vld [vmem:[#allocation2 + $0x80] sm:$0xff]  ;;  %v1148_v44 = vrot.slane %v1090_v40, 7  ;;  %v1294_v46 = vrot.slane %v1090_v40, 1  ;;  %v1152_v54 = vrot.slane %v1093_v50, 7  ;;  %v4618_v40 = vld [vmem:[%s7003_s5 + $0x118] sm:$0xff] }
  0xe2   : > { %5376 = vmatprep.subr.bf16.mxu0 %v5375_v42  ;;  %v1145_v35 = vrot.slane %v1088_v31, 7  ;;  %v1291_v37 = vrot.slane %v1088_v31, 1  ;;  %v1298_v56 = vrot.slane %v1093_v50, 1 }
  0xe3   : > { %5398 = vmatpush3.bf16.msra.mxu1 %v5395_v41  ;;  %v1138_v12 = vsel %vm1120_vm2, %v1136_v4, %v1137_v5  ;;  %v1091_v41 = vld [vmem:[#allocation2 + $0x98] sm:$0xff] }
  0xe4   : > { %1165 = vrot.lane.b32.xlu0 %v1127_v6, %s5612_s29  ;;  %5400 = vmatprep.subr.bf16.mxu1 %v5399_v51  ;;  %v5407_v6 = vpack.c.bf16 %v4586_v1, %v4585_v0  ;;  %v1147_v39 = vsel %vm1120_vm2, %v1145_v35, %v1146_v36  ;;  %v1295_v47 = vrot.slane %v1091_v41, 1  ;;  %v1325_v61 = vsel %vm1266_vm1, %v1298_v56, 0.0 }
  0xe5   : > { %1167 = vrot.lane.b32.xlu1 %v1129_v14, %s5612_s29  ;;  %5378 = vmatpush3.bf16.msra.mxu0 %v5375_v42  ;;  %v1085_v14 = vld [vmem:[#allocation2 + $0x68] sm:$0xff]  ;;  %v1300_v0 = vrot.slane %v1094_v58, 1 }
  0xe6   : > { %5380 = vmatprep.subr.bf16.mxu0 %v5379_v52  ;;  %v1140_v18 = vrot.slane %v1085_v14, 7  ;;  %v1286_v20 = vrot.slane %v1085_v14, 1  ;;  %v4609_v14 = vld [vmem:[%s7003_s5 + $0xd0] sm:$0xff] }
  0xe7   : > { %5402 = vmatpush3.bf16.msra.mxu1 %v5399_v51  ;;  %v1296_v51 = vsel %vm1266_vm1, %v1294_v46, %v1295_v47 }
  0xe8   : > { %1347 = vrot.lane.b32.xlu0 %v1275_v23, %s5609_s30  ;;  %5404 = vmatprep.subr.bf16.mxu1 %v5403_v62  ;;  %v1141_v21 = vsel %vm1120_vm2, %v1139_v17, %v1140_v18  ;;  %v1087_v23 = vld [vmem:[#allocation2 + $0x78] sm:$0xff]  ;;  %v1287_v24 = vsel %vm1266_vm1, %v1285_v19, %v1286_v20  ;;  %v1321_v25 = vsel %vm1266_vm1, %v1286_v20, 0.0 }
  0xe9   : > { %1349 = vrot.lane.b32.xlu1 %v1317_v26, %s5609_s30  ;;  %5382 = vmatpush3.bf16.msra.mxu0 %v5379_v52  ;;  %v1142_v26 = vrot.slane %v1086_v22, 7  ;;  %v1289_v29 = vrot.slane %v1087_v23, 1  ;;  %v1324_v52 = vsel %vm1266_vm1, %v1295_v47, 0.0  ;;  %v4612_v22 = vld [vmem:[%s7003_s5 + $0xe8] sm:$0xff] }
  0xea   : > { %5384 = vmatprep.subr.bf16.mxu0 %v5383_v63 }
  0xeb   : > { %5406 = vmatpush3.bf16.msra.mxu1 %v5403_v62  ;;  %v1290_v33 = vsel %vm1266_vm1, %v1288_v28, %v1289_v29  ;;  %v1322_v34 = vsel %vm1266_vm1, %v1289_v29, 0.0  ;;  %v1154_v62 = vrot.slane %v1094_v58, 7  ;;  %v4614_v28 = vld [vmem:[%s7003_s5 + $0xf8] sm:$0xff] }
  0xec   : > { %1169 = vrot.lane.b32.xlu0 %v1130_v27, %s5612_s29  ;;  %5408 = vmatprep.subr.bf16.mxu1 %v5407_v6  ;;  %v1143_v27 = vrot.slane %v1087_v23, 7 }
  0xed   : > { %1171 = vrot.lane.b32.xlu1 %v1132_v38, %s5612_s29  ;;  %5386 = vmatpush3.bf16.msra.mxu0 %v5383_v63  ;;  %v1292_v38 = vrot.slane %v1089_v32, 1 }
  0xee   : > { %5412 = vmatprep.subr.bf16.mxu0 %v5994_v11  ;;  %v1144_v30 = vsel %vm1120_vm2, %v1142_v26, %v1143_v27  ;;  %v4613_v27 = vld [vmem:[%s7003_s5 + $0xf0] sm:$0xff] }
  0xef   : > { %5410 = vmatpush3.bf16.msra.mxu1 %v5407_v6  ;;  %v1293_v42 = vsel %vm1266_vm1, %v1291_v37, %v1292_v38  ;;  %v1323_v43 = vsel %vm1266_vm1, %v1292_v38, 0.0 }
  0xf0   : > { %1351 = vrot.lane.b32.xlu0 %v1278_v45, %s5609_s30  ;;  %v1149_v45 = vrot.slane %v1091_v41, 7 }
  0xf1   : > { %1353 = vrot.lane.b32.xlu1 %v1318_v48, %s5609_s30 }
  0xf2   : > { %v1150_v48 = vsel %vm1120_vm2, %v1148_v44, %v1149_v45 }
  0xf4   : > { %1173 = vrot.lane.b32.xlu0 %v1133_v49, %s5612_s29  ;;  %v1092_v49 = vld [vmem:[#allocation2 + $0xa0] sm:$0xff] }
  0xf5   : > { %1175 = vrot.lane.b32.xlu1 %v1135_v59, %s5612_s29  ;;  %v1151_v53 = vrot.slane %v1092_v49, 7  ;;  %v1297_v55 = vrot.slane %v1092_v49, 1  ;;  %v1095_v59 = vld [vmem:[#allocation2 + $0xb8] sm:$0xff] }
  0xf6   : > { %v1155_v63 = vrot.slane %v1095_v59, 7  ;;  %v1301_v1 = vrot.slane %v1095_v59, 1 }
  0xf7   : > { %v1153_v57 = vsel %vm1120_vm2, %v1151_v53, %v1152_v54  ;;  %v1299_v60 = vsel %vm1266_vm1, %v1297_v55, %v1298_v56 }
  0xf8   : > { %1355 = vrot.lane.b32.xlu0 %v1281_v2, %s5609_s30  ;;  %v1156_v2 = vsel %vm1120_vm2, %v1154_v62, %v1155_v63 }
  0xf9   : > { %1357 = vrot.lane.b32.xlu1 %v1319_v3, %s5609_s30  ;;  %v1302_v3 = vsel %vm1266_vm1, %v1300_v0, %v1301_v1 }
  0xfc   : > { %1177 = vrot.lane.b32.xlu0 %v1136_v4, %s5612_s29  ;;  %v1326_v4 = vsel %vm1266_vm1, %v1301_v1, 0.0 }
  0xfd   : > { %1179 = vrot.lane.b32.xlu1 %v1138_v12, %s5612_s29 }
 0x100   : > { %1359 = vrot.lane.b32.xlu0 %v1284_v15, %s5609_s30  ;;  %v4610_v15 = vld [vmem:[%s7003_s5 + $0xd8] sm:$0xff] }
 0x101   : > { %1361 = vrot.lane.b32.xlu1 %v1320_v16, %s5609_s30  ;;  %v5415_v18 = vpack.c.bf16 %v4610_v15, %v4609_v14 }
 0x104   : > { %1181 = vrot.lane.b32.xlu0 %v1139_v17, %s5612_s29 }
 0x105   : > { %1183 = vrot.lane.b32.xlu1 %v1141_v21, %s5612_s29  ;;  %v4611_v21 = vld [vmem:[%s7003_s5 + $0xe0] sm:$0xff] }
 0x108   : > { %1363 = vrot.lane.b32.xlu0 %v1287_v24, %s5609_s30  ;;  %v5419_v24 = vpack.c.bf16 %v4612_v22, %v4611_v21 }
 0x109   : > { %1365 = vrot.lane.b32.xlu1 %v1321_v25, %s5609_s30 }
 0x10c   : > { %1185 = vrot.lane.b32.xlu0 %v1142_v26, %s5612_s29 }
 0x10d   : > { %1187 = vrot.lane.b32.xlu1 %v1144_v30, %s5612_s29  ;;  %v5423_v30 = vpack.c.bf16 %v4614_v28, %v4613_v27 }
 0x110   : > { %1367 = vrot.lane.b32.xlu0 %v1290_v33, %s5609_s30  ;;  %v4615_v33 = vld [vmem:[%s7003_s5 + $0x100] sm:$0xff] }
 0x111   : > { %1369 = vrot.lane.b32.xlu1 %v1322_v34, %s5609_s30  ;;  %v4616_v34 = vld [vmem:[%s7003_s5 + $0x108] sm:$0xff] }
 0x112   : > { %v5427_v36 = vpack.c.bf16 %v4616_v34, %v4615_v33 }
 0x114   : > { %1189 = vrot.lane.b32.xlu0 %v1145_v35, %s5612_s29 }
 0x115   : > { %1191 = vrot.lane.b32.xlu1 %v1147_v39, %s5612_s29  ;;  %v4617_v39 = vld [vmem:[%s7003_s5 + $0x110] sm:$0xff] }
 0x118   : > { %1371 = vrot.lane.b32.xlu0 %v1293_v42, %s5609_s30 }
 0x119   : > { %1373 = vrot.lane.b32.xlu1 %v1323_v43, %s5609_s30  ;;  %v5431_v43 = vpack.c.bf16 %v4618_v40, %v4617_v39  ;;  %v2471_v40 = vld [vmem:[%s7007_s9] sm:$0xff] }
 0x11c   : > { %1193 = vrot.lane.b32.xlu0 %v1148_v44, %s5612_s29 }
 0x11d   : > { %1195 = vrot.lane.b32.xlu1 %v1150_v48, %s5612_s29 }
 0x120   : > { %1375 = vrot.lane.b32.xlu0 %v1296_v51, %s5609_s30 }
 0x121   : > { %1377 = vrot.lane.b32.xlu1 %v1324_v52, %s5609_s30 }
 0x124   : > { %1197 = vrot.lane.b32.xlu0 %v1151_v53, %s5612_s29 }
 0x125   : > { %1199 = vrot.lane.b32.xlu1 %v1153_v57, %s5612_s29 }
 0x128   : > { %1379 = vrot.lane.b32.xlu0 %v1299_v60, %s5609_s30 }
 0x129   : > { %1381 = vrot.lane.b32.xlu1 %v1325_v61, %s5609_s30 }
 0x12c   : > { %1201 = vrot.lane.b32.xlu0 %v1154_v62, %s5612_s29 }
 0x12d   : > { %1203 = vrot.lane.b32.xlu1 %v1156_v2, %s5612_s29 }
 0x130   : > { %1383 = vrot.lane.b32.xlu0 %v1302_v3, %s5609_s30 }
 0x131   : > { %1385 = vrot.lane.b32.xlu1 %v1326_v4, %s5609_s30 }
 0x146   : > { %v1158_v5 = vpop.permute.xlu0 %1157 }
 0x147   : > { %v1229_v6 = vsel %vm1120_vm2, 0.0, %v1158_v5  ;;  %v1340_v7 = vpop.permute.xlu1 %1339 }
 0x148   : > { %1242 = vst.msk [vmem:[#allocation2] sm:$0xff] %vm1241_vm3, %v1229_v6 }
 0x149   : > { %1412 = vst.msk [vmem:[#allocation2] sm:$0xff] %vm1411_vm4, %v1340_v7 }
 0x14a   : > { %v1160_v8 = vpop.permute.xlu0 %1159 }
 0x14b   : > { %1243 = vst.msk [vmem:[#allocation2 + $0x8] sm:$0xff] %vm1241_vm3, %v1160_v8  ;;  %v1342_v9 = vpop.permute.xlu1 %1341 }
 0x14c   : > { %1413 = vst.msk [vmem:[#allocation2 + $0x8] sm:$0xff] %vm1411_vm4, %v1342_v9 }
 0x14e   : > { %v1162_v10 = vpop.permute.xlu0 %1161 }
 0x14f   : > { %v1230_v12 = vsel %vm1120_vm2, 0.0, %v1162_v10  ;;  %v1164_v13 = vpop.permute.xlu1 %1163 }
 0x150   : > { %1244 = vst.msk [vmem:[#allocation2 + $0x10] sm:$0xff] %vm1241_vm3, %v1230_v12  ;;  %1245 = vst.msk [vmem:[#allocation2 + $0x18] sm:$0xff] %vm1241_vm3, %v1164_v13  ;;  %v1436_v16 = vld [vmem:[#allocation2] sm:$0xff] }
 0x151   : > { %5011 = vmatprep.mubr.msk.f32.mxu0 %vm1468_vm5, %v1436_v16 }
 0x152   : > { %v1344_v17 = vpop.permute.xlu0 %1343 }
 0x153   : > { %1414 = vst.msk [vmem:[#allocation2 + $0x10] sm:$0xff] %vm1411_vm4, %v1344_v17  ;;  %v1346_v19 = vpop.permute.xlu1 %1345  ;;  %v1437_v20 = vld [vmem:[#allocation2 + $0x8] sm:$0xff] }
 0x154   : > { %1415 = vst.msk [vmem:[#allocation2 + $0x18] sm:$0xff] %vm1411_vm4, %v1346_v19  ;;  %5012 = vmatmul.mubr.msk.f32.vlgmr.msra.gmra.mrb[0].mxu0 %vm1468_vm5, %v1437_v20 }
 0x155   : > { %5414 = vmatpush3.bf16.msra.mxu0 %v5994_v11 }
 0x156   : > { %v1166_v23 = vpop.permute.xlu0 %1165  ;;  %5416 = vmatprep.subr.bf16.mxu0 %v5415_v18 }
 0x157   : > { %v1231_v25 = vsel %vm1120_vm2, 0.0, %v1166_v23  ;;  %v1168_v26 = vpop.permute.xlu1 %1167 }
 0x158   : > { %1246 = vst.msk [vmem:[#allocation2 + $0x20] sm:$0xff] %vm1241_vm3, %v1231_v25  ;;  %1247 = vst.msk [vmem:[#allocation2 + $0x28] sm:$0xff] %vm1241_vm3, %v1168_v26 }
 0x159   : > { %5418 = vmatpush3.bf16.msra.mxu0 %v5415_v18 }
 0x15a   : > { %v1348_v11 = vpop.permute.xlu0 %1347  ;;  %v1438_v29 = vld [vmem:[#allocation2 + $0x10] sm:$0xff]  ;;  %5420 = vmatprep.subr.bf16.mxu0 %v5419_v24 }
 0x15b   : > { %1416 = vst.msk [vmem:[#allocation2 + $0x20] sm:$0xff] %vm1411_vm4, %v1348_v11  ;;  %v1350_v31 = vpop.permute.xlu1 %1349  ;;  %5014 = vmatprep.mubr.msk.f32.mxu0 %vm1468_vm5, %v1438_v29  ;;  %5065 = vmatprep.mubr.msk.f32.mxu1 %vm1468_vm5, %v1438_v29  ;;  %v1439_v32 = vld [vmem:[#allocation2 + $0x18] sm:$0xff] }
 0x15c   : > { %1417 = vst.msk [vmem:[#allocation2 + $0x28] sm:$0xff] %vm1411_vm4, %v1350_v31  ;;  %5015 = vmatmul.mubr.msk.f32.gmra.mrb[2].mxu0 %vm1468_vm5, %v1439_v32  ;;  %5066 = vmatmul.mubr.msk.f32.vlgmr.msra.gmra.mrb[0].mxu1 %vm1468_vm5, %v1439_v32 }
 0x15d   : > { %5422 = vmatpush3.bf16.msra.mxu0 %v5419_v24 }
 0x15e   : > { %v1170_v35 = vpop.permute.xlu0 %1169  ;;  %5424 = vmatprep.subr.bf16.mxu0 %v5423_v30 }
 0x15f   : > { %v1232_v37 = vsel %vm1120_vm2, 0.0, %v1170_v35  ;;  %v1172_v38 = vpop.permute.xlu1 %1171 }
 0x160   : > { %1248 = vst.msk [vmem:[#allocation2 + $0x30] sm:$0xff] %vm1241_vm3, %v1232_v37  ;;  %1249 = vst.msk [vmem:[#allocation2 + $0x38] sm:$0xff] %vm1241_vm3, %v1172_v38 }
 0x161   : > { %5426 = vmatpush3.bf16.msra.mxu0 %v5423_v30 }
 0x162   : > { %v1352_v41 = vpop.permute.xlu0 %1351  ;;  %v6101_v42 = vld [vmem:[#allocation2 + $0x20] sm:$0xff]  ;;  %5428 = vmatprep.subr.bf16.mxu0 %v5427_v36 }
 0x163   : > { %1418 = vst.msk [vmem:[#allocation2 + $0x30] sm:$0xff] %vm1411_vm4, %v1352_v41  ;;  %v1354_v44 = vpop.permute.xlu1 %1353  ;;  %5017 = vmatprep.mubr.msk.f32.mxu0 %vm1468_vm5, %v6101_v42  ;;  %5068 = vmatprep.mubr.msk.f32.mxu1 %vm1468_vm5, %v6101_v42  ;;  %v6108_v45 = vld [vmem:[#allocation2 + $0x28] sm:$0xff] }
 0x164   : > { %1419 = vst.msk [vmem:[#allocation2 + $0x38] sm:$0xff] %vm1411_vm4, %v1354_v44  ;;  %5018 = vmatmul.mubr.msk.f32.gmra.mrb[4].mxu0 %vm1468_vm5, %v6108_v45  ;;  %5069 = vmatmul.mubr.msk.f32.gmra.mrb[2].mxu1 %vm1468_vm5, %v6108_v45  ;;  %v2472_v41 = vld [vmem:[%s7007_s9 + $0x8] sm:$0xff]  ;;  %v2474_v44 = vld [vmem:[%s7007_s9 + $0x18] sm:$0xff] }
 0x165   : > { %5430 = vmatpush3.bf16.msra.mxu0 %v5427_v36 }
 0x166   : > { %v1174_v46 = vpop.permute.xlu0 %1173  ;;  %5432 = vmatprep.subr.bf16.mxu0 %v5431_v43 }
 0x167   : > { %v1233_v47 = vsel %vm1120_vm2, 0.0, %v1174_v46  ;;  %v1176_v48 = vpop.permute.xlu1 %1175 }
 0x168   : > { %1250 = vst.msk [vmem:[#allocation2 + $0x40] sm:$0xff] %vm1241_vm3, %v1233_v47  ;;  %1251 = vst.msk [vmem:[#allocation2 + $0x48] sm:$0xff] %vm1241_vm3, %v1176_v48 }
 0x169   : > { %5434 = vmatpush3.bf16.msra.mxu0 %v5431_v43  ;;  %v2473_v43 = vld [vmem:[%s7007_s9 + $0x10] sm:$0xff] }
 0x16a   : > { %v1356_v49 = vpop.permute.xlu0 %1355  ;;  %v6118_v50 = vld [vmem:[#allocation2 + $0x30] sm:$0xff] }
 0x16b   : > { %1420 = vst.msk [vmem:[#allocation2 + $0x40] sm:$0xff] %vm1411_vm4, %v1356_v49  ;;  %v1358_v51 = vpop.permute.xlu1 %1357  ;;  %5020 = vmatprep.mubr.msk.f32.mxu0 %vm1468_vm5, %v6118_v50  ;;  %5071 = vmatprep.mubr.msk.f32.mxu1 %vm1468_vm5, %v6118_v50  ;;  %v6125_v52 = vld [vmem:[#allocation2 + $0x38] sm:$0xff] }
 0x16c   : > { %1421 = vst.msk [vmem:[#allocation2 + $0x48] sm:$0xff] %vm1411_vm4, %v1358_v51  ;;  %5021 = vmatmul.mubr.msk.f32.gmra.mrb[6].mxu0 %vm1468_vm5, %v6125_v52  ;;  %5072 = vmatmul.mubr.msk.f32.gmra.mrb[4].mxu1 %vm1468_vm5, %v6125_v52 }
 0x16e   : > { %v1178_v53 = vpop.permute.xlu0 %1177 }
 0x16f   : > { %v1234_v54 = vsel %vm1120_vm2, 0.0, %v1178_v53  ;;  %v1180_v55 = vpop.permute.xlu1 %1179 }
 0x170   : > { %1252 = vst.msk [vmem:[#allocation2 + $0x50] sm:$0xff] %vm1241_vm3, %v1234_v54  ;;  %1253 = vst.msk [vmem:[#allocation2 + $0x58] sm:$0xff] %vm1241_vm3, %v1180_v55 }
 0x172   : > { %v1360_v56 = vpop.permute.xlu0 %1359  ;;  %v6135_v57 = vld [vmem:[#allocation2 + $0x40] sm:$0xff] }
 0x173   : > { %1422 = vst.msk [vmem:[#allocation2 + $0x50] sm:$0xff] %vm1411_vm4, %v1360_v56  ;;  %v1362_v58 = vpop.permute.xlu1 %1361  ;;  %5023 = vmatprep.mubr.msk.f32.mxu0 %vm1468_vm5, %v6135_v57  ;;  %5074 = vmatprep.mubr.msk.f32.mxu1 %vm1468_vm5, %v6135_v57  ;;  %v6142_v59 = vld [vmem:[#allocation2 + $0x48] sm:$0xff] }
 0x174   : > { %1423 = vst.msk [vmem:[#allocation2 + $0x58] sm:$0xff] %vm1411_vm4, %v1362_v58  ;;  %5024 = vmatmul.mubr.msk.f32.gmra.mrb[8].mxu0 %vm1468_vm5, %v6142_v59  ;;  %5075 = vmatmul.mubr.msk.f32.gmra.mrb[6].mxu1 %vm1468_vm5, %v6142_v59 }
 0x176   : > { %v1182_v60 = vpop.permute.xlu0 %1181 }
 0x177   : > { %v1235_v61 = vsel %vm1120_vm2, 0.0, %v1182_v60  ;;  %v1184_v62 = vpop.permute.xlu1 %1183 }
 0x178   : > { %1254 = vst.msk [vmem:[#allocation2 + $0x60] sm:$0xff] %vm1241_vm3, %v1235_v61  ;;  %1255 = vst.msk [vmem:[#allocation2 + $0x68] sm:$0xff] %vm1241_vm3, %v1184_v62 }
 0x17a   : > { %v1364_v63 = vpop.permute.xlu0 %1363  ;;  %v6152_v0 = vld [vmem:[#allocation2 + $0x50] sm:$0xff] }
 0x17b   : > { %1424 = vst.msk [vmem:[#allocation2 + $0x60] sm:$0xff] %vm1411_vm4, %v1364_v63  ;;  %v1366_v1 = vpop.permute.xlu1 %1365  ;;  %5026 = vmatprep.mubr.msk.f32.mxu0 %vm1468_vm5, %v6152_v0  ;;  %5077 = vmatprep.mubr.msk.f32.mxu1 %vm1468_vm5, %v6152_v0  ;;  %v6159_v2 = vld [vmem:[#allocation2 + $0x58] sm:$0xff] }
 0x17c   : > { %1425 = vst.msk [vmem:[#allocation2 + $0x68] sm:$0xff] %vm1411_vm4, %v1366_v1  ;;  %5027 = vmatmul.mubr.msk.f32.gmra.mrb[10].mxu0 %vm1468_vm5, %v6159_v2  ;;  %5078 = vmatmul.mubr.msk.f32.gmra.mrb[8].mxu1 %vm1468_vm5, %v6159_v2 }
 0x17e   : > { %v1186_v3 = vpop.permute.xlu0 %1185 }
 0x17f   : > { %v1236_v4 = vsel %vm1120_vm2, 0.0, %v1186_v3  ;;  %v1188_v5 = vpop.permute.xlu1 %1187 }
 0x180   : > { %1256 = vst.msk [vmem:[#allocation2 + $0x70] sm:$0xff] %vm1241_vm3, %v1236_v4  ;;  %1257 = vst.msk [vmem:[#allocation2 + $0x78] sm:$0xff] %vm1241_vm3, %v1188_v5 }
 0x182   : > { %v1368_v6 = vpop.permute.xlu0 %1367  ;;  %v6169_v7 = vld [vmem:[#allocation2 + $0x60] sm:$0xff] }
 0x183   : > { %1426 = vst.msk [vmem:[#allocation2 + $0x70] sm:$0xff] %vm1411_vm4, %v1368_v6  ;;  %v1370_v8 = vpop.permute.xlu1 %1369  ;;  %5029 = vmatprep.mubr.msk.f32.mxu0 %vm1468_vm5, %v6169_v7  ;;  %5080 = vmatprep.mubr.msk.f32.mxu1 %vm1468_vm5, %v6169_v7  ;;  %v6176_v9 = vld [vmem:[#allocation2 + $0x68] sm:$0xff] }
 0x184   : > { %1427 = vst.msk [vmem:[#allocation2 + $0x78] sm:$0xff] %vm1411_vm4, %v1370_v8  ;;  %5030 = vmatmul.mubr.msk.f32.gmra.mrb[12].mxu0 %vm1468_vm5, %v6176_v9  ;;  %5081 = vmatmul.mubr.msk.f32.gmra.mrb[10].mxu1 %vm1468_vm5, %v6176_v9 }
 0x186   : > { %v1190_v10 = vpop.permute.xlu0 %1189 }
 0x187   : > { %v1237_v12 = vsel %vm1120_vm2, 0.0, %v1190_v10  ;;  %v1192_v13 = vpop.permute.xlu1 %1191 }
 0x188   : > { %1258 = vst.msk [vmem:[#allocation2 + $0x80] sm:$0xff] %vm1241_vm3, %v1237_v12  ;;  %1259 = vst.msk [vmem:[#allocation2 + $0x88] sm:$0xff] %vm1241_vm3, %v1192_v13 }
 0x18a   : > { %v1372_v14 = vpop.permute.xlu0 %1371  ;;  %v1450_v15 = vld [vmem:[#allocation2 + $0x70] sm:$0xff] }
 0x18b   : > { %1428 = vst.msk [vmem:[#allocation2 + $0x80] sm:$0xff] %vm1411_vm4, %v1372_v14  ;;  %v1374_v16 = vpop.permute.xlu1 %1373  ;;  %5032 = vmatprep.mubr.msk.f32.mxu0 %vm1468_vm5, %v1450_v15  ;;  %5083 = vmatprep.mubr.msk.f32.mxu1 %vm1468_vm5, %v1450_v15  ;;  %v1451_v17 = vld [vmem:[#allocation2 + $0x78] sm:$0xff] }
 0x18c   : > { %1429 = vst.msk [vmem:[#allocation2 + $0x88] sm:$0xff] %vm1411_vm4, %v1374_v16  ;;  %5033 = vmatmul.mubr.msk.f32.gmra.mrb[14].mxu0 %vm1468_vm5, %v1451_v17  ;;  %5084 = vmatmul.mubr.msk.f32.gmra.mrb[12].mxu1 %vm1468_vm5, %v1451_v17 }
 0x18e   : > { %v1194_v18 = vpop.permute.xlu0 %1193 }
 0x18f   : > { %v1238_v19 = vsel %vm1120_vm2, 0.0, %v1194_v18  ;;  %v1196_v20 = vpop.permute.xlu1 %1195 }
 0x190   : > { %1260 = vst.msk [vmem:[#allocation2 + $0x90] sm:$0xff] %vm1241_vm3, %v1238_v19  ;;  %1261 = vst.msk [vmem:[#allocation2 + $0x98] sm:$0xff] %vm1241_vm3, %v1196_v20 }
 0x192   : > { %v1376_v21 = vpop.permute.xlu0 %1375  ;;  %v1452_v22 = vld [vmem:[#allocation2 + $0x80] sm:$0xff] }
 0x193   : > { %1430 = vst.msk [vmem:[#allocation2 + $0x90] sm:$0xff] %vm1411_vm4, %v1376_v21  ;;  %v1378_v23 = vpop.permute.xlu1 %1377  ;;  %5035 = vmatprep.mubr.msk.f32.mxu0 %vm1468_vm5, %v1452_v22  ;;  %5086 = vmatprep.mubr.msk.f32.mxu1 %vm1468_vm5, %v1452_v22  ;;  %v1453_v24 = vld [vmem:[#allocation2 + $0x88] sm:$0xff] }
 0x194   : > { %1431 = vst.msk [vmem:[#allocation2 + $0x98] sm:$0xff] %vm1411_vm4, %v1378_v23  ;;  %5036 = vmatmul.mubr.msk.f32.gmra.mrb[16].mxu0 %vm1468_vm5, %v1453_v24  ;;  %5087 = vmatmul.mubr.msk.f32.gmra.mrb[14].mxu1 %vm1468_vm5, %v1453_v24 }
 0x196   : > { %v1198_v25 = vpop.permute.xlu0 %1197 }
 0x197   : > { %v1239_v26 = vsel %vm1120_vm2, 0.0, %v1198_v25  ;;  %v1200_v27 = vpop.permute.xlu1 %1199 }
 0x198   : > { %1262 = vst.msk [vmem:[#allocation2 + $0xa0] sm:$0xff] %vm1241_vm3, %v1239_v26  ;;  %1263 = vst.msk [vmem:[#allocation2 + $0xa8] sm:$0xff] %vm1241_vm3, %v1200_v27 }
 0x19a   : > { %v1380_v28 = vpop.permute.xlu0 %1379  ;;  %v1454_v11 = vld [vmem:[#allocation2 + $0x90] sm:$0xff] }
 0x19b   : > { %1432 = vst.msk [vmem:[#allocation2 + $0xa0] sm:$0xff] %vm1411_vm4, %v1380_v28  ;;  %v1382_v29 = vpop.permute.xlu1 %1381  ;;  %5038 = vmatprep.mubr.msk.f32.mxu0 %vm1468_vm5, %v1454_v11  ;;  %5089 = vmatprep.mubr.msk.f32.mxu1 %vm1468_vm5, %v1454_v11  ;;  %v1455_v30 = vld [vmem:[#allocation2 + $0x98] sm:$0xff] }
 0x19c   : > { %1433 = vst.msk [vmem:[#allocation2 + $0xa8] sm:$0xff] %vm1411_vm4, %v1382_v29  ;;  %5039 = vmatmul.mubr.msk.f32.gmra.mrb[18].mxu0 %vm1468_vm5, %v1455_v30  ;;  %5090 = vmatmul.mubr.msk.f32.gmra.mrb[16].mxu1 %vm1468_vm5, %v1455_v30 }
 0x19d   : > { %5119 = vmatprep.mubr.msk.f32.mxu0 %vm1468_vm5, %v6101_v42  ;;  %v5435_v42 = vpack.c.bf16 %v2472_v41, %v2471_v40 }
 0x19e   : > { %v1202_v31 = vpop.permute.xlu0 %1201 }
 0x19f   : > { %v1240_v32 = vsel %vm1120_vm2, 0.0, %v1202_v31  ;;  %v1204_v33 = vpop.permute.xlu1 %1203  ;;  %5436 = vmatprep.subr.bf16.mxu1 %v5435_v42 }
 0x1a0   : > { %5120 = vmatmul.mubr.msk.f32.vlgmr.msra.gmra.mrb[20].mxu0 %vm1468_vm5, %v6108_v45  ;;  %1264 = vst.msk [vmem:[#allocation2 + $0xb0] sm:$0xff] %vm1241_vm3, %v1240_v32  ;;  %1265 = vst.msk [vmem:[#allocation2 + $0xb8] sm:$0xff] %vm1241_vm3, %v1204_v33  ;;  %5438 = vmatpush3.bf16.msra.mxu1 %v5435_v42  ;;  %v5439_v45 = vpack.c.bf16 %v2474_v44, %v2473_v43 }
 0x1a1   : > { %5122 = vmatprep.mubr.msk.f32.mxu0 %vm1468_vm5, %v6118_v50 }
 0x1a2   : > { %v1732_v34 = vld [vmem:[#allocation2 + $0xa0] sm:$0xff]  ;;  %v1384_v35 = vpop.permute.xlu0 %1383  ;;  %5440 = vmatprep.subr.bf16.mxu1 %v5439_v45 }
 0x1a3   : > { %5092 = vmatprep.mubr.msk.f32.mxu1 %vm1468_vm5, %v1732_v34  ;;  %v1733_v36 = vld [vmem:[#allocation2 + $0xa8] sm:$0xff]  ;;  %1434 = vst.msk [vmem:[#allocation2 + $0xb0] sm:$0xff] %vm1411_vm4, %v1384_v35  ;;  %v1386_v37 = vpop.permute.xlu1 %1385 }
 0x1a4   : > { %5093 = vmatmul.mubr.msk.f32.gmra.mrb[18].mxu1 %vm1468_vm5, %v1733_v36  ;;  %5123 = vmatmul.mubr.msk.f32.gmra.mrb[22].mxu0 %vm1468_vm5, %v6125_v52  ;;  %1435 = vst.msk [vmem:[#allocation2 + $0xb8] sm:$0xff] %vm1411_vm4, %v1386_v37 }
 0x1a5   : > { %5125 = vmatprep.mubr.msk.f32.mxu0 %vm1468_vm5, %v6135_v57  ;;  %5442 = vmatpush3.bf16.msra.mxu1 %v5439_v45 }
 0x1a8   : > { %5126 = vmatmul.mubr.msk.f32.gmra.mrb[24].mxu0 %vm1468_vm5, %v6142_v59 }
 0x1a9   : > { %5128 = vmatprep.mubr.msk.f32.mxu0 %vm1468_vm5, %v6152_v0 }
 0x1aa   : > { %v2050_v38 = vld [vmem:[#allocation2 + $0xb0] sm:$0xff] }
 0x1ab   : > { %v2051_v39 = vld [vmem:[#allocation2 + $0xb8] sm:$0xff] }
 0x1ac   : > { %5129 = vmatmul.mubr.msk.f32.gmra.mrb[26].mxu0 %vm1468_vm5, %v6159_v2 }
 0x1ad   : > { %5131 = vmatprep.mubr.msk.f32.mxu0 %vm1468_vm5, %v6169_v7 }
 0x1b0   : > { %5132 = vmatmul.mubr.msk.f32.gmra.mrb[28].mxu0 %vm1468_vm5, %v6176_v9 }
 0x1b1   : > { %5134 = vmatprep.mubr.msk.f32.mxu0 %vm1468_vm5, %v1450_v15 }
 0x1b4   : > { %5135 = vmatmul.mubr.msk.f32.gmra.mrb[30].mxu0 %vm1468_vm5, %v1451_v17 }
 0x1b5   : > { %5137 = vmatprep.mubr.msk.f32.mxu0 %vm1468_vm5, %v1452_v22 }
 0x1b8   : > { %5138 = vmatmul.mubr.msk.f32.gmra.mrb[32].mxu0 %vm1468_vm5, %v1453_v24 }
 0x1b9   : > { %5140 = vmatprep.mubr.msk.f32.mxu0 %vm1468_vm5, %v1454_v11 }
 0x1bc   : > { %5141 = vmatmul.mubr.msk.f32.gmra.mrb[34].mxu0 %vm1468_vm5, %v1455_v30 }
 0x1bd   : > { %5143 = vmatprep.mubr.msk.f32.mxu0 %vm1468_vm5, %v1732_v34 }
 0x1c0   : > { %5144 = vmatmul.mubr.msk.f32.gmra.mrb[36].mxu0 %vm1468_vm5, %v1733_v36 }
 0x1c1   : > { %5146 = vmatprep.mubr.msk.f32.mxu0 %vm1468_vm5, %v2050_v38 }
 0x1c4   : > { %5147 = vmatmul.mubr.msk.f32.gmra.mrb[38].mxu0 %vm1468_vm5, %v2051_v39 }
 0x227   : > { %v5013_v46 = vpop.f32.mrb[0].mxu0 }
 0x228   : > { %1695 = vst.msk [vmem:[#allocation4 + $0x8] sm:$0xff] %vm1241_vm3, %v5013_v46  ;;  %v1595_v47 = vpop.f32.mrb[1].mxu0 }
 0x229   : > { %1694 = vst.msk [vmem:[#allocation4] sm:$0xff] %vm1241_vm3, %v1595_v47 }
 0x22f   : > { %v5016_v48 = vpop.f32.mrb[2].mxu0  ;;  %v5067_v49 = vpop.f32.mrb[0].mxu1  ;;  %v1973_v50 = vld [vmem:[#allocation4 + $0x8] sm:$0xff] }
 0x230   : > { %1697 = vst.msk [vmem:[#allocation4 + $0x18] sm:$0xff] %vm1241_vm3, %v5016_v48  ;;  %v1993_v51 = vadd.f32 %v5067_v49, %v1973_v50  ;;  %v1605_v52 = vpop.f32.mrb[3].mxu0  ;;  %v1873_v53 = vpop.f32.mrb[1].mxu1  ;;  %v1972_v54 = vld [vmem:[#allocation4] sm:$0xff] }
 0x231   : > { %1696 = vst.msk [vmem:[#allocation4 + $0x10] sm:$0xff] %vm1241_vm3, %v1605_v52  ;;  %v1992_v55 = vadd.f32 %v1972_v54, %v1873_v53 }
 0x232   : > { %2013 = vst.msk [vmem:[#allocation4 + $0x8] sm:$0xff] %vm1241_vm3, %v1993_v51 }
 0x233   : > { %2012 = vst.msk [vmem:[#allocation4] sm:$0xff] %vm1241_vm3, %v1992_v55 }
 0x237   : > { %v5019_v56 = vpop.f32.mrb[4].mxu0  ;;  %v5070_v57 = vpop.f32.mrb[2].mxu1  ;;  %v1975_v58 = vld [vmem:[#allocation4 + $0x18] sm:$0xff] }
 0x238   : > { %1699 = vst.msk [vmem:[#allocation4 + $0x28] sm:$0xff] %vm1241_vm3, %v5019_v56  ;;  %v1995_v59 = vadd.f32 %v5070_v57, %v1975_v58  ;;  %v1615_v60 = vpop.f32.mrb[5].mxu0  ;;  %v1883_v61 = vpop.f32.mrb[3].mxu1  ;;  %v1974_v62 = vld [vmem:[#allocation4 + $0x10] sm:$0xff] }
 0x239   : > { %1698 = vst.msk [vmem:[#allocation4 + $0x20] sm:$0xff] %vm1241_vm3, %v1615_v60  ;;  %v1994_v63 = vadd.f32 %v1974_v62, %v1883_v61  ;;  %v2291_v57 = vld [vmem:[#allocation4 + $0x8] sm:$0xff] }
 0x23a   : > { %2015 = vst.msk [vmem:[#allocation4 + $0x18] sm:$0xff] %vm1241_vm3, %v1995_v59  ;;  %v2290_v60 = vld [vmem:[#allocation4] sm:$0xff] }
 0x23b   : > { %2014 = vst.msk [vmem:[#allocation4 + $0x10] sm:$0xff] %vm1241_vm3, %v1994_v63 }
 0x23f   : > { %v5022_v0 = vpop.f32.mrb[6].mxu0  ;;  %v5073_v1 = vpop.f32.mrb[4].mxu1  ;;  %v1977_v2 = vld [vmem:[#allocation4 + $0x28] sm:$0xff] }
 0x240   : > { %1701 = vst.msk [vmem:[#allocation4 + $0x38] sm:$0xff] %vm1241_vm3, %v5022_v0  ;;  %v1997_v3 = vadd.f32 %v5073_v1, %v1977_v2  ;;  %v1625_v4 = vpop.f32.mrb[7].mxu0  ;;  %v1893_v5 = vpop.f32.mrb[5].mxu1  ;;  %v1976_v6 = vld [vmem:[#allocation4 + $0x20] sm:$0xff] }
 0x241   : > { %1700 = vst.msk [vmem:[#allocation4 + $0x30] sm:$0xff] %vm1241_vm3, %v1625_v4  ;;  %v1996_v7 = vadd.f32 %v1976_v6, %v1893_v5  ;;  %v2293_v1 = vld [vmem:[#allocation4 + $0x18] sm:$0xff] }
 0x242   : > { %2017 = vst.msk [vmem:[#allocation4 + $0x28] sm:$0xff] %vm1241_vm3, %v1997_v3 }
 0x243   : > { %2016 = vst.msk [vmem:[#allocation4 + $0x20] sm:$0xff] %vm1241_vm3, %v1996_v7  ;;  %v2292_v7 = vld [vmem:[#allocation4 + $0x10] sm:$0xff] }
 0x247   : > { %v5025_v8 = vpop.f32.mrb[8].mxu0  ;;  %v5076_v9 = vpop.f32.mrb[6].mxu1  ;;  %v1979_v10 = vld [vmem:[#allocation4 + $0x38] sm:$0xff] }
 0x248   : > { %1703 = vst.msk [vmem:[#allocation4 + $0x48] sm:$0xff] %vm1241_vm3, %v5025_v8  ;;  %v1999_v12 = vadd.f32 %v5076_v9, %v1979_v10  ;;  %v1635_v13 = vpop.f32.mrb[9].mxu0  ;;  %v1903_v14 = vpop.f32.mrb[7].mxu1  ;;  %v1978_v15 = vld [vmem:[#allocation4 + $0x30] sm:$0xff] }
 0x249   : > { %1702 = vst.msk [vmem:[#allocation4 + $0x40] sm:$0xff] %vm1241_vm3, %v1635_v13  ;;  %v1998_v16 = vadd.f32 %v1978_v15, %v1903_v14  ;;  %v6306_v13 = vld [vmem:[%s7004_s6] ss:$0 sm:$0xff] }
 0x24a   : > { %2019 = vst.msk [vmem:[#allocation4 + $0x38] sm:$0xff] %vm1241_vm3, %v1999_v12  ;;  %v2295_v12 = vld [vmem:[#allocation4 + $0x28] sm:$0xff] }
 0x24b   : > { %2018 = vst.msk [vmem:[#allocation4 + $0x30] sm:$0xff] %vm1241_vm3, %v1998_v16  ;;  %v2294_v16 = vld [vmem:[#allocation4 + $0x20] sm:$0xff] }
 0x24f   : > { %v5028_v17 = vpop.f32.mrb[10].mxu0  ;;  %v5079_v18 = vpop.f32.mrb[8].mxu1  ;;  %v1981_v19 = vld [vmem:[#allocation4 + $0x48] sm:$0xff] }
 0x250   : > { %1705 = vst.msk [vmem:[#allocation4 + $0x58] sm:$0xff] %vm1241_vm3, %v5028_v17  ;;  %v2001_v20 = vadd.f32 %v5079_v18, %v1981_v19  ;;  %v1645_v21 = vpop.f32.mrb[11].mxu0  ;;  %v1913_v22 = vpop.f32.mrb[9].mxu1  ;;  %v1980_v23 = vld [vmem:[#allocation4 + $0x40] sm:$0xff] }
 0x251   : > { %1704 = vst.msk [vmem:[#allocation4 + $0x50] sm:$0xff] %vm1241_vm3, %v1645_v21  ;;  %v2000_v24 = vadd.f32 %v1980_v23, %v1913_v22  ;;  %v6311_v18 = vld [vmem:[%s7005_s7] ss:$0 sm:$0xff]  ;;  %v2297_v23 = vld [vmem:[#allocation4 + $0x38] sm:$0xff] }
 0x252   : > { %2021 = vst.msk [vmem:[#allocation4 + $0x48] sm:$0xff] %vm1241_vm3, %v2001_v20 }
 0x253   : > { %2020 = vst.msk [vmem:[#allocation4 + $0x40] sm:$0xff] %vm1241_vm3, %v2000_v24 }
 0x257   : > { %v5031_v25 = vpop.f32.mrb[12].mxu0  ;;  %v5082_v26 = vpop.f32.mrb[10].mxu1  ;;  %v1983_v27 = vld [vmem:[#allocation4 + $0x58] sm:$0xff] }
 0x258   : > { %1707 = vst.msk [vmem:[#allocation4 + $0x68] sm:$0xff] %vm1241_vm3, %v5031_v25  ;;  %v2003_v28 = vadd.f32 %v5082_v26, %v1983_v27  ;;  %v1655_v11 = vpop.f32.mrb[13].mxu0  ;;  %v1923_v29 = vpop.f32.mrb[11].mxu1  ;;  %v1982_v30 = vld [vmem:[#allocation4 + $0x50] sm:$0xff]  ;;  %v6320_v25 = vld [vmem:[%s7006_s8] ss:$0 sm:$0xff] }
 0x259   : > { %1706 = vst.msk [vmem:[#allocation4 + $0x60] sm:$0xff] %vm1241_vm3, %v1655_v11  ;;  %v2002_v31 = vadd.f32 %v1982_v30, %v1923_v29 }
 0x25a   : > { %2023 = vst.msk [vmem:[#allocation4 + $0x58] sm:$0xff] %vm1241_vm3, %v2003_v28  ;;  %v2296_v28 = vld [vmem:[#allocation4 + $0x30] sm:$0xff] }
 0x25b   : > { %2022 = vst.msk [vmem:[#allocation4 + $0x50] sm:$0xff] %vm1241_vm3, %v2002_v31 }
 0x25f   : > { %v5034_v32 = vpop.f32.mrb[14].mxu0  ;;  %v5085_v33 = vpop.f32.mrb[12].mxu1  ;;  %v1985_v34 = vld [vmem:[#allocation4 + $0x68] sm:$0xff] }
 0x260   : > { %1709 = vst.msk [vmem:[#allocation4 + $0x78] sm:$0xff] %vm1241_vm3, %v5034_v32  ;;  %v2005_v35 = vadd.f32 %v5085_v33, %v1985_v34  ;;  %v1665_v36 = vpop.f32.mrb[15].mxu0  ;;  %v1933_v37 = vpop.f32.mrb[13].mxu1  ;;  %v1984_v38 = vld [vmem:[#allocation4 + $0x60] sm:$0xff] }
 0x261   : > { %1708 = vst.msk [vmem:[#allocation4 + $0x70] sm:$0xff] %vm1241_vm3, %v1665_v36  ;;  %v2004_v39 = vadd.f32 %v1984_v38, %v1933_v37  ;;  %v2299_v36 = vld [vmem:[#allocation4 + $0x48] sm:$0xff] }
 0x262   : > { %2025 = vst.msk [vmem:[#allocation4 + $0x68] sm:$0xff] %vm1241_vm3, %v2005_v35 }
 0x263   : > { %2024 = vst.msk [vmem:[#allocation4 + $0x60] sm:$0xff] %vm1241_vm3, %v2004_v39 }
 0x267   : > { %v5037_v40 = vpop.f32.mrb[16].mxu0  ;;  %v5088_v41 = vpop.f32.mrb[14].mxu1  ;;  %v1987_v42 = vld [vmem:[#allocation4 + $0x78] sm:$0xff] }
 0x268   : > { %1711 = vst.msk [vmem:[#allocation4 + $0x88] sm:$0xff] %vm1241_vm3, %v5037_v40  ;;  %v2007_v43 = vadd.f32 %v5088_v41, %v1987_v42  ;;  %v1675_v44 = vpop.f32.mrb[17].mxu0  ;;  %v1943_v45 = vpop.f32.mrb[15].mxu1  ;;  %v1986_v46 = vld [vmem:[#allocation4 + $0x70] sm:$0xff]  ;;  %v2298_v41 = vld [vmem:[#allocation4 + $0x40] sm:$0xff] }
 0x269   : > { %1710 = vst.msk [vmem:[#allocation4 + $0x80] sm:$0xff] %vm1241_vm3, %v1675_v44  ;;  %v2006_v47 = vadd.f32 %v1986_v46, %v1943_v45 }
 0x26a   : > { %2027 = vst.msk [vmem:[#allocation4 + $0x78] sm:$0xff] %vm1241_vm3, %v2007_v43 }
 0x26b   : > { %2026 = vst.msk [vmem:[#allocation4 + $0x70] sm:$0xff] %vm1241_vm3, %v2006_v47 }
 0x26f   : > { %v5040_v48 = vpop.f32.mrb[18].mxu0  ;;  %v5091_v49 = vpop.f32.mrb[16].mxu1  ;;  %v1989_v50 = vld [vmem:[#allocation4 + $0x88] sm:$0xff] }
 0x270   : > { %1713 = vst.msk [vmem:[#allocation4 + $0x98] sm:$0xff] %vm1241_vm3, %v5040_v48  ;;  %v2009_v51 = vadd.f32 %v5091_v49, %v1989_v50  ;;  %v1685_v52 = vpop.f32.mrb[19].mxu0  ;;  %v1953_v53 = vpop.f32.mrb[17].mxu1  ;;  %v1988_v54 = vld [vmem:[#allocation4 + $0x80] sm:$0xff] }
 0x271   : > { %1712 = vst.msk [vmem:[#allocation4 + $0x90] sm:$0xff] %vm1241_vm3, %v1685_v52  ;;  %v2008_v55 = vadd.f32 %v1988_v54, %v1953_v53  ;;  %v2301_v52 = vld [vmem:[#allocation4 + $0x58] sm:$0xff] }
 0x272   : > { %2029 = vst.msk [vmem:[#allocation4 + $0x88] sm:$0xff] %vm1241_vm3, %v2009_v51 }
 0x273   : > { %2028 = vst.msk [vmem:[#allocation4 + $0x80] sm:$0xff] %vm1241_vm3, %v2008_v55  ;;  %v5121_v56 = vpop.f32.mrb[20].mxu0 }
 0x274   : > { %v2311_v58 = vadd.f32 %v5121_v56, %v2291_v57  ;;  %v2191_v59 = vpop.f32.mrb[21].mxu0  ;;  %v2300_v57 = vld [vmem:[#allocation4 + $0x50] sm:$0xff] }
 0x275   : > { %v2310_v61 = vadd.f32 %v2290_v60, %v2191_v59 }
 0x276   : > { %2331 = vst.msk [vmem:[#allocation4 + $0x8] sm:$0xff] %vm1241_vm3, %v2311_v58 }
 0x277   : > { %2330 = vst.msk [vmem:[#allocation4] sm:$0xff] %vm1241_vm3, %v2310_v61  ;;  %v5094_v62 = vpop.f32.mrb[18].mxu1  ;;  %v1991_v63 = vld [vmem:[#allocation4 + $0x98] sm:$0xff]  ;;  %v5124_v0 = vpop.f32.mrb[22].mxu0 }
 0x278   : > { %v2011_v2 = vadd.f32 %v5094_v62, %v1991_v63  ;;  %v2313_v3 = vadd.f32 %v5124_v0, %v2293_v1  ;;  %v1963_v4 = vpop.f32.mrb[19].mxu1  ;;  %v1990_v5 = vld [vmem:[#allocation4 + $0x90] sm:$0xff]  ;;  %v2201_v6 = vpop.f32.mrb[23].mxu0 }
 0x279   : > { %v2010_v8 = vadd.f32 %v1990_v5, %v1963_v4  ;;  %v2312_v9 = vadd.f32 %v2292_v7, %v2201_v6  ;;  %v2303_v4 = vld [vmem:[#allocation4 + $0x68] sm:$0xff] }
 0x27a   : > { %2031 = vst.msk [vmem:[#allocation4 + $0x98] sm:$0xff] %vm1241_vm3, %v2011_v2  ;;  %2333 = vst.msk [vmem:[#allocation4 + $0x18] sm:$0xff] %vm1241_vm3, %v2313_v3 }
 0x27b   : > { %2030 = vst.msk [vmem:[#allocation4 + $0x90] sm:$0xff] %vm1241_vm3, %v2010_v8  ;;  %2332 = vst.msk [vmem:[#allocation4 + $0x10] sm:$0xff] %vm1241_vm3, %v2312_v9  ;;  %v5127_v10 = vpop.f32.mrb[24].mxu0  ;;  %v2302_v9 = vld [vmem:[#allocation4 + $0x60] sm:$0xff] }
 0x27c   : > { %v2315_v14 = vadd.f32 %v5127_v10, %v2295_v12  ;;  %v2211_v15 = vpop.f32.mrb[25].mxu0 }
 0x27d   : > { %v2314_v17 = vadd.f32 %v2294_v16, %v2211_v15  ;;  %v2351_v19 = vld [vmem:[#allocation4 + $0x8] sm:$0xff] }
 0x27e   : > { %2335 = vst.msk [vmem:[#allocation4 + $0x28] sm:$0xff] %vm1241_vm3, %v2315_v14  ;;  %v2350_v20 = vld [vmem:[#allocation4] sm:$0xff]  ;;  %v2378_v21 = vadd.f32 %v6306_v13, %v2351_v19 }
 0x27f   : > { %2334 = vst.msk [vmem:[#allocation4 + $0x20] sm:$0xff] %vm1241_vm3, %v2314_v17  ;;  %v5130_v22 = vpop.f32.mrb[26].mxu0  ;;  %v2377_v24 = vadd.f32 %v6306_v13, %v2350_v20 }
 0x280   : > { %v2317_v26 = vadd.f32 %v5130_v22, %v2297_v23  ;;  %v2221_v27 = vpop.f32.mrb[27].mxu0  ;;  %v2405_v11 = vmul.f32 %v6311_v18, %v2378_v21  ;;  %v2305_v23 = vld [vmem:[#allocation4 + $0x78] sm:$0xff] }
 0x281   : > { %v2316_v29 = vadd.f32 %v2296_v28, %v2221_v27  ;;  %v2404_v30 = vmul.f32 %v6311_v18, %v2377_v24  ;;  %v2353_v31 = vld [vmem:[#allocation4 + $0x18] sm:$0xff] }
 0x282   : > { %2337 = vst.msk [vmem:[#allocation4 + $0x38] sm:$0xff] %vm1241_vm3, %v2317_v26  ;;  %v2432_v32 = vadd.f32 %v6320_v25, %v2405_v11  ;;  %v2352_v33 = vld [vmem:[#allocation4 + $0x10] sm:$0xff]  ;;  %v2380_v34 = vadd.f32 %v6306_v13, %v2353_v31 }
 0x283   : > { %2336 = vst.msk [vmem:[#allocation4 + $0x30] sm:$0xff] %vm1241_vm3, %v2316_v29  ;;  %v5133_v35 = vpop.f32.mrb[28].mxu0  ;;  %v2431_v37 = vadd.f32 %v6320_v25, %v2404_v30  ;;  %v2379_v38 = vadd.f32 %v6306_v13, %v2352_v33  ;;  %v2304_v11 = vld [vmem:[#allocation4 + $0x70] sm:$0xff] }
 0x284   : > { %v2319_v39 = vadd.f32 %v5133_v35, %v2299_v36  ;;  %v2231_v40 = vpop.f32.mrb[29].mxu0  ;;  %v2407_v42 = vmul.f32 %v6311_v18, %v2380_v34  ;;  %v2452_v47 = vmax.f32 %v2432_v32, 0.0 }
 0x285   : > { %v2318_v43 = vadd.f32 %v2298_v41, %v2231_v40  ;;  %v2451_v44 = vmax.f32 %v2431_v37, 0.0  ;;  %v2406_v45 = vmul.f32 %v6311_v18, %v2379_v38  ;;  %v2355_v46 = vld [vmem:[#allocation4 + $0x28] sm:$0xff] }
 0x286   : > { %2339 = vst.msk [vmem:[#allocation4 + $0x48] sm:$0xff] %vm1241_vm3, %v2319_v39  ;;  %v2434_v48 = vadd.f32 %v6320_v25, %v2407_v42  ;;  %v2354_v49 = vld [vmem:[#allocation4 + $0x20] sm:$0xff]  ;;  %v2382_v50 = vadd.f32 %v6306_v13, %v2355_v46  ;;  %v2307_v39 = vld [vmem:[#allocation4 + $0x88] sm:$0xff] }
 0x287   : > { %2338 = vst.msk [vmem:[#allocation4 + $0x40] sm:$0xff] %vm1241_vm3, %v2318_v43  ;;  %v5136_v51 = vpop.f32.mrb[30].mxu0  ;;  %5157 = vmatprep.mubr.msk.f32.mxu1 %vm1241_vm3, %v2451_v44  ;;  %v2433_v53 = vadd.f32 %v6320_v25, %v2406_v45  ;;  %v2381_v54 = vadd.f32 %v6306_v13, %v2354_v49  ;;  %v2306_v44 = vld [vmem:[#allocation4 + $0x80] sm:$0xff] }
 0x288   : > { %v2321_v55 = vadd.f32 %v5136_v51, %v2301_v52  ;;  %v2241_v56 = vpop.f32.mrb[31].mxu0  ;;  %5158 = vmatmul.mubr.msk.f32.vlgmr.msra.gmra.mrb[20].mxu1 %vm1241_vm3, %v2452_v47  ;;  %v2409_v58 = vmul.f32 %v6311_v18, %v2382_v50  ;;  %v2454_v63 = vmax.f32 %v2434_v48, 0.0 }
 0x289   : > { %v2320_v59 = vadd.f32 %v2300_v57, %v2241_v56  ;;  %v2453_v60 = vmax.f32 %v2433_v53, 0.0  ;;  %v2408_v61 = vmul.f32 %v6311_v18, %v2381_v54  ;;  %v2357_v62 = vld [vmem:[#allocation4 + $0x38] sm:$0xff] }
 0x28a   : > { %2341 = vst.msk [vmem:[#allocation4 + $0x58] sm:$0xff] %vm1241_vm3, %v2321_v55  ;;  %v2436_v0 = vadd.f32 %v6320_v25, %v2409_v58  ;;  %v2356_v1 = vld [vmem:[#allocation4 + $0x30] sm:$0xff]  ;;  %v2384_v2 = vadd.f32 %v6306_v13, %v2357_v62  ;;  %v2309_v55 = vld [vmem:[#allocation4 + $0x98] sm:$0xff] }
 0x28b   : > { %2340 = vst.msk [vmem:[#allocation4 + $0x50] sm:$0xff] %vm1241_vm3, %v2320_v59  ;;  %v5139_v3 = vpop.f32.mrb[32].mxu0  ;;  %5160 = vmatprep.mubr.msk.f32.mxu1 %vm1241_vm3, %v2453_v60  ;;  %v2435_v5 = vadd.f32 %v6320_v25, %v2408_v61  ;;  %v2383_v6 = vadd.f32 %v6306_v13, %v2356_v1  ;;  %v2308_v60 = vld [vmem:[#allocation4 + $0x90] sm:$0xff] }
 0x28c   : > { %v2323_v7 = vadd.f32 %v5139_v3, %v2303_v4  ;;  %v2251_v8 = vpop.f32.mrb[33].mxu0  ;;  %5161 = vmatmul.mubr.msk.f32.gmra.mrb[22].mxu1 %vm1241_vm3, %v2454_v63  ;;  %v2411_v10 = vmul.f32 %v6311_v18, %v2384_v2  ;;  %v2456_v17 = vmax.f32 %v2436_v0, 0.0 }
 0x28d   : > { %v2322_v12 = vadd.f32 %v2302_v9, %v2251_v8  ;;  %v2455_v14 = vmax.f32 %v2435_v5, 0.0  ;;  %v2410_v15 = vmul.f32 %v6311_v18, %v2383_v6  ;;  %v2359_v16 = vld [vmem:[#allocation4 + $0x48] sm:$0xff] }
 0x28e   : > { %2343 = vst.msk [vmem:[#allocation4 + $0x68] sm:$0xff] %vm1241_vm3, %v2323_v7  ;;  %v2438_v19 = vadd.f32 %v6320_v25, %v2411_v10  ;;  %v2358_v20 = vld [vmem:[#allocation4 + $0x40] sm:$0xff]  ;;  %v2386_v21 = vadd.f32 %v6306_v13, %v2359_v16 }
 0x28f   : > { %2342 = vst.msk [vmem:[#allocation4 + $0x60] sm:$0xff] %vm1241_vm3, %v2322_v12  ;;  %v5142_v22 = vpop.f32.mrb[34].mxu0  ;;  %5163 = vmatprep.mubr.msk.f32.mxu1 %vm1241_vm3, %v2455_v14  ;;  %v2437_v24 = vadd.f32 %v6320_v25, %v2410_v15  ;;  %v2385_v26 = vadd.f32 %v6306_v13, %v2358_v20 }
 0x290   : > { %v2325_v27 = vadd.f32 %v5142_v22, %v2305_v23  ;;  %v2261_v28 = vpop.f32.mrb[35].mxu0  ;;  %5164 = vmatmul.mubr.msk.f32.gmra.mrb[24].mxu1 %vm1241_vm3, %v2456_v17  ;;  %v2413_v29 = vmul.f32 %v6311_v18, %v2386_v21  ;;  %v2458_v34 = vmax.f32 %v2438_v19, 0.0 }
 0x291   : > { %v2324_v30 = vadd.f32 %v2304_v11, %v2261_v28  ;;  %v2457_v31 = vmax.f32 %v2437_v24, 0.0  ;;  %v2412_v32 = vmul.f32 %v6311_v18, %v2385_v26  ;;  %v2361_v33 = vld [vmem:[#allocation4 + $0x58] sm:$0xff] }
 0x292   : > { %2345 = vst.msk [vmem:[#allocation4 + $0x78] sm:$0xff] %vm1241_vm3, %v2325_v27  ;;  %v2440_v35 = vadd.f32 %v6320_v25, %v2413_v29  ;;  %v2360_v36 = vld [vmem:[#allocation4 + $0x50] sm:$0xff]  ;;  %v2388_v37 = vadd.f32 %v6306_v13, %v2361_v33 }
 0x293   : > { %2344 = vst.msk [vmem:[#allocation4 + $0x70] sm:$0xff] %vm1241_vm3, %v2324_v30  ;;  %v5145_v38 = vpop.f32.mrb[36].mxu0  ;;  %5166 = vmatprep.mubr.msk.f32.mxu1 %vm1241_vm3, %v2457_v31  ;;  %v2439_v40 = vadd.f32 %v6320_v25, %v2412_v32  ;;  %v2387_v41 = vadd.f32 %v6306_v13, %v2360_v36 }
 0x294   : > { %v2327_v42 = vadd.f32 %v5145_v38, %v2307_v39  ;;  %v2271_v43 = vpop.f32.mrb[37].mxu0  ;;  %5167 = vmatmul.mubr.msk.f32.gmra.mrb[26].mxu1 %vm1241_vm3, %v2458_v34  ;;  %v2415_v45 = vmul.f32 %v6311_v18, %v2388_v37  ;;  %v2460_v50 = vmax.f32 %v2440_v35, 0.0 }
 0x295   : > { %v2326_v46 = vadd.f32 %v2306_v44, %v2271_v43  ;;  %v2459_v47 = vmax.f32 %v2439_v40, 0.0  ;;  %v2414_v48 = vmul.f32 %v6311_v18, %v2387_v41  ;;  %v2363_v49 = vld [vmem:[#allocation4 + $0x68] sm:$0xff] }
 0x296   : > { %2347 = vst.msk [vmem:[#allocation4 + $0x88] sm:$0xff] %vm1241_vm3, %v2327_v42  ;;  %v2442_v51 = vadd.f32 %v6320_v25, %v2415_v45  ;;  %v2362_v52 = vld [vmem:[#allocation4 + $0x60] sm:$0xff]  ;;  %v2390_v53 = vadd.f32 %v6306_v13, %v2363_v49 }
 0x297   : > { %2346 = vst.msk [vmem:[#allocation4 + $0x80] sm:$0xff] %vm1241_vm3, %v2326_v46  ;;  %v5148_v54 = vpop.f32.mrb[38].mxu0  ;;  %5169 = vmatprep.mubr.msk.f32.mxu1 %vm1241_vm3, %v2459_v47  ;;  %v2441_v56 = vadd.f32 %v6320_v25, %v2414_v48  ;;  %v2389_v57 = vadd.f32 %v6306_v13, %v2362_v52 }
 0x298   : > { %v2329_v58 = vadd.f32 %v5148_v54, %v2309_v55  ;;  %v2281_v59 = vpop.f32.mrb[39].mxu0  ;;  %5170 = vmatmul.mubr.msk.f32.gmra.mrb[28].mxu1 %vm1241_vm3, %v2460_v50  ;;  %v2417_v61 = vmul.f32 %v6311_v18, %v2390_v53  ;;  %v2462_v2 = vmax.f32 %v2442_v51, 0.0 }
 0x299   : > { %v2328_v62 = vadd.f32 %v2308_v60, %v2281_v59  ;;  %v2461_v63 = vmax.f32 %v2441_v56, 0.0  ;;  %v2416_v0 = vmul.f32 %v6311_v18, %v2389_v57  ;;  %v2365_v1 = vld [vmem:[#allocation4 + $0x78] sm:$0xff] }
 0x29a   : > { %2349 = vst.msk [vmem:[#allocation4 + $0x98] sm:$0xff] %vm1241_vm3, %v2329_v58  ;;  %v2444_v3 = vadd.f32 %v6320_v25, %v2417_v61  ;;  %v2364_v4 = vld [vmem:[#allocation4 + $0x70] sm:$0xff]  ;;  %v2392_v5 = vadd.f32 %v6306_v13, %v2365_v1 }
 0x29b   : > { %2348 = vst.msk [vmem:[#allocation4 + $0x90] sm:$0xff] %vm1241_vm3, %v2328_v62  ;;  %5172 = vmatprep.mubr.msk.f32.mxu1 %vm1241_vm3, %v2461_v63  ;;  %v2443_v6 = vadd.f32 %v6320_v25, %v2416_v0  ;;  %v2391_v7 = vadd.f32 %v6306_v13, %v2364_v4 }
 0x29c   : > { %5173 = vmatmul.mubr.msk.f32.gmra.mrb[30].mxu1 %vm1241_vm3, %v2462_v2  ;;  %v2419_v8 = vmul.f32 %v6311_v18, %v2392_v5  ;;  %v2464_v14 = vmax.f32 %v2444_v3, 0.0 }
 0x29d   : > { %v2463_v9 = vmax.f32 %v2443_v6, 0.0  ;;  %v2418_v10 = vmul.f32 %v6311_v18, %v2391_v7  ;;  %v2367_v12 = vld [vmem:[#allocation4 + $0x88] sm:$0xff] }
 0x29e   : > { %v2446_v15 = vadd.f32 %v6320_v25, %v2419_v8  ;;  %v2366_v16 = vld [vmem:[#allocation4 + $0x80] sm:$0xff]  ;;  %v2394_v17 = vadd.f32 %v6306_v13, %v2367_v12 }
 0x29f   : > { %5175 = vmatprep.mubr.msk.f32.mxu1 %vm1241_vm3, %v2463_v9  ;;  %v2445_v19 = vadd.f32 %v6320_v25, %v2418_v10  ;;  %v2393_v20 = vadd.f32 %v6306_v13, %v2366_v16 }
 0x2a0   : > { %5176 = vmatmul.mubr.msk.f32.gmra.mrb[32].mxu1 %vm1241_vm3, %v2464_v14  ;;  %v2421_v21 = vmul.f32 %v6311_v18, %v2394_v17  ;;  %v2466_v26 = vmax.f32 %v2446_v15, 0.0 }
 0x2a1   : > { %v2465_v22 = vmax.f32 %v2445_v19, 0.0  ;;  %v2420_v23 = vmul.f32 %v6311_v18, %v2393_v20  ;;  %v2369_v24 = vld [vmem:[#allocation4 + $0x98] sm:$0xff] }
 0x2a2   : > { %v2448_v27 = vadd.f32 %v6320_v25, %v2421_v21  ;;  %v2368_v28 = vld [vmem:[#allocation4 + $0x90] sm:$0xff]  ;;  %v2396_v11 = vadd.f32 %v6306_v13, %v2369_v24 }
 0x2a3   : > { %5178 = vmatprep.mubr.msk.f32.mxu1 %vm1241_vm3, %v2465_v22  ;;  %v2447_v29 = vadd.f32 %v6320_v25, %v2420_v23  ;;  %v2395_v30 = vadd.f32 %v6306_v13, %v2368_v28  ;;  %v4662_v13 = vld [vmem:[%s7008_s10] ss:$0 sm:$0xff] }
 0x2a4   : > { %5179 = vmatmul.mubr.msk.f32.gmra.mrb[34].mxu1 %vm1241_vm3, %v2466_v26  ;;  %v2423_v31 = vmul.f32 %v6311_v18, %v2396_v11  ;;  %v2468_v34 = vmax.f32 %v2448_v27, 0.0 }
 0x2a5   : > { %v2467_v32 = vmax.f32 %v2447_v29, 0.0  ;;  %v2422_v33 = vmul.f32 %v6311_v18, %v2395_v30 }
 0x2a6   : > { %v2450_v35 = vadd.f32 %v6320_v25, %v2423_v31 }
 0x2a7   : > { %5181 = vmatprep.mubr.msk.f32.mxu1 %vm1241_vm3, %v2467_v32  ;;  %v2449_v36 = vadd.f32 %v6320_v25, %v2422_v33 }
 0x2a8   : > { %5182 = vmatmul.mubr.msk.f32.gmra.mrb[36].mxu1 %vm1241_vm3, %v2468_v34  ;;  %v2470_v38 = vmax.f32 %v2450_v35, 0.0 }
 0x2a9   : > { %v2469_v37 = vmax.f32 %v2449_v36, 0.0  ;;  %v5613_v36 = vmov (!%p4553_p13), 0.0  }
 0x2ab   : > { %5184 = vmatprep.mubr.msk.f32.mxu1 %vm1241_vm3, %v2469_v37 }
 0x2ac   : > { %5185 = vmatmul.mubr.msk.f32.gmra.mrb[38].mxu1 %vm1241_vm3, %v2470_v38 }
 0x35b   : > { %v5159_v18 = vpop.f32.mrb[20].mxu1 }
 0x35c   : > { %v2708_v39 = vadd.f32 %v5159_v18, %v4662_v13  ;;  %v2601_v40 = vpop.f32.mrb[21].mxu1 }
 0x35d   : > { %v2707_v41 = vadd.f32 %v4662_v13, %v2601_v40 }
 0x35e   : > { %2749 = vrot.lane.b32.xlu1 %v2708_v39, %s5609_s30 }
 0x35f   : > { %2747 = vrot.lane.b32.xlu0 %v2707_v41, %s5609_s30  ;;  %v5162_v25 = vpop.f32.mrb[22].mxu1 }
 0x360   : > { %v2710_v42 = vadd.f32 %v5162_v25, %v4662_v13  ;;  %v2611_v43 = vpop.f32.mrb[23].mxu1 }
 0x361   : > { %v2709_v44 = vadd.f32 %v4662_v13, %v2611_v43 }
 0x362   : > { %2753 = vrot.lane.b32.xlu1 %v2710_v42, %s5609_s30 }
 0x363   : > { %2751 = vrot.lane.b32.xlu0 %v2709_v44, %s5609_s30  ;;  %v5165_v45 = vpop.f32.mrb[24].mxu1 }
 0x364   : > { %v2712_v46 = vadd.f32 %v5165_v45, %v4662_v13  ;;  %v2621_v47 = vpop.f32.mrb[25].mxu1 }
 0x365   : > { %v2711_v48 = vadd.f32 %v4662_v13, %v2621_v47 }
 0x366   : > { %2757 = vrot.lane.b32.xlu1 %v2712_v46, %s5609_s30 }
 0x367   : > { %2755 = vrot.lane.b32.xlu0 %v2711_v48, %s5609_s30  ;;  %v5168_v49 = vpop.f32.mrb[26].mxu1 }
 0x368   : > { %v2714_v50 = vadd.f32 %v5168_v49, %v4662_v13  ;;  %v2631_v51 = vpop.f32.mrb[27].mxu1 }
 0x369   : > { %v2713_v52 = vadd.f32 %v4662_v13, %v2631_v51 }
 0x36a   : > { %2761 = vrot.lane.b32.xlu1 %v2714_v50, %s5609_s30 }
 0x36b   : > { %2759 = vrot.lane.b32.xlu0 %v2713_v52, %s5609_s30  ;;  %v5171_v53 = vpop.f32.mrb[28].mxu1 }
 0x36c   : > { %v2716_v54 = vadd.f32 %v5171_v53, %v4662_v13  ;;  %v2641_v55 = vpop.f32.mrb[29].mxu1 }
 0x36d   : > { %v2715_v56 = vadd.f32 %v4662_v13, %v2641_v55 }
 0x36e   : > { %2765 = vrot.lane.b32.xlu1 %v2716_v54, %s5609_s30 }
 0x36f   : > { %2763 = vrot.lane.b32.xlu0 %v2715_v56, %s5609_s30  ;;  %v5174_v57 = vpop.f32.mrb[30].mxu1 }
 0x370   : > { %v2718_v58 = vadd.f32 %v5174_v57, %v4662_v13  ;;  %v2651_v59 = vpop.f32.mrb[31].mxu1 }
 0x371   : > { %v2717_v60 = vadd.f32 %v4662_v13, %v2651_v59 }
 0x372   : > { %2769 = vrot.lane.b32.xlu1 %v2718_v58, %s5609_s30 }
 0x373   : > { %2767 = vrot.lane.b32.xlu0 %v2717_v60, %s5609_s30  ;;  %v5177_v61 = vpop.f32.mrb[32].mxu1 }
 0x374   : > { %v2720_v62 = vadd.f32 %v5177_v61, %v4662_v13  ;;  %v2661_v63 = vpop.f32.mrb[33].mxu1 }
 0x375   : > { %v2719_v0 = vadd.f32 %v4662_v13, %v2661_v63 }
 0x376   : > { %2773 = vrot.lane.b32.xlu1 %v2720_v62, %s5609_s30 }
 0x377   : > { %2771 = vrot.lane.b32.xlu0 %v2719_v0, %s5609_s30  ;;  %v5180_v1 = vpop.f32.mrb[34].mxu1 }
 0x378   : > { %v2722_v2 = vadd.f32 %v5180_v1, %v4662_v13  ;;  %v2671_v3 = vpop.f32.mrb[35].mxu1 }
 0x379   : > { %v2721_v4 = vadd.f32 %v4662_v13, %v2671_v3 }
 0x37a   : > { %2777 = vrot.lane.b32.xlu1 %v2722_v2, %s5609_s30 }
 0x37b   : > { %2775 = vrot.lane.b32.xlu0 %v2721_v4, %s5609_s30  ;;  %v5183_v5 = vpop.f32.mrb[36].mxu1 }
 0x37c   : > { %v2724_v6 = vadd.f32 %v5183_v5, %v4662_v13  ;;  %v2681_v7 = vpop.f32.mrb[37].mxu1 }
 0x37d   : > { %v2723_v8 = vadd.f32 %v4662_v13, %v2681_v7 }
 0x37e   : > { %2781 = vrot.lane.b32.xlu1 %v2724_v6, %s5609_s30 }
 0x37f   : > { %2779 = vrot.lane.b32.xlu0 %v2723_v8, %s5609_s30  ;;  %v5186_v9 = vpop.f32.mrb[38].mxu1 }
 0x380   : > { %v2726_v10 = vadd.f32 %v5186_v9, %v4662_v13  ;;  %v2691_v12 = vpop.f32.mrb[39].mxu1 }
 0x381   : > { %v2725_v14 = vadd.f32 %v4662_v13, %v2691_v12 }
 0x382   : > { %2785 = vrot.lane.b32.xlu1 %v2726_v10, %s5609_s30 }
 0x383   : > { %2783 = vrot.lane.b32.xlu0 %v2725_v14, %s5609_s30 }
 0x3d0   : > { %v2750_v15 = vpop.permute.xlu1 %2749 }
 0x3d1   : > { %2808 = vst.msk [vmem:[#allocation3 + $0x8] sm:$0xff] %vm917_vm0, %v2750_v15  ;;  %v2748_v16 = vpop.permute.xlu0 %2747 }
 0x3d2   : > { %2807 = vst.msk [vmem:[#allocation3] sm:$0xff] %vm917_vm0, %v2748_v16  ;;  %2831 = vst.msk [vmem:[#allocation3 + $0x8] sm:$0xff] (!%p4553_p13), %vm917_vm0, %v5613_v36 }
 0x3d3   : > { %2830 = vst.msk [vmem:[#allocation3] sm:$0xff] (!%p4553_p13), %vm917_vm0, %v5613_v36 }
 0x3d4   : > { %v2754_v17 = vpop.permute.xlu1 %2753 }
 0x3d5   : > { %2810 = vst.msk [vmem:[#allocation3 + $0x18] sm:$0xff] %vm917_vm0, %v2754_v17  ;;  %v2752_v19 = vpop.permute.xlu0 %2751 }
 0x3d6   : > { %2809 = vst.msk [vmem:[#allocation3 + $0x10] sm:$0xff] %vm917_vm0, %v2752_v19 }
 0x3d8   : > { %v2758_v20 = vpop.permute.xlu1 %2757 }
 0x3d9   : > { %2812 = vst.msk [vmem:[#allocation3 + $0x28] sm:$0xff] %vm917_vm0, %v2758_v20  ;;  %v2756_v21 = vpop.permute.xlu0 %2755 }
 0x3da   : > { %2811 = vst.msk [vmem:[#allocation3 + $0x20] sm:$0xff] %vm917_vm0, %v2756_v21 }
 0x3dc   : > { %v2762_v22 = vpop.permute.xlu1 %2761 }
 0x3dd   : > { %2814 = vst.msk [vmem:[#allocation3 + $0x38] sm:$0xff] %vm917_vm0, %v2762_v22  ;;  %v2760_v23 = vpop.permute.xlu0 %2759 }
 0x3de   : > { %2813 = vst.msk [vmem:[#allocation3 + $0x30] sm:$0xff] %vm917_vm0, %v2760_v23 }
 0x3e0   : > { %v2766_v24 = vpop.permute.xlu1 %2765 }
 0x3e1   : > { %2816 = vst.msk [vmem:[#allocation3 + $0x48] sm:$0xff] %vm917_vm0, %v2766_v24  ;;  %v2764_v26 = vpop.permute.xlu0 %2763 }
 0x3e2   : > { %2815 = vst.msk [vmem:[#allocation3 + $0x40] sm:$0xff] %vm917_vm0, %v2764_v26 }
 0x3e4   : > { %v2770_v27 = vpop.permute.xlu1 %2769 }
 0x3e5   : > { %2818 = vst.msk [vmem:[#allocation3 + $0x58] sm:$0xff] %vm917_vm0, %v2770_v27  ;;  %v2768_v28 = vpop.permute.xlu0 %2767 }
 0x3e6   : > { %2817 = vst.msk [vmem:[#allocation3 + $0x50] sm:$0xff] %vm917_vm0, %v2768_v28 }
 0x3e8   : > { %v2774_v11 = vpop.permute.xlu1 %2773 }
 0x3e9   : > { %2820 = vst.msk [vmem:[#allocation3 + $0x68] sm:$0xff] %vm917_vm0, %v2774_v11  ;;  %v2772_v29 = vpop.permute.xlu0 %2771 }
 0x3ea   : > { %2819 = vst.msk [vmem:[#allocation3 + $0x60] sm:$0xff] %vm917_vm0, %v2772_v29 }
 0x3ec   : > { %v2778_v30 = vpop.permute.xlu1 %2777 }
 0x3ed   : > { %2822 = vst.msk [vmem:[#allocation3 + $0x78] sm:$0xff] %vm917_vm0, %v2778_v30  ;;  %v2776_v31 = vpop.permute.xlu0 %2775 }
 0x3ee   : > { %2821 = vst.msk [vmem:[#allocation3 + $0x70] sm:$0xff] %vm917_vm0, %v2776_v31 }
 0x3f0   : > { %v2782_v32 = vpop.permute.xlu1 %2781  ;;  %2829 = sbr.rel (%p4553_p13) target bundleno = 1015 (0x3f7), region = 104 }
 0x3f1   : > { %2824 = vst.msk [vmem:[#allocation3 + $0x88] sm:$0xff] %vm917_vm0, %v2782_v32  ;;  %v2780_v33 = vpop.permute.xlu0 %2779 }
 0x3f2   : > { %2823 = vst.msk [vmem:[#allocation3 + $0x80] sm:$0xff] %vm917_vm0, %v2780_v33 }
 0x3f4   : > { %v2786_v34 = vpop.permute.xlu1 %2785 }
 0x3f5   : > { %2826 = vst.msk [vmem:[#allocation3 + $0x98] sm:$0xff] %vm917_vm0, %v2786_v34  ;;  %v2784_v35 = vpop.permute.xlu0 %2783 }
 0x3f6   : > { %2825 = vst.msk [vmem:[#allocation3 + $0x90] sm:$0xff] %vm917_vm0, %v2784_v35 }
 0x3f7 PF: > { %2834 = sbr.rel (%p4554_p0) target bundleno = 1022 (0x3fe), region = 108  ;;  %v5614_v37 = vmov (!%p4554_p0), 0.0  }
 0x3f8   : > { %2836 = vst.msk [vmem:[#allocation3 + $0x90] sm:$0xff] (!%p4554_p0), %vm917_vm0, %v5614_v37  ;;  %2837 = vst.msk [vmem:[#allocation3 + $0x98] sm:$0xff] (!%p4554_p0), %vm917_vm0, %v5614_v37 }
 0x3fe PF: > { %v2838_v38 = vld [vmem:[#allocation3] sm:$0xff]  ;;  %v2839_v13 = vld [vmem:[#allocation3 + $0x8] sm:$0xff]  ;;  %v2840_v25 = vld [vmem:[#allocation3 + $0x10] sm:$0xff]  ;;  %s7043_s23 = sld [smem:[#allocation15_spill]]  ;;  %s7044_s14 = sld [smem:[#allocation10_spill]] }
 0x3ff   : > { %v2878_v18 = vrot.slane %v2838_v38, 7  ;;  %v2998_v39 = vrot.slane %v2838_v38, 1  ;;  %v2999_v40 = vrot.slane %v2839_v13, 1  ;;  %v2879_v41 = vrot.slane %v2839_v13, 7  ;;  %v2841_v42 = vld [vmem:[#allocation3 + $0x18] sm:$0xff]  ;;  %v2842_v51 = vld [vmem:[#allocation3 + $0x20] sm:$0xff] }
 0x400   : > { %v2881_v46 = vrot.slane %v2840_v25, 7  ;;  %v2882_v47 = vrot.slane %v2841_v42, 7  ;;  %v3001_v48 = vrot.slane %v2840_v25, 1  ;;  %v3002_v49 = vrot.slane %v2841_v42, 1  ;;  %v2843_v52 = vld [vmem:[#allocation3 + $0x28] sm:$0xff]  ;;  %v3154_v57 = vld [vmem:[%s7009_s11] sm:$0xff] }
 0x401   : > { %2908 = vrot.lane.b32.xlu0 %v2878_v18, %s5612_s29  ;;  %v3000_v43 = vsel %vm1266_vm1, %v2998_v39, %v2999_v40  ;;  %v2880_v44 = vsel %vm1120_vm2, %v2878_v18, %v2879_v41  ;;  %v3038_v45 = vsel %vm1266_vm1, %v2999_v40, 0.0  ;;  %v2884_v55 = vrot.slane %v2842_v51, 7  ;;  %v3155_v58 = vld [vmem:[%s7009_s11 + $0x8] sm:$0xff]  ;;  %v3156_v59 = vld [vmem:[%s7009_s11 + $0x10] sm:$0xff]  ;;  %v3157_v60 = vld [vmem:[%s7009_s11 + $0x18] sm:$0xff]  ;;  %s7045_s24 = sld [smem:[#allocation11_spill]] }
 0x402   : > { %3058 = vrot.lane.b32.xlu1 %v3000_v43, %s5609_s30  ;;  %v2883_v50 = vsel %vm1120_vm2, %v2881_v46, %v2882_v47  ;;  %v3003_v53 = vsel %vm1266_vm1, %v3001_v48, %v3002_v49  ;;  %v3039_v54 = vsel %vm1266_vm1, %v3002_v49, 0.0  ;;  %v2885_v56 = vrot.slane %v2843_v52, 7  ;;  %v4681_v61 = vld [vmem:[%s7009_s11 + $0x60] sm:$0xff]  ;;  %v4682_v62 = vld [vmem:[%s7009_s11 + $0x68] sm:$0xff]  ;;  %v4683_v1 = vld [vmem:[%s7009_s11 + $0x70] sm:$0xff] }
 0x403   : > { %v3004_v63 = vrot.slane %v2842_v51, 1  ;;  %v3005_v0 = vrot.slane %v2843_v52, 1  ;;  %v4684_v2 = vld [vmem:[%s7009_s11 + $0x78] sm:$0xff]  ;;  %v2844_v4 = vld [vmem:[#allocation3 + $0x30] sm:$0xff]  ;;  %v5443_v6 = vpack.c.bf16 %v3155_v58, %v3154_v57  ;;  %v5447_v7 = vpack.c.bf16 %v3157_v60, %v3156_v59  ;;  %v3158_v9 = vld [vmem:[%s7009_s11 + $0x20] sm:$0xff] }
 0x404   : > { %v2886_v3 = vsel %vm1120_vm2, %v2884_v55, %v2885_v56  ;;  %v2845_v5 = vld [vmem:[#allocation3 + $0x38] sm:$0xff]  ;;  %v5467_v8 = vpack.c.bf16 %v4682_v62, %v4681_v61  ;;  %v3159_v10 = vld [vmem:[%s7009_s11 + $0x28] sm:$0xff]  ;;  %v5471_v12 = vpack.c.bf16 %v4684_v2, %v4683_v1  ;;  %v4685_v15 = vld [vmem:[%s7009_s11 + $0x80] sm:$0xff]  ;;  %v2887_v19 = vrot.slane %v2844_v4, 7 }
 0x405   : > { %2910 = vrot.lane.b32.xlu0 %v2880_v44, %s5612_s29  ;;  %v3006_v14 = vsel %vm1266_vm1, %v3004_v63, %v3005_v0  ;;  %5444 = vmatprep.subr.bf16.mxu0 %v5443_v6  ;;  %v4686_v16 = vld [vmem:[%s7009_s11 + $0x88] sm:$0xff]  ;;  %v3040_v17 = vsel %vm1266_vm1, %v3005_v0, 0.0  ;;  %v2888_v20 = vrot.slane %v2845_v5, 7  ;;  %v5451_v21 = vpack.c.bf16 %v3159_v10, %v3158_v9  ;;  %v3160_v22 = vld [vmem:[%s7009_s11 + $0x30] sm:$0xff]  ;;  %v3161_v23 = vld [vmem:[%s7009_s11 + $0x38] sm:$0xff] }
 0x406   : > { %3060 = vrot.lane.b32.xlu1 %v3038_v45, %s5609_s30  ;;  %5446 = vmatpush3.bf16.msra.mxu0 %v5443_v6  ;;  %v5475_v24 = vpack.c.bf16 %v4686_v16, %v4685_v15  ;;  %v3007_v26 = vrot.slane %v2844_v4, 1  ;;  %v3008_v27 = vrot.slane %v2845_v5, 1  ;;  %v4687_v28 = vld [vmem:[%s7009_s11 + $0x90] sm:$0xff]  ;;  %v4688_v11 = vld [vmem:[%s7009_s11 + $0x98] sm:$0xff]  ;;  %v2846_v30 = vld [vmem:[#allocation3 + $0x40] sm:$0xff]  ;;  %v5455_v32 = vpack.c.bf16 %v3161_v23, %v3160_v22 }
 0x407   : > { %5468 = vmatprep.subr.bf16.mxu1 %v5467_v8  ;;  %5448 = vmatprep.subr.bf16.mxu0 %v5447_v7  ;;  %v2889_v29 = vsel %vm1120_vm2, %v2887_v19, %v2888_v20  ;;  %v2847_v31 = vld [vmem:[#allocation3 + $0x48] sm:$0xff]  ;;  %v3162_v33 = vld [vmem:[%s7009_s11 + $0x40] sm:$0xff]  ;;  %v5479_v35 = vpack.c.bf16 %v4688_v11, %v4687_v28  ;;  %v2890_v18 = vrot.slane %v2846_v30, 7  ;;  %v3164_v41 = vld [vmem:[%s7009_s11 + $0x50] sm:$0xff]  ;;  %v3010_v43 = vrot.slane %v2846_v30, 1 }
 0x408   : > { %5470 = vmatpush3.bf16.msra.mxu1 %v5467_v8  ;;  %v3163_v34 = vld [vmem:[%s7009_s11 + $0x48] sm:$0xff]  ;;  %v3009_v36 = vsel %vm1266_vm1, %v3007_v26, %v3008_v27  ;;  %v4689_v37 = vld [vmem:[%s7009_s11 + $0xa0] sm:$0xff]  ;;  %v3041_v13 = vsel %vm1266_vm1, %v3008_v27, 0.0  ;;  %v2891_v39 = vrot.slane %v2847_v31, 7  ;;  %v3165_v25 = vld [vmem:[%s7009_s11 + $0x58] sm:$0xff]  ;;  %v3011_v44 = vrot.slane %v2847_v31, 1 }
 0x409   : > { %2912 = vrot.lane.b32.xlu0 %v2881_v46, %s5612_s29  ;;  %5472 = vmatprep.subr.bf16.mxu1 %v5471_v12  ;;  %v4690_v38 = vld [vmem:[%s7009_s11 + $0xa8] sm:$0xff]  ;;  %v5459_v40 = vpack.c.bf16 %v3163_v34, %v3162_v33  ;;  %v4691_v45 = vld [vmem:[%s7009_s11 + $0xb0] sm:$0xff]  ;;  %v4692_v46 = vld [vmem:[%s7009_s11 + $0xb8] sm:$0xff] }
 0x40a   : > { %2914 = vrot.lane.b32.xlu1 %v2883_v50, %s5612_s29  ;;  %5450 = vmatpush3.bf16.msra.mxu0 %v5447_v7  ;;  %v5483_v42 = vpack.c.bf16 %v4690_v38, %v4689_v37  ;;  %v2892_v47 = vsel %vm1120_vm2, %v2890_v18, %v2891_v39  ;;  %v2848_v48 = vld [vmem:[#allocation3 + $0x50] sm:$0xff]  ;;  %v2849_v49 = vld [vmem:[#allocation3 + $0x58] sm:$0xff]  ;;  %v5463_v50 = vpack.c.bf16 %v3165_v25, %v3164_v41  ;;  %v4709_v52 = vld [vmem:[%s7009_s11 + $0xc0] sm:$0xff] }
 0x40b   : > { %5452 = vmatprep.subr.bf16.mxu0 %v5451_v21  ;;  %v5487_v51 = vpack.c.bf16 %v4692_v46, %v4691_v45  ;;  %v2893_v56 = vrot.slane %v2848_v48, 7  ;;  %v2894_v57 = vrot.slane %v2849_v49, 7  ;;  %v3013_v59 = vrot.slane %v2848_v48, 1  ;;  %v2850_v62 = vld [vmem:[#allocation3 + $0x60] sm:$0xff]  ;;  %v2851_v63 = vld [vmem:[#allocation3 + $0x68] sm:$0xff]  ;;  %v2852_v7 = vld [vmem:[#allocation3 + $0x70] sm:$0xff] }
 0x40c   : > { %5474 = vmatpush3.bf16.msra.mxu1 %v5471_v12  ;;  %v3014_v60 = vrot.slane %v2849_v49, 1  ;;  %v2896_v2 = vrot.slane %v2850_v62, 7  ;;  %v3016_v4 = vrot.slane %v2850_v62, 1  ;;  %v3017_v5 = vrot.slane %v2851_v63, 1  ;;  %v2853_v8 = vld [vmem:[#allocation3 + $0x78] sm:$0xff]  ;;  %v2855_v20 = vld [vmem:[#allocation3 + $0x88] sm:$0xff] }
 0x40d   : > { %3062 = vrot.lane.b32.xlu0 %v3003_v53, %s5609_s30  ;;  %5476 = vmatprep.subr.bf16.mxu1 %v5475_v24  ;;  %v4710_v53 = vld [vmem:[%s7009_s11 + $0xc8] sm:$0xff]  ;;  %v2895_v61 = vsel %vm1120_vm2, %v2893_v56, %v2894_v57  ;;  %v2899_v12 = vrot.slane %v2852_v7, 7  ;;  %v3019_v15 = vrot.slane %v2852_v7, 1  ;;  %v3020_v16 = vrot.slane %v2853_v8, 1  ;;  %v2856_v11 = vld [vmem:[#allocation3 + $0x90] sm:$0xff]  ;;  %v4712_v45 = vld [vmem:[%s7009_s11 + $0xd8] sm:$0xff] }
 0x40e   : > { %3064 = vrot.lane.b32.xlu1 %v3039_v54, %s5609_s30  ;;  %5454 = vmatpush3.bf16.msra.mxu0 %v5451_v21  ;;  %v3012_v54 = vsel %vm1266_vm1, %v3010_v43, %v3011_v44  ;;  %v6576_v58 = vpack.c.bf16 %v4710_v53, %v4709_v52  ;;  %v3015_v0 = vsel %vm1266_vm1, %v3013_v59, %v3014_v60  ;;  %v3043_v1 = vsel %vm1266_vm1, %v3014_v60, 0.0  ;;  %v4714_v52 = vld [vmem:[%s7009_s11 + $0xe8] sm:$0xff]  ;;  %v4715_v57 = vld [vmem:[%s7009_s11 + $0xf0] sm:$0xff]  ;;  %v4716_v59 = vld [vmem:[%s7009_s11 + $0xf8] sm:$0xff] }
 0x40f   : > { %5456 = vmatprep.subr.bf16.mxu0 %v5455_v32  ;;  %v3018_v9 = vsel %vm1266_vm1, %v3016_v4, %v3017_v5  ;;  %v3044_v10 = vsel %vm1266_vm1, %v3017_v5, 0.0  ;;  %v3021_v21 = vsel %vm1266_vm1, %v3019_v15, %v3020_v16  ;;  %v3045_v22 = vsel %vm1266_vm1, %v3020_v16, 0.0  ;;  %v4720_v7 = vld [vmem:[%s7009_s11 + $0x118] sm:$0xff] }
 0x410   : > { %5478 = vmatpush3.bf16.msra.mxu1 %v5475_v24  ;;  %v2903_v24 = vrot.slane %v2855_v20, 7  ;;  %v3023_v27 = vrot.slane %v2855_v20, 1  ;;  %v3025_v34 = vrot.slane %v2856_v11, 1 }
 0x411   : > { %2916 = vrot.lane.b32.xlu0 %v2884_v55, %s5612_s29  ;;  %5480 = vmatprep.subr.bf16.mxu1 %v5479_v35  ;;  %v3042_v55 = vsel %vm1266_vm1, %v3011_v44, 0.0  ;;  %v4711_v44 = vld [vmem:[%s7009_s11 + $0xd0] sm:$0xff] }
 0x412   : > { %2918 = vrot.lane.b32.xlu1 %v2886_v3, %s5612_s29  ;;  %5458 = vmatpush3.bf16.msra.mxu0 %v5455_v32  ;;  %v2897_v3 = vrot.slane %v2851_v63, 7  ;;  %v3046_v31 = vsel %vm1266_vm1, %v3023_v27, 0.0  ;;  %v2905_v32 = vrot.slane %v2856_v11, 7  ;;  %v5495_v48 = vpack.c.bf16 %v4712_v45, %v4711_v44 }
 0x413   : > { %5460 = vmatprep.subr.bf16.mxu0 %v5459_v40 }
 0x414   : > { %5482 = vmatpush3.bf16.msra.mxu1 %v5479_v35  ;;  %v2898_v6 = vsel %vm1120_vm2, %v2896_v2, %v2897_v3 }
 0x415   : > { %3066 = vrot.lane.b32.xlu0 %v3006_v14, %s5609_s30  ;;  %5484 = vmatprep.subr.bf16.mxu1 %v5483_v42  ;;  %v2900_v14 = vrot.slane %v2853_v8, 7 }
 0x416   : > { %3068 = vrot.lane.b32.xlu1 %v3040_v17, %s5609_s30  ;;  %5462 = vmatpush3.bf16.msra.mxu0 %v5459_v40 }
 0x417   : > { %5464 = vmatprep.subr.bf16.mxu0 %v5463_v50  ;;  %v2901_v17 = vsel %vm1120_vm2, %v2899_v12, %v2900_v14 }
 0x418   : > { %5486 = vmatpush3.bf16.msra.mxu1 %v5483_v42 }
 0x419   : > { %2920 = vrot.lane.b32.xlu0 %v2887_v19, %s5612_s29  ;;  %5488 = vmatprep.subr.bf16.mxu1 %v5487_v51  ;;  %v2854_v19 = vld [vmem:[#allocation3 + $0x80] sm:$0xff] }
 0x41a   : > { %2922 = vrot.lane.b32.xlu1 %v2889_v29, %s5612_s29  ;;  %5466 = vmatpush3.bf16.msra.mxu0 %v5463_v50  ;;  %v2902_v23 = vrot.slane %v2854_v19, 7  ;;  %v3022_v26 = vrot.slane %v2854_v19, 1  ;;  %v2857_v29 = vld [vmem:[#allocation3 + $0x98] sm:$0xff] }
 0x41b   : > { %5492 = vmatprep.subr.bf16.mxu0 %v6576_v58  ;;  %v2906_v33 = vrot.slane %v2857_v29, 7  ;;  %v3026_v35 = vrot.slane %v2857_v29, 1 }
 0x41c   : > { %5490 = vmatpush3.bf16.msra.mxu1 %v5487_v51  ;;  %v2904_v28 = vsel %vm1120_vm2, %v2902_v23, %v2903_v24  ;;  %v3024_v30 = vsel %vm1266_vm1, %v3022_v26, %v3023_v27  ;;  %v4713_v51 = vld [vmem:[%s7009_s11 + $0xe0] sm:$0xff] }
 0x41d   : > { %3070 = vrot.lane.b32.xlu0 %v3009_v36, %s5609_s30  ;;  %v2907_v36 = vsel %vm1120_vm2, %v2905_v32, %v2906_v33  ;;  %v3027_v37 = vsel %vm1266_vm1, %v3025_v34, %v3026_v35  ;;  %v3047_v38 = vsel %vm1266_vm1, %v3026_v35, 0.0 }
 0x41e   : > { %3072 = vrot.lane.b32.xlu1 %v3041_v13, %s5609_s30 }
 0x421   : > { %2924 = vrot.lane.b32.xlu0 %v2890_v18, %s5612_s29 }
 0x422   : > { %2926 = vrot.lane.b32.xlu1 %v2892_v47, %s5612_s29 }
 0x425   : > { %3074 = vrot.lane.b32.xlu0 %v3012_v54, %s5609_s30  ;;  %v5499_v54 = vpack.c.bf16 %v4714_v52, %v4713_v51 }
 0x426   : > { %3076 = vrot.lane.b32.xlu1 %v3042_v55, %s5609_s30 }
 0x429   : > { %2928 = vrot.lane.b32.xlu0 %v2893_v56, %s5612_s29 }
 0x42a   : > { %2930 = vrot.lane.b32.xlu1 %v2895_v61, %s5612_s29  ;;  %v5503_v61 = vpack.c.bf16 %v4716_v59, %v4715_v57  ;;  %v4018_v57 = vld [vmem:[%s7013_s15] sm:$0xff]  ;;  %v4019_v59 = vld [vmem:[%s7013_s15 + $0x8] sm:$0xff] }
 0x42d   : > { %3078 = vrot.lane.b32.xlu0 %v3015_v0, %s5609_s30  ;;  %v4717_v0 = vld [vmem:[%s7009_s11 + $0x100] sm:$0xff] }
 0x42e   : > { %3080 = vrot.lane.b32.xlu1 %v3043_v1, %s5609_s30  ;;  %v4718_v1 = vld [vmem:[%s7009_s11 + $0x108] sm:$0xff] }
 0x42f   : > { %v5507_v3 = vpack.c.bf16 %v4718_v1, %v4717_v0 }
 0x431   : > { %2932 = vrot.lane.b32.xlu0 %v2896_v2, %s5612_s29 }
 0x432   : > { %2934 = vrot.lane.b32.xlu1 %v2898_v6, %s5612_s29  ;;  %v4719_v6 = vld [vmem:[%s7009_s11 + $0x110] sm:$0xff] }
 0x435   : > { %3082 = vrot.lane.b32.xlu0 %v3018_v9, %s5609_s30 }
 0x436   : > { %3084 = vrot.lane.b32.xlu1 %v3044_v10, %s5609_s30  ;;  %v5511_v10 = vpack.c.bf16 %v4720_v7, %v4719_v6 }
 0x439   : > { %2936 = vrot.lane.b32.xlu0 %v2899_v12, %s5612_s29 }
 0x43a   : > { %2938 = vrot.lane.b32.xlu1 %v2901_v17, %s5612_s29 }
 0x43d   : > { %3086 = vrot.lane.b32.xlu0 %v3021_v21, %s5609_s30 }
 0x43e   : > { %3088 = vrot.lane.b32.xlu1 %v3045_v22, %s5609_s30 }
 0x441   : > { %2940 = vrot.lane.b32.xlu0 %v2902_v23, %s5612_s29 }
 0x442   : > { %2942 = vrot.lane.b32.xlu1 %v2904_v28, %s5612_s29 }
 0x445   : > { %3090 = vrot.lane.b32.xlu0 %v3024_v30, %s5609_s30 }
 0x446   : > { %3092 = vrot.lane.b32.xlu1 %v3046_v31, %s5609_s30 }
 0x449   : > { %2944 = vrot.lane.b32.xlu0 %v2905_v32, %s5612_s29 }
 0x44a   : > { %2946 = vrot.lane.b32.xlu1 %v2907_v36, %s5612_s29 }
 0x44d   : > { %3094 = vrot.lane.b32.xlu0 %v3027_v37, %s5609_s30 }
 0x44e   : > { %3096 = vrot.lane.b32.xlu1 %v3047_v38, %s5609_s30  ;;  %s7046_s30 = sld [smem:[#allocation16_spill]] }
 0x473   : > { %v2909_v13 = vpop.permute.xlu0 %2908 }
 0x474   : > { %v2968_v18 = vsel %vm1120_vm2, 0.0, %v2909_v13  ;;  %v3059_v39 = vpop.permute.xlu1 %3058 }
 0x475   : > { %2978 = vst.msk [vmem:[#allocation3] sm:$0xff] %vm1241_vm3, %v2968_v18 }
 0x476   : > { %3118 = vst.msk [vmem:[#allocation3] sm:$0xff] %vm1411_vm4, %v3059_v39 }
 0x477   : > { %v2911_v40 = vpop.permute.xlu0 %2910 }
 0x478   : > { %2979 = vst.msk [vmem:[#allocation3 + $0x8] sm:$0xff] %vm1241_vm3, %v2911_v40  ;;  %v3061_v41 = vpop.permute.xlu1 %3060 }
 0x479   : > { %3119 = vst.msk [vmem:[#allocation3 + $0x8] sm:$0xff] %vm1411_vm4, %v3061_v41 }
 0x47b   : > { %v2913_v25 = vpop.permute.xlu0 %2912 }
 0x47c   : > { %v2969_v42 = vsel %vm1120_vm2, 0.0, %v2913_v25  ;;  %v2915_v43 = vpop.permute.xlu1 %2914 }
 0x47d   : > { %2980 = vst.msk [vmem:[#allocation3 + $0x10] sm:$0xff] %vm1241_vm3, %v2969_v42  ;;  %2981 = vst.msk [vmem:[#allocation3 + $0x18] sm:$0xff] %vm1241_vm3, %v2915_v43  ;;  %v3138_v46 = vld [vmem:[#allocation3] sm:$0xff] }
 0x47e   : > { %5211 = vmatprep.mubr.msk.f32.mxu0 %vm1468_vm5, %v3138_v46 }
 0x47f   : > { %v3063_v47 = vpop.permute.xlu0 %3062 }
 0x480   : > { %3120 = vst.msk [vmem:[#allocation3 + $0x10] sm:$0xff] %vm1411_vm4, %v3063_v47  ;;  %v3065_v49 = vpop.permute.xlu1 %3064  ;;  %v3139_v50 = vld [vmem:[#allocation3 + $0x8] sm:$0xff] }
 0x481   : > { %3121 = vst.msk [vmem:[#allocation3 + $0x18] sm:$0xff] %vm1411_vm4, %v3065_v49  ;;  %5212 = vmatmul.mubr.msk.f32.vlgmr.msra.gmra.mrb[40].mxu0 %vm1468_vm5, %v3139_v50 }
 0x482   : > { %5494 = vmatpush3.bf16.msra.mxu0 %v6576_v58 }
 0x483   : > { %v2917_v53 = vpop.permute.xlu0 %2916  ;;  %5496 = vmatprep.subr.bf16.mxu0 %v5495_v48 }
 0x484   : > { %v2970_v55 = vsel %vm1120_vm2, 0.0, %v2917_v53  ;;  %v2919_v56 = vpop.permute.xlu1 %2918 }
 0x485   : > { %2982 = vst.msk [vmem:[#allocation3 + $0x20] sm:$0xff] %vm1241_vm3, %v2970_v55  ;;  %2983 = vst.msk [vmem:[#allocation3 + $0x28] sm:$0xff] %vm1241_vm3, %v2919_v56 }
 0x486   : > { %5498 = vmatpush3.bf16.msra.mxu0 %v5495_v48 }
 0x487   : > { %v3067_v58 = vpop.permute.xlu0 %3066  ;;  %v3140_v60 = vld [vmem:[#allocation3 + $0x10] sm:$0xff]  ;;  %5500 = vmatprep.subr.bf16.mxu0 %v5499_v54 }
 0x488   : > { %3122 = vst.msk [vmem:[#allocation3 + $0x20] sm:$0xff] %vm1411_vm4, %v3067_v58  ;;  %v3069_v62 = vpop.permute.xlu1 %3068  ;;  %5214 = vmatprep.mubr.msk.f32.mxu0 %vm1468_vm5, %v3140_v60  ;;  %5259 = vmatprep.mubr.msk.f32.mxu1 %vm1468_vm5, %v3140_v60  ;;  %v3141_v63 = vld [vmem:[#allocation3 + $0x18] sm:$0xff]  ;;  %v5515_v58 = vpack.c.bf16 %v4019_v59, %v4018_v57  ;;  %v4020_v60 = vld [vmem:[%s7013_s15 + $0x10] sm:$0xff] }
 0x489   : > { %3123 = vst.msk [vmem:[#allocation3 + $0x28] sm:$0xff] %vm1411_vm4, %v3069_v62  ;;  %5215 = vmatmul.mubr.msk.f32.gmra.mrb[42].mxu0 %vm1468_vm5, %v3141_v63  ;;  %5260 = vmatmul.mubr.msk.f32.vlgmr.msra.gmra.mrb[40].mxu1 %vm1468_vm5, %v3141_v63 }
 0x48a   : > { %5502 = vmatpush3.bf16.msra.mxu0 %v5499_v54  ;;  %5516 = vmatprep.subr.bf16.mxu1 %v5515_v58 }
 0x48b   : > { %v2921_v2 = vpop.permute.xlu0 %2920  ;;  %5504 = vmatprep.subr.bf16.mxu0 %v5503_v61  ;;  %5518 = vmatpush3.bf16.msra.mxu1 %v5515_v58 }
 0x48c   : > { %v2971_v4 = vsel %vm1120_vm2, 0.0, %v2921_v2  ;;  %v2923_v5 = vpop.permute.xlu1 %2922 }
 0x48d   : > { %2984 = vst.msk [vmem:[#allocation3 + $0x30] sm:$0xff] %vm1241_vm3, %v2971_v4  ;;  %2985 = vst.msk [vmem:[#allocation3 + $0x38] sm:$0xff] %vm1241_vm3, %v2923_v5 }
 0x48e   : > { %5506 = vmatpush3.bf16.msra.mxu0 %v5503_v61  ;;  %v4021_v61 = vld [vmem:[%s7013_s15 + $0x18] sm:$0xff] }
 0x48f   : > { %v3071_v8 = vpop.permute.xlu0 %3070  ;;  %v6671_v9 = vld [vmem:[#allocation3 + $0x20] sm:$0xff]  ;;  %5508 = vmatprep.subr.bf16.mxu0 %v5507_v3  ;;  %v5519_v62 = vpack.c.bf16 %v4021_v61, %v4020_v60 }
 0x490   : > { %3124 = vst.msk [vmem:[#allocation3 + $0x30] sm:$0xff] %vm1411_vm4, %v3071_v8  ;;  %v3073_v12 = vpop.permute.xlu1 %3072  ;;  %5217 = vmatprep.mubr.msk.f32.mxu0 %vm1468_vm5, %v6671_v9  ;;  %5262 = vmatprep.mubr.msk.f32.mxu1 %vm1468_vm5, %v6671_v9  ;;  %v6678_v14 = vld [vmem:[#allocation3 + $0x28] sm:$0xff] }
 0x491   : > { %3125 = vst.msk [vmem:[#allocation3 + $0x38] sm:$0xff] %vm1411_vm4, %v3073_v12  ;;  %5218 = vmatmul.mubr.msk.f32.gmra.mrb[44].mxu0 %vm1468_vm5, %v6678_v14  ;;  %5263 = vmatmul.mubr.msk.f32.gmra.mrb[42].mxu1 %vm1468_vm5, %v6678_v14 }
 0x492   : > { %5510 = vmatpush3.bf16.msra.mxu0 %v5507_v3  ;;  %5520 = vmatprep.subr.bf16.mxu1 %v5519_v62 }
 0x493   : > { %v2925_v15 = vpop.permute.xlu0 %2924  ;;  %5512 = vmatprep.subr.bf16.mxu0 %v5511_v10  ;;  %5522 = vmatpush3.bf16.msra.mxu1 %v5519_v62 }
 0x494   : > { %v2972_v16 = vsel %vm1120_vm2, 0.0, %v2925_v15  ;;  %v2927_v17 = vpop.permute.xlu1 %2926 }
 0x495   : > { %2986 = vst.msk [vmem:[#allocation3 + $0x40] sm:$0xff] %vm1241_vm3, %v2972_v16  ;;  %2987 = vst.msk [vmem:[#allocation3 + $0x48] sm:$0xff] %vm1241_vm3, %v2927_v17 }
 0x496   : > { %5514 = vmatpush3.bf16.msra.mxu0 %v5511_v10 }
 0x497   : > { %v3075_v19 = vpop.permute.xlu0 %3074  ;;  %v6688_v20 = vld [vmem:[#allocation3 + $0x30] sm:$0xff] }
 0x498   : > { %3126 = vst.msk [vmem:[#allocation3 + $0x40] sm:$0xff] %vm1411_vm4, %v3075_v19  ;;  %v3077_v21 = vpop.permute.xlu1 %3076  ;;  %5220 = vmatprep.mubr.msk.f32.mxu0 %vm1468_vm5, %v6688_v20  ;;  %5265 = vmatprep.mubr.msk.f32.mxu1 %vm1468_vm5, %v6688_v20  ;;  %v6695_v22 = vld [vmem:[#allocation3 + $0x38] sm:$0xff] }
 0x499   : > { %3127 = vst.msk [vmem:[#allocation3 + $0x48] sm:$0xff] %vm1411_vm4, %v3077_v21  ;;  %5221 = vmatmul.mubr.msk.f32.gmra.mrb[46].mxu0 %vm1468_vm5, %v6695_v22  ;;  %5266 = vmatmul.mubr.msk.f32.gmra.mrb[44].mxu1 %vm1468_vm5, %v6695_v22 }
 0x49b   : > { %v2929_v23 = vpop.permute.xlu0 %2928 }
 0x49c   : > { %v2973_v24 = vsel %vm1120_vm2, 0.0, %v2929_v23  ;;  %v2931_v26 = vpop.permute.xlu1 %2930 }
 0x49d   : > { %2988 = vst.msk [vmem:[#allocation3 + $0x50] sm:$0xff] %vm1241_vm3, %v2973_v24  ;;  %2989 = vst.msk [vmem:[#allocation3 + $0x58] sm:$0xff] %vm1241_vm3, %v2931_v26 }
 0x49f   : > { %v3079_v27 = vpop.permute.xlu0 %3078  ;;  %v6705_v28 = vld [vmem:[#allocation3 + $0x40] sm:$0xff] }
 0x4a0   : > { %3128 = vst.msk [vmem:[#allocation3 + $0x50] sm:$0xff] %vm1411_vm4, %v3079_v27  ;;  %v3081_v11 = vpop.permute.xlu1 %3080  ;;  %5223 = vmatprep.mubr.msk.f32.mxu0 %vm1468_vm5, %v6705_v28  ;;  %5268 = vmatprep.mubr.msk.f32.mxu1 %vm1468_vm5, %v6705_v28  ;;  %v6712_v29 = vld [vmem:[#allocation3 + $0x48] sm:$0xff] }
 0x4a1   : > { %3129 = vst.msk [vmem:[#allocation3 + $0x58] sm:$0xff] %vm1411_vm4, %v3081_v11  ;;  %5224 = vmatmul.mubr.msk.f32.gmra.mrb[48].mxu0 %vm1468_vm5, %v6712_v29  ;;  %5269 = vmatmul.mubr.msk.f32.gmra.mrb[46].mxu1 %vm1468_vm5, %v6712_v29 }
 0x4a3   : > { %v2933_v30 = vpop.permute.xlu0 %2932 }
 0x4a4   : > { %v2974_v31 = vsel %vm1120_vm2, 0.0, %v2933_v30  ;;  %v2935_v32 = vpop.permute.xlu1 %2934 }
 0x4a5   : > { %2990 = vst.msk [vmem:[#allocation3 + $0x60] sm:$0xff] %vm1241_vm3, %v2974_v31  ;;  %2991 = vst.msk [vmem:[#allocation3 + $0x68] sm:$0xff] %vm1241_vm3, %v2935_v32 }
 0x4a7   : > { %v3083_v33 = vpop.permute.xlu0 %3082  ;;  %v3148_v34 = vld [vmem:[#allocation3 + $0x50] sm:$0xff] }
 0x4a8   : > { %3130 = vst.msk [vmem:[#allocation3 + $0x60] sm:$0xff] %vm1411_vm4, %v3083_v33  ;;  %v3085_v35 = vpop.permute.xlu1 %3084  ;;  %5226 = vmatprep.mubr.msk.f32.mxu0 %vm1468_vm5, %v3148_v34  ;;  %5271 = vmatprep.mubr.msk.f32.mxu1 %vm1468_vm5, %v3148_v34  ;;  %v3149_v36 = vld [vmem:[#allocation3 + $0x58] sm:$0xff] }
 0x4a9   : > { %3131 = vst.msk [vmem:[#allocation3 + $0x68] sm:$0xff] %vm1411_vm4, %v3085_v35  ;;  %5227 = vmatmul.mubr.msk.f32.gmra.mrb[50].mxu0 %vm1468_vm5, %v3149_v36  ;;  %5272 = vmatmul.mubr.msk.f32.gmra.mrb[48].mxu1 %vm1468_vm5, %v3149_v36 }
 0x4ab   : > { %v2937_v37 = vpop.permute.xlu0 %2936 }
 0x4ac   : > { %v2975_v38 = vsel %vm1120_vm2, 0.0, %v2937_v37  ;;  %v2939_v13 = vpop.permute.xlu1 %2938 }
 0x4ad   : > { %2992 = vst.msk [vmem:[#allocation3 + $0x70] sm:$0xff] %vm1241_vm3, %v2975_v38  ;;  %2993 = vst.msk [vmem:[#allocation3 + $0x78] sm:$0xff] %vm1241_vm3, %v2939_v13 }
 0x4af   : > { %v3087_v18 = vpop.permute.xlu0 %3086  ;;  %v3150_v39 = vld [vmem:[#allocation3 + $0x60] sm:$0xff] }
 0x4b0   : > { %3132 = vst.msk [vmem:[#allocation3 + $0x70] sm:$0xff] %vm1411_vm4, %v3087_v18  ;;  %v3089_v40 = vpop.permute.xlu1 %3088  ;;  %5229 = vmatprep.mubr.msk.f32.mxu0 %vm1468_vm5, %v3150_v39  ;;  %5274 = vmatprep.mubr.msk.f32.mxu1 %vm1468_vm5, %v3150_v39  ;;  %v3151_v41 = vld [vmem:[#allocation3 + $0x68] sm:$0xff] }
 0x4b1   : > { %3133 = vst.msk [vmem:[#allocation3 + $0x78] sm:$0xff] %vm1411_vm4, %v3089_v40  ;;  %5230 = vmatmul.mubr.msk.f32.gmra.mrb[52].mxu0 %vm1468_vm5, %v3151_v41  ;;  %5275 = vmatmul.mubr.msk.f32.gmra.mrb[50].mxu1 %vm1468_vm5, %v3151_v41 }
 0x4b3   : > { %v2941_v25 = vpop.permute.xlu0 %2940 }
 0x4b4   : > { %v2976_v42 = vsel %vm1120_vm2, 0.0, %v2941_v25  ;;  %v2943_v43 = vpop.permute.xlu1 %2942 }
 0x4b5   : > { %2994 = vst.msk [vmem:[#allocation3 + $0x80] sm:$0xff] %vm1241_vm3, %v2976_v42  ;;  %2995 = vst.msk [vmem:[#allocation3 + $0x88] sm:$0xff] %vm1241_vm3, %v2943_v43 }
 0x4b7   : > { %v3091_v44 = vpop.permute.xlu0 %3090  ;;  %v3152_v45 = vld [vmem:[#allocation3 + $0x70] sm:$0xff] }
 0x4b8   : > { %3134 = vst.msk [vmem:[#allocation3 + $0x80] sm:$0xff] %vm1411_vm4, %v3091_v44  ;;  %v3093_v46 = vpop.permute.xlu1 %3092  ;;  %5232 = vmatprep.mubr.msk.f32.mxu0 %vm1468_vm5, %v3152_v45  ;;  %5277 = vmatprep.mubr.msk.f32.mxu1 %vm1468_vm5, %v3152_v45  ;;  %v3153_v47 = vld [vmem:[#allocation3 + $0x78] sm:$0xff] }
 0x4b9   : > { %3135 = vst.msk [vmem:[#allocation3 + $0x88] sm:$0xff] %vm1411_vm4, %v3093_v46  ;;  %5233 = vmatmul.mubr.msk.f32.gmra.mrb[54].mxu0 %vm1468_vm5, %v3153_v47  ;;  %5278 = vmatmul.mubr.msk.f32.gmra.mrb[52].mxu1 %vm1468_vm5, %v3153_v47 }
 0x4ba   : > { %5307 = vmatprep.mubr.msk.f32.mxu0 %vm1468_vm5, %v6671_v9 }
 0x4bb   : > { %v2945_v48 = vpop.permute.xlu0 %2944 }
 0x4bc   : > { %v2977_v49 = vsel %vm1120_vm2, 0.0, %v2945_v48  ;;  %v2947_v50 = vpop.permute.xlu1 %2946 }
 0x4bd   : > { %5308 = vmatmul.mubr.msk.f32.vlgmr.msra.gmra.mrb[56].mxu0 %vm1468_vm5, %v6678_v14  ;;  %2996 = vst.msk [vmem:[#allocation3 + $0x90] sm:$0xff] %vm1241_vm3, %v2977_v49  ;;  %2997 = vst.msk [vmem:[#allocation3 + $0x98] sm:$0xff] %vm1241_vm3, %v2947_v50 }
 0x4be   : > { %5310 = vmatprep.mubr.msk.f32.mxu0 %vm1468_vm5, %v6688_v20 }
 0x4bf   : > { %v3390_v51 = vld [vmem:[#allocation3 + $0x80] sm:$0xff]  ;;  %v3095_v52 = vpop.permute.xlu0 %3094 }
 0x4c0   : > { %5280 = vmatprep.mubr.msk.f32.mxu1 %vm1468_vm5, %v3390_v51  ;;  %v3391_v53 = vld [vmem:[#allocation3 + $0x88] sm:$0xff]  ;;  %3136 = vst.msk [vmem:[#allocation3 + $0x90] sm:$0xff] %vm1411_vm4, %v3095_v52  ;;  %v3097_v54 = vpop.permute.xlu1 %3096 }
 0x4c1   : > { %5281 = vmatmul.mubr.msk.f32.gmra.mrb[54].mxu1 %vm1468_vm5, %v3391_v53  ;;  %5311 = vmatmul.mubr.msk.f32.gmra.mrb[58].mxu0 %vm1468_vm5, %v6695_v22  ;;  %3137 = vst.msk [vmem:[#allocation3 + $0x98] sm:$0xff] %vm1411_vm4, %v3097_v54 }
 0x4c2   : > { %5313 = vmatprep.mubr.msk.f32.mxu0 %vm1468_vm5, %v6705_v28 }
 0x4c5   : > { %5314 = vmatmul.mubr.msk.f32.gmra.mrb[60].mxu0 %vm1468_vm5, %v6712_v29 }
 0x4c6   : > { %5316 = vmatprep.mubr.msk.f32.mxu0 %vm1468_vm5, %v3148_v34 }
 0x4c7   : > { %v3661_v55 = vld [vmem:[#allocation3 + $0x90] sm:$0xff] }
 0x4c8   : > { %v3662_v56 = vld [vmem:[#allocation3 + $0x98] sm:$0xff] }
 0x4c9   : > { %5317 = vmatmul.mubr.msk.f32.gmra.mrb[62].mxu0 %vm1468_vm5, %v3149_v36 }
 0x4ca   : > { %5319 = vmatprep.mubr.msk.f32.mxu0 %vm1468_vm5, %v3150_v39 }
 0x4cd   : > { %5320 = vmatmul.mubr.msk.f32.gmra.mrb[64].mxu0 %vm1468_vm5, %v3151_v41 }
 0x4ce   : > { %5322 = vmatprep.mubr.msk.f32.mxu0 %vm1468_vm5, %v3152_v45 }
 0x4d1   : > { %5323 = vmatmul.mubr.msk.f32.gmra.mrb[66].mxu0 %vm1468_vm5, %v3153_v47 }
 0x4d2   : > { %5325 = vmatprep.mubr.msk.f32.mxu0 %vm1468_vm5, %v3390_v51 }
 0x4d5   : > { %5326 = vmatmul.mubr.msk.f32.gmra.mrb[68].mxu0 %vm1468_vm5, %v3391_v53 }
 0x4d6   : > { %5328 = vmatprep.mubr.msk.f32.mxu0 %vm1468_vm5, %v3661_v55 }
 0x4d9   : > { %5329 = vmatmul.mubr.msk.f32.gmra.mrb[70].mxu0 %vm1468_vm5, %v3662_v56 }
 0x554   : > { %v5213_v63 = vpop.f32.mrb[40].mxu0 }
 0x555   : > { %3360 = vst.msk [vmem:[#allocation4 + $0x8] sm:$0xff] %vm1241_vm3, %v5213_v63  ;;  %v3280_v0 = vpop.f32.mrb[41].mxu0 }
 0x556   : > { %3359 = vst.msk [vmem:[#allocation4] sm:$0xff] %vm1241_vm3, %v3280_v0 }
 0x55c   : > { %v5216_v1 = vpop.f32.mrb[42].mxu0  ;;  %v5261_v2 = vpop.f32.mrb[40].mxu1  ;;  %v3599_v3 = vld [vmem:[#allocation4 + $0x8] sm:$0xff] }
 0x55d   : > { %3362 = vst.msk [vmem:[#allocation4 + $0x18] sm:$0xff] %vm1241_vm3, %v5216_v1  ;;  %v3615_v4 = vadd.f32 %v5261_v2, %v3599_v3  ;;  %v3290_v5 = vpop.f32.mrb[43].mxu0  ;;  %v3519_v6 = vpop.f32.mrb[41].mxu1  ;;  %v3598_v7 = vld [vmem:[#allocation4] sm:$0xff] }
 0x55e   : > { %3361 = vst.msk [vmem:[#allocation4 + $0x10] sm:$0xff] %vm1241_vm3, %v3290_v5  ;;  %v3614_v8 = vadd.f32 %v3598_v7, %v3519_v6 }
 0x55f   : > { %3631 = vst.msk [vmem:[#allocation4 + $0x8] sm:$0xff] %vm1241_vm3, %v3615_v4 }
 0x560   : > { %3630 = vst.msk [vmem:[#allocation4] sm:$0xff] %vm1241_vm3, %v3614_v8 }
 0x564   : > { %v5219_v9 = vpop.f32.mrb[44].mxu0  ;;  %v5264_v10 = vpop.f32.mrb[42].mxu1  ;;  %v3601_v12 = vld [vmem:[#allocation4 + $0x18] sm:$0xff] }
 0x565   : > { %3364 = vst.msk [vmem:[#allocation4 + $0x28] sm:$0xff] %vm1241_vm3, %v5219_v9  ;;  %v3617_v14 = vadd.f32 %v5264_v10, %v3601_v12  ;;  %v3300_v15 = vpop.f32.mrb[45].mxu0  ;;  %v3529_v16 = vpop.f32.mrb[43].mxu1  ;;  %v3600_v17 = vld [vmem:[#allocation4 + $0x10] sm:$0xff] }
 0x566   : > { %3363 = vst.msk [vmem:[#allocation4 + $0x20] sm:$0xff] %vm1241_vm3, %v3300_v15  ;;  %v3616_v19 = vadd.f32 %v3600_v17, %v3529_v16  ;;  %v3870_v59 = vld [vmem:[#allocation4 + $0x8] sm:$0xff]  ;;  %v6826_v15 = vld [vmem:[%s7010_s12] ss:$0 sm:$0xff] }
 0x567   : > { %3633 = vst.msk [vmem:[#allocation4 + $0x18] sm:$0xff] %vm1241_vm3, %v3617_v14  ;;  %v3869_v61 = vld [vmem:[#allocation4] sm:$0xff] }
 0x568   : > { %3632 = vst.msk [vmem:[#allocation4 + $0x10] sm:$0xff] %vm1241_vm3, %v3616_v19 }
 0x56c   : > { %v5222_v20 = vpop.f32.mrb[46].mxu0  ;;  %v5267_v21 = vpop.f32.mrb[44].mxu1  ;;  %v3603_v22 = vld [vmem:[#allocation4 + $0x28] sm:$0xff] }
 0x56d   : > { %3366 = vst.msk [vmem:[#allocation4 + $0x38] sm:$0xff] %vm1241_vm3, %v5222_v20  ;;  %v3619_v23 = vadd.f32 %v5267_v21, %v3603_v22  ;;  %v3310_v24 = vpop.f32.mrb[47].mxu0  ;;  %v3539_v26 = vpop.f32.mrb[45].mxu1  ;;  %v3602_v27 = vld [vmem:[#allocation4 + $0x20] sm:$0xff] }
 0x56e   : > { %3365 = vst.msk [vmem:[#allocation4 + $0x30] sm:$0xff] %vm1241_vm3, %v3310_v24  ;;  %v3618_v28 = vadd.f32 %v3602_v27, %v3539_v26  ;;  %v3872_v2 = vld [vmem:[#allocation4 + $0x18] sm:$0xff]  ;;  %v6831_v21 = vld [vmem:[%s7011_s13] ss:$0 sm:$0xff] }
 0x56f   : > { %3635 = vst.msk [vmem:[#allocation4 + $0x28] sm:$0xff] %vm1241_vm3, %v3619_v23  ;;  %v3871_v8 = vld [vmem:[#allocation4 + $0x10] sm:$0xff] }
 0x570   : > { %3634 = vst.msk [vmem:[#allocation4 + $0x20] sm:$0xff] %vm1241_vm3, %v3618_v28 }
 0x574   : > { %v5225_v11 = vpop.f32.mrb[48].mxu0  ;;  %v5270_v29 = vpop.f32.mrb[46].mxu1  ;;  %v3605_v30 = vld [vmem:[#allocation4 + $0x38] sm:$0xff] }
 0x575   : > { %3368 = vst.msk [vmem:[#allocation4 + $0x48] sm:$0xff] %vm1241_vm3, %v5225_v11  ;;  %v3621_v31 = vadd.f32 %v5270_v29, %v3605_v30  ;;  %v3320_v32 = vpop.f32.mrb[49].mxu0  ;;  %v3549_v33 = vpop.f32.mrb[47].mxu1  ;;  %v3604_v34 = vld [vmem:[#allocation4 + $0x30] sm:$0xff]  ;;  %v6840_v11 = vld [vmem:[%s7043_s23] ss:$0 sm:$0xff] }
 0x576   : > { %3367 = vst.msk [vmem:[#allocation4 + $0x40] sm:$0xff] %vm1241_vm3, %v3320_v32  ;;  %v3620_v35 = vadd.f32 %v3604_v34, %v3549_v33  ;;  %v3874_v14 = vld [vmem:[#allocation4 + $0x28] sm:$0xff] }
 0x577   : > { %3637 = vst.msk [vmem:[#allocation4 + $0x38] sm:$0xff] %vm1241_vm3, %v3621_v31  ;;  %v3873_v19 = vld [vmem:[#allocation4 + $0x20] sm:$0xff] }
 0x578   : > { %3636 = vst.msk [vmem:[#allocation4 + $0x30] sm:$0xff] %vm1241_vm3, %v3620_v35 }
 0x57c   : > { %v5228_v36 = vpop.f32.mrb[50].mxu0  ;;  %v5273_v37 = vpop.f32.mrb[48].mxu1  ;;  %v3607_v38 = vld [vmem:[#allocation4 + $0x48] sm:$0xff] }
 0x57d   : > { %3370 = vst.msk [vmem:[#allocation4 + $0x58] sm:$0xff] %vm1241_vm3, %v5228_v36  ;;  %v3623_v13 = vadd.f32 %v5273_v37, %v3607_v38  ;;  %v3330_v18 = vpop.f32.mrb[51].mxu0  ;;  %v3559_v39 = vpop.f32.mrb[49].mxu1  ;;  %v3606_v40 = vld [vmem:[#allocation4 + $0x40] sm:$0xff] }
 0x57e   : > { %3369 = vst.msk [vmem:[#allocation4 + $0x50] sm:$0xff] %vm1241_vm3, %v3330_v18  ;;  %v3622_v41 = vadd.f32 %v3606_v40, %v3559_v39  ;;  %v3876_v27 = vld [vmem:[#allocation4 + $0x38] sm:$0xff] }
 0x57f   : > { %3639 = vst.msk [vmem:[#allocation4 + $0x48] sm:$0xff] %vm1241_vm3, %v3623_v13  ;;  %v3875_v31 = vld [vmem:[#allocation4 + $0x30] sm:$0xff] }
 0x580   : > { %3638 = vst.msk [vmem:[#allocation4 + $0x40] sm:$0xff] %vm1241_vm3, %v3622_v41 }
 0x584   : > { %v5231_v25 = vpop.f32.mrb[52].mxu0  ;;  %v5276_v42 = vpop.f32.mrb[50].mxu1  ;;  %v3609_v43 = vld [vmem:[#allocation4 + $0x58] sm:$0xff] }
 0x585   : > { %3372 = vst.msk [vmem:[#allocation4 + $0x68] sm:$0xff] %vm1241_vm3, %v5231_v25  ;;  %v3625_v44 = vadd.f32 %v5276_v42, %v3609_v43  ;;  %v3340_v45 = vpop.f32.mrb[53].mxu0  ;;  %v3569_v46 = vpop.f32.mrb[51].mxu1  ;;  %v3608_v47 = vld [vmem:[#allocation4 + $0x50] sm:$0xff] }
 0x586   : > { %3371 = vst.msk [vmem:[#allocation4 + $0x60] sm:$0xff] %vm1241_vm3, %v3340_v45  ;;  %v3624_v48 = vadd.f32 %v3608_v47, %v3569_v46  ;;  %v3878_v18 = vld [vmem:[#allocation4 + $0x48] sm:$0xff] }
 0x587   : > { %3641 = vst.msk [vmem:[#allocation4 + $0x58] sm:$0xff] %vm1241_vm3, %v3625_v44  ;;  %v3877_v42 = vld [vmem:[#allocation4 + $0x40] sm:$0xff] }
 0x588   : > { %3640 = vst.msk [vmem:[#allocation4 + $0x50] sm:$0xff] %vm1241_vm3, %v3624_v48 }
 0x58c   : > { %v5234_v49 = vpop.f32.mrb[54].mxu0  ;;  %v5279_v50 = vpop.f32.mrb[52].mxu1  ;;  %v3611_v51 = vld [vmem:[#allocation4 + $0x68] sm:$0xff] }
 0x58d   : > { %3374 = vst.msk [vmem:[#allocation4 + $0x78] sm:$0xff] %vm1241_vm3, %v5234_v49  ;;  %v3627_v52 = vadd.f32 %v5279_v50, %v3611_v51  ;;  %v3350_v53 = vpop.f32.mrb[55].mxu0  ;;  %v3579_v54 = vpop.f32.mrb[53].mxu1  ;;  %v3610_v55 = vld [vmem:[#allocation4 + $0x60] sm:$0xff] }
 0x58e   : > { %3373 = vst.msk [vmem:[#allocation4 + $0x70] sm:$0xff] %vm1241_vm3, %v3350_v53  ;;  %v3626_v56 = vadd.f32 %v3610_v55, %v3579_v54  ;;  %v3880_v53 = vld [vmem:[#allocation4 + $0x58] sm:$0xff] }
 0x58f   : > { %3643 = vst.msk [vmem:[#allocation4 + $0x68] sm:$0xff] %vm1241_vm3, %v3627_v52 }
 0x590   : > { %3642 = vst.msk [vmem:[#allocation4 + $0x60] sm:$0xff] %vm1241_vm3, %v3626_v56  ;;  %v5309_v57 = vpop.f32.mrb[56].mxu0 }
 0x591   : > { %v3886_v58 = vadd.f32 %v5309_v57, %v3870_v59  ;;  %v3790_v60 = vpop.f32.mrb[57].mxu0  ;;  %v3879_v59 = vld [vmem:[#allocation4 + $0x50] sm:$0xff] }
 0x592   : > { %v3885_v62 = vadd.f32 %v3869_v61, %v3790_v60 }
 0x593   : > { %3902 = vst.msk [vmem:[#allocation4 + $0x8] sm:$0xff] %vm1241_vm3, %v3886_v58 }
 0x594   : > { %3901 = vst.msk [vmem:[#allocation4] sm:$0xff] %vm1241_vm3, %v3885_v62  ;;  %v5282_v63 = vpop.f32.mrb[54].mxu1  ;;  %v3613_v0 = vld [vmem:[#allocation4 + $0x78] sm:$0xff]  ;;  %v5312_v1 = vpop.f32.mrb[58].mxu0 }
 0x595   : > { %v3629_v3 = vadd.f32 %v5282_v63, %v3613_v0  ;;  %v3888_v4 = vadd.f32 %v5312_v1, %v3872_v2  ;;  %v3589_v5 = vpop.f32.mrb[55].mxu1  ;;  %v3612_v6 = vld [vmem:[#allocation4 + $0x70] sm:$0xff]  ;;  %v3800_v7 = vpop.f32.mrb[59].mxu0 }
 0x596   : > { %v3628_v9 = vadd.f32 %v3612_v6, %v3589_v5  ;;  %v3887_v10 = vadd.f32 %v3871_v8, %v3800_v7  ;;  %v3882_v5 = vld [vmem:[#allocation4 + $0x68] sm:$0xff] }
 0x597   : > { %3645 = vst.msk [vmem:[#allocation4 + $0x78] sm:$0xff] %vm1241_vm3, %v3629_v3  ;;  %3904 = vst.msk [vmem:[#allocation4 + $0x18] sm:$0xff] %vm1241_vm3, %v3888_v4 }
 0x598   : > { %3644 = vst.msk [vmem:[#allocation4 + $0x70] sm:$0xff] %vm1241_vm3, %v3628_v9  ;;  %3903 = vst.msk [vmem:[#allocation4 + $0x10] sm:$0xff] %vm1241_vm3, %v3887_v10  ;;  %v5315_v12 = vpop.f32.mrb[60].mxu0  ;;  %v3881_v10 = vld [vmem:[#allocation4 + $0x60] sm:$0xff] }
 0x599   : > { %v3890_v16 = vadd.f32 %v5315_v12, %v3874_v14  ;;  %v3810_v17 = vpop.f32.mrb[61].mxu0 }
 0x59a   : > { %v3889_v20 = vadd.f32 %v3873_v19, %v3810_v17  ;;  %v3918_v22 = vld [vmem:[#allocation4 + $0x8] sm:$0xff] }
 0x59b   : > { %3906 = vst.msk [vmem:[#allocation4 + $0x28] sm:$0xff] %vm1241_vm3, %v3890_v16  ;;  %v3917_v23 = vld [vmem:[#allocation4] sm:$0xff]  ;;  %v3941_v24 = vadd.f32 %v6826_v15, %v3918_v22 }
 0x59c   : > { %3905 = vst.msk [vmem:[#allocation4 + $0x20] sm:$0xff] %vm1241_vm3, %v3889_v20  ;;  %v5318_v26 = vpop.f32.mrb[62].mxu0  ;;  %v3940_v28 = vadd.f32 %v6826_v15, %v3917_v23 }
 0x59d   : > { %v3892_v29 = vadd.f32 %v5318_v26, %v3876_v27  ;;  %v3820_v30 = vpop.f32.mrb[63].mxu0  ;;  %v3964_v32 = vmul.f32 %v6831_v21, %v3941_v24 }
 0x59e   : > { %v3891_v33 = vadd.f32 %v3875_v31, %v3820_v30  ;;  %v3963_v34 = vmul.f32 %v6831_v21, %v3940_v28  ;;  %v3920_v35 = vld [vmem:[#allocation4 + $0x18] sm:$0xff] }
 0x59f   : > { %3908 = vst.msk [vmem:[#allocation4 + $0x38] sm:$0xff] %vm1241_vm3, %v3892_v29  ;;  %v3987_v36 = vadd.f32 %v6840_v11, %v3964_v32  ;;  %v3919_v37 = vld [vmem:[#allocation4 + $0x10] sm:$0xff]  ;;  %v3943_v38 = vadd.f32 %v6826_v15, %v3920_v35  ;;  %v3884_v27 = vld [vmem:[#allocation4 + $0x78] sm:$0xff] }
 0x5a0   : > { %3907 = vst.msk [vmem:[#allocation4 + $0x30] sm:$0xff] %vm1241_vm3, %v3891_v33  ;;  %v5321_v13 = vpop.f32.mrb[64].mxu0  ;;  %v3986_v39 = vadd.f32 %v6840_v11, %v3963_v34  ;;  %v3942_v40 = vadd.f32 %v6826_v15, %v3919_v37  ;;  %v3883_v32 = vld [vmem:[#allocation4 + $0x70] sm:$0xff] }
 0x5a1   : > { %v3894_v41 = vadd.f32 %v5321_v13, %v3878_v18  ;;  %v3830_v25 = vpop.f32.mrb[65].mxu0  ;;  %v3966_v43 = vmul.f32 %v6831_v21, %v3943_v38  ;;  %v4003_v48 = vmax.f32 %v3987_v36, 0.0 }
 0x5a2   : > { %v3893_v44 = vadd.f32 %v3877_v42, %v3830_v25  ;;  %v4002_v45 = vmax.f32 %v3986_v39, 0.0  ;;  %v3965_v46 = vmul.f32 %v6831_v21, %v3942_v40  ;;  %v3922_v47 = vld [vmem:[#allocation4 + $0x28] sm:$0xff] }
 0x5a3   : > { %3910 = vst.msk [vmem:[#allocation4 + $0x48] sm:$0xff] %vm1241_vm3, %v3894_v41  ;;  %v3989_v49 = vadd.f32 %v6840_v11, %v3966_v43  ;;  %v3921_v50 = vld [vmem:[#allocation4 + $0x20] sm:$0xff]  ;;  %v3945_v51 = vadd.f32 %v6826_v15, %v3922_v47 }
 0x5a4   : > { %3909 = vst.msk [vmem:[#allocation4 + $0x40] sm:$0xff] %vm1241_vm3, %v3893_v44  ;;  %v5324_v52 = vpop.f32.mrb[66].mxu0  ;;  %5339 = vmatprep.mubr.msk.f32.mxu1 %vm1241_vm3, %v4002_v45  ;;  %v3988_v54 = vadd.f32 %v6840_v11, %v3965_v46  ;;  %v3944_v55 = vadd.f32 %v6826_v15, %v3921_v50 }
 0x5a5   : > { %v3896_v56 = vadd.f32 %v5324_v52, %v3880_v53  ;;  %v3840_v57 = vpop.f32.mrb[67].mxu0  ;;  %5340 = vmatmul.mubr.msk.f32.vlgmr.msra.gmra.mrb[56].mxu1 %vm1241_vm3, %v4003_v48  ;;  %v3968_v58 = vmul.f32 %v6831_v21, %v3945_v51  ;;  %v4005_v0 = vmax.f32 %v3989_v49, 0.0 }
 0x5a6   : > { %v3895_v60 = vadd.f32 %v3879_v59, %v3840_v57  ;;  %v4004_v61 = vmax.f32 %v3988_v54, 0.0  ;;  %v3967_v62 = vmul.f32 %v6831_v21, %v3944_v55  ;;  %v3924_v63 = vld [vmem:[#allocation4 + $0x38] sm:$0xff] }
 0x5a7   : > { %3912 = vst.msk [vmem:[#allocation4 + $0x58] sm:$0xff] %vm1241_vm3, %v3896_v56  ;;  %v3991_v1 = vadd.f32 %v6840_v11, %v3968_v58  ;;  %v3923_v2 = vld [vmem:[#allocation4 + $0x30] sm:$0xff]  ;;  %v3947_v3 = vadd.f32 %v6826_v15, %v3924_v63 }
 0x5a8   : > { %3911 = vst.msk [vmem:[#allocation4 + $0x50] sm:$0xff] %vm1241_vm3, %v3895_v60  ;;  %v5327_v4 = vpop.f32.mrb[68].mxu0  ;;  %5342 = vmatprep.mubr.msk.f32.mxu1 %vm1241_vm3, %v4004_v61  ;;  %v3990_v6 = vadd.f32 %v6840_v11, %v3967_v62  ;;  %v3946_v7 = vadd.f32 %v6826_v15, %v3923_v2 }
 0x5a9   : > { %v3898_v8 = vadd.f32 %v5327_v4, %v3882_v5  ;;  %v3850_v9 = vpop.f32.mrb[69].mxu0  ;;  %5343 = vmatmul.mubr.msk.f32.gmra.mrb[58].mxu1 %vm1241_vm3, %v4005_v0  ;;  %v3970_v12 = vmul.f32 %v6831_v21, %v3947_v3  ;;  %v4007_v20 = vmax.f32 %v3991_v1, 0.0  ;;  %v4239_v5 = vld [vmem:[%s7044_s14 + $0x8] sm:$0xff] }
 0x5aa   : > { %v3897_v14 = vadd.f32 %v3881_v10, %v3850_v9  ;;  %v4006_v16 = vmax.f32 %v3990_v6, 0.0  ;;  %v3969_v17 = vmul.f32 %v6831_v21, %v3946_v7  ;;  %v3926_v19 = vld [vmem:[#allocation4 + $0x48] sm:$0xff]  ;;  %v4238_v7 = vld [vmem:[%s7044_s14] sm:$0xff] }
 0x5ab   : > { %3914 = vst.msk [vmem:[#allocation4 + $0x68] sm:$0xff] %vm1241_vm3, %v3898_v8  ;;  %v3993_v22 = vadd.f32 %v6840_v11, %v3970_v12  ;;  %v3925_v23 = vld [vmem:[#allocation4 + $0x40] sm:$0xff]  ;;  %v3949_v24 = vadd.f32 %v6826_v15, %v3926_v19  ;;  %v4240_v19 = vld [vmem:[%s7044_s14 + $0x10] sm:$0xff] }
 0x5ac   : > { %3913 = vst.msk [vmem:[#allocation4 + $0x60] sm:$0xff] %vm1241_vm3, %v3897_v14  ;;  %v5330_v26 = vpop.f32.mrb[70].mxu0  ;;  %5345 = vmatprep.mubr.msk.f32.mxu1 %vm1241_vm3, %v4006_v16  ;;  %v3992_v28 = vadd.f32 %v6840_v11, %v3969_v17  ;;  %v3948_v29 = vadd.f32 %v6826_v15, %v3925_v23  ;;  %v4241_v14 = vld [vmem:[%s7044_s14 + $0x18] sm:$0xff] }
 0x5ad   : > { %v3900_v30 = vadd.f32 %v5330_v26, %v3884_v27  ;;  %v3860_v31 = vpop.f32.mrb[71].mxu0  ;;  %5346 = vmatmul.mubr.msk.f32.gmra.mrb[60].mxu1 %vm1241_vm3, %v4007_v20  ;;  %v3972_v33 = vmul.f32 %v6831_v21, %v3949_v24  ;;  %v4009_v38 = vmax.f32 %v3993_v22, 0.0  ;;  %v4243_v26 = vld [vmem:[%s7044_s14 + $0x28] sm:$0xff] }
 0x5ae   : > { %v3899_v34 = vadd.f32 %v3883_v32, %v3860_v31  ;;  %v4008_v35 = vmax.f32 %v3992_v28, 0.0  ;;  %v3971_v36 = vmul.f32 %v6831_v21, %v3948_v29  ;;  %v3928_v37 = vld [vmem:[#allocation4 + $0x58] sm:$0xff]  ;;  %v4242_v29 = vld [vmem:[%s7044_s14 + $0x20] sm:$0xff] }
 0x5af   : > { %3916 = vst.msk [vmem:[#allocation4 + $0x78] sm:$0xff] %vm1241_vm3, %v3900_v30  ;;  %v3995_v13 = vadd.f32 %v6840_v11, %v3972_v33  ;;  %v3927_v18 = vld [vmem:[#allocation4 + $0x50] sm:$0xff]  ;;  %v3951_v39 = vadd.f32 %v6826_v15, %v3928_v37 }
 0x5b0   : > { %3915 = vst.msk [vmem:[#allocation4 + $0x70] sm:$0xff] %vm1241_vm3, %v3899_v34  ;;  %5348 = vmatprep.mubr.msk.f32.mxu1 %vm1241_vm3, %v4008_v35  ;;  %v3994_v40 = vadd.f32 %v6840_v11, %v3971_v36  ;;  %v3950_v41 = vadd.f32 %v6826_v15, %v3927_v18  ;;  %v4245_v34 = vld [vmem:[%s7044_s14 + $0x38] sm:$0xff]  ;;  %v4244_v37 = vld [vmem:[%s7044_s14 + $0x30] sm:$0xff] }
 0x5b1   : > { %5349 = vmatmul.mubr.msk.f32.gmra.mrb[62].mxu1 %vm1241_vm3, %v4009_v38  ;;  %v3974_v25 = vmul.f32 %v6831_v21, %v3951_v39  ;;  %v4011_v45 = vmax.f32 %v3995_v13, 0.0 }
 0x5b2   : > { %v4010_v42 = vmax.f32 %v3994_v40, 0.0  ;;  %v3973_v43 = vmul.f32 %v6831_v21, %v3950_v41  ;;  %v3930_v44 = vld [vmem:[#allocation4 + $0x68] sm:$0xff] }
 0x5b3   : > { %v3997_v46 = vadd.f32 %v6840_v11, %v3974_v25  ;;  %v3929_v47 = vld [vmem:[#allocation4 + $0x60] sm:$0xff]  ;;  %v3953_v48 = vadd.f32 %v6826_v15, %v3930_v44  ;;  %v4247_v40 = vld [vmem:[%s7044_s14 + $0x48] sm:$0xff] }
 0x5b4   : > { %5351 = vmatprep.mubr.msk.f32.mxu1 %vm1241_vm3, %v4010_v42  ;;  %v3996_v49 = vadd.f32 %v6840_v11, %v3973_v43  ;;  %v3952_v50 = vadd.f32 %v6826_v15, %v3929_v47  ;;  %v4246_v42 = vld [vmem:[%s7044_s14 + $0x40] sm:$0xff]  ;;  %v4249_v47 = vld [vmem:[%s7044_s14 + $0x58] sm:$0xff] }
 0x5b5   : > { %5352 = vmatmul.mubr.msk.f32.gmra.mrb[64].mxu1 %vm1241_vm3, %v4011_v45  ;;  %v3976_v51 = vmul.f32 %v6831_v21, %v3953_v48  ;;  %v4013_v55 = vmax.f32 %v3997_v46, 0.0 }
 0x5b6   : > { %v4012_v52 = vmax.f32 %v3996_v49, 0.0  ;;  %v3975_v53 = vmul.f32 %v6831_v21, %v3952_v50  ;;  %v3932_v54 = vld [vmem:[#allocation4 + $0x78] sm:$0xff]  ;;  %v4248_v50 = vld [vmem:[%s7044_s14 + $0x50] sm:$0xff] }
 0x5b7   : > { %v3999_v56 = vadd.f32 %v6840_v11, %v3976_v51  ;;  %v3931_v57 = vld [vmem:[#allocation4 + $0x70] sm:$0xff]  ;;  %v3955_v59 = vadd.f32 %v6826_v15, %v3932_v54 }
 0x5b8   : > { %5354 = vmatprep.mubr.msk.f32.mxu1 %vm1241_vm3, %v4012_v52  ;;  %v3998_v58 = vadd.f32 %v6840_v11, %v3975_v53  ;;  %v3954_v60 = vadd.f32 %v6826_v15, %v3931_v57 }
 0x5b9   : > { %5355 = vmatmul.mubr.msk.f32.gmra.mrb[66].mxu1 %vm1241_vm3, %v4013_v55  ;;  %v3978_v61 = vmul.f32 %v6831_v21, %v3955_v59  ;;  %v4015_v0 = vmax.f32 %v3999_v56, 0.0  ;;  %v4251_v55 = vld [vmem:[%s7044_s14 + $0x68] sm:$0xff]  ;;  %v4250_v59 = vld [vmem:[%s7044_s14 + $0x60] sm:$0xff] }
 0x5ba   : > { %v4014_v62 = vmax.f32 %v3998_v58, 0.0  ;;  %v3977_v63 = vmul.f32 %v6831_v21, %v3954_v60  ;;  %v6917_v21 = vld [vmem:[%s7046_s30] ss:$0 sm:$0xff] }
 0x5bb   : > { %v4001_v1 = vadd.f32 %v6840_v11, %v3978_v61 }
 0x5bc   : > { %5357 = vmatprep.mubr.msk.f32.mxu1 %vm1241_vm3, %v4014_v62  ;;  %v4000_v2 = vadd.f32 %v6840_v11, %v3977_v63  ;;  %v4253_v63 = vld [vmem:[%s7044_s14 + $0x78] sm:$0xff] }
 0x5bd   : > { %5358 = vmatmul.mubr.msk.f32.gmra.mrb[68].mxu1 %vm1241_vm3, %v4015_v0  ;;  %v4017_v3 = vmax.f32 %v4001_v1, 0.0 }
 0x5be   : > { %v4016_v15 = vmax.f32 %v4000_v2, 0.0  ;;  %v4252_v2 = vld [vmem:[%s7044_s14 + $0x70] sm:$0xff] }
 0x5c0   : > { %5360 = vmatprep.mubr.msk.f32.mxu1 %vm1241_vm3, %v4016_v15 }
 0x5c1   : > { %5361 = vmatmul.mubr.msk.f32.gmra.mrb[70].mxu1 %vm1241_vm3, %v4017_v3 }
 0x678   : > { %v5341_v4 = vpop.f32.mrb[56].mxu1 }
 0x679   : > { %v4223_v11 = vadd.f32 %v5341_v4, %v6917_v21  ;;  %v4136_v6 = vpop.f32.mrb[57].mxu1 }
 0x67a   : > { %v4222_v8 = vadd.f32 %v6917_v21, %v4136_v6 }
 0x67b   : > { %v4255_v9 = vadd.f32 %v4239_v5, %v4223_v11 }
 0x67c   : > { %v4254_v10 = vadd.f32 %v4238_v7, %v4222_v8  ;;  %v5344_v12 = vpop.f32.mrb[58].mxu1 }
 0x67d   : > { %4271 = vst.msk [vmem:[%s7045_s24 + $0x8] sm:$0xff] %vm1241_vm3, %v4255_v9  ;;  %v4225_v16 = vadd.f32 %v5344_v12, %v6917_v21  ;;  %v4146_v17 = vpop.f32.mrb[59].mxu1 }
 0x67e   : > { %4270 = vst.msk [vmem:[%s7045_s24] sm:$0xff] %vm1241_vm3, %v4254_v10  ;;  %v4224_v20 = vadd.f32 %v6917_v21, %v4146_v17 }
 0x67f   : > { %v4257_v22 = vadd.f32 %v4241_v14, %v4225_v16 }
 0x680   : > { %v4256_v23 = vadd.f32 %v4240_v19, %v4224_v20  ;;  %v5347_v24 = vpop.f32.mrb[60].mxu1 }
 0x681   : > { %4273 = vst.msk [vmem:[%s7045_s24 + $0x18] sm:$0xff] %vm1241_vm3, %v4257_v22  ;;  %v4227_v27 = vadd.f32 %v5347_v24, %v6917_v21  ;;  %v4156_v28 = vpop.f32.mrb[61].mxu1 }
 0x682   : > { %4272 = vst.msk [vmem:[%s7045_s24 + $0x10] sm:$0xff] %vm1241_vm3, %v4256_v23  ;;  %v4226_v30 = vadd.f32 %v6917_v21, %v4156_v28 }
 0x683   : > { %v4259_v31 = vadd.f32 %v4243_v26, %v4227_v27 }
 0x684   : > { %v4258_v32 = vadd.f32 %v4242_v29, %v4226_v30  ;;  %v5350_v33 = vpop.f32.mrb[62].mxu1 }
 0x685   : > { %4275 = vst.msk [vmem:[%s7045_s24 + $0x28] sm:$0xff] %vm1241_vm3, %v4259_v31  ;;  %v4229_v35 = vadd.f32 %v5350_v33, %v6917_v21  ;;  %v4166_v36 = vpop.f32.mrb[63].mxu1 }
 0x686   : > { %4274 = vst.msk [vmem:[%s7045_s24 + $0x20] sm:$0xff] %vm1241_vm3, %v4258_v32  ;;  %v4228_v38 = vadd.f32 %v6917_v21, %v4166_v36 }
 0x687   : > { %v4261_v13 = vadd.f32 %v4245_v34, %v4229_v35 }
 0x688   : > { %v4260_v18 = vadd.f32 %v4244_v37, %v4228_v38  ;;  %v5353_v39 = vpop.f32.mrb[64].mxu1 }
 0x689   : > { %4277 = vst.msk [vmem:[%s7045_s24 + $0x38] sm:$0xff] %vm1241_vm3, %v4261_v13  ;;  %v4231_v41 = vadd.f32 %v5353_v39, %v6917_v21  ;;  %v4176_v25 = vpop.f32.mrb[65].mxu1 }
 0x68a   : > { %4276 = vst.msk [vmem:[%s7045_s24 + $0x30] sm:$0xff] %vm1241_vm3, %v4260_v18  ;;  %v4230_v43 = vadd.f32 %v6917_v21, %v4176_v25 }
 0x68b   : > { %v4263_v44 = vadd.f32 %v4247_v40, %v4231_v41 }
 0x68c   : > { %v4262_v45 = vadd.f32 %v4246_v42, %v4230_v43  ;;  %v5356_v46 = vpop.f32.mrb[66].mxu1 }
 0x68d   : > { %4279 = vst.msk [vmem:[%s7045_s24 + $0x48] sm:$0xff] %vm1241_vm3, %v4263_v44  ;;  %v4233_v48 = vadd.f32 %v5356_v46, %v6917_v21  ;;  %v4186_v49 = vpop.f32.mrb[67].mxu1 }
 0x68e   : > { %4278 = vst.msk [vmem:[%s7045_s24 + $0x40] sm:$0xff] %vm1241_vm3, %v4262_v45  ;;  %v4232_v51 = vadd.f32 %v6917_v21, %v4186_v49 }
 0x68f   : > { %v4265_v52 = vadd.f32 %v4249_v47, %v4233_v48 }
 0x690   : > { %v4264_v53 = vadd.f32 %v4248_v50, %v4232_v51  ;;  %v5359_v54 = vpop.f32.mrb[68].mxu1 }
 0x691   : > { %4281 = vst.msk [vmem:[%s7045_s24 + $0x58] sm:$0xff] %vm1241_vm3, %v4265_v52  ;;  %v4235_v56 = vadd.f32 %v5359_v54, %v6917_v21  ;;  %v4196_v57 = vpop.f32.mrb[69].mxu1 }
 0x692   : > { %4280 = vst.msk [vmem:[%s7045_s24 + $0x50] sm:$0xff] %vm1241_vm3, %v4264_v53  ;;  %v4234_v58 = vadd.f32 %v6917_v21, %v4196_v57 }
 0x693   : > { %v4267_v60 = vadd.f32 %v4251_v55, %v4235_v56 }
 0x694   : > { %v4266_v61 = vadd.f32 %v4250_v59, %v4234_v58  ;;  %v5362_v62 = vpop.f32.mrb[70].mxu1 }
 0x695   : > { %4283 = vst.msk [vmem:[%s7045_s24 + $0x68] sm:$0xff] %vm1241_vm3, %v4267_v60  ;;  %v4237_v0 = vadd.f32 %v5362_v62, %v6917_v21  ;;  %v4206_v1 = vpop.f32.mrb[71].mxu1 }
 0x696   : > { %4282 = vst.msk [vmem:[%s7045_s24 + $0x60] sm:$0xff] %vm1241_vm3, %v4266_v61  ;;  %v4236_v15 = vadd.f32 %v6917_v21, %v4206_v1 }
 0x697   : > { %v4269_v3 = vadd.f32 %v4253_v63, %v4237_v0 }
 0x698   : > { %v4268_v4 = vadd.f32 %v4252_v2, %v4236_v15 }
 0x699   : > { %4285 = vst.msk [vmem:[%s7045_s24 + $0x78] sm:$0xff] %vm1241_vm3, %v4269_v3 }
 0x69a   : > { %4284 = vst.msk [vmem:[%s7045_s24 + $0x70] sm:$0xff] %vm1241_vm3, %v4268_v4 }
 0x69b PF: > { %s7047_s18 = sld [smem:[#allocation7_spill]]  ;;  %s7048_s27 = sld [smem:[#allocation5_spill]] }
 0x69c   : > { %s7049_s28 = sld [smem:[#allocation6_spill]]  ;;  %s7050_s29 = sld [smem:[#allocation8_spill]] }
 0x69d   : > { %s7051_s30 = sld [smem:[#allocation9_spill]] }
 0x6a1   : > { %s28_s0 = sadd.s32 1, %s7047_s18  }
 0x6a2   : > { %p25_p1 = scmp.ge.s32.totalorder %s28_s0, 6  }
 0x6a4   :  { %27 = sbr.rel (!%p25_p1) target bundleno = 8 (0x8), region = 164 }

</bundles_post_ra>
